<compile_context>
chip_gen: v5e
topology: v5e:2x2
jax: 0.10.0
libtpu: 0.0.40
codegen_flags: <defaults>
</compile_context>

<pallas_src>
import jax
import jax.numpy as jnp
from jax import lax
from jax.experimental import pallas as pl
from jax.experimental.pallas import tpu as pltpu


# ----------------------------------------------------------------------------
# In-kernel helpers
# ----------------------------------------------------------------------------
def _elu(x):
    # ELU(alpha=1): x if x > 0 else exp(x) - 1  (clamp exp arg for safety)
    return jnp.where(x > 0, x, jnp.exp(jnp.minimum(x, 0.0)) - 1.0)


def _shift_rows(a, dy):
    """result[r] = a[r + dy]; the bottom `dy` rows become zeros (never read back).

    Rows are (image, y) pairs, so shifting the flat row axis by dy < H only mixes
    images in rows that correspond to invalid (discarded) conv output positions.
    """
    if dy == 0:
        return a
    pad = jnp.zeros((dy, a.shape[1]), a.dtype)
    return jnp.concatenate([a[dy:], pad], axis=0)


def _encoder_kernel(x_ref, *refs):
    """Fused conv-stack + Linear head for one batch block.

    refs = [Band_0, bias_0, ..., Band_{L-1}, bias_{L-1}, lin_W, lin_bias, out_ref]
      Band_l   : [3, w_in*c_in, w_out*c_out]   bf16 band matrices (one per ky)
      bias_l   : [1, w_out*c_out]              f32 (conv bias + folded BN shift)
      lin_W    : [zw, zw*c_last, out_total]    bf16 (one slab per feature row y)
      lin_bias : [1, out_total]                f32
      x_ref    : [b_blk*H0, W0*C0]   rows = (image, y), cols = (x, channel)
      out_ref  : [b_blk, out_total]
    """
    out_ref = refs[-1]
    lin_w_ref = refs[-3]
    lin_b_ref = refs[-2]
    n_layers = (len(refs) - 3) // 2

    b_blk = out_ref.shape[0]
    h0 = x_ref.shape[0] // b_blk            # input rows per image

    h = x_ref[...].astype(jnp.bfloat16)     # [R, W0*C0]
    for l in range(n_layers):
        band_ref = refs[2 * l]              # [3, K, N]
        bias_ref = refs[2 * l + 1]          # [1, N]
        acc = jnp.zeros((h.shape[0], band_ref.shape[2]), jnp.float32)
        for ky in range(band_ref.shape[0]):
            acc = acc + jnp.dot(_shift_rows(h, ky), band_ref[ky],
                                preferred_element_type=jnp.float32)
        acc = acc + bias_ref[...]           # conv bias + folded previous-BN shift
        h = _elu(acc).astype(jnp.bfloat16)  # ELU; this layer's BN folded downstream

    # Fused Linear: mean[b] = sum_y feat_row(b, y) @ lin_W[y]
    zw = lin_w_ref.shape[0]
    res = jnp.zeros((h.shape[0], lin_w_ref.shape[2]), jnp.float32)
    for y in range(zw):
        res = res + jnp.dot(_shift_rows(h, y), lin_w_ref[y],
                            preferred_element_type=jnp.float32)
    # one valid row per image: row b*h0 of `res`
    rows = jnp.concatenate([res[b * h0:b * h0 + 1] for b in range(b_blk)], axis=0)
    out_ref[...] = (rows + lin_b_ref[...]).astype(out_ref.dtype)


# ----------------------------------------------------------------------------
# Trace-time parameter folding
# ----------------------------------------------------------------------------
def _conv_band_matrices(w, b, in_scale, in_shift, w_in):
    """Fold a VALID 3x3 conv (plus the preceding per-channel affine, i.e. the
    previous layer's eval-mode BatchNorm) into 3 per-ky band matrices acting on
    rows laid out as [..., x*c_in + ci] -> [..., x_out*c_out + co]."""
    c_out, c_in = w.shape[0], w.shape[1]
    w_out = w_in - 2
    # w_s[ky, kx, ci, co] = in_scale[ci] * w[co, ci, ky, kx]
    w_s = jnp.transpose(w, (2, 3, 1, 0)) * in_scale[None, None, :, None]
    band = jnp.stack(
        [sum(jnp.kron(jnp.eye(w_in, w_out, k=-kx, dtype=w.dtype), w_s[ky, kx])
             for kx in range(3))
         for ky in range(3)],
        axis=0)                                            # [3, w_in*c_in, w_out*c_out]
    # effective bias per output column (channel-fastest column layout)
    b_eff = b + jnp.einsum("oiyx,i->o", w, in_shift)
    bias_row = jnp.tile(b_eff, w_out)[None, :]             # [1, w_out*c_out]
    return band, bias_row


def _linear_fold(lin_w, lin_b, s_last, t_last, c_last, zw):
    """Fold the last BatchNorm into the Linear and split it per feature row y.

    lin_w: [c_last*zw*zw, out_total], rows indexed (co, y, x) (PyTorch NCHW flatten).
    Returns lin_W [zw, zw*c_last, out_total] (columns indexed x*c_last+co) and
    lin_bias [1, out_total].
    """
    out_total = lin_w.shape[1]
    wr = lin_w.reshape(c_last, zw, zw, out_total)                    # [co, y, x, o]
    L = jnp.transpose(wr, (1, 2, 0, 3)) * s_last[None, None, :, None]  # [y, x, co, o]
    L = L.reshape(zw, zw * c_last, out_total)
    b_eff = lin_b + jnp.einsum("cyxo,c->o", wr, t_last)
    return L, b_eff[None, :]


# ----------------------------------------------------------------------------
# Wrapper
# ----------------------------------------------------------------------------
def l1_mlp_encoder_forward(x_nchw, params, *, eps=1e-5, block_n=8):
    """x_nchw: [N, C, H, W]. Returns mean reshaped to [N, -1, 6, 6]."""
    N, C, H, W = x_nchw.shape
    n_layers = len(params["conv_ws"])
    zw = H - 2 * n_layers
    c_last = params["conv_ws"][-1].shape[0]
    out_total = params["lin_w"].shape[1]
    f32 = jnp.float32

    # ---- batch block (grid over batch blocks). Blocks of 8k images keep both
    #      the [b_blk*H, :] input block and the [b_blk, out_total] output block
    #      sublane-aligned; a single whole-batch block is always layout-legal.
    if block_n % 8 == 0 and N % block_n == 0:
        b_blk = block_n
    elif N % 8 == 0:
        b_blk = 8
    else:
        b_blk = N
    grid = (N // b_blk,)

    # ---- fold BN(eval) into the next layer's band matrices / bias rows ----
    scale_prev = jnp.ones((C,), f32)
    shift_prev = jnp.zeros((C,), f32)
    w_cur = W
    ops = []
    for l in range(n_layers):
        band, bias_row = _conv_band_matrices(
            params["conv_ws"][l].astype(f32), params["conv_bs"][l].astype(f32),
            scale_prev, shift_prev, w_cur)
        ops += [band.astype(jnp.bfloat16), bias_row.astype(f32)]
        scale_prev = params["bn_gamma"][l] / jnp.sqrt(params["bn_var"][l] + eps)
        shift_prev = params["bn_beta"][l] - params["bn_mean"][l] * scale_prev
        w_cur -= 2

    lin_W, lin_bias = _linear_fold(params["lin_w"].astype(f32),
                                   params["lin_b"].astype(f32),
                                   scale_prev, shift_prev, c_last, zw)
    ops += [lin_W.astype(jnp.bfloat16), lin_bias.astype(f32)]

    # ---- lane-friendly input layout: rows = (image, y), cols = (x, channel) ----
    x_rows = jnp.transpose(x_nchw, (0, 2, 3, 1)).reshape(N * H, W * C).astype(f32)

    def _full_spec(a):
        return pl.BlockSpec(a.shape, lambda i: (0,) * a.ndim)

    mean = pl.pallas_call(
        _encoder_kernel,
        out_shape=jax.ShapeDtypeStruct((N, out_total), f32),
        grid_spec=pltpu.PrefetchScalarGridSpec(
            num_scalar_prefetch=0,
            grid=grid,
            in_specs=[pl.BlockSpec((b_blk * H, W * C), lambda i: (i, 0))]
                     + [_full_spec(a) for a in ops],
            out_specs=pl.BlockSpec((b_blk, out_total), lambda i: (i, 0)),
        ),
        compiler_params=pltpu.CompilerParams(
            dimension_semantics=("parallel",)),
    )(x_rows, *ops)

    return mean.reshape(N, -1, 6, 6)


# ----------------------------------------------------------------------------
# Parameter init + pure-JAX reference
# ----------------------------------------------------------------------------
def init_params(key, in_dim, out_dim, hidden_dim, zw_dim):
    """PyTorch-default-like init for the convs / linear; non-trivial BN stats."""
    h2 = hidden_dim // 2
    chans = [(in_dim, h2), (h2, h2), (h2, hidden_dim), (hidden_dim, hidden_dim)]
    keys = jax.random.split(key, 2 * len(chans) + 1)

    conv_ws, conv_bs = [], []
    bn_gamma, bn_beta, bn_mean, bn_var = [], [], [], []
    for l, (ci, co) in enumerate(chans):
        kw, kb = jax.random.split(keys[2 * l])
        bound = 1.0 / jnp.sqrt(ci * 9.0)
        conv_ws.append(jax.random.uniform(kw, (co, ci, 3, 3), jnp.float32, -bound, bound))
        conv_bs.append(jax.random.uniform(kb, (co,), jnp.float32, -bound, bound))
        kg, kbt, km, kv = jax.random.split(keys[2 * l + 1], 4)
        bn_gamma.append(1.0 + 0.1 * jax.random.normal(kg, (co,), jnp.float32))
        bn_beta.append(0.1 * jax.random.normal(kbt, (co,), jnp.float32))
        bn_mean.append(0.1 * jax.random.normal(km, (co,), jnp.float32))
        bn_var.append(jax.random.uniform(kv, (co,), jnp.float32, 0.5, 1.5))

    fin = hidden_dim * zw_dim * zw_dim
    fout = out_dim * zw_dim * zw_dim
    kw, kb = jax.random.split(keys[-1])
    bound = 1.0 / jnp.sqrt(float(fin))
    # stored as [in_features, out_features]; in_features indexes (c, y, x) like PyTorch
    lin_w = jax.random.uniform(kw, (fin, fout), jnp.float32, -bound, bound)
    lin_b = jax.random.uniform(kb, (fout,), jnp.float32, -bound, bound)

    return dict(conv_ws=conv_ws, conv_bs=conv_bs,
                bn_gamma=bn_gamma, bn_beta=bn_beta, bn_mean=bn_mean, bn_var=bn_var,
                lin_w=lin_w, lin_b=lin_b)


def reference_forward(x, params, eps=1e-5):
    """Pure-JAX reference matching the PyTorch module (BN in eval mode)."""
    h = x
    for l in range(len(params["conv_ws"])):
        w = params["conv_ws"][l]
        b = params["conv_bs"][l]
        h = lax.conv_general_dilated(
            h, w, window_strides=(1, 1), padding="VALID",
            dimension_numbers=("NCHW", "OIHW", "NCHW"),
            precision=lax.Precision.HIGHEST)
        h = h + b[None, :, None, None]
        h = jnp.where(h > 0, h, jnp.exp(jnp.minimum(h, 0.0)) - 1.0)
        scale = params["bn_gamma"][l] / jnp.sqrt(params["bn_var"][l] + eps)
        shift = params["bn_beta"][l] - params["bn_mean"][l] * scale
        h = h * scale[None, :, None, None] + shift[None, :, None, None]
    flat = h.reshape(x.shape[0], -1)                      # NCHW flatten: (c, y, x)
    mean = jnp.dot(flat, params["lin_w"], precision=lax.Precision.HIGHEST)
    mean = mean + params["lin_b"]
    return mean.reshape(x.shape[0], -1, 6, 6)


if __name__ == "__main__":
    key = jax.random.PRNGKey(0)
    k_x, k_p = jax.random.split(key)

    # in_dim=4, out_dim=4, hidden_dim=32, zw_dim=6  ->  input spatial = 6 + 8 = 14
    # N=16 with block_n=8 -> 2 grid steps (exercises the batch-blocked grid).
    N, in_dim, out_dim, hidden_dim, zw_dim = 16, 4, 4, 32, 6
    H = W = zw_dim + 8

    x = jax.random.normal(k_x, (N, in_dim, H, W), dtype=jnp.float32)
    params = init_params(k_p, in_dim, out_dim, hidden_dim, zw_dim)

    fwd = jax.jit(l1_mlp_encoder_forward)
    mean = jax.block_until_ready(fwd(x, params))

    ref = reference_forward(x, params)
    assert mean.shape == (N, out_dim, 6, 6)
    # bf16 MXU operands (f32 accumulation) give a few e-3 absolute error vs the
    # f32 HIGHEST-precision reference; 3e-2 leaves comfortable margin.
    assert jnp.allclose(mean, ref, atol=3e-2, rtol=3e-2), \
        float(jnp.max(jnp.abs(mean - ref)))

    print("KERNEL_OK")
</pallas_src>

<mosaic_0001>
module attributes {stable_mosaic.version = 11 : i64} {
  func.func @_encoder_kernel(%arg0: i32, %arg1: memref<112x56xf32, #tpu.memory_space<vmem>>, %arg2: memref<3x56x192xbf16, #tpu.memory_space<vmem>>, %arg3: memref<1x192xf32, #tpu.memory_space<vmem>>, %arg4: memref<3x192x160xbf16, #tpu.memory_space<vmem>>, %arg5: memref<1x160xf32, #tpu.memory_space<vmem>>, %arg6: memref<3x160x256xbf16, #tpu.memory_space<vmem>>, %arg7: memref<1x256xf32, #tpu.memory_space<vmem>>, %arg8: memref<3x256x192xbf16, #tpu.memory_space<vmem>>, %arg9: memref<1x192xf32, #tpu.memory_space<vmem>>, %arg10: memref<6x192x144xbf16, #tpu.memory_space<vmem>>, %arg11: memref<1x144xf32, #tpu.memory_space<vmem>>, %arg12: memref<8x144xf32, #tpu.memory_space<vmem>>) attributes {dimension_semantics = [#tpu.dimension_semantics<parallel>], iteration_bounds = array<i64: 2>, scalar_prefetch = 0 : i64, scratch_operands = 0 : i64, tpu.core_type = #tpu.core_type<tc>, window_params = [{transform_indices = @transform_0, window_bounds = array<i64: 112, 56>}, {pipeline_mode = #tpu.pipeline_mode<synchronous>, transform_indices = @transform_1, window_bounds = array<i64: 3, 56, 192>}, {pipeline_mode = #tpu.pipeline_mode<synchronous>, transform_indices = @transform_2, window_bounds = array<i64: 1, 192>}, {pipeline_mode = #tpu.pipeline_mode<synchronous>, transform_indices = @transform_3, window_bounds = array<i64: 3, 192, 160>}, {pipeline_mode = #tpu.pipeline_mode<synchronous>, transform_indices = @transform_4, window_bounds = array<i64: 1, 160>}, {pipeline_mode = #tpu.pipeline_mode<synchronous>, transform_indices = @transform_5, window_bounds = array<i64: 3, 160, 256>}, {pipeline_mode = #tpu.pipeline_mode<synchronous>, transform_indices = @transform_6, window_bounds = array<i64: 1, 256>}, {pipeline_mode = #tpu.pipeline_mode<synchronous>, transform_indices = @transform_7, window_bounds = array<i64: 3, 256, 192>}, {pipeline_mode = #tpu.pipeline_mode<synchronous>, transform_indices = @transform_8, window_bounds = array<i64: 1, 192>}, {pipeline_mode = #tpu.pipeline_mode<synchronous>, transform_indices = @transform_9, window_bounds = array<i64: 6, 192, 144>}, {pipeline_mode = #tpu.pipeline_mode<synchronous>, transform_indices = @transform_10, window_bounds = array<i64: 1, 144>}, {transform_indices = @transform_11, window_bounds = array<i64: 8, 144>}]} {
    %c0 = arith.constant 0 : index
    %c0_0 = arith.constant 0 : index
    %0 = vector.load %arg1[%c0, %c0_0] : memref<112x56xf32, #tpu.memory_space<vmem>>, vector<112x56xf32>
    %1 = arith.truncf %0 : vector<112x56xf32> to vector<112x56xbf16>
    %cst = arith.constant 0.000000e+00 : f32
    %2 = vector.broadcast %cst : f32 to vector<112x192xf32>
    %c0_1 = arith.constant 0 : index
    %c0_2 = arith.constant 0 : index
    %c0_3 = arith.constant 0 : index
    %3 = vector.load %arg2[%c0_1, %c0_2, %c0_3] : memref<3x56x192xbf16, #tpu.memory_space<vmem>>, vector<1x56x192xbf16>
    %4 = vector.shape_cast %3 : vector<1x56x192xbf16> to vector<56x192xbf16>
    %cst_4 = arith.constant dense<0.000000e+00> : vector<112x192xf32>
    %5 = tpu.matmul %1, %4, %cst_4 {dimension_numbers = #tpu.dot_dimension_numbers<[1], [0], [0], [1], [0, 0, 1, 1], [], []>} : vector<112x56xbf16>, vector<56x192xbf16>, vector<112x192xf32> -> vector<112x192xf32>
    %6 = arith.addf %2, %5 : vector<112x192xf32>
    %cst_5 = arith.constant 0.000000e+00 : bf16
    %7 = vector.broadcast %cst_5 : bf16 to vector<1x56xbf16>
    %8 = vector.extract_strided_slice %1 {offsets = [1, 0], sizes = [111, 56], strides = [1, 1]} : vector<112x56xbf16> to vector<111x56xbf16>
    %9 = tpu.concatenate %8, %7 in 0 : vector<111x56xbf16>, vector<1x56xbf16> -> vector<112x56xbf16>
    %c1 = arith.constant 1 : index
    %c0_6 = arith.constant 0 : index
    %c0_7 = arith.constant 0 : index
    %10 = vector.load %arg2[%c1, %c0_6, %c0_7] : memref<3x56x192xbf16, #tpu.memory_space<vmem>>, vector<1x56x192xbf16>
    %11 = vector.shape_cast %10 : vector<1x56x192xbf16> to vector<56x192xbf16>
    %cst_8 = arith.constant dense<0.000000e+00> : vector<112x192xf32>
    %12 = tpu.matmul %9, %11, %cst_8 {dimension_numbers = #tpu.dot_dimension_numbers<[1], [0], [0], [1], [0, 0, 1, 1], [], []>} : vector<112x56xbf16>, vector<56x192xbf16>, vector<112x192xf32> -> vector<112x192xf32>
    %13 = arith.addf %6, %12 : vector<112x192xf32>
    %cst_9 = arith.constant 0.000000e+00 : bf16
    %14 = vector.broadcast %cst_9 : bf16 to vector<2x56xbf16>
    %15 = vector.extract_strided_slice %1 {offsets = [2, 0], sizes = [110, 56], strides = [1, 1]} : vector<112x56xbf16> to vector<110x56xbf16>
    %16 = tpu.concatenate %15, %14 in 0 : vector<110x56xbf16>, vector<2x56xbf16> -> vector<112x56xbf16>
    %c2 = arith.constant 2 : index
    %c0_10 = arith.constant 0 : index
    %c0_11 = arith.constant 0 : index
    %17 = vector.load %arg2[%c2, %c0_10, %c0_11] : memref<3x56x192xbf16, #tpu.memory_space<vmem>>, vector<1x56x192xbf16>
    %18 = vector.shape_cast %17 : vector<1x56x192xbf16> to vector<56x192xbf16>
    %cst_12 = arith.constant dense<0.000000e+00> : vector<112x192xf32>
    %19 = tpu.matmul %16, %18, %cst_12 {dimension_numbers = #tpu.dot_dimension_numbers<[1], [0], [0], [1], [0, 0, 1, 1], [], []>} : vector<112x56xbf16>, vector<56x192xbf16>, vector<112x192xf32> -> vector<112x192xf32>
    %20 = arith.addf %13, %19 : vector<112x192xf32>
    %c0_13 = arith.constant 0 : index
    %c0_14 = arith.constant 0 : index
    %21 = vector.load %arg3[%c0_13, %c0_14] : memref<1x192xf32, #tpu.memory_space<vmem>>, vector<1x192xf32>
    %22 = vector.broadcast %21 : vector<1x192xf32> to vector<112x192xf32>
    %23 = arith.addf %20, %22 : vector<112x192xf32>
    %cst_15 = arith.constant 0.000000e+00 : f32
    %24 = vector.broadcast %cst_15 : f32 to vector<112x192xf32>
    %25 = arith.cmpf ogt, %23, %24 : vector<112x192xf32>
    %cst_16 = arith.constant 0.000000e+00 : f32
    %26 = vector.broadcast %cst_16 : f32 to vector<112x192xf32>
    %27 = arith.minimumf %23, %26 : vector<112x192xf32>
    %28 = math.exp %27 : vector<112x192xf32>
    %cst_17 = arith.constant 1.000000e+00 : f32
    %29 = vector.broadcast %cst_17 : f32 to vector<112x192xf32>
    %30 = arith.subf %28, %29 : vector<112x192xf32>
    %31 = arith.select %25, %23, %30 : vector<112x192xi1>, vector<112x192xf32>
    %32 = arith.truncf %31 : vector<112x192xf32> to vector<112x192xbf16>
    %cst_18 = arith.constant 0.000000e+00 : f32
    %33 = vector.broadcast %cst_18 : f32 to vector<112x160xf32>
    %c0_19 = arith.constant 0 : index
    %c0_20 = arith.constant 0 : index
    %c0_21 = arith.constant 0 : index
    %34 = vector.load %arg4[%c0_19, %c0_20, %c0_21] : memref<3x192x160xbf16, #tpu.memory_space<vmem>>, vector<1x192x160xbf16>
    %35 = vector.shape_cast %34 : vector<1x192x160xbf16> to vector<192x160xbf16>
    %cst_22 = arith.constant dense<0.000000e+00> : vector<112x160xf32>
    %36 = tpu.matmul %32, %35, %cst_22 {dimension_numbers = #tpu.dot_dimension_numbers<[1], [0], [0], [1], [0, 0, 1, 1], [], []>} : vector<112x192xbf16>, vector<192x160xbf16>, vector<112x160xf32> -> vector<112x160xf32>
    %37 = arith.addf %33, %36 : vector<112x160xf32>
    %cst_23 = arith.constant 0.000000e+00 : bf16
    %38 = vector.broadcast %cst_23 : bf16 to vector<1x192xbf16>
    %39 = vector.extract_strided_slice %32 {offsets = [1, 0], sizes = [111, 192], strides = [1, 1]} : vector<112x192xbf16> to vector<111x192xbf16>
    %40 = tpu.concatenate %39, %38 in 0 : vector<111x192xbf16>, vector<1x192xbf16> -> vector<112x192xbf16>
    %c1_24 = arith.constant 1 : index
    %c0_25 = arith.constant 0 : index
    %c0_26 = arith.constant 0 : index
    %41 = vector.load %arg4[%c1_24, %c0_25, %c0_26] : memref<3x192x160xbf16, #tpu.memory_space<vmem>>, vector<1x192x160xbf16>
    %42 = vector.shape_cast %41 : vector<1x192x160xbf16> to vector<192x160xbf16>
    %cst_27 = arith.constant dense<0.000000e+00> : vector<112x160xf32>
    %43 = tpu.matmul %40, %42, %cst_27 {dimension_numbers = #tpu.dot_dimension_numbers<[1], [0], [0], [1], [0, 0, 1, 1], [], []>} : vector<112x192xbf16>, vector<192x160xbf16>, vector<112x160xf32> -> vector<112x160xf32>
    %44 = arith.addf %37, %43 : vector<112x160xf32>
    %cst_28 = arith.constant 0.000000e+00 : bf16
    %45 = vector.broadcast %cst_28 : bf16 to vector<2x192xbf16>
    %46 = vector.extract_strided_slice %32 {offsets = [2, 0], sizes = [110, 192], strides = [1, 1]} : vector<112x192xbf16> to vector<110x192xbf16>
    %47 = tpu.concatenate %46, %45 in 0 : vector<110x192xbf16>, vector<2x192xbf16> -> vector<112x192xbf16>
    %c2_29 = arith.constant 2 : index
    %c0_30 = arith.constant 0 : index
    %c0_31 = arith.constant 0 : index
    %48 = vector.load %arg4[%c2_29, %c0_30, %c0_31] : memref<3x192x160xbf16, #tpu.memory_space<vmem>>, vector<1x192x160xbf16>
    %49 = vector.shape_cast %48 : vector<1x192x160xbf16> to vector<192x160xbf16>
    %cst_32 = arith.constant dense<0.000000e+00> : vector<112x160xf32>
    %50 = tpu.matmul %47, %49, %cst_32 {dimension_numbers = #tpu.dot_dimension_numbers<[1], [0], [0], [1], [0, 0, 1, 1], [], []>} : vector<112x192xbf16>, vector<192x160xbf16>, vector<112x160xf32> -> vector<112x160xf32>
    %51 = arith.addf %44, %50 : vector<112x160xf32>
    %c0_33 = arith.constant 0 : index
    %c0_34 = arith.constant 0 : index
    %52 = vector.load %arg5[%c0_33, %c0_34] : memref<1x160xf32, #tpu.memory_space<vmem>>, vector<1x160xf32>
    %53 = vector.broadcast %52 : vector<1x160xf32> to vector<112x160xf32>
    %54 = arith.addf %51, %53 : vector<112x160xf32>
    %cst_35 = arith.constant 0.000000e+00 : f32
    %55 = vector.broadcast %cst_35 : f32 to vector<112x160xf32>
    %56 = arith.cmpf ogt, %54, %55 : vector<112x160xf32>
    %cst_36 = arith.constant 0.000000e+00 : f32
    %57 = vector.broadcast %cst_36 : f32 to vector<112x160xf32>
    %58 = arith.minimumf %54, %57 : vector<112x160xf32>
    %59 = math.exp %58 : vector<112x160xf32>
    %cst_37 = arith.constant 1.000000e+00 : f32
    %60 = vector.broadcast %cst_37 : f32 to vector<112x160xf32>
    %61 = arith.subf %59, %60 : vector<112x160xf32>
    %62 = arith.select %56, %54, %61 : vector<112x160xi1>, vector<112x160xf32>
    %63 = arith.truncf %62 : vector<112x160xf32> to vector<112x160xbf16>
    %cst_38 = arith.constant 0.000000e+00 : f32
    %64 = vector.broadcast %cst_38 : f32 to vector<112x256xf32>
    %c0_39 = arith.constant 0 : index
    %c0_40 = arith.constant 0 : index
    %c0_41 = arith.constant 0 : index
    %65 = vector.load %arg6[%c0_39, %c0_40, %c0_41] : memref<3x160x256xbf16, #tpu.memory_space<vmem>>, vector<1x160x256xbf16>
    %66 = vector.shape_cast %65 : vector<1x160x256xbf16> to vector<160x256xbf16>
    %cst_42 = arith.constant dense<0.000000e+00> : vector<112x256xf32>
    %67 = tpu.matmul %63, %66, %cst_42 {dimension_numbers = #tpu.dot_dimension_numbers<[1], [0], [0], [1], [0, 0, 1, 1], [], []>} : vector<112x160xbf16>, vector<160x256xbf16>, vector<112x256xf32> -> vector<112x256xf32>
    %68 = arith.addf %64, %67 : vector<112x256xf32>
    %cst_43 = arith.constant 0.000000e+00 : bf16
    %69 = vector.broadcast %cst_43 : bf16 to vector<1x160xbf16>
    %70 = vector.extract_strided_slice %63 {offsets = [1, 0], sizes = [111, 160], strides = [1, 1]} : vector<112x160xbf16> to vector<111x160xbf16>
    %71 = tpu.concatenate %70, %69 in 0 : vector<111x160xbf16>, vector<1x160xbf16> -> vector<112x160xbf16>
    %c1_44 = arith.constant 1 : index
    %c0_45 = arith.constant 0 : index
    %c0_46 = arith.constant 0 : index
    %72 = vector.load %arg6[%c1_44, %c0_45, %c0_46] : memref<3x160x256xbf16, #tpu.memory_space<vmem>>, vector<1x160x256xbf16>
    %73 = vector.shape_cast %72 : vector<1x160x256xbf16> to vector<160x256xbf16>
    %cst_47 = arith.constant dense<0.000000e+00> : vector<112x256xf32>
    %74 = tpu.matmul %71, %73, %cst_47 {dimension_numbers = #tpu.dot_dimension_numbers<[1], [0], [0], [1], [0, 0, 1, 1], [], []>} : vector<112x160xbf16>, vector<160x256xbf16>, vector<112x256xf32> -> vector<112x256xf32>
    %75 = arith.addf %68, %74 : vector<112x256xf32>
    %cst_48 = arith.constant 0.000000e+00 : bf16
    %76 = vector.broadcast %cst_48 : bf16 to vector<2x160xbf16>
    %77 = vector.extract_strided_slice %63 {offsets = [2, 0], sizes = [110, 160], strides = [1, 1]} : vector<112x160xbf16> to vector<110x160xbf16>
    %78 = tpu.concatenate %77, %76 in 0 : vector<110x160xbf16>, vector<2x160xbf16> -> vector<112x160xbf16>
    %c2_49 = arith.constant 2 : index
    %c0_50 = arith.constant 0 : index
    %c0_51 = arith.constant 0 : index
    %79 = vector.load %arg6[%c2_49, %c0_50, %c0_51] : memref<3x160x256xbf16, #tpu.memory_space<vmem>>, vector<1x160x256xbf16>
    %80 = vector.shape_cast %79 : vector<1x160x256xbf16> to vector<160x256xbf16>
    %cst_52 = arith.constant dense<0.000000e+00> : vector<112x256xf32>
    %81 = tpu.matmul %78, %80, %cst_52 {dimension_numbers = #tpu.dot_dimension_numbers<[1], [0], [0], [1], [0, 0, 1, 1], [], []>} : vector<112x160xbf16>, vector<160x256xbf16>, vector<112x256xf32> -> vector<112x256xf32>
    %82 = arith.addf %75, %81 : vector<112x256xf32>
    %c0_53 = arith.constant 0 : index
    %c0_54 = arith.constant 0 : index
    %83 = vector.load %arg7[%c0_53, %c0_54] : memref<1x256xf32, #tpu.memory_space<vmem>>, vector<1x256xf32>
    %84 = vector.broadcast %83 : vector<1x256xf32> to vector<112x256xf32>
    %85 = arith.addf %82, %84 : vector<112x256xf32>
    %cst_55 = arith.constant 0.000000e+00 : f32
    %86 = vector.broadcast %cst_55 : f32 to vector<112x256xf32>
    %87 = arith.cmpf ogt, %85, %86 : vector<112x256xf32>
    %cst_56 = arith.constant 0.000000e+00 : f32
    %88 = vector.broadcast %cst_56 : f32 to vector<112x256xf32>
    %89 = arith.minimumf %85, %88 : vector<112x256xf32>
    %90 = math.exp %89 : vector<112x256xf32>
    %cst_57 = arith.constant 1.000000e+00 : f32
    %91 = vector.broadcast %cst_57 : f32 to vector<112x256xf32>
    %92 = arith.subf %90, %91 : vector<112x256xf32>
    %93 = arith.select %87, %85, %92 : vector<112x256xi1>, vector<112x256xf32>
    %94 = arith.truncf %93 : vector<112x256xf32> to vector<112x256xbf16>
    %cst_58 = arith.constant 0.000000e+00 : f32
    %95 = vector.broadcast %cst_58 : f32 to vector<112x192xf32>
    %c0_59 = arith.constant 0 : index
    %c0_60 = arith.constant 0 : index
    %c0_61 = arith.constant 0 : index
    %96 = vector.load %arg8[%c0_59, %c0_60, %c0_61] : memref<3x256x192xbf16, #tpu.memory_space<vmem>>, vector<1x256x192xbf16>
    %97 = vector.shape_cast %96 : vector<1x256x192xbf16> to vector<256x192xbf16>
    %cst_62 = arith.constant dense<0.000000e+00> : vector<112x192xf32>
    %98 = tpu.matmul %94, %97, %cst_62 {dimension_numbers = #tpu.dot_dimension_numbers<[1], [0], [0], [1], [0, 0, 1, 1], [], []>} : vector<112x256xbf16>, vector<256x192xbf16>, vector<112x192xf32> -> vector<112x192xf32>
    %99 = arith.addf %95, %98 : vector<112x192xf32>
    %cst_63 = arith.constant 0.000000e+00 : bf16
    %100 = vector.broadcast %cst_63 : bf16 to vector<1x256xbf16>
    %101 = vector.extract_strided_slice %94 {offsets = [1, 0], sizes = [111, 256], strides = [1, 1]} : vector<112x256xbf16> to vector<111x256xbf16>
    %102 = tpu.concatenate %101, %100 in 0 : vector<111x256xbf16>, vector<1x256xbf16> -> vector<112x256xbf16>
    %c1_64 = arith.constant 1 : index
    %c0_65 = arith.constant 0 : index
    %c0_66 = arith.constant 0 : index
    %103 = vector.load %arg8[%c1_64, %c0_65, %c0_66] : memref<3x256x192xbf16, #tpu.memory_space<vmem>>, vector<1x256x192xbf16>
    %104 = vector.shape_cast %103 : vector<1x256x192xbf16> to vector<256x192xbf16>
    %cst_67 = arith.constant dense<0.000000e+00> : vector<112x192xf32>
    %105 = tpu.matmul %102, %104, %cst_67 {dimension_numbers = #tpu.dot_dimension_numbers<[1], [0], [0], [1], [0, 0, 1, 1], [], []>} : vector<112x256xbf16>, vector<256x192xbf16>, vector<112x192xf32> -> vector<112x192xf32>
    %106 = arith.addf %99, %105 : vector<112x192xf32>
    %cst_68 = arith.constant 0.000000e+00 : bf16
    %107 = vector.broadcast %cst_68 : bf16 to vector<2x256xbf16>
    %108 = vector.extract_strided_slice %94 {offsets = [2, 0], sizes = [110, 256], strides = [1, 1]} : vector<112x256xbf16> to vector<110x256xbf16>
    %109 = tpu.concatenate %108, %107 in 0 : vector<110x256xbf16>, vector<2x256xbf16> -> vector<112x256xbf16>
    %c2_69 = arith.constant 2 : index
    %c0_70 = arith.constant 0 : index
    %c0_71 = arith.constant 0 : index
    %110 = vector.load %arg8[%c2_69, %c0_70, %c0_71] : memref<3x256x192xbf16, #tpu.memory_space<vmem>>, vector<1x256x192xbf16>
    %111 = vector.shape_cast %110 : vector<1x256x192xbf16> to vector<256x192xbf16>
    %cst_72 = arith.constant dense<0.000000e+00> : vector<112x192xf32>
    %112 = tpu.matmul %109, %111, %cst_72 {dimension_numbers = #tpu.dot_dimension_numbers<[1], [0], [0], [1], [0, 0, 1, 1], [], []>} : vector<112x256xbf16>, vector<256x192xbf16>, vector<112x192xf32> -> vector<112x192xf32>
    %113 = arith.addf %106, %112 : vector<112x192xf32>
    %c0_73 = arith.constant 0 : index
    %c0_74 = arith.constant 0 : index
    %114 = vector.load %arg9[%c0_73, %c0_74] : memref<1x192xf32, #tpu.memory_space<vmem>>, vector<1x192xf32>
    %115 = vector.broadcast %114 : vector<1x192xf32> to vector<112x192xf32>
    %116 = arith.addf %113, %115 : vector<112x192xf32>
    %cst_75 = arith.constant 0.000000e+00 : f32
    %117 = vector.broadcast %cst_75 : f32 to vector<112x192xf32>
    %118 = arith.cmpf ogt, %116, %117 : vector<112x192xf32>
    %cst_76 = arith.constant 0.000000e+00 : f32
    %119 = vector.broadcast %cst_76 : f32 to vector<112x192xf32>
    %120 = arith.minimumf %116, %119 : vector<112x192xf32>
    %121 = math.exp %120 : vector<112x192xf32>
    %cst_77 = arith.constant 1.000000e+00 : f32
    %122 = vector.broadcast %cst_77 : f32 to vector<112x192xf32>
    %123 = arith.subf %121, %122 : vector<112x192xf32>
    %124 = arith.select %118, %116, %123 : vector<112x192xi1>, vector<112x192xf32>
    %125 = arith.truncf %124 : vector<112x192xf32> to vector<112x192xbf16>
    %cst_78 = arith.constant 0.000000e+00 : f32
    %126 = vector.broadcast %cst_78 : f32 to vector<112x144xf32>
    %c0_79 = arith.constant 0 : index
    %c0_80 = arith.constant 0 : index
    %c0_81 = arith.constant 0 : index
    %127 = vector.load %arg10[%c0_79, %c0_80, %c0_81] : memref<6x192x144xbf16, #tpu.memory_space<vmem>>, vector<1x192x144xbf16>
    %128 = vector.shape_cast %127 : vector<1x192x144xbf16> to vector<192x144xbf16>
    %cst_82 = arith.constant dense<0.000000e+00> : vector<112x144xf32>
    %129 = tpu.matmul %125, %128, %cst_82 {dimension_numbers = #tpu.dot_dimension_numbers<[1], [0], [0], [1], [0, 0, 1, 1], [], []>} : vector<112x192xbf16>, vector<192x144xbf16>, vector<112x144xf32> -> vector<112x144xf32>
    %130 = arith.addf %126, %129 : vector<112x144xf32>
    %cst_83 = arith.constant 0.000000e+00 : bf16
    %131 = vector.broadcast %cst_83 : bf16 to vector<1x192xbf16>
    %132 = vector.extract_strided_slice %125 {offsets = [1, 0], sizes = [111, 192], strides = [1, 1]} : vector<112x192xbf16> to vector<111x192xbf16>
    %133 = tpu.concatenate %132, %131 in 0 : vector<111x192xbf16>, vector<1x192xbf16> -> vector<112x192xbf16>
    %c1_84 = arith.constant 1 : index
    %c0_85 = arith.constant 0 : index
    %c0_86 = arith.constant 0 : index
    %134 = vector.load %arg10[%c1_84, %c0_85, %c0_86] : memref<6x192x144xbf16, #tpu.memory_space<vmem>>, vector<1x192x144xbf16>
    %135 = vector.shape_cast %134 : vector<1x192x144xbf16> to vector<192x144xbf16>
    %cst_87 = arith.constant dense<0.000000e+00> : vector<112x144xf32>
    %136 = tpu.matmul %133, %135, %cst_87 {dimension_numbers = #tpu.dot_dimension_numbers<[1], [0], [0], [1], [0, 0, 1, 1], [], []>} : vector<112x192xbf16>, vector<192x144xbf16>, vector<112x144xf32> -> vector<112x144xf32>
    %137 = arith.addf %130, %136 : vector<112x144xf32>
    %cst_88 = arith.constant 0.000000e+00 : bf16
    %138 = vector.broadcast %cst_88 : bf16 to vector<2x192xbf16>
    %139 = vector.extract_strided_slice %125 {offsets = [2, 0], sizes = [110, 192], strides = [1, 1]} : vector<112x192xbf16> to vector<110x192xbf16>
    %140 = tpu.concatenate %139, %138 in 0 : vector<110x192xbf16>, vector<2x192xbf16> -> vector<112x192xbf16>
    %c2_89 = arith.constant 2 : index
    %c0_90 = arith.constant 0 : index
    %c0_91 = arith.constant 0 : index
    %141 = vector.load %arg10[%c2_89, %c0_90, %c0_91] : memref<6x192x144xbf16, #tpu.memory_space<vmem>>, vector<1x192x144xbf16>
    %142 = vector.shape_cast %141 : vector<1x192x144xbf16> to vector<192x144xbf16>
    %cst_92 = arith.constant dense<0.000000e+00> : vector<112x144xf32>
    %143 = tpu.matmul %140, %142, %cst_92 {dimension_numbers = #tpu.dot_dimension_numbers<[1], [0], [0], [1], [0, 0, 1, 1], [], []>} : vector<112x192xbf16>, vector<192x144xbf16>, vector<112x144xf32> -> vector<112x144xf32>
    %144 = arith.addf %137, %143 : vector<112x144xf32>
    %cst_93 = arith.constant 0.000000e+00 : bf16
    %145 = vector.broadcast %cst_93 : bf16 to vector<3x192xbf16>
    %146 = vector.extract_strided_slice %125 {offsets = [3, 0], sizes = [109, 192], strides = [1, 1]} : vector<112x192xbf16> to vector<109x192xbf16>
    %147 = tpu.concatenate %146, %145 in 0 : vector<109x192xbf16>, vector<3x192xbf16> -> vector<112x192xbf16>
    %c3 = arith.constant 3 : index
    %c0_94 = arith.constant 0 : index
    %c0_95 = arith.constant 0 : index
    %148 = vector.load %arg10[%c3, %c0_94, %c0_95] : memref<6x192x144xbf16, #tpu.memory_space<vmem>>, vector<1x192x144xbf16>
    %149 = vector.shape_cast %148 : vector<1x192x144xbf16> to vector<192x144xbf16>
    %cst_96 = arith.constant dense<0.000000e+00> : vector<112x144xf32>
    %150 = tpu.matmul %147, %149, %cst_96 {dimension_numbers = #tpu.dot_dimension_numbers<[1], [0], [0], [1], [0, 0, 1, 1], [], []>} : vector<112x192xbf16>, vector<192x144xbf16>, vector<112x144xf32> -> vector<112x144xf32>
    %151 = arith.addf %144, %150 : vector<112x144xf32>
    %cst_97 = arith.constant 0.000000e+00 : bf16
    %152 = vector.broadcast %cst_97 : bf16 to vector<4x192xbf16>
    %153 = vector.extract_strided_slice %125 {offsets = [4, 0], sizes = [108, 192], strides = [1, 1]} : vector<112x192xbf16> to vector<108x192xbf16>
    %154 = tpu.concatenate %153, %152 in 0 : vector<108x192xbf16>, vector<4x192xbf16> -> vector<112x192xbf16>
    %c4 = arith.constant 4 : index
    %c0_98 = arith.constant 0 : index
    %c0_99 = arith.constant 0 : index
    %155 = vector.load %arg10[%c4, %c0_98, %c0_99] : memref<6x192x144xbf16, #tpu.memory_space<vmem>>, vector<1x192x144xbf16>
    %156 = vector.shape_cast %155 : vector<1x192x144xbf16> to vector<192x144xbf16>
    %cst_100 = arith.constant dense<0.000000e+00> : vector<112x144xf32>
    %157 = tpu.matmul %154, %156, %cst_100 {dimension_numbers = #tpu.dot_dimension_numbers<[1], [0], [0], [1], [0, 0, 1, 1], [], []>} : vector<112x192xbf16>, vector<192x144xbf16>, vector<112x144xf32> -> vector<112x144xf32>
    %158 = arith.addf %151, %157 : vector<112x144xf32>
    %cst_101 = arith.constant 0.000000e+00 : bf16
    %159 = vector.broadcast %cst_101 : bf16 to vector<5x192xbf16>
    %160 = vector.extract_strided_slice %125 {offsets = [5, 0], sizes = [107, 192], strides = [1, 1]} : vector<112x192xbf16> to vector<107x192xbf16>
    %161 = tpu.concatenate %160, %159 in 0 : vector<107x192xbf16>, vector<5x192xbf16> -> vector<112x192xbf16>
    %c5 = arith.constant 5 : index
    %c0_102 = arith.constant 0 : index
    %c0_103 = arith.constant 0 : index
    %162 = vector.load %arg10[%c5, %c0_102, %c0_103] : memref<6x192x144xbf16, #tpu.memory_space<vmem>>, vector<1x192x144xbf16>
    %163 = vector.shape_cast %162 : vector<1x192x144xbf16> to vector<192x144xbf16>
    %cst_104 = arith.constant dense<0.000000e+00> : vector<112x144xf32>
    %164 = tpu.matmul %161, %163, %cst_104 {dimension_numbers = #tpu.dot_dimension_numbers<[1], [0], [0], [1], [0, 0, 1, 1], [], []>} : vector<112x192xbf16>, vector<192x144xbf16>, vector<112x144xf32> -> vector<112x144xf32>
    %165 = arith.addf %158, %164 : vector<112x144xf32>
    %166 = vector.extract_strided_slice %165 {offsets = [0, 0], sizes = [1, 144], strides = [1, 1]} : vector<112x144xf32> to vector<1x144xf32>
    %167 = vector.extract_strided_slice %165 {offsets = [14, 0], sizes = [1, 144], strides = [1, 1]} : vector<112x144xf32> to vector<1x144xf32>
    %168 = vector.extract_strided_slice %165 {offsets = [28, 0], sizes = [1, 144], strides = [1, 1]} : vector<112x144xf32> to vector<1x144xf32>
    %169 = vector.extract_strided_slice %165 {offsets = [42, 0], sizes = [1, 144], strides = [1, 1]} : vector<112x144xf32> to vector<1x144xf32>
    %170 = vector.extract_strided_slice %165 {offsets = [56, 0], sizes = [1, 144], strides = [1, 1]} : vector<112x144xf32> to vector<1x144xf32>
    %171 = vector.extract_strided_slice %165 {offsets = [70, 0], sizes = [1, 144], strides = [1, 1]} : vector<112x144xf32> to vector<1x144xf32>
    %172 = vector.extract_strided_slice %165 {offsets = [84, 0], sizes = [1, 144], strides = [1, 1]} : vector<112x144xf32> to vector<1x144xf32>
    %173 = vector.extract_strided_slice %165 {offsets = [98, 0], sizes = [1, 144], strides = [1, 1]} : vector<112x144xf32> to vector<1x144xf32>
    %174 = tpu.concatenate %166, %167, %168, %169, %170, %171, %172, %173 in 0 : vector<1x144xf32>, vector<1x144xf32>, vector<1x144xf32>, vector<1x144xf32>, vector<1x144xf32>, vector<1x144xf32>, vector<1x144xf32>, vector<1x144xf32> -> vector<8x144xf32>
    %c0_105 = arith.constant 0 : index
    %c0_106 = arith.constant 0 : index
    %175 = vector.load %arg11[%c0_105, %c0_106] : memref<1x144xf32, #tpu.memory_space<vmem>>, vector<1x144xf32>
    %176 = vector.broadcast %175 : vector<1x144xf32> to vector<8x144xf32>
    %177 = arith.addf %174, %176 : vector<8x144xf32>
    %c0_107 = arith.constant 0 : index
    %c0_108 = arith.constant 0 : index
    %178 = vector.load %arg12[%c0_107, %c0_108] : memref<8x144xf32, #tpu.memory_space<vmem>>, vector<8x144xf32>
    tpu.vector_store %arg12[%c0_107, %c0_108], %177 {strides = array<i32>} : memref<8x144xf32, #tpu.memory_space<vmem>>, vector<8x144xf32>,
    return
  }
  func.func @transform_0(%arg0: i32) -> (i32, i32) {
    %c0_i32 = arith.constant 0 : i32
    %c0_i32_0 = arith.constant 0 : i32
    return %arg0, %c0_i32 : i32, i32
  }
  func.func @transform_1(%arg0: i32) -> (i32, i32, i32) {
    %c0_i32 = arith.constant 0 : i32
    %c0_i32_0 = arith.constant 0 : i32
    %c0_i32_1 = arith.constant 0 : i32
    %c0_i32_2 = arith.constant 0 : i32
    return %c0_i32, %c0_i32_0, %c0_i32_1 : i32, i32, i32
  }
  func.func @transform_2(%arg0: i32) -> (i32, i32) {
    %c0_i32 = arith.constant 0 : i32
    %c0_i32_0 = arith.constant 0 : i32
    %c0_i32_1 = arith.constant 0 : i32
    return %c0_i32, %c0_i32_0 : i32, i32
  }
  func.func @transform_3(%arg0: i32) -> (i32, i32, i32) {
    %c0_i32 = arith.constant 0 : i32
    %c0_i32_0 = arith.constant 0 : i32
    %c0_i32_1 = arith.constant 0 : i32
    %c0_i32_2 = arith.constant 0 : i32
    return %c0_i32, %c0_i32_0, %c0_i32_1 : i32, i32, i32
  }
  func.func @transform_4(%arg0: i32) -> (i32, i32) {
    %c0_i32 = arith.constant 0 : i32
    %c0_i32_0 = arith.constant 0 : i32
    %c0_i32_1 = arith.constant 0 : i32
    return %c0_i32, %c0_i32_0 : i32, i32
  }
  func.func @transform_5(%arg0: i32) -> (i32, i32, i32) {
    %c0_i32 = arith.constant 0 : i32
    %c0_i32_0 = arith.constant 0 : i32
    %c0_i32_1 = arith.constant 0 : i32
    %c0_i32_2 = arith.constant 0 : i32
    return %c0_i32, %c0_i32_0, %c0_i32_1 : i32, i32, i32
  }
  func.func @transform_6(%arg0: i32) -> (i32, i32) {
    %c0_i32 = arith.constant 0 : i32
    %c0_i32_0 = arith.constant 0 : i32
    %c0_i32_1 = arith.constant 0 : i32
    return %c0_i32, %c0_i32_0 : i32, i32
  }
  func.func @transform_7(%arg0: i32) -> (i32, i32, i32) {
    %c0_i32 = arith.constant 0 : i32
    %c0_i32_0 = arith.constant 0 : i32
    %c0_i32_1 = arith.constant 0 : i32
    %c0_i32_2 = arith.constant 0 : i32
    return %c0_i32, %c0_i32_0, %c0_i32_1 : i32, i32, i32
  }
  func.func @transform_8(%arg0: i32) -> (i32, i32) {
    %c0_i32 = arith.constant 0 : i32
    %c0_i32_0 = arith.constant 0 : i32
    %c0_i32_1 = arith.constant 0 : i32
    return %c0_i32, %c0_i32_0 : i32, i32
  }
  func.func @transform_9(%arg0: i32) -> (i32, i32, i32) {
    %c0_i32 = arith.constant 0 : i32
    %c0_i32_0 = arith.constant 0 : i32
    %c0_i32_1 = arith.constant 0 : i32
    %c0_i32_2 = arith.constant 0 : i32
    return %c0_i32, %c0_i32_0, %c0_i32_1 : i32, i32, i32
  }
  func.func @transform_10(%arg0: i32) -> (i32, i32) {
    %c0_i32 = arith.constant 0 : i32
    %c0_i32_0 = arith.constant 0 : i32
    %c0_i32_1 = arith.constant 0 : i32
    return %c0_i32, %c0_i32_0 : i32, i32
  }
  func.func @transform_11(%arg0: i32) -> (i32, i32) {
    %c0_i32 = arith.constant 0 : i32
    %c0_i32_0 = arith.constant 0 : i32
    return %arg0, %c0_i32 : i32, i32
  }
}

</mosaic_0001>

<bundles_post_ra>
// kernel: tile.23
= control target key start
LH: loop header
LB: loop body
LE: loop exit
PB: predicated region body
PF: predicated region fallthrough
CT: control target
= control target key end

     0   :  { %s28_s0 = inlined_call_operand.vmem [shape: f32[16], index: 0, kind: input, shape index: {}]   ;;  %s29_s1 = inlined_call_operand.vmem [shape: f32[12,16], index: 1, kind: output, shape index: {}]  }
   0x1   :  { %v4_v0 = vld [vmem:[%s28_s0] ss:$0 sm:$0xff] }
   0x2   :  { %5 = vst [vmem:[%s29_s1] sm:$0xff] %v4_v0 }
   0x3   :  { %8 = vst [vmem:[%s29_s1 + $0x8] sm:$0xff] %v4_v0 }

// kernel: tile.24
= control target key start
LH: loop header
LB: loop body
LE: loop exit
PB: predicated region body
PF: predicated region fallthrough
CT: control target
= control target key end

     0   :  { %s78_s10 = smov 112   ;;  %s79_s11 = smov 80   ;;  %vm4_vm0 = vcmask 130048   ;;  %vm10_vm1 = vcmask 1048448   ;;  %vm16_vm2 = vcmask 917248   ;;  %vm22_vm3 = vcmask 786048   ;;  %s125_s0 = inlined_call_operand.vmem [shape: f32[12,16], index: 0, kind: input, shape index: {}]   ;;  %s126_s1 = inlined_call_operand.vmem [shape: f32[1,192], index: 1, kind: output, shape index: {}]  }
   0x1   :  { %v63_v0 = vld [vmem:[%s125_s0 + $0x7] sm:$0x1]   ;;  %v65_v1 = vld [vmem:[%s125_s0 + $0x5] sm:$0x1]   ;;  %s31_s12 = smov 3  ;;  %s80_s15 = smov 48  }
   0x2   :  { %8 = vrot.lane.b32.xlu0 %v63_v0, %s78_s10  ;;  %20 = vrot.lane.b32.xlu1 %v65_v1, %s79_s11  ;;  %v67_v2 = vld [vmem:[%s125_s0 + $0x3] ss:$8 sm:%s31_s12]   ;;  %s38_s20 = smov 3  ;;  %s81_s21 = smov 96   ;;  %vm28_vm4 = vcmask 654848   ;;  %vm35_vm5 = vcmask 523648  }
   0x3   :  { %33 = vrot.lane.b32.xlu2 %v67_v2, %s80_s15  ;;  %v64_v3 = vld [vmem:[%s125_s0 + $0x6] sm:$0x1]   ;;  %v66_v4 = vld [vmem:[%s125_s0 + $0x4] sm:$0x1]   ;;  %s82_s22 = smov 64   ;;  %s45_s25 = smov 3 }
   0x4   :  { %v68_v5 = vld [vmem:[%s125_s0 + $0x2] ss:$8 sm:%s38_s20]   ;;  %s83_s26 = smov 32   ;;  %v69_v6 = vld [vmem:[%s125_s0 + $0x1] ss:$8 sm:%s45_s25]   ;;  %s84_s29 = smov 16  }
   0x5   :  { %s2_s30 = smov 3  ;;  %vm42_vm6 = vcmask 392448   ;;  %vm49_vm7 = vcmask 261248  }
   0x6   :  { %v3_v7 = vld [vmem:[%s125_s0] ss:$8 sm:%s2_s30]  }
   0x7   :  { %5 = vst.msk [vmem:[#allocation0] ss:$8 sm:$0x3] %vm4_vm0, %v3_v7  }
   0xa   :  { %14 = vrot.lane.b32.xlu0 %v64_v3, %s81_s21  ;;  %26 = vrot.lane.b32.xlu1 %v66_v4, %s82_s22 }
   0xb   :  { %40 = vrot.lane.b32.xlu2 %v68_v5, %s83_s26 }
  0x12   :  { %47 = vrot.lane.b32.xlu0 %v69_v6, %s84_s29 }
  0x5d   :  { %v34_v8 = vpop.permute.xlu2 %33  }
  0x65   :  { %v41_v9 = vpop.permute.xlu2 %40  }
  0x74   :  { %v9_v10 = vpop.permute.xlu0 %8   ;;  %v21_v11 = vpop.permute.xlu1 %20  }
  0x75   :  { %11 = vst.msk [vmem:[#allocation0] sm:$0x1] %vm10_vm1, %v9_v10  }
  0x7c   :  { %v15_v12 = vpop.permute.xlu0 %14   ;;  %v27_v13 = vpop.permute.xlu1 %26  }
  0x7d   :  { %17 = vst.msk [vmem:[#allocation0] sm:$0x1] %vm16_vm2, %v15_v12  }
  0x7e   :  { %23 = vst.msk [vmem:[#allocation0] sm:$0x1] %vm22_vm3, %v21_v11  }
  0x7f   :  { %29 = vst.msk [vmem:[#allocation0] sm:$0x1] %vm28_vm4, %v27_v13  }
  0x80   :  { %36 = vst.msk [vmem:[#allocation0] ss:$8 sm:$0x3] %vm35_vm5, %v34_v8  }
  0x81   :  { %43 = vst.msk [vmem:[#allocation0] ss:$8 sm:$0x3] %vm42_vm6, %v41_v9  }
  0x84   :  { %v48_v14 = vpop.permute.xlu0 %47  }
  0x85   :  { %50 = vst.msk [vmem:[#allocation0] ss:$8 sm:$0x3] %vm49_vm7, %v48_v14  }
  0x8c   :  { %v53_v15 = vld [vmem:[#allocation0] sm:$0x1]  ;;  %v58_v16 = vld [vmem:[#allocation0 + $0x8] sm:$0x1] }
  0x8d   :  { %56 = vst [vmem:[%s126_s1] sm:$0x1] %v53_v15 }
  0x8e   :  { %70 = vst [vmem:[%s126_s1 + $0x1] sm:$0x1] %v58_v16 }

// kernel: tile.33
= control target key start
LH: loop header
LB: loop body
LE: loop exit
PB: predicated region body
PF: predicated region fallthrough
CT: control target
= control target key end

     0   :  { %s22_s0 = inlined_call_operand.vmem [shape: f32[32], index: 0, kind: input, shape index: {}]   ;;  %s23_s1 = inlined_call_operand.vmem [shape: f32[8,32], index: 1, kind: output, shape index: {}]  }
   0x1   :  { %v4_v0 = vld [vmem:[%s22_s0] ss:$0 sm:$0xff] }
   0x2   :  { %5 = vst [vmem:[%s23_s1] sm:$0xff] %v4_v0 }

// kernel: tile.34
= control target key start
LH: loop header
LB: loop body
LE: loop exit
PB: predicated region body
PF: predicated region fallthrough
CT: control target
= control target key end

     0   :  { %s7_s6 = smov 3  ;;  %s46_s9 = smov 96   ;;  %vm4_vm0 = vcmask 261120   ;;  %vm11_vm1 = vcmask 1048320   ;;  %vm18_vm2 = vcmask 785920   ;;  %vm25_vm3 = vcmask 523520   ;;  %s77_s0 = inlined_call_operand.vmem [shape: f32[8,32], index: 0, kind: input, shape index: {}]   ;;  %s78_s1 = inlined_call_operand.vmem [shape: f32[1,256], index: 1, kind: output, shape index: {}]  }
   0x1   :  { %v39_v0 = vld [vmem:[%s77_s0 + $0x3] ss:$4 sm:%s7_s6]   ;;  %s21_s10 = smov 3  ;;  %s14_s13 = smov 3 }
   0x2   :  { %9 = vrot.lane.b32.xlu0 %v39_v0, %s46_s9  ;;  %v41_v1 = vld [vmem:[%s77_s0 + $0x1] ss:$4 sm:%s21_s10]   ;;  %s47_s14 = smov 32   ;;  %s48_s17 = smov 64  }
   0x3   :  { %23 = vrot.lane.b32.xlu1 %v41_v1, %s47_s14  ;;  %v40_v2 = vld [vmem:[%s77_s0 + $0x2] ss:$4 sm:%s14_s13]   ;;  %s2_s18 = smov 3 }
   0x4   :  { %v3_v3 = vld [vmem:[%s77_s0] ss:$4 sm:%s2_s18]  }
   0x5   :  { %5 = vst.msk [vmem:[#allocation0] ss:$8 sm:$0x3] %vm4_vm0, %v3_v3  }
   0xa   :  { %16 = vrot.lane.b32.xlu0 %v40_v2, %s48_s17 }
  0x74   :  { %v10_v4 = vpop.permute.xlu0 %9  }
  0x75   :  { %12 = vst.msk [vmem:[#allocation0] ss:$8 sm:$0x3] %vm11_vm1, %v10_v4   ;;  %v24_v5 = vpop.permute.xlu1 %23  }
  0x7c   :  { %v17_v6 = vpop.permute.xlu0 %16  }
  0x7d   :  { %19 = vst.msk [vmem:[#allocation0] ss:$8 sm:$0x3] %vm18_vm2, %v17_v6  }
  0x7e   :  { %26 = vst.msk [vmem:[#allocation0] ss:$8 sm:$0x3] %vm25_vm3, %v24_v5  }
  0x85   :  { %v29_v7 = vld [vmem:[#allocation0] sm:$0x1]  ;;  %v34_v8 = vld [vmem:[#allocation0 + $0x8] sm:$0x1] }
  0x86   :  { %32 = vst [vmem:[%s78_s1] sm:$0x1] %v29_v7 }
  0x87   :  { %42 = vst [vmem:[%s78_s1 + $0x1] sm:$0x1] %v34_v8 }

// kernel: tile.28
= control target key start
LH: loop header
LB: loop body
LE: loop exit
PB: predicated region body
PF: predicated region fallthrough
CT: control target
= control target key end

     0   :  { %s28_s0 = inlined_call_operand.vmem [shape: f32[16], index: 0, kind: input, shape index: {}]   ;;  %s29_s1 = inlined_call_operand.vmem [shape: f32[10,16], index: 1, kind: output, shape index: {}]  }
   0x1   :  { %v4_v0 = vld [vmem:[%s28_s0] ss:$0 sm:$0xff] }
   0x2   :  { %5 = vst [vmem:[%s29_s1] sm:$0xff] %v4_v0 }
   0x3   :  { %8 = vst [vmem:[%s29_s1 + $0x8] sm:$0xff] %v4_v0 }

// kernel: tile.29
= control target key start
LH: loop header
LB: loop body
LE: loop exit
PB: predicated region body
PF: predicated region fallthrough
CT: control target
= control target key end

     0   :  { %s76_s10 = smov 112   ;;  %s77_s11 = smov 80   ;;  %vm4_vm0 = vcmask 130048   ;;  %vm10_vm1 = vcmask 1048448   ;;  %vm16_vm2 = vcmask 917248   ;;  %vm22_vm3 = vcmask 786048   ;;  %s123_s0 = inlined_call_operand.vmem [shape: f32[10,16], index: 0, kind: input, shape index: {}]   ;;  %s124_s1 = inlined_call_operand.vmem [shape: f32[1,160], index: 1, kind: output, shape index: {}]  }
   0x1   :  { %v61_v0 = vld [vmem:[%s123_s0 + $0x7] sm:$0x1]   ;;  %v63_v1 = vld [vmem:[%s123_s0 + $0x5] sm:$0x1]   ;;  %v65_v2 = vld [vmem:[%s123_s0 + $0x3] sm:$0x1]  }
   0x2   :  { %8 = vrot.lane.b32.xlu0 %v61_v0, %s76_s10  ;;  %20 = vrot.lane.b32.xlu1 %v63_v1, %s77_s11  ;;  %s78_s14 = smov 48   ;;  %v62_v3 = vld [vmem:[%s123_s0 + $0x6] sm:$0x1]   ;;  %v64_v4 = vld [vmem:[%s123_s0 + $0x4] sm:$0x1]   ;;  %s79_s19 = smov 96  }
   0x3   :  { %32 = vrot.lane.b32.xlu2 %v65_v2, %s78_s14  ;;  %s80_s20 = smov 64   ;;  %v66_v5 = vld [vmem:[%s123_s0 + $0x2] sm:$0x1]   ;;  %s43_s23 = smov 3  ;;  %vm28_vm4 = vcmask 654848   ;;  %vm34_vm5 = vcmask 523648  }
   0x4   :  { %s81_s24 = smov 32   ;;  %v67_v6 = vld [vmem:[%s123_s0 + $0x1] ss:$8 sm:%s43_s23]   ;;  %s82_s27 = smov 16   ;;  %vm40_vm6 = vcmask 392448   ;;  %vm47_vm7 = vcmask 261248  }
   0x5   :  { %s2_s28 = smov 3 }
   0x6   :  { %v3_v7 = vld [vmem:[%s123_s0] ss:$8 sm:%s2_s28]  }
   0x7   :  { %5 = vst.msk [vmem:[#allocation0] ss:$8 sm:$0x3] %vm4_vm0, %v3_v7  }
   0xa   :  { %14 = vrot.lane.b32.xlu0 %v62_v3, %s79_s19  ;;  %26 = vrot.lane.b32.xlu1 %v64_v4, %s80_s20 }
   0xb   :  { %38 = vrot.lane.b32.xlu2 %v66_v5, %s81_s24 }
  0x12   :  { %45 = vrot.lane.b32.xlu0 %v67_v6, %s82_s27 }
  0x5d   :  { %v33_v8 = vpop.permute.xlu2 %32  }
  0x65   :  { %v39_v9 = vpop.permute.xlu2 %38  }
  0x74   :  { %v9_v10 = vpop.permute.xlu0 %8   ;;  %v21_v11 = vpop.permute.xlu1 %20  }
  0x75   :  { %11 = vst.msk [vmem:[#allocation0] sm:$0x1] %vm10_vm1, %v9_v10  }
  0x7c   :  { %v15_v12 = vpop.permute.xlu0 %14   ;;  %v27_v13 = vpop.permute.xlu1 %26  }
  0x7d   :  { %17 = vst.msk [vmem:[#allocation0] sm:$0x1] %vm16_vm2, %v15_v12  }
  0x7e   :  { %23 = vst.msk [vmem:[#allocation0] sm:$0x1] %vm22_vm3, %v21_v11  }
  0x7f   :  { %29 = vst.msk [vmem:[#allocation0] sm:$0x1] %vm28_vm4, %v27_v13  }
  0x80   :  { %35 = vst.msk [vmem:[#allocation0] sm:$0x1] %vm34_vm5, %v33_v8  }
  0x81   :  { %41 = vst.msk [vmem:[#allocation0] sm:$0x1] %vm40_vm6, %v39_v9  }
  0x84   :  { %v46_v14 = vpop.permute.xlu0 %45  }
  0x85   :  { %48 = vst.msk [vmem:[#allocation0] ss:$8 sm:$0x3] %vm47_vm7, %v46_v14  }
  0x8c   :  { %v51_v15 = vld [vmem:[#allocation0] sm:$0x1]  ;;  %v56_v16 = vld [vmem:[#allocation0 + $0x8] sm:$0x1] }
  0x8d   :  { %54 = vst [vmem:[%s124_s1] sm:$0x1] %v51_v15 }
  0x8e   :  { %68 = vst [vmem:[%s124_s1 + $0x1] sm:$0x1] %v56_v16 }

// kernel: tile.38
= control target key start
LH: loop header
LB: loop body
LE: loop exit
PB: predicated region body
PF: predicated region fallthrough
CT: control target
= control target key end

     0   :  { %s22_s0 = inlined_call_operand.vmem [shape: f32[32], index: 0, kind: input, shape index: {}]   ;;  %s23_s1 = inlined_call_operand.vmem [shape: f32[6,32], index: 1, kind: output, shape index: {}]  }
   0x1   :  { %v4_v0 = vld [vmem:[%s22_s0] ss:$0 sm:$0xff] }
   0x2   :  { %5 = vst [vmem:[%s23_s1] sm:$0xff] %v4_v0 }

// kernel: tile.39
= control target key start
LH: loop header
LB: loop body
LE: loop exit
PB: predicated region body
PF: predicated region fallthrough
CT: control target
= control target key end

     0   :  { %s44_s8 = smov 96   ;;  %s19_s9 = smov 3  ;;  %vm4_vm0 = vcmask 261120   ;;  %vm10_vm1 = vcmask 1048320   ;;  %vm16_vm2 = vcmask 785920   ;;  %vm23_vm3 = vcmask 523520   ;;  %s75_s0 = inlined_call_operand.vmem [shape: f32[6,32], index: 0, kind: input, shape index: {}]   ;;  %s76_s1 = inlined_call_operand.vmem [shape: f32[1,192], index: 1, kind: output, shape index: {}]  }
   0x1   :  { %v37_v0 = vld [vmem:[%s75_s0 + $0x3] sm:$0x1]   ;;  %v39_v1 = vld [vmem:[%s75_s0 + $0x1] ss:$4 sm:%s19_s9]   ;;  %s45_s12 = smov 32   ;;  %s46_s15 = smov 64  }
   0x2   :  { %8 = vrot.lane.b32.xlu0 %v37_v0, %s44_s8  ;;  %21 = vrot.lane.b32.xlu1 %v39_v1, %s45_s12  ;;  %v38_v2 = vld [vmem:[%s75_s0 + $0x2] sm:$0x1]   ;;  %s2_s16 = smov 3 }
   0x3   :  { %v3_v3 = vld [vmem:[%s75_s0] ss:$4 sm:%s2_s16]  }
   0x4   :  { %5 = vst.msk [vmem:[#allocation0] ss:$8 sm:$0x3] %vm4_vm0, %v3_v3  }
   0xa   :  { %14 = vrot.lane.b32.xlu0 %v38_v2, %s46_s15 }
  0x74   :  { %v9_v4 = vpop.permute.xlu0 %8   ;;  %v22_v5 = vpop.permute.xlu1 %21  }
  0x75   :  { %11 = vst.msk [vmem:[#allocation0] sm:$0x1] %vm10_vm1, %v9_v4  }
  0x7c   :  { %v15_v6 = vpop.permute.xlu0 %14  }
  0x7d   :  { %17 = vst.msk [vmem:[#allocation0] sm:$0x1] %vm16_vm2, %v15_v6  }
  0x7e   :  { %24 = vst.msk [vmem:[#allocation0] ss:$8 sm:$0x3] %vm23_vm3, %v22_v5  }
  0x85   :  { %v27_v7 = vld [vmem:[#allocation0] sm:$0x1]  ;;  %v32_v8 = vld [vmem:[#allocation0 + $0x8] sm:$0x1] }
  0x86   :  { %30 = vst [vmem:[%s76_s1] sm:$0x1] %v27_v7 }
  0x87   :  { %40 = vst [vmem:[%s76_s1 + $0x1] sm:$0x1] %v32_v8 }

// kernel: l1_mlp_encoder_forward.1
= control target key start
LH: loop header
LB: loop body
LE: loop exit
PB: predicated region body
PF: predicated region fallthrough
CT: control target
= control target key end

     0   :  { %s11092_s17 = smov 0   ;;  %s16392_s0 = inlined_call_operand.vmem [shape: f32[224,56], index: 0, kind: input, shape index: {}]   ;;  %s16393_s1 = inlined_call_operand.vmem [shape: bf16[3,56,192], index: 1, kind: input, shape index: {}]   ;;  %s16394_s2 = inlined_call_operand.vmem [shape: f32[1,192], index: 2, kind: input, shape index: {}]   ;;  %s16395_s3 = inlined_call_operand.vmem [shape: bf16[3,192,160], index: 3, kind: input, shape index: {}]   ;;  %s16396_s4 = inlined_call_operand.vmem [shape: f32[1,160], index: 4, kind: input, shape index: {}]   ;;  %s16397_s5 = inlined_call_operand.vmem [shape: bf16[3,160,256], index: 5, kind: input, shape index: {}]   ;;  %s16398_s6 = inlined_call_operand.vmem [shape: f32[1,256], index: 6, kind: input, shape index: {}]   ;;  %s16399_s7 = inlined_call_operand.vmem [shape: bf16[3,256,192], index: 7, kind: input, shape index: {}]   ;;  %s16400_s8 = inlined_call_operand.vmem [shape: f32[1,192], index: 8, kind: input, shape index: {}]   ;;  %s16401_s9 = inlined_call_operand.vmem [shape: bf16[6,192,144], index: 9, kind: input, shape index: {}]   ;;  %s16402_s10 = inlined_call_operand.vmem [shape: f32[1,144], index: 10, kind: input, shape index: {}]   ;;  %s16403_s11 = inlined_call_operand.vmem [shape: f32[16,144], index: 11, kind: output, shape index: {}]  }
   0x1 LB: > { %s11098_s18 = sadd.s32 4294967295, %s11030_s17   ;;  %p8207_p0 = scmp.ge.s32.totalorder %s11030_s17, 1  ;;  %s11030_s17 = sphi %s11092_s17, %s21_s17  }
   0x2   : > { %p338_p1 = scmp.lt.s32.totalorder %s11030_s17, 3 }
   0x4   : > { %p339_p2 = pnand %p8207_p0, %p338_p1 }
   0x6   : > { %342 = sbr.rel (%p339_p2) target bundleno = 2315 (0x90b), region = 64 }
   0xb   : > { %v8217_v0 = vld [vmem:[%s16393_s1 + $0x68] sm:$0xff]  ;;  %vm585_vm0 = vcmask 1043456   ;;  %v8236_v5 = vld [vmem:[%s16393_s1 + $0x58] sm:$0xf]  ;;  %v10405_v6 = vld [vmem:[%s16393_s1 + $0x5c] sm:$0xf0] }
   0xc   : > { %v547_v1 = vunpack.c.l.b16 %v8217_v0  ;;  %v548_v2 = vunpack.c.h.b16 %v8217_v0  ;;  %v10404_v7 = vld [vmem:[%s16393_s1 + $0x5c] sm:$0xf]  ;;  %v8238_v8 = vld [vmem:[%s16393_s1 + $0x60] sm:$0xf0]  ;;  %s378_s29 = smul.u32 14, %s11098_s18  ;;  %v424_v12 = vld [vmem:[%s16393_s1 + $0x30] sm:$0xff]  ;;  %v8237_v13 = vor.u32 %v10405_v6, %v8236_v5 }
   0xd   : > { %v8300_v11 = vld [vmem:[%s16393_s1 + $0xa0] sm:$0xff]  ;;  %v699_v16 = vunpack.c.l.b16 %v424_v12  ;;  %v8241_v17 = vor.u32 %v10404_v7, %v8238_v8  ;;  %v8228_v18 = vld [vmem:[%s16393_s1 + $0x48] sm:$0xf]  ;;  %v10403_v19 = vld [vmem:[%s16393_s1 + $0x4c] sm:$0xf0]  ;;  %v700_v24 = vunpack.c.h.b16 %v424_v12  ;;  %vm563_vm2 = vcmask 457728  }
   0xe   : > { %v555_v3 = vpack.c.b16 %v547_v1, %v547_v1  ;;  %v556_v4 = vpack.c.b16 %v548_v2, %v548_v2  ;;  %p379_p3 = scmp.lt.s32.totalorder %s378_s29, 27  ;;  %v868_v14 = vunpack.c.l.b16 %v8300_v11  ;;  %v869_v15 = vunpack.c.h.b16 %v8300_v11  ;;  %v10402_v20 = vld [vmem:[%s16393_s1 + $0x4c] sm:$0xf]  ;;  %v8230_v21 = vld [vmem:[%s16393_s1 + $0x50] sm:$0xf0]  ;;  %p384_p4 = scmp.lt.s32.totalorder %s11098_s18, 1 }
   0xf   : > { %v8220_v22 = vld [vmem:[%s16393_s1 + $0x38] sm:$0xf]  ;;  %v10401_v25 = vld [vmem:[%s16393_s1 + $0x3c] sm:$0xf0]  ;;  %v10400_v26 = vld [vmem:[%s16393_s1 + $0x3c] sm:$0xf]  ;;  %v8229_v29 = vor.u32 %v10403_v19, %v8228_v18  ;;  %v707_v30 = vpack.c.b16 %v699_v16, %v699_v16  ;;  %v8233_v31 = vor.u32 %v10402_v20, %v8230_v21  ;;  %v708_v38 = vpack.c.b16 %v700_v24, %v700_v24 }
  0x10   : > { %v587_v9 = vsel %vm585_vm0, %v555_v3, 0  ;;  %v590_v10 = vsel %vm585_vm0, %v556_v4, 0  ;;  %s16511_s29 = smov (!%p379_p3, %s378_s29), 27  ;;  %v876_v23 = vpack.c.b16 %v868_v14, %v868_v14  ;;  %v8222_v27 = vld [vmem:[%s16393_s1 + $0x40] sm:$0xf0]  ;;  %v877_v28 = vpack.c.b16 %v869_v15, %v869_v15  ;;  %s16513_s18 = smov (!%p384_p4, %s11098_s18), 1 }
  0x11   : > { %596 = vmatpush.bf16.msra.mxu0 %v587_v9  ;;  %10784 = vmatpush.bf16.msra.mxu2 %v587_v9  ;;  %s8208_s15 = sshll.u32 %s16511_s29, 3  ;;  %v8221_v32 = vor.u32 %v10401_v25, %v8220_v22  ;;  %v8225_v33 = vor.u32 %v10400_v26, %v8222_v27  ;;  %vm460_vm1 = vsmask.f32 7424  ;;  %v730_v51 = vsel %vm585_vm0, %v707_v30, 0  ;;  %v8319_v63 = vld [vmem:[%s16393_s1 + $0x90] sm:$0xf] }
  0x12   : > { %640 = vmatpush.bf16.msra.mxu1 %v590_v10  ;;  %10788 = vmatpush.bf16.msra.mxu3 %v590_v10  ;;  %s11153_s20 = scalar_lea.vmem %s16392_s0, %s8208_s15  ;;  %v905_v37 = vsel %vm585_vm0, %v876_v23, 0  ;;  %v908_v45 = vsel %vm585_vm0, %v877_v28, 0  ;;  %v10411_v0 = vld [vmem:[%s16393_s1 + $0x94] sm:$0xf0]  ;;  %v733_v8 = vsel %vm585_vm0, %v708_v38, 0  ;;  %vm517_vm3 = vcmask 1047552  }
  0x13   : > { %v390_v34 = vld [vmem:[%s11153_s20] sm:$0xff]  ;;  %v391_v35 = vld [vmem:[%s11153_s20 + $0x8] sm:$0xff]  ;;  %v392_v36 = vld [vmem:[%s11153_s20 + $0x10] sm:$0xff]  ;;  %vm823_vm5 = vcmask 1046528   ;;  %vm1587_vm15 = vcmask 523264   ;;  %s10393_s21 = sshll.u32 %s16513_s18, 4 }
  0x14   : > { %v393_v39 = vld [vmem:[%s11153_s20 + $0x18] sm:$0xff]  ;;  %v404_v40 = vpack.c.bf16 %v390_v34, %v390_v34  ;;  %v405_v41 = vpack.c.bf16 %v391_v35, %v391_v35  ;;  %v406_v42 = vpack.c.bf16 %v392_v36, %v392_v36  ;;  %v398_v43 = vld [vmem:[%s11153_s20 + $0x40] sm:$0xff]  ;;  %v399_v44 = vld [vmem:[%s11153_s20 + $0x48] sm:$0xff]  ;;  %s388_s24 = scalar_lea.vmem %s16403_s11, %s10393_s21 }
  0x15   : > { %597 = vmatpush.bf16.msra.mxu0 %v8237_v13  ;;  %10785 = vmatpush.bf16.msra.mxu2 %v8237_v13  ;;  %v407_v46 = vpack.c.bf16 %v393_v39, %v393_v39  ;;  %v400_v47 = vld [vmem:[%s11153_s20 + $0x50] sm:$0xff]  ;;  %v401_v48 = vld [vmem:[%s11153_s20 + $0x58] sm:$0xff]  ;;  %v412_v49 = vpack.c.bf16 %v398_v43, %v398_v43  ;;  %v413_v50 = vpack.c.bf16 %v399_v44, %v399_v44  ;;  %v394_v52 = vld [vmem:[%s11153_s20 + $0x20] sm:$0xff] }
  0x16   : > { %641 = vmatpush.bf16.msra.mxu1 %v8241_v17  ;;  %10789 = vmatpush.bf16.msra.mxu3 %v8241_v17  ;;  %v439_v53 = vunpack.c.l.b16 %v404_v40  ;;  %v440_v54 = vunpack.c.l.b16 %v405_v41  ;;  %v441_v55 = vunpack.c.l.b16 %v406_v42  ;;  %v414_v56 = vpack.c.bf16 %v400_v47, %v400_v47  ;;  %v395_v57 = vld [vmem:[%s11153_s20 + $0x28] sm:$0xff]  ;;  %v402_v62 = vld [vmem:[%s11153_s20 + $0x60] sm:$0xff]  ;;  %v10410_v18 = vld [vmem:[%s16393_s1 + $0x94] sm:$0xf] }
  0x17   : > { %v442_v58 = vunpack.c.l.b16 %v407_v46  ;;  %v415_v59 = vpack.c.bf16 %v401_v48, %v401_v48  ;;  %v447_v60 = vunpack.c.l.b16 %v412_v49  ;;  %v448_v61 = vunpack.c.l.b16 %v413_v50  ;;  %v403_v9 = vld [vmem:[%s11153_s20 + $0x68] sm:$0xff]  ;;  %v8321_v23 = vld [vmem:[%s16393_s1 + $0x98] sm:$0xf0]  ;;  %v8274_v24 = vld [vmem:[%s16393_s1 + $0x20] sm:$0xf] }
  0x18   : > { %v11175_v1 = vpack.c.b16 %v440_v54, %v439_v53  ;;  %v449_v2 = vunpack.c.l.b16 %v414_v56  ;;  %v408_v3 = vpack.c.bf16 %v394_v52, %v394_v52  ;;  %v409_v4 = vpack.c.bf16 %v395_v57, %v395_v57  ;;  %v10399_v28 = vld [vmem:[%s16393_s1 + $0x24] sm:$0xf0]  ;;  %v8266_v42 = vld [vmem:[%s16393_s1 + $0x10] sm:$0xf]  ;;  %v10397_v43 = vld [vmem:[%s16393_s1 + $0x14] sm:$0xf0] }
  0x19   : > { %598 = vmatpush.bf16.msra.mxu0 %v8229_v29  ;;  %10786 = vmatpush.bf16.msra.mxu2 %v8229_v29  ;;  %v11177_v5 = vpack.c.b16 %v442_v58, %v441_v55  ;;  %v450_v6 = vunpack.c.l.b16 %v415_v59  ;;  %v11179_v7 = vpack.c.b16 %v448_v61, %v447_v60  ;;  %v416_v12 = vpack.c.bf16 %v402_v62, %v402_v62  ;;  %v10396_v46 = vld [vmem:[%s16393_s1 + $0x14] sm:$0xf]  ;;  %v8268_v47 = vld [vmem:[%s16393_s1 + $0x18] sm:$0xf0]  ;;  %v10409_v52 = vld [vmem:[%s16393_s1 + $0x84] sm:$0xf0] }
  0x1a   : > { %642 = vmatpush.bf16.msra.mxu1 %v8233_v31  ;;  %10790 = vmatpush.bf16.msra.mxu3 %v8233_v31  ;;  %v462_v10 = vshrl.u32 %v11175_v1, 16  ;;  %v464_v11 = vshll.u32 %v11175_v1, 16  ;;  %v8320_v13 = vor.u32 %v10411_v0, %v8319_v63  ;;  %v443_v20 = vunpack.c.l.b16 %v408_v3  ;;  %v10398_v31 = vld [vmem:[%s16393_s1 + $0x24] sm:$0xf]  ;;  %v8313_v55 = vld [vmem:[%s16393_s1 + $0x88] sm:$0xf0]  ;;  %vm11288_vm4 = vmand %vm517_vm3, %vm460_vm1 }
  0x1b   : > { %v469_v14 = vshll.u32 %v11177_v5, 16  ;;  %v11186_v15 = vpack.c.b16 %v450_v6, %v449_v2  ;;  %v493_v16 = vshll.u32 %v11179_v7, 16  ;;  %v497_v17 = vshrl.u32 %v11179_v7, 16  ;;  %v10408_v54 = vld [vmem:[%s16393_s1 + $0x84] sm:$0xf]  ;;  %v396_v63 = vld [vmem:[%s11153_s20 + $0x30] sm:$0xff] }
  0x1c   : > { %v466_v19 = vrot.slane %v464_v11, 1  ;;  %v444_v21 = vunpack.c.l.b16 %v409_v4  ;;  %v417_v22 = vpack.c.bf16 %v403_v9, %v403_v9  ;;  %v451_v30 = vunpack.c.l.b16 %v416_v12  ;;  %v8258_v56 = vld [vmem:[%s16393_s1] sm:$0xf]  ;;  %v10395_v58 = vld [vmem:[%s16393_s1 + $0x4] sm:$0xf0]  ;;  %v397_v0 = vld [vmem:[%s11153_s20 + $0x38] sm:$0xff] }
  0x1d   : > { %599 = vmatpush.bf16.msra.mxu0 %v8221_v32  ;;  %10787 = vmatpush.bf16.msra.mxu2 %v8221_v32  ;;  %v471_v25 = vrot.slane %v469_v14, 1  ;;  %v11199_v26 = vrot.slane %v493_v16, 1  ;;  %v501_v27 = vshll.u32 %v11186_v15, 16  ;;  %v8276_v32 = vld [vmem:[%s16393_s1 + $0x28] sm:$0xf0]  ;;  %v8324_v36 = vor.u32 %v10410_v18, %v8321_v23 }
  0x1e   : > { %643 = vmatpush.bf16.msra.mxu1 %v8225_v33  ;;  %10791 = vmatpush.bf16.msra.mxu3 %v8225_v33  ;;  %v467_v29 = vor.u32 %v466_v19, %v462_v10  ;;  %v452_v35 = vunpack.c.l.b16 %v417_v22  ;;  %v11213_v38 = vpack.c.b16 %v444_v21, %v443_v20  ;;  %v8275_v39 = vor.u32 %v10399_v28, %v8274_v24  ;;  %v10394_v59 = vld [vmem:[%s16393_s1 + $0x4] sm:$0xf]  ;;  %v8260_v60 = vld [vmem:[%s16393_s1 + $0x8] sm:$0xf0]  ;;  %v8303_v18 = vld [vmem:[%s16393_s1 + $0x70] sm:$0xf] }
  0x1f   : > { %v499_v33 = vor.u32 %v497_v17, %v11199_v26  ;;  %v503_v34 = vrot.slane %v501_v27, 1  ;;  %v8279_v41 = vor.u32 %v10398_v31, %v8276_v32  ;;  %v473_v48 = vshrl.u32 %v11177_v5, 16  ;;  %v10407_v19 = vld [vmem:[%s16393_s1 + $0x74] sm:$0xf0]  ;;  %v10406_v20 = vld [vmem:[%s16393_s1 + $0x74] sm:$0xf] }
  0x20   : > { %v11226_v44 = vpack.c.b16 %v452_v35, %v451_v30  ;;  %v477_v49 = vshll.u32 %v11213_v38, 16  ;;  %v8271_v50 = vor.u32 %v10396_v46, %v8268_v47  ;;  %v8316_v57 = vor.u32 %v10408_v54, %v8313_v55  ;;  %v8305_v22 = vld [vmem:[%s16393_s1 + $0x78] sm:$0xf0]  ;;  %v10459_v46 = vld [vmem:[%s16395_s3 + $0x174] sm:$0xf0] }
  0x21   : > { %914 = vmatpush.bf16.msrb.mxu0 %v905_v37  ;;  %739 = vmatpush.bf16.msrb.mxu2 %v730_v51  ;;  %v472_v37 = vsel %vm460_vm1, %v467_v29, %v471_v25  ;;  %v504_v40 = vsel %vm460_vm1, %v499_v33, %v503_v34  ;;  %v8311_v51 = vld [vmem:[%s16393_s1 + $0x80] sm:$0xf]  ;;  %v505_v61 = vshrl.u32 %v11186_v15, 16  ;;  %v8259_v2 = vor.u32 %v10395_v58, %v8258_v56  ;;  %v10450_v47 = vld [vmem:[%s16395_s3 + $0x134] sm:$0xf] }
  0x22   : > { %958 = vmatpush.bf16.msrb.mxu1 %v908_v45  ;;  %783 = vmatpush.bf16.msrb.mxu3 %v733_v8  ;;  %v8267_v45 = vor.u32 %v10397_v43, %v8266_v42  ;;  %v8312_v53 = vor.u32 %v10409_v52, %v8311_v51  ;;  %v509_v62 = vshll.u32 %v11226_v44, 16  ;;  %v8263_v3 = vor.u32 %v10394_v59, %v8260_v60  ;;  %v8481_v43 = vld [vmem:[%s16395_s3 + $0x170] sm:$0xf]  ;;  %v10458_v51 = vld [vmem:[%s16395_s3 + $0x174] sm:$0xf] }
  0x23   : > { %8242 = vmatmul.msk.bf16.vlgmr.msra.gmra.mxu0 %vm563_vm2, %v472_v37  ;;  %8249 = vmatmul.msk.bf16.vlgmr.msra.gmra.mxu1 %vm563_vm2, %v472_v37  ;;  %v475_v4 = vor.u32 %v473_v48, %v471_v25  ;;  %v479_v6 = vrot.slane %v477_v49, 1  ;;  %v410_v8 = vpack.c.bf16 %v396_v63, %v396_v63  ;;  %v411_v9 = vpack.c.bf16 %v397_v0, %v397_v0  ;;  %v8451_v48 = vld [vmem:[%s16395_s3 + $0x138] sm:$0xf0]  ;;  %v8441_v56 = vld [vmem:[%s16395_s3 + $0x120] sm:$0xf] }
  0x24   : > { %8246 = vmatmul.msk.bf16.vlgmr.msra.gmra.mxu2 %vm563_vm2, %v504_v40  ;;  %8253 = vmatmul.msk.bf16.vlgmr.msra.gmra.mxu3 %vm563_vm2, %v504_v40  ;;  %v507_v10 = vor.u32 %v505_v61, %v503_v34  ;;  %v511_v11 = vrot.slane %v509_v62, 1  ;;  %v8304_v21 = vor.u32 %v10407_v19, %v8303_v18  ;;  %v8308_v23 = vor.u32 %v10406_v20, %v8305_v22  ;;  %v8483_v52 = vld [vmem:[%s16395_s3 + $0x178] sm:$0xf0]  ;;  %v10448_v59 = vld [vmem:[%s16395_s3 + $0x124] sm:$0xf] }
  0x25   : > { %915 = vmatpush.bf16.msrb.mxu0 %v8320_v13  ;;  %740 = vmatpush.bf16.msrb.mxu2 %v8275_v39  ;;  %v480_v12 = vsel %vm460_vm1, %v475_v4, %v479_v6  ;;  %v445_v13 = vunpack.c.l.b16 %v410_v8  ;;  %v446_v14 = vunpack.c.l.b16 %v411_v9  ;;  %v481_v24 = vshrl.u32 %v11213_v38, 16  ;;  %v8443_v60 = vld [vmem:[%s16395_s3 + $0x128] sm:$0xf0]  ;;  %v8473_v4 = vld [vmem:[%s16395_s3 + $0x160] sm:$0xf] }
  0x26   : > { %959 = vmatpush.bf16.msrb.mxu1 %v8324_v36  ;;  %784 = vmatpush.bf16.msrb.mxu3 %v8279_v41  ;;  %v512_v16 = vsel %vm460_vm1, %v507_v10, %v511_v11  ;;  %v513_v27 = vshrl.u32 %v11226_v44, 16  ;;  %v16428_v31 = vmov 0  ;;  %v824_v37 = vrot.slane %v11175_v1, 1  ;;  %v10457_v8 = vld [vmem:[%s16395_s3 + $0x164] sm:$0xf0] }
  0x27   : > { %v11270_v17 = vpack.c.b16 %v446_v14, %v445_v13  ;;  %v483_v28 = vor.u32 %v481_v24, %v479_v6  ;;  %v16429_v31 = vsel %vm11288_vm4, 4294967295, %v16428_v31  ;;  %v825_v39 = vrot.slane %v11177_v5, 1  ;;  %v10446_v14 = vld [vmem:[%s16395_s3 + $0x114] sm:$0xf]  ;;  %v8475_v18 = vld [vmem:[%s16395_s3 + $0x168] sm:$0xf0] }
  0x28   : > { %v515_v30 = vor.u32 %v513_v27, %v511_v11  ;;  %16430 = vst [vmem:[#allocation2_spill] sm:$0xff] %v16429_v31  ;;  %v8482_v49 = vor.u32 %v10459_v46, %v8481_v43  ;;  %v831_v54 = vrot.slane %v11179_v7, 1  ;;  %v8446_v61 = vor.u32 %v10448_v59, %v8443_v60  ;;  %v8425_v27 = vld [vmem:[%s16395_s3 + $0x100] sm:$0xf]  ;;  %v10455_v43 = vld [vmem:[%s16395_s3 + $0x154] sm:$0xf0] }
  0x29   : > { %741 = vmatpush.bf16.msrb.mxu2 %v8267_v45  ;;  %916 = vmatpush.bf16.msrb.mxu0 %v8312_v53  ;;  %v485_v25 = vshll.u32 %v11270_v17, 16  ;;  %v489_v34 = vshrl.u32 %v11270_v17, 16  ;;  %v826_v40 = vsel %vm823_vm5, %v824_v37, %v825_v39  ;;  %v8486_v53 = vor.u32 %v10458_v51, %v8483_v52  ;;  %v8467_v60 = vld [vmem:[%s16395_s3 + $0x158] sm:$0xf0] }
  0x2a   : > { %785 = vmatpush.bf16.msrb.mxu3 %v8271_v50  ;;  %960 = vmatpush.bf16.msrb.mxu1 %v8316_v57  ;;  %v519_v33 = vsel %vm11288_vm4, %v515_v30, 0  ;;  %v8454_v50 = vor.u32 %v10450_v47, %v8451_v48  ;;  %v10449_v57 = vld [vmem:[%s16395_s3 + $0x124] sm:$0xf0]  ;;  %v8474_v9 = vor.u32 %v10457_v8, %v8473_v4  ;;  %v835_v20 = vrot.slane %v11226_v44, 1 }
  0x2b   : > { %v487_v29 = vrot.slane %v485_v25, 1  ;;  %v8442_v58 = vor.u32 %v10449_v57, %v8441_v56  ;;  %v10454_v56 = vld [vmem:[%s16395_s3 + $0x154] sm:$0xf] }
  0x2d   : > { %742 = vmatpush.bf16.msrb.mxu2 %v8259_v2  ;;  %917 = vmatpush.bf16.msrb.mxu0 %v8304_v21  ;;  %v488_v32 = vsel %vm460_vm1, %v483_v28, %v487_v29  ;;  %v491_v35 = vor.u32 %v489_v34, %v487_v29  ;;  %v8433_v2 = vld [vmem:[%s16395_s3 + $0x110] sm:$0xf]  ;;  %v10445_v28 = vld [vmem:[%s16395_s3 + $0x104] sm:$0xf0] }
  0x2e   : > { %786 = vmatpush.bf16.msrb.mxu3 %v8263_v3  ;;  %961 = vmatpush.bf16.msrb.mxu1 %v8308_v23  ;;  %v10447_v3 = vld [vmem:[%s16395_s3 + $0x114] sm:$0xf0]  ;;  %v8426_v29 = vor.u32 %v10445_v28, %v8425_v27 }
  0x2f   : > { %v496_v36 = vsel %vm460_vm1, %v491_v35, %v11199_v26  ;;  %v827_v26 = vrot.slane %v11213_v38, 1  ;;  %v8434_v6 = vor.u32 %v10447_v3, %v8433_v2  ;;  %v10444_v35 = vld [vmem:[%s16395_s3 + $0x104] sm:$0xf]  ;;  %v1026_v2 = vld [vmem:[%s16394_s2] sm:$0x3] }
  0x31   : > { %v828_v41 = vsel %vm823_vm5, %v825_v39, %v827_v26  ;;  %1697 = vmatpush.bf16.msra.mxu0 %v8454_v50 }
  0x32   : > { %1657 = vmatpush.bf16.msra.mxu3 %v8482_v49  ;;  %1745 = vmatpush.bf16.msra.mxu1 %v8486_v53 }
  0x33   : > { %8243 = vmatmul.msk.bf16.gmra.mxu0 %vm563_vm2, %v480_v12  ;;  %8250 = vmatmul.msk.bf16.gmra.mxu1 %vm563_vm2, %v480_v12 }
  0x34   : > { %8247 = vmatmul.msk.bf16.gmra.mxu2 %vm563_vm2, %v512_v16  ;;  %8254 = vmatmul.msk.bf16.gmra.mxu3 %vm563_vm2, %v512_v16  ;;  %v8435_v16 = vld [vmem:[%s16395_s3 + $0x118] sm:$0xf0] }
  0x35   : > { %1698 = vmatpush.bf16.msra.mxu0 %v8446_v61 }
  0x36   : > { %1658 = vmatpush.bf16.msra.mxu3 %v8474_v9  ;;  %v11517_v9 = vperm.slane %v1026_v2, 0 }
  0x43   : > { %8244 = vmatmul.msk.bf16.gmra.mxu0 %vm563_vm2, %v488_v32  ;;  %8251 = vmatmul.msk.bf16.gmra.mxu1 %vm563_vm2, %v488_v32 }
  0x44   : > { %8248 = vmatmul.msk.bf16.gmra.mxu2 %vm563_vm2, %v519_v33  ;;  %8255 = vmatmul.msk.bf16.gmra.mxu3 %vm563_vm2, %v519_v33 }
  0x53   : > { %8245 = vmatmul.msk.bf16.gmra.mxu0 %vm563_vm2, %v496_v36  ;;  %8252 = vmatmul.msk.bf16.gmra.mxu1 %vm563_vm2, %v496_v36  ;;  %v8427_v36 = vld [vmem:[%s16395_s3 + $0x108] sm:$0xf0] }
  0x54   : > { %8280 = vmatmul.msk.bf16.vlgmr.msrb.gmra.mxu2 %vm563_vm2, %v11175_v1  ;;  %8287 = vmatmul.msk.bf16.vlgmr.msrb.gmra.mxu3 %vm563_vm2, %v11175_v1  ;;  %v829_v1 = vrot.slane %v11270_v17, 1  ;;  %v8430_v37 = vor.u32 %v10444_v35, %v8427_v36  ;;  %v10440_v35 = vld [vmem:[%s16395_s3 + $0xe4] sm:$0xf]  ;;  %v8411_v36 = vld [vmem:[%s16395_s3 + $0xe8] sm:$0xf0] }
  0x56   : > { %v830_v42 = vsel %vm823_vm5, %v827_v26, %v829_v1  ;;  %v832_v55 = vsel %vm823_vm5, %v829_v1, %v831_v54  ;;  %v8417_v1 = vld [vmem:[%s16395_s3 + $0xf0] sm:$0xf] }
  0x63   : > { %8325 = vmatmul.msk.bf16.vlgmr.msrb.gmra.mxu0 %vm563_vm2, %v826_v40  ;;  %8332 = vmatmul.msk.bf16.vlgmr.msrb.gmra.mxu1 %vm563_vm2, %v826_v40  ;;  %v840_v40 = vsel %vm823_vm5, %v835_v20, 0 }
  0x64   : > { %8281 = vmatmul.msk.bf16.gmra.mxu2 %vm563_vm2, %v11177_v5  ;;  %8288 = vmatmul.msk.bf16.gmra.mxu3 %vm563_vm2, %v11177_v5  ;;  %v8449_v5 = vld [vmem:[%s16395_s3 + $0x130] sm:$0xf] }
  0x73   : > { %8326 = vmatmul.msk.bf16.gmra.mxu0 %vm563_vm2, %v828_v41  ;;  %8333 = vmatmul.msk.bf16.gmra.mxu1 %vm563_vm2, %v828_v41 }
  0x74   : > { %8282 = vmatmul.msk.bf16.gmra.mxu2 %vm563_vm2, %v11213_v38  ;;  %8289 = vmatmul.msk.bf16.gmra.mxu3 %vm563_vm2, %v11213_v38  ;;  %v10451_v38 = vld [vmem:[%s16395_s3 + $0x134] sm:$0xf0] }
  0x75   : > { %v8450_v45 = vor.u32 %v10451_v38, %v8449_v5  ;;  %v8465_v5 = vld [vmem:[%s16395_s3 + $0x150] sm:$0xf] }
  0x77   : > { %1609 = vmatpush.bf16.msra.mxu2 %v8450_v45  ;;  %v8466_v45 = vor.u32 %v10455_v43, %v8465_v5 }
  0x79   : > { %1659 = vmatpush.bf16.msra.mxu3 %v8466_v45 }
  0x7b   : > { %1610 = vmatpush.bf16.msra.mxu2 %v8442_v58 }
  0x7f   : > { %1611 = vmatpush.bf16.msra.mxu2 %v8434_v6 }
  0x83   : > { %8327 = vmatmul.msk.bf16.gmra.mxu0 %vm563_vm2, %v830_v42  ;;  %8334 = vmatmul.msk.bf16.gmra.mxu1 %vm563_vm2, %v830_v42  ;;  %v10443_v42 = vld [vmem:[%s16395_s3 + $0xf4] sm:$0xf0] }
  0x84   : > { %8283 = vmatmul.msk.bf16.gmra.mxu2 %vm563_vm2, %v11270_v17  ;;  %8290 = vmatmul.msk.bf16.gmra.mxu3 %vm563_vm2, %v11270_v17  ;;  %v8438_v17 = vor.u32 %v10446_v14, %v8435_v16  ;;  %v8418_v38 = vor.u32 %v10443_v42, %v8417_v1  ;;  %v11519_v14 = vperm.slane %v1026_v2, 1  ;;  %v10438_v2 = vld [vmem:[%s16395_s3 + $0xd4] sm:$0xf] }
  0x85   : > { %1612 = vmatpush.bf16.msra.mxu2 %v8426_v29 }
  0x86   : > { %1699 = vmatpush.bf16.msra.mxu0 %v8438_v17  ;;  %v8409_v17 = vld [vmem:[%s16395_s3 + $0xe0] sm:$0xf] }
  0x89   : > { %1613 = vmatpush.bf16.msra.mxu2 %v8418_v38  ;;  %v8414_v38 = vor.u32 %v10440_v35, %v8411_v36 }
  0x8a   : > { %1700 = vmatpush.bf16.msra.mxu0 %v8430_v37 }
  0x93   : > { %8328 = vmatmul.msk.bf16.gmra.mxu0 %vm563_vm2, %v832_v55  ;;  %8335 = vmatmul.msk.bf16.gmra.mxu1 %vm563_vm2, %v832_v55  ;;  %v8419_v55 = vld [vmem:[%s16395_s3 + $0xf8] sm:$0xf0] }
  0x94   : > { %8284 = vmatmul.msk.bf16.gmra.mxu2 %vm563_vm2, %v11179_v7  ;;  %8291 = vmatmul.msk.bf16.gmra.mxu3 %vm563_vm2, %v11179_v7  ;;  %v833_v7 = vrot.slane %v11186_v15, 1 }
  0x96   : > { %v834_v0 = vsel %vm823_vm5, %v831_v54, %v833_v7  ;;  %v836_v25 = vsel %vm823_vm5, %v833_v7, %v835_v20  ;;  %v10442_v54 = vld [vmem:[%s16395_s3 + $0xf4] sm:$0xf] }
  0x97   : > { %v8422_v59 = vor.u32 %v10442_v54, %v8419_v55 }
  0x99   : > { %1701 = vmatpush.bf16.msra.mxu0 %v8422_v59 }
  0x9d   : > { %1702 = vmatpush.bf16.msra.mxu0 %v8414_v38 }
  0xa0   : > { %v11378_v62 = vpop.f32.mrf.mxu0  ;;  %v11380_v63 = vpop.f32.mrf.mxu1 }
  0xa3   : > { %8329 = vmatmul.msk.bf16.gmra.mxu0 %vm563_vm2, %v834_v0  ;;  %8336 = vmatmul.msk.bf16.gmra.mxu1 %vm563_vm2, %v834_v0  ;;  %v8470_v0 = vor.u32 %v10454_v56, %v8467_v60 }
  0xa4   : > { %8285 = vmatmul.msk.bf16.gmra.mxu2 %vm563_vm2, %v11186_v15  ;;  %8292 = vmatmul.msk.bf16.gmra.mxu3 %vm563_vm2, %v11186_v15  ;;  %v10456_v15 = vld [vmem:[%s16395_s3 + $0x164] sm:$0xf] }
  0xa5   : > { %v8478_v19 = vor.u32 %v10456_v15, %v8475_v18  ;;  %v10441_v18 = vld [vmem:[%s16395_s3 + $0xe4] sm:$0xf0] }
  0xa6   : > { %v8410_v20 = vor.u32 %v10441_v18, %v8409_v17 }
  0xa7   : > { %v11401_v10 = vpop.f32.mrf.mxu2  ;;  %v11403_v11 = vpop.f32.mrf.mxu3  ;;  %1746 = vmatpush.bf16.msra.mxu1 %v8478_v19 }
  0xa8   : > { %v11405_v12 = vpop.f32.mrf.mxu0  ;;  %v11407_v13 = vpop.f32.mrf.mxu1  ;;  %1614 = vmatpush.bf16.msra.mxu2 %v8410_v20  ;;  %v8457_v20 = vld [vmem:[%s16395_s3 + $0x140] sm:$0xf] }
  0xab   : > { %1747 = vmatpush.bf16.msra.mxu1 %v8470_v0  ;;  %v10439_v0 = vld [vmem:[%s16395_s3 + $0xd4] sm:$0xf0] }
  0xaf   : > { %v11422_v21 = vpop.f32.mrf.mxu2  ;;  %v11424_v22 = vpop.f32.mrf.mxu3 }
  0xb0   : > { %v11426_v23 = vpop.f32.mrf.mxu0  ;;  %v11428_v24 = vpop.f32.mrf.mxu1 }
  0xb3   : > { %8330 = vmatmul.msk.bf16.gmra.mxu0 %vm563_vm2, %v836_v25  ;;  %8337 = vmatmul.msk.bf16.gmra.mxu1 %vm563_vm2, %v836_v25 }
  0xb4   : > { %8286 = vmatmul.msk.bf16.gmra.mxu2 %vm563_vm2, %v11226_v44  ;;  %8293 = vmatmul.msk.bf16.gmra.mxu3 %vm563_vm2, %v11226_v44 }
  0xb7   : > { %v11443_v30 = vpop.f32.mrf.mxu2  ;;  %v11445_v32 = vpop.f32.mrf.mxu3 }
  0xb8   : > { %v11447_v33 = vpop.f32.mrf.mxu0  ;;  %v11449_v34 = vpop.f32.mrf.mxu1 }
  0xbf   : > { %v11457_v44 = vpop.f32.mrf.mxu2  ;;  %v11459_v39 = vpop.f32.mrf.mxu3 }
  0xc0   : > { %v11462_v26 = vpop.f32.mrf.mxu0  ;;  %v11464_v41 = vpop.f32.mrf.mxu1 }
  0xc3   : > { %8331 = vmatmul.msk.bf16.gmra.mxu0 %vm563_vm2, %v840_v40  ;;  %8338 = vmatmul.msk.bf16.gmra.mxu1 %vm563_vm2, %v840_v40 }
  0xc7   : > { %v11480_v46 = vpop.f32.mrf.mxu2  ;;  %v11482_v47 = vpop.f32.mrf.mxu3 }
  0xc8   : > { %v11484_v48 = vpop.f32.mrf.mxu0  ;;  %v11486_v49 = vpop.f32.mrf.mxu1 }
  0xcf   : > { %v11488_v50 = vpop.f32.mrf.mxu2  ;;  %v11490_v51 = vpop.f32.mrf.mxu3 }
  0xd0   : > { %v11492_v52 = vpop.f32.mrf.mxu0  ;;  %v11494_v53 = vpop.f32.mrf.mxu1 }
  0xd7   : > { %v744_v57 = vpop.f32.mrf.mxu2  ;;  %v788_v58 = vpop.f32.mrf.mxu3 }
  0xd8   : > { %v11508_v61 = vpop.f32.mrf.mxu0  ;;  %v11510_v7 = vpop.f32.mrf.mxu1  ;;  %v745_v3 = vadd.f32 %v744_v57, %v11378_v62  ;;  %v789_v4 = vadd.f32 %v788_v58, %v11380_v63  ;;  %v8401_v58 = vld [vmem:[%s16395_s3 + $0xd0] sm:$0xf] }
  0xdf   : > { %v746_v6 = vpop.f32.mrf.mxu2  ;;  %v790_v8 = vpop.f32.mrf.mxu3 }
  0xe0   : > { %v919_v16 = vpop.f32.mrf.mxu0  ;;  %v963_v15 = vpop.f32.mrf.mxu1  ;;  %v747_v29 = vadd.f32 %v746_v6, %v11405_v12  ;;  %v791_v37 = vadd.f32 %v790_v8, %v11407_v13 }
  0xe1   : > { %v998_v19 = vadd.f32 %v919_v16, %v745_v3  ;;  %v999_v62 = vadd.f32 %v963_v15, %v789_v4  ;;  %v8403_v3 = vld [vmem:[%s16395_s3 + $0xd8] sm:$0xf0] }
  0xe2   : > { %v8406_v17 = vor.u32 %v10438_v2, %v8403_v3 }
  0xe3   : > { %v1032_v63 = vadd.f32 %v11517_v9, %v998_v19  ;;  %v1033_v25 = vadd.f32 %v11519_v14, %v999_v62 }
  0xe4   : > { %1703 = vmatpush.bf16.msra.mxu0 %v8406_v17 }
  0xe5   : > { %v1088_v27 = vmin.f32 %v1032_v63, 0.0  ;;  %v1089_v28 = vmin.f32 %v1033_v25, 0.0  ;;  %vm1060_vm6 = vcmp.gt.f32.partialorder %v1032_v63, 0.0  ;;  %vm1061_vm7 = vcmp.gt.f32.partialorder %v1033_v25, 0.0 }
  0xe7   : > { %v1116_v40 = vmul.f32 1.442695, %v1088_v27  ;;  %v1118_v1 = vmul.f32 1.442695, %v1089_v28  ;;  %v749_v42 = vpop.f32.mrf.mxu2  ;;  %v793_v5 = vpop.f32.mrf.mxu3  ;;  %v10453_v27 = vld [vmem:[%s16395_s3 + $0x144] sm:$0xf0] }
  0xe8   : > { %v921_v43 = vpop.f32.mrf.mxu0  ;;  %v965_v45 = vpop.f32.mrf.mxu1  ;;  %v750_v59 = vadd.f32 %v749_v42, %v11426_v23  ;;  %v794_v60 = vadd.f32 %v793_v5, %v11428_v24  ;;  %v8402_v23 = vor.u32 %v10439_v0, %v8401_v58  ;;  %v8393_v42 = vld [vmem:[%s16395_s3 + $0xc0] sm:$0xf] }
  0xe9   : > { %10800 = vpow2.f32 %v1116_v40  ;;  %v1000_v54 = vadd.f32 %v921_v43, %v747_v29  ;;  %v1001_v12 = vadd.f32 %v965_v45, %v791_v37  ;;  %v8458_v37 = vor.u32 %v10453_v27, %v8457_v20  ;;  %v10452_v40 = vld [vmem:[%s16395_s3 + $0x144] sm:$0xf]  ;;  %v10437_v45 = vld [vmem:[%s16395_s3 + $0xc4] sm:$0xf0] }
  0xea   : > { %10802 = vpow2.f32 %v1118_v1  ;;  %1615 = vmatpush.bf16.msra.mxu2 %v8402_v23  ;;  %v8459_v1 = vld [vmem:[%s16395_s3 + $0x148] sm:$0xf0] }
  0xeb   : > { %v11538_v55 = vadd.f32 %v11517_v9, %v1000_v54  ;;  %v11541_v56 = vadd.f32 %v11519_v14, %v1001_v12  ;;  %v8462_v43 = vor.u32 %v10452_v40, %v8459_v1  ;;  %v10436_v54 = vld [vmem:[%s16395_s3 + $0xc4] sm:$0xf]  ;;  %v8395_v12 = vld [vmem:[%s16395_s3 + $0xc8] sm:$0xf0]  ;;  %1660 = vmatpush.bf16.msra.mxu3 %v8458_v37 }
  0xed   : > { %v1090_v13 = vmin.f32 %v11538_v55, 0.0  ;;  %v1091_v57 = vmin.f32 %v11541_v56, 0.0  ;;  %1748 = vmatpush.bf16.msra.mxu1 %v8462_v43  ;;  %vm1062_vm8 = vcmp.gt.f32.partialorder %v11538_v55, 0.0  ;;  %vm1063_vm9 = vcmp.gt.f32.partialorder %v11541_v56, 0.0 }
  0xef   : > { %v10801_v4 = vpop.eup %10800  ;;  %v1120_v6 = vmul.f32 1.442695, %v1090_v13  ;;  %v1122_v8 = vmul.f32 1.442695, %v1091_v57  ;;  %v751_v16 = vpop.f32.mrf.mxu2  ;;  %v8398_v57 = vor.u32 %v10436_v54, %v8395_v12 }
  0xf0   : > { %v795_v15 = vpop.f32.mrf.mxu3  ;;  %v10803_v24 = vpop.eup %10802  ;;  %v8339_v18 = vadd.f32 -1.0, %v10801_v4  ;;  %v752_v0 = vadd.f32 %v751_v16, %v11447_v33 }
  0xf1   : > { %v924_v19 = vpop.f32.mrf.mxu0  ;;  %v968_v62 = vpop.f32.mrf.mxu1  ;;  %v8340_v28 = vadd.f32 -1.0, %v10803_v24  ;;  %10804 = vpow2.f32 %v1120_v6  ;;  %1704 = vmatpush.bf16.msra.mxu0 %v8398_v57  ;;  %v796_v2 = vadd.f32 %v795_v15, %v11449_v34 }
  0xf2   : > { %v1002_v29 = vadd.f32 %v924_v19, %v750_v59  ;;  %v1003_v35 = vadd.f32 %v968_v62, %v794_v60  ;;  %v1200_v36 = vsel %vm1060_vm6, %v1032_v63, %v8339_v18  ;;  %10806 = vpow2.f32 %v1122_v8 }
  0xf3   : > { %v1201_v5 = vsel %vm1061_vm7, %v1033_v25, %v8340_v28  ;;  %v8394_v25 = vor.u32 %v10437_v45, %v8393_v42 }
  0xf4   : > { %v1036_v38 = vadd.f32 %v11517_v9, %v1002_v29  ;;  %v1037_v63 = vadd.f32 %v11519_v14, %v1003_v35  ;;  %v11587_v13 = vpack.c.bf16 %v1201_v5, %v1200_v36 }
  0xf5   : > { %1616 = vmatpush.bf16.msra.mxu2 %v8394_v25 }
  0xf6   : > { %v1092_v58 = vmin.f32 %v1036_v38, 0.0  ;;  %v1093_v59 = vmin.f32 %v1037_v63, 0.0  ;;  %vm1064_vm10 = vcmp.gt.f32.partialorder %v1036_v38, 0.0  ;;  %vm1065_vm11 = vcmp.gt.f32.partialorder %v1037_v63, 0.0 }
  0xf7   : > { %v10805_v60 = vpop.eup %10804  ;;  %v754_v6 = vpop.f32.mrf.mxu2  ;;  %v1280_v57 = vunpack.c.l.b16 %v11587_v13 }
  0xf8   : > { %v1124_v3 = vmul.f32 1.442695, %v1092_v58  ;;  %v1126_v4 = vmul.f32 1.442695, %v1093_v59  ;;  %v798_v8 = vpop.f32.mrf.mxu3  ;;  %v10807_v23 = vpop.eup %10806  ;;  %v8341_v17 = vadd.f32 -1.0, %v10805_v60  ;;  %v755_v36 = vadd.f32 %v754_v6, %v11462_v26 }
  0xf9   : > { %v926_v24 = vpop.f32.mrf.mxu0  ;;  %v970_v18 = vpop.f32.mrf.mxu1  ;;  %v8342_v19 = vadd.f32 -1.0, %v10807_v23  ;;  %v799_v43 = vadd.f32 %v798_v8, %v11464_v41  ;;  %v1281_v6 = vunpack.c.h.b16 %v11587_v13  ;;  %v10427_v8 = vld [vmem:[%s16395_s3 + $0x74] sm:$0xf0] }
  0xfa   : > { %10808 = vpow2.f32 %v1124_v3  ;;  %v1004_v62 = vadd.f32 %v926_v24, %v752_v0  ;;  %v1005_v20 = vadd.f32 %v970_v18, %v796_v2  ;;  %v1202_v27 = vsel %vm1062_vm8, %v11538_v55, %v8341_v17 }
  0xfb   : > { %10810 = vpow2.f32 %v1126_v4  ;;  %v1203_v33 = vsel %vm1063_vm9, %v11541_v56, %v8342_v19 }
  0xfc   : > { %v1038_v34 = vadd.f32 %v11517_v9, %v1004_v62  ;;  %v11597_v16 = vadd.f32 %v11519_v14, %v1005_v20  ;;  %v1229_v15 = vpack.c.bf16 %v1203_v33, %v1202_v27  ;;  %v8591_v20 = vld [vmem:[%s16395_s3 + $0xb0] sm:$0xf] }
  0xfe   : > { %v1094_v28 = vmin.f32 %v1038_v34, 0.0  ;;  %v1095_v29 = vmin.f32 %v11597_v16, 0.0  ;;  %v1282_v5 = vunpack.c.l.b16 %v1229_v15  ;;  %v1283_v0 = vunpack.c.h.b16 %v1229_v15 }
  0xff   : > { %v756_v55 = vpop.f32.mrf.mxu2  ;;  %vm1066_vm12 = vcmp.gt.f32.partialorder %v1038_v34, 0.0  ;;  %vm1067_vm13 = vcmp.gt.f32.partialorder %v11597_v16, 0.0 }
 0x100   : > { %v10809_v35 = vpop.eup %10808  ;;  %v1128_v37 = vmul.f32 1.442695, %v1094_v28  ;;  %v1130_v40 = vmul.f32 1.442695, %v1095_v29  ;;  %v800_v1 = vpop.f32.mrf.mxu3  ;;  %v11606_v2 = vpack.c.b16 %v1282_v5, %v1280_v57  ;;  %v757_v17 = vadd.f32 %v756_v55, %v11484_v48  ;;  %v10435_v48 = vld [vmem:[%s16395_s3 + $0xb4] sm:$0xf0] }
 0x101   : > { %v10811_v42 = vpop.eup %10810  ;;  %v8343_v56 = vadd.f32 -1.0, %v10809_v35  ;;  %v929_v45 = vpop.f32.mrf.mxu0  ;;  %v801_v24 = vadd.f32 %v800_v1, %v11486_v49  ;;  %v11625_v33 = vpack.c.b16 %v1283_v0, %v1281_v6  ;;  %v8592_v1 = vor.u32 %v10435_v48, %v8591_v20 }
 0x102   : > { %v973_v54 = vpop.f32.mrf.mxu1  ;;  %v8344_v12 = vadd.f32 -1.0, %v10811_v42  ;;  %10812 = vpow2.f32 %v1128_v37  ;;  %v1006_v25 = vadd.f32 %v929_v45, %v755_v36  ;;  %v1325_v36 = vshll.u32 %v11606_v2, 16 }
 0x103   : > { %v1204_v58 = vsel %vm1064_vm10, %v1036_v38, %v8343_v56  ;;  %10814 = vpow2.f32 %v1130_v40  ;;  %v1007_v26 = vadd.f32 %v973_v54, %v799_v43  ;;  %v1323_v45 = vshrl.u32 %v11606_v2, 16  ;;  %1974 = vmatpush.bf16.msrb.mxu3 %v8592_v1 }
 0x104   : > { %v1205_v59 = vsel %vm1065_vm11, %v1037_v63, %v8344_v12  ;;  %v11604_v60 = vadd.f32 %v11517_v9, %v1006_v25  ;;  %v8559_v63 = vld [vmem:[%s16395_s3 + $0x70] sm:$0xf]  ;;  %v1335_v54 = vshrl.u32 %v11625_v33, 16  ;;  %v1337_v12 = vshll.u32 %v11625_v33, 16 }
 0x105   : > { %v1230_v3 = vpack.c.bf16 %v1205_v59, %v1204_v58  ;;  %v11609_v41 = vadd.f32 %v11519_v14, %v1007_v26  ;;  %v8560_v13 = vor.u32 %v10427_v8, %v8559_v63  ;;  %v1327_v25 = vrot.slane %v1325_v36, 1 }
 0x106   : > { %v1096_v4 = vmin.f32 %v11604_v60, 0.0  ;;  %vm1068_vm14 = vcmp.gt.f32.partialorder %v11604_v60, 0.0 }
 0x107   : > { %v1097_v38 = vmin.f32 %v11609_v41, 0.0  ;;  %v759_v19 = vpop.f32.mrf.mxu2  ;;  %1926 = vmatpush.bf16.msrb.mxu2 %v8560_v13  ;;  %v1284_v57 = vunpack.c.l.b16 %v1230_v3  ;;  %v1285_v58 = vunpack.c.h.b16 %v1230_v3  ;;  %vm1069_vm2 = vcmp.gt.f32.partialorder %v11609_v41, 0.0 }
 0x108   : > { %v10813_v23 = vpop.eup %10812  ;;  %v1132_v18 = vmul.f32 1.442695, %v1096_v4  ;;  %v803_v62 = vpop.f32.mrf.mxu3  ;;  %v760_v4 = vadd.f32 %v759_v19, %v11492_v52  ;;  %v8561_v52 = vld [vmem:[%s16395_s3 + $0x78] sm:$0xf0] }
 0x109   : > { %v10815_v27 = vpop.eup %10814  ;;  %v8345_v15 = vadd.f32 -1.0, %v10813_v23  ;;  %v1134_v28 = vmul.f32 1.442695, %v1097_v38  ;;  %v931_v29 = vpop.f32.mrf.mxu0  ;;  %v804_v13 = vadd.f32 %v803_v62, %v11494_v53  ;;  %v8593_v53 = vld [vmem:[%s16395_s3 + $0xb8] sm:$0xf0] }
 0x10a   : > { %v975_v35 = vpop.f32.mrf.mxu1  ;;  %v8346_v49 = vadd.f32 -1.0, %v10815_v27  ;;  %10816 = vpow2.f32 %v1132_v18  ;;  %v1008_v37 = vadd.f32 %v931_v29, %v757_v17  ;;  %v10426_v27 = vld [vmem:[%s16395_s3 + $0x74] sm:$0xf] }
 0x10b   : > { %v1009_v40 = vadd.f32 %v975_v35, %v801_v24  ;;  %v1206_v55 = vsel %vm1066_vm12, %v1038_v34, %v8345_v15  ;;  %10818 = vpow2.f32 %v1134_v28  ;;  %v1339_v28 = vrot.slane %v1337_v12, 1  ;;  %v10434_v29 = vld [vmem:[%s16395_s3 + $0xb4] sm:$0xf] }
 0x10c   : > { %v1207_v42 = vsel %vm1067_vm13, %v11597_v16, %v8346_v49  ;;  %v11635_v5 = vadd.f32 %v11517_v9, %v1008_v37  ;;  %v1328_v12 = vor.u32 %v1327_v25, %v1323_v45 }
 0x10d   : > { %v11638_v56 = vadd.f32 %v11519_v14, %v1009_v40  ;;  %v1231_v43 = vpack.c.bf16 %v1207_v42, %v1206_v55  ;;  %v8564_v40 = vor.u32 %v10426_v27, %v8561_v52 }
 0x10e   : > { %v1098_v34 = vmin.f32 %v11635_v5, 0.0  ;;  %vm1070_vm3 = vcmp.gt.f32.partialorder %v11635_v5, 0.0 }
 0x10f   : > { %v1099_v16 = vmin.f32 %v11638_v56, 0.0  ;;  %v1286_v26 = vunpack.c.l.b16 %v1231_v43  ;;  %v1287_v59 = vunpack.c.h.b16 %v1231_v43  ;;  %v761_v63 = vpop.f32.mrf.mxu2  ;;  %2014 = vmatpush.bf16.msrb.mxu0 %v8564_v40  ;;  %vm1071_vm6 = vcmp.gt.f32.partialorder %v11638_v56, 0.0 }
 0x110   : > { %v10817_v0 = vpop.eup %10816  ;;  %v1136_v6 = vmul.f32 1.442695, %v1098_v34  ;;  %v805_v8 = vpop.f32.mrf.mxu3  ;;  %v1340_v34 = vor.u32 %v1339_v28, %v1335_v54 }
 0x111   : > { %v1138_v38 = vmul.f32 1.442695, %v1099_v16  ;;  %v10819_v23 = vpop.eup %10818  ;;  %v11648_v17 = vpack.c.b16 %v1286_v26, %v1284_v57  ;;  %v11650_v24 = vpack.c.b16 %v1287_v59, %v1285_v58  ;;  %v8347_v18 = vadd.f32 -1.0, %v10817_v0  ;;  %v934_v3 = vpop.f32.mrf.mxu0  ;;  %v8551_v26 = vld [vmem:[%s16395_s3 + $0x60] sm:$0xf] }
 0x112   : > { %v978_v20 = vpop.f32.mrf.mxu1  ;;  %v8348_v19 = vadd.f32 -1.0, %v10819_v23  ;;  %10820 = vpow2.f32 %v1136_v6  ;;  %v1010_v15 = vadd.f32 %v934_v3, %v760_v4  ;;  %v806_v57 = vadd.f32 %v805_v8, %v11510_v7  ;;  %v10425_v59 = vld [vmem:[%s16395_s3 + $0x64] sm:$0xf0] }
 0x113   : > { %v1208_v62 = vsel %vm1068_vm14, %v11604_v60, %v8347_v18  ;;  %10822 = vpow2.f32 %v1138_v38  ;;  %v1011_v35 = vadd.f32 %v978_v20, %v804_v13  ;;  %v1330_v36 = vshll.u32 %v11648_v17, 16 }
 0x114   : > { %v1209_v48 = vsel %vm1069_vm2, %v11609_v41, %v8348_v19  ;;  %v11673_v49 = vadd.f32 %v11517_v9, %v1010_v15  ;;  %v1342_v37 = vshll.u32 %v11650_v24, 16  ;;  %v8596_v60 = vor.u32 %v10434_v29, %v8593_v53 }
 0x115   : > { %v1232_v55 = vpack.c.bf16 %v1209_v48, %v1208_v62  ;;  %v11677_v1 = vadd.f32 %v11519_v14, %v1011_v35  ;;  %v11679_v42 = vrot.slane %v1330_v36, 1  ;;  %v762_v41 = vadd.f32 %v761_v63, %v11508_v61 }
 0x116   : > { %v1100_v43 = vmin.f32 %v11673_v49, 0.0  ;;  %v11682_v16 = vrot.slane %v1342_v37, 1  ;;  %2062 = vmatpush.bf16.msrb.mxu1 %v8596_v60  ;;  %v8552_v4 = vor.u32 %v10425_v59, %v8551_v26  ;;  %vm1072_vm7 = vcmp.gt.f32.partialorder %v11673_v49, 0.0  ;;  %v10424_v59 = vld [vmem:[%s16395_s3 + $0x64] sm:$0xf] }
 0x117   : > { %v1101_v58 = vmin.f32 %v11677_v1, 0.0  ;;  %v764_v25 = vpop.f32.mrf.mxu2  ;;  %v1333_v61 = vsel %vm460_vm1, %v1328_v12, %v11679_v42  ;;  %v1288_v53 = vunpack.c.l.b16 %v1232_v55  ;;  %v1289_v62 = vunpack.c.h.b16 %v1232_v55 }
 0x118   : > { %v10821_v45 = vpop.eup %10820  ;;  %v1140_v54 = vmul.f32 1.442695, %v1100_v43  ;;  %v808_v0 = vpop.f32.mrf.mxu3  ;;  %v1345_v7 = vsel %vm460_vm1, %v1340_v34, %v11682_v16  ;;  %1617 = vmatmul.bf16.vlgmr.msra.gmra.mxu2 %v1333_v61  ;;  %1705 = vmatmul.bf16.vlgmr.msra.gmra.mxu0 %v1333_v61  ;;  %vm1073_vm8 = vcmp.gt.f32.partialorder %v11677_v1, 0.0  ;;  %v765_v48 = vadd.f32 %v764_v25, %v11401_v10  ;;  %v8553_v10 = vld [vmem:[%s16395_s3 + $0x68] sm:$0xf0] }
 0x119   : > { %v10823_v6 = vpop.eup %10822  ;;  %v8349_v38 = vadd.f32 -1.0, %v10821_v45  ;;  %v1142_v63 = vmul.f32 1.442695, %v1101_v58  ;;  %8487 = vmatmul.msk.bf16.vlgmr.msra.gmra.mxu3 %vm1587_vm15, %v1345_v7  ;;  %v936_v8 = vpop.f32.mrf.mxu0  ;;  %8494 = vmatmul.msk.bf16.vlgmr.msra.gmra.mxu1 %vm1587_vm15, %v1345_v7  ;;  %v809_v58 = vadd.f32 %v808_v0, %v11403_v11  ;;  %v1354_v25 = vshrl.u32 %v11650_v24, 16 }
 0x11a   : > { %v980_v23 = vpop.f32.mrf.mxu1  ;;  %v8350_v18 = vadd.f32 -1.0, %v10823_v6  ;;  %10824 = vpow2.f32 %v1140_v54  ;;  %v1012_v13 = vadd.f32 %v936_v8, %v762_v41  ;;  %1927 = vmatpush.bf16.msrb.mxu2 %v8552_v4 }
 0x11b   : > { %v1013_v3 = vadd.f32 %v980_v23, %v806_v57  ;;  %v1210_v20 = vsel %vm1070_vm3, %v11635_v5, %v8349_v38  ;;  %10826 = vpow2.f32 %v1142_v63  ;;  %v1346_v5 = vshrl.u32 %v11648_v17, 16 }
 0x11c   : > { %v1211_v27 = vsel %vm1071_vm6, %v11638_v56, %v8350_v18  ;;  %v11704_v52 = vadd.f32 %v11517_v9, %v1012_v13  ;;  %v8556_v38 = vor.u32 %v10424_v59, %v8553_v10  ;;  %v1356_v13 = vor.u32 %v1354_v25, %v11682_v16 }
 0x11d   : > { %v11707_v19 = vadd.f32 %v11519_v14, %v1013_v3  ;;  %v1233_v15 = vpack.c.bf16 %v1211_v27, %v1210_v20  ;;  %v1348_v18 = vor.u32 %v1346_v5, %v11679_v42 }
 0x11e   : > { %v1102_v28 = vmin.f32 %v11704_v52, 0.0  ;;  %2015 = vmatpush.bf16.msrb.mxu0 %v8556_v38  ;;  %vm1074_vm9 = vcmp.gt.f32.partialorder %v11704_v52, 0.0 }
 0x11f   : > { %v1103_v29 = vmin.f32 %v11707_v19, 0.0  ;;  %v1290_v35 = vunpack.c.l.b16 %v1233_v15  ;;  %v1291_v36 = vunpack.c.h.b16 %v1233_v15  ;;  %v766_v60 = vpop.f32.mrf.mxu2  ;;  %v8543_v15 = vld [vmem:[%s16395_s3 + $0x50] sm:$0xf]  ;;  %vm1075_vm10 = vcmp.gt.f32.partialorder %v11707_v19, 0.0 }
 0x120   : > { %v10825_v56 = vpop.eup %10824  ;;  %v1144_v37 = vmul.f32 1.442695, %v1102_v28  ;;  %v810_v43 = vpop.f32.mrf.mxu3  ;;  %v10423_v28 = vld [vmem:[%s16395_s3 + $0x54] sm:$0xf0] }
 0x121   : > { %v1146_v40 = vmul.f32 1.442695, %v1103_v29  ;;  %v10827_v12 = vpop.eup %10826  ;;  %v11715_v34 = vpack.c.b16 %v1290_v35, %v1288_v53  ;;  %v11717_v41 = vpack.c.b16 %v1291_v36, %v1289_v62  ;;  %v8351_v57 = vadd.f32 -1.0, %v10825_v56  ;;  %v939_v55 = vpop.f32.mrf.mxu0  ;;  %v8583_v62 = vld [vmem:[%s16395_s3 + $0xa0] sm:$0xf] }
 0x122   : > { %v983_v26 = vpop.f32.mrf.mxu1  ;;  %v8352_v45 = vadd.f32 -1.0, %v10827_v12  ;;  %10828 = vpow2.f32 %v1144_v37  ;;  %v1014_v54 = vadd.f32 %v939_v55, %v765_v48  ;;  %v811_v20 = vadd.f32 %v810_v43, %v11424_v22  ;;  %v10433_v35 = vld [vmem:[%s16395_s3 + $0xa4] sm:$0xf0] }
 0x123   : > { %v1212_v61 = vsel %vm1072_vm7, %v11673_v49, %v8351_v57  ;;  %10830 = vpow2.f32 %v1146_v40  ;;  %v1015_v11 = vadd.f32 %v983_v26, %v809_v58  ;;  %v1350_v0 = vshll.u32 %v11715_v34, 16 }
 0x124   : > { %v1213_v7 = vsel %vm1073_vm8, %v11677_v1, %v8352_v45  ;;  %v11735_v4 = vadd.f32 %v11517_v9, %v1014_v54  ;;  %v1358_v6 = vshll.u32 %v11717_v41, 16  ;;  %v767_v1 = vadd.f32 %v766_v60, %v11422_v21 }
 0x125   : > { %v1234_v63 = vpack.c.bf16 %v1213_v7, %v1212_v61  ;;  %v11739_v8 = vadd.f32 %v11519_v14, %v1015_v11  ;;  %v11741_v23 = vrot.slane %v1350_v0, 1  ;;  %v8544_v22 = vor.u32 %v10423_v28, %v8543_v15  ;;  %v8545_v28 = vld [vmem:[%s16395_s3 + $0x58] sm:$0xf0] }
 0x126   : > { %v1104_v49 = vmin.f32 %v11735_v4, 0.0  ;;  %v11746_v3 = vrot.slane %v1358_v6, 1  ;;  %v8584_v58 = vor.u32 %v10433_v35, %v8583_v62  ;;  %vm1076_vm11 = vcmp.gt.f32.partialorder %v11735_v4, 0.0 }
 0x127   : > { %v1105_v27 = vmin.f32 %v11739_v8, 0.0  ;;  %v769_v16 = vpop.f32.mrf.mxu2  ;;  %v1353_v53 = vsel %vm460_vm1, %v1348_v18, %v11741_v23  ;;  %1928 = vmatpush.bf16.msrb.mxu2 %v8544_v22  ;;  %v1293_v25 = vunpack.c.h.b16 %v1234_v63  ;;  %v1362_v18 = vshrl.u32 %v11715_v34, 16 }
 0x128   : > { %v10829_v42 = vpop.eup %10828  ;;  %v1148_v29 = vmul.f32 1.442695, %v1104_v49  ;;  %v813_v5 = vpop.f32.mrf.mxu3  ;;  %v1361_v21 = vsel %vm460_vm1, %v1356_v13, %v11746_v3  ;;  %1622 = vmatmul.bf16.gmra.mxu2 %v1353_v53  ;;  %1710 = vmatmul.bf16.gmra.mxu0 %v1353_v53  ;;  %v770_v7 = vadd.f32 %v769_v16, %v11443_v30  ;;  %v10422_v30 = vld [vmem:[%s16395_s3 + $0x54] sm:$0xf]  ;;  %v1370_v16 = vshrl.u32 %v11717_v41, 16 }
 0x129   : > { %v10831_v36 = vpop.eup %10830  ;;  %v8353_v56 = vadd.f32 -1.0, %v10829_v42  ;;  %v1150_v48 = vmul.f32 1.442695, %v1105_v27  ;;  %8488 = vmatmul.msk.bf16.gmra.mxu3 %vm1587_vm15, %v1361_v21  ;;  %v941_v37 = vpop.f32.mrf.mxu0  ;;  %8495 = vmatmul.msk.bf16.gmra.mxu1 %vm1587_vm15, %v1361_v21  ;;  %v10432_v53 = vld [vmem:[%s16395_s3 + $0xa4] sm:$0xf]  ;;  %vm1077_vm12 = vcmp.gt.f32.partialorder %v11739_v8, 0.0 }
 0x12a   : > { %v985_v40 = vpop.f32.mrf.mxu1  ;;  %v8354_v60 = vadd.f32 -1.0, %v10831_v36  ;;  %10832 = vpow2.f32 %v1148_v29  ;;  %v1016_v43 = vadd.f32 %v941_v37, %v767_v1  ;;  %1975 = vmatpush.bf16.msrb.mxu3 %v8584_v58  ;;  %v8548_v36 = vor.u32 %v10422_v30, %v8545_v28 }
 0x12b   : > { %v1017_v12 = vadd.f32 %v985_v40, %v811_v20  ;;  %v1214_v57 = vsel %vm1074_vm9, %v11704_v52, %v8353_v56  ;;  %10834 = vpow2.f32 %v1150_v48  ;;  %v1292_v52 = vunpack.c.l.b16 %v1234_v63 }
 0x12c   : > { %v1215_v55 = vsel %vm1075_vm10, %v11707_v19, %v8354_v60  ;;  %v11774_v26 = vadd.f32 %v11517_v9, %v1016_v43  ;;  %v814_v63 = vadd.f32 %v813_v5, %v11445_v32  ;;  %v8585_v32 = vld [vmem:[%s16395_s3 + $0xa8] sm:$0xf0]  ;;  %v1364_v48 = vor.u32 %v1362_v18, %v11741_v23  ;;  %2016 = vmatpush.bf16.msrb.mxu0 %v8548_v36 }
 0x12d   : > { %v11777_v59 = vadd.f32 %v11519_v14, %v1017_v12  ;;  %v1235_v10 = vpack.c.bf16 %v1215_v55, %v1214_v57  ;;  %v8588_v40 = vor.u32 %v10432_v53, %v8585_v32  ;;  %v1372_v12 = vor.u32 %v1370_v16, %v11746_v3  ;;  %v10421_v3 = vld [vmem:[%s16395_s3 + $0x44] sm:$0xf0] }
 0x12e   : > { %v1106_v45 = vmin.f32 %v11774_v26, 0.0  ;;  %vm1078_vm13 = vcmp.gt.f32.partialorder %v11774_v26, 0.0 }
 0x12f   : > { %v1107_v54 = vmin.f32 %v11777_v59, 0.0  ;;  %v1294_v61 = vunpack.c.l.b16 %v1235_v10  ;;  %v1295_v11 = vunpack.c.h.b16 %v1235_v10  ;;  %v771_v38 = vpop.f32.mrf.mxu2  ;;  %2063 = vmatpush.bf16.msrb.mxu1 %v8588_v40  ;;  %vm1079_vm14 = vcmp.gt.f32.partialorder %v11777_v59, 0.0 }
 0x130   : > { %v10833_v0 = vpop.eup %10832  ;;  %v1152_v19 = vmul.f32 1.442695, %v1106_v45  ;;  %v815_v49 = vpop.f32.mrf.mxu3  ;;  %v772_v60 = vadd.f32 %v771_v38, %v11457_v44  ;;  %v8535_v44 = vld [vmem:[%s16395_s3 + $0x40] sm:$0xf] }
 0x131   : > { %v1154_v6 = vmul.f32 1.442695, %v1107_v54  ;;  %v10835_v13 = vpop.eup %10834  ;;  %v11783_v1 = vpack.c.b16 %v1294_v61, %v1292_v52  ;;  %v11785_v20 = vpack.c.b16 %v1295_v11, %v1293_v25  ;;  %v944_v27 = vpop.f32.mrf.mxu0  ;;  %v8355_v42 = vadd.f32 -1.0, %v10833_v0  ;;  %v10420_v52 = vld [vmem:[%s16395_s3 + $0x44] sm:$0xf] }
 0x132   : > { %v988_v15 = vpop.f32.mrf.mxu1  ;;  %10836 = vpow2.f32 %v1152_v19  ;;  %v1018_v29 = vadd.f32 %v944_v27, %v770_v7  ;;  %v8356_v5 = vadd.f32 -1.0, %v10835_v13  ;;  %v816_v23 = vadd.f32 %v815_v49, %v11459_v39  ;;  %v8537_v19 = vld [vmem:[%s16395_s3 + $0x48] sm:$0xf0] }
 0x133   : > { %10838 = vpow2.f32 %v1154_v6  ;;  %v1019_v21 = vadd.f32 %v988_v15, %v814_v63  ;;  %v1366_v22 = vshll.u32 %v11783_v1, 16  ;;  %v1374_v35 = vshll.u32 %v11785_v20, 16 }
 0x134   : > { %v11805_v62 = vadd.f32 %v11517_v9, %v1018_v29  ;;  %v1216_v58 = vsel %vm1076_vm11, %v11735_v4, %v8355_v42  ;;  %v1217_v55 = vsel %vm1077_vm12, %v11739_v8, %v8356_v5  ;;  %v8536_v39 = vor.u32 %v10421_v3, %v8535_v44 }
 0x135   : > { %v11809_v56 = vadd.f32 %v11519_v14, %v1019_v21  ;;  %v11812_v37 = vrot.slane %v1366_v22, 1  ;;  %v11817_v57 = vrot.slane %v1374_v35, 1  ;;  %v1236_v63 = vpack.c.bf16 %v1217_v55, %v1216_v58 }
 0x136   : > { %v1108_v43 = vmin.f32 %v11805_v62, 0.0  ;;  %1929 = vmatpush.bf16.msrb.mxu2 %v8536_v39  ;;  %v8540_v42 = vor.u32 %v10420_v52, %v8537_v19  ;;  %vm1080_vm2 = vcmp.gt.f32.partialorder %v11805_v62, 0.0  ;;  %v1378_v53 = vshrl.u32 %v11783_v1, 16  ;;  %v10418_v52 = vld [vmem:[%s16395_s3 + $0x34] sm:$0xf] }
 0x137   : > { %v1109_v10 = vmin.f32 %v11809_v56, 0.0  ;;  %v1369_v4 = vsel %vm460_vm1, %v1364_v48, %v11812_v37  ;;  %v1377_v8 = vsel %vm460_vm1, %v1372_v12, %v11817_v57  ;;  %v774_v38 = vpop.f32.mrf.mxu2  ;;  %v1296_v32 = vunpack.c.l.b16 %v1236_v63 }
 0x138   : > { %v10837_v45 = vpop.eup %10836  ;;  %v1156_v54 = vmul.f32 1.442695, %v1108_v43  ;;  %1627 = vmatmul.bf16.gmra.mxu2 %v1369_v4  ;;  %v818_v49 = vpop.f32.mrf.mxu3  ;;  %1715 = vmatmul.bf16.gmra.mxu0 %v1369_v4  ;;  %v1297_v5 = vunpack.c.h.b16 %v1236_v63  ;;  %vm1081_vm3 = vcmp.gt.f32.partialorder %v11809_v56, 0.0  ;;  %v775_v35 = vadd.f32 %v774_v38, %v11480_v46  ;;  %v10419_v46 = vld [vmem:[%s16395_s3 + $0x34] sm:$0xf0] }
 0x139   : > { %v10839_v25 = vpop.eup %10838  ;;  %v8357_v61 = vadd.f32 -1.0, %v10837_v45  ;;  %v1158_v11 = vmul.f32 1.442695, %v1109_v10  ;;  %8489 = vmatmul.msk.bf16.gmra.mxu3 %vm1587_vm15, %v1377_v8  ;;  %v946_v0 = vpop.f32.mrf.mxu0  ;;  %8496 = vmatmul.msk.bf16.gmra.mxu1 %vm1587_vm15, %v1377_v8  ;;  %v819_v58 = vadd.f32 %v818_v49, %v11482_v47  ;;  %v8527_v10 = vld [vmem:[%s16395_s3 + $0x30] sm:$0xf]  ;;  %v1386_v45 = vshrl.u32 %v11785_v20, 16 }
 0x13a   : > { %v990_v7 = vpop.f32.mrf.mxu1  ;;  %v8358_v6 = vadd.f32 -1.0, %v10839_v25  ;;  %10840 = vpow2.f32 %v1156_v54  ;;  %v1020_v18 = vadd.f32 %v946_v0, %v772_v60  ;;  %2017 = vmatpush.bf16.msrb.mxu0 %v8540_v42  ;;  %v8575_v54 = vld [vmem:[%s16395_s3 + $0x90] sm:$0xf]  ;;  %v10431_v47 = vld [vmem:[%s16395_s3 + $0x94] sm:$0xf0]  ;;  %v1380_v8 = vor.u32 %v1378_v53, %v11812_v37 }
 0x13b   : > { %v1021_v13 = vadd.f32 %v990_v7, %v816_v23  ;;  %v1218_v27 = vsel %vm1078_vm13, %v11774_v26, %v8357_v61  ;;  %10842 = vpow2.f32 %v1158_v11  ;;  %v8529_v25 = vld [vmem:[%s16395_s3 + $0x38] sm:$0xf0]  ;;  %v1388_v7 = vor.u32 %v1386_v45, %v11817_v57  ;;  %v10429_v45 = vld [vmem:[%s16395_s3 + $0x84] sm:$0xf0] }
 0x13c   : > { %v1219_v15 = vsel %vm1079_vm14, %v11777_v59, %v8358_v6  ;;  %v11850_v30 = vadd.f32 %v11517_v9, %v1020_v18  ;;  %v8528_v37 = vor.u32 %v10419_v46, %v8527_v10  ;;  %v8576_v18 = vor.u32 %v10431_v47, %v8575_v54  ;;  %v8577_v57 = vld [vmem:[%s16395_s3 + $0x98] sm:$0xf0]  ;;  %v8511_v10 = vld [vmem:[%s16395_s3 + $0x10] sm:$0xf]  ;;  %v10415_v46 = vld [vmem:[%s16395_s3 + $0x14] sm:$0xf0] }
 0x13d   : > { %v11853_v28 = vadd.f32 %v11519_v14, %v1021_v13  ;;  %v1237_v29 = vpack.c.bf16 %v1219_v15, %v1218_v27  ;;  %v10430_v13 = vld [vmem:[%s16395_s3 + $0x94] sm:$0xf]  ;;  %v8532_v15 = vor.u32 %v10418_v52, %v8529_v25  ;;  %v10428_v52 = vld [vmem:[%s16395_s3 + $0x84] sm:$0xf]  ;;  %v8569_v25 = vld [vmem:[%s16395_s3 + $0x88] sm:$0xf0] }
 0x13e   : > { %v1110_v16 = vmin.f32 %v11850_v30, 0.0  ;;  %1930 = vmatpush.bf16.msrb.mxu2 %v8528_v37  ;;  %vm1082_vm6 = vcmp.gt.f32.partialorder %v11850_v30, 0.0  ;;  %1976 = vmatpush.bf16.msrb.mxu3 %v8576_v18  ;;  %v10414_v54 = vld [vmem:[%s16395_s3 + $0x14] sm:$0xf]  ;;  %v8512_v37 = vor.u32 %v10415_v46, %v8511_v10  ;;  %v10412_v46 = vld [vmem:[%s16395_s3 + $0x4] sm:$0xf] }
 0x13f   : > { %v1111_v26 = vmin.f32 %v11853_v28, 0.0  ;;  %v1298_v59 = vunpack.c.l.b16 %v1237_v29  ;;  %v1299_v21 = vunpack.c.h.b16 %v1237_v29  ;;  %v776_v61 = vpop.f32.mrf.mxu2  ;;  %2018 = vmatpush.bf16.msrb.mxu0 %v8532_v15  ;;  %vm1083_vm7 = vcmp.gt.f32.partialorder %v11853_v28, 0.0 }
 0x140   : > { %v10841_v22 = vpop.eup %10840  ;;  %v1160_v36 = vmul.f32 1.442695, %v1110_v16  ;;  %v820_v11 = vpop.f32.mrf.mxu3  ;;  %v777_v42 = vadd.f32 %v776_v61, %v11488_v50  ;;  %v10417_v50 = vld [vmem:[%s16395_s3 + $0x24] sm:$0xf0] }
 0x141   : > { %v1162_v48 = vmul.f32 1.442695, %v1111_v26  ;;  %v10843_v40 = vpop.eup %10842  ;;  %v11861_v60 = vpack.c.b16 %v1298_v59, %v1296_v32  ;;  %v11863_v43 = vpack.c.b16 %v1299_v21, %v1297_v5  ;;  %v8359_v12 = vadd.f32 -1.0, %v10841_v22  ;;  %v949_v55 = vpop.f32.mrf.mxu0  ;;  %v8519_v26 = vld [vmem:[%s16395_s3 + $0x20] sm:$0xf] }
 0x142   : > { %v993_v23 = vpop.f32.mrf.mxu1  ;;  %v8360_v44 = vadd.f32 -1.0, %v10843_v40  ;;  %10844 = vpow2.f32 %v1160_v36  ;;  %v1022_v3 = vadd.f32 %v949_v55, %v775_v35  ;;  %v821_v29 = vadd.f32 %v820_v11, %v11490_v51  ;;  %v10416_v51 = vld [vmem:[%s16395_s3 + $0x24] sm:$0xf] }
 0x143   : > { %10846 = vpow2.f32 %v1162_v48  ;;  %v1023_v4 = vadd.f32 %v993_v23, %v819_v58  ;;  %v1382_v39 = vshll.u32 %v11861_v60, 16  ;;  %v1390_v19 = vshll.u32 %v11863_v43, 16 }
 0x144   : > { %v11888_v0 = vadd.f32 %v11517_v9, %v1022_v3  ;;  %v1220_v6 = vsel %vm1080_vm2, %v11805_v62, %v8359_v12  ;;  %v1221_v63 = vsel %vm1081_vm3, %v11809_v56, %v8360_v44  ;;  %v8580_v59 = vor.u32 %v10430_v13, %v8577_v57  ;;  %v8521_v12 = vld [vmem:[%s16395_s3 + $0x28] sm:$0xf0]  ;;  %v8567_v3 = vld [vmem:[%s16395_s3 + $0x80] sm:$0xf] }
 0x145   : > { %v11896_v38 = vadd.f32 %v11519_v14, %v1023_v4  ;;  %v11898_v49 = vrot.slane %v1382_v39, 1  ;;  %v11910_v27 = vrot.slane %v1390_v19, 1  ;;  %v1238_v22 = vpack.c.bf16 %v1221_v63, %v1220_v6  ;;  %v8513_v39 = vld [vmem:[%s16395_s3 + $0x18] sm:$0xf0] }
 0x146   : > { %v1112_v62 = vmin.f32 %v11888_v0, 0.0  ;;  %2064 = vmatpush.bf16.msrb.mxu1 %v8580_v59  ;;  %v8524_v11 = vor.u32 %v10416_v51, %v8521_v12  ;;  %v8516_v13 = vor.u32 %v10414_v54, %v8513_v39  ;;  %v8572_v57 = vor.u32 %v10428_v52, %v8569_v25 }
 0x147   : > { %v1113_v16 = vmin.f32 %v11896_v38, 0.0  ;;  %v1385_v32 = vsel %vm460_vm1, %v1380_v8, %v11898_v49  ;;  %v1393_v5 = vsel %vm460_vm1, %v1388_v7, %v11910_v27  ;;  %v8520_v8 = vor.u32 %v10417_v50, %v8519_v26 }
 0x148   : > { %v10845_v56 = vpop.eup %10844  ;;  %v1164_v53 = vmul.f32 1.442695, %v1112_v62  ;;  %1632 = vmatmul.bf16.gmra.mxu2 %v1385_v32  ;;  %1720 = vmatmul.bf16.gmra.mxu0 %v1385_v32  ;;  %v1300_v61 = vunpack.c.l.b16 %v1238_v22  ;;  %v1301_v7 = vunpack.c.h.b16 %v1238_v22  ;;  %v1394_v26 = vshrl.u32 %v11861_v60, 16 }
 0x149   : > { %v10847_v21 = vpop.eup %10846  ;;  %v8361_v35 = vadd.f32 -1.0, %v10845_v56  ;;  %v1166_v36 = vmul.f32 1.442695, %v1113_v16  ;;  %8490 = vmatmul.msk.bf16.gmra.mxu3 %vm1587_vm15, %v1393_v5  ;;  %v951_v48 = vpop.f32.mrf.mxu0  ;;  %8497 = vmatmul.msk.bf16.gmra.mxu1 %vm1587_vm15, %v1393_v5  ;;  %vm1084_vm8 = vcmp.gt.f32.partialorder %v11888_v0, 0.0  ;;  %vm1085_vm9 = vcmp.gt.f32.partialorder %v11896_v38, 0.0 }
 0x14a   : > { %v995_v40 = vpop.f32.mrf.mxu1  ;;  %v8362_v58 = vadd.f32 -1.0, %v10847_v21  ;;  %10848 = vpow2.f32 %v1164_v53  ;;  %v1024_v55 = vadd.f32 %v951_v48, %v777_v42  ;;  %1931 = vmatpush.bf16.msrb.mxu2 %v8520_v8  ;;  %2019 = vmatpush.bf16.msrb.mxu0 %v8524_v11  ;;  %v1402_v53 = vshrl.u32 %v11863_v43, 16 }
 0x14b   : > { %v1025_v23 = vadd.f32 %v995_v40, %v821_v29  ;;  %v1222_v44 = vsel %vm1082_vm6, %v11850_v30, %v8361_v35  ;;  %10850 = vpow2.f32 %v1166_v36  ;;  %2065 = vmatpush.bf16.msrb.mxu1 %v8572_v57  ;;  %v1396_v50 = vor.u32 %v1394_v26, %v11898_v49  ;;  %v8725_v57 = vld [vmem:[%s16395_s3 + $0x230] sm:$0xf] }
 0x14c   : > { %v1223_v47 = vsel %vm1083_vm7, %v11853_v28, %v8362_v58  ;;  %v1058_v30 = vadd.f32 %v11517_v9, %v1024_v55  ;;  %v8568_v9 = vor.u32 %v10429_v45, %v8567_v3  ;;  %v1404_v21 = vor.u32 %v1402_v53, %v11910_v27  ;;  %v8503_v27 = vld [vmem:[%s16395_s3] sm:$0xf]  ;;  %v10482_v53 = vld [vmem:[%s16395_s3 + $0x234] sm:$0xf] }
 0x14d   : > { %v11958_v4 = vadd.f32 %v11519_v14, %v1025_v23  ;;  %v1239_v28 = vpack.c.bf16 %v1223_v47, %v1222_v44  ;;  %v8505_v44 = vld [vmem:[%s16395_s3 + $0x8] sm:$0xf0] }
 0x14e   : > { %v1114_v14 = vmin.f32 %v1058_v30, 0.0  ;;  %1977 = vmatpush.bf16.msrb.mxu3 %v8568_v9  ;;  %1932 = vmatpush.bf16.msrb.mxu2 %v8512_v37  ;;  %vm1086_vm10 = vcmp.gt.f32.partialorder %v1058_v30, 0.0  ;;  %v8508_v45 = vor.u32 %v10412_v46, %v8505_v44  ;;  %v10470_v46 = vld [vmem:[%s16395_s3 + $0x1d4] sm:$0xf]  ;;  %v8679_v44 = vld [vmem:[%s16395_s3 + $0x1d8] sm:$0xf0] }
 0x14f   : > { %v1115_v19 = vmin.f32 %v11958_v4, 0.0  ;;  %v1302_v6 = vunpack.c.l.b16 %v1239_v28  ;;  %v1303_v18 = vunpack.c.h.b16 %v1239_v28  ;;  %2020 = vmatpush.bf16.msrb.mxu0 %v8516_v13  ;;  %vm1087_vm11 = vcmp.gt.f32.partialorder %v11958_v4, 0.0  ;;  %v10475_v13 = vld [vmem:[%s16395_s3 + $0x1f4] sm:$0xf0] }
 0x150   : > { %v10849_v63 = vpop.eup %10848  ;;  %v1168_v62 = vmul.f32 1.442695, %v1114_v14 }
 0x151   : > { %v1170_v15 = vmul.f32 1.442695, %v1115_v19  ;;  %v10851_v42 = vpop.eup %10850  ;;  %v11970_v29 = vpack.c.b16 %v1302_v6, %v1300_v61  ;;  %v11972_v16 = vpack.c.b16 %v1303_v18, %v1301_v7  ;;  %v8363_v5 = vadd.f32 -1.0, %v10849_v63  ;;  %v8693_v18 = vld [vmem:[%s16395_s3 + $0x1f0] sm:$0xf] }
 0x152   : > { %10852 = vpow2.f32 %v1168_v62  ;;  %v8364_v59 = vadd.f32 -1.0, %v10851_v42  ;;  %v8694_v63 = vor.u32 %v10475_v13, %v8693_v18  ;;  %v10483_v62 = vld [vmem:[%s16395_s3 + $0x234] sm:$0xf0]  ;;  %v8695_v42 = vld [vmem:[%s16395_s3 + $0x1f8] sm:$0xf0] }
 0x153   : > { %10854 = vpow2.f32 %v1170_v15  ;;  %v1398_v56 = vshll.u32 %v11970_v29, 16  ;;  %v1406_v32 = vshll.u32 %v11972_v16, 16  ;;  %v1224_v40 = vsel %vm1084_vm8, %v11888_v0, %v8363_v5  ;;  %v10413_v0 = vld [vmem:[%s16395_s3 + $0x4] sm:$0xf0]  ;;  %2021 = vmatpush.bf16.msrb.mxu0 %v8508_v45  ;;  %v10474_v15 = vld [vmem:[%s16395_s3 + $0x1f4] sm:$0xf] }
 0x154   : > { %v1225_v12 = vsel %vm1085_vm9, %v11896_v38, %v8364_v59  ;;  %v8504_v10 = vor.u32 %v10413_v0, %v8503_v27  ;;  %v1410_v61 = vshrl.u32 %v11970_v29, 16  ;;  %v1418_v11 = vshrl.u32 %v11972_v16, 16  ;;  %v10471_v27 = vld [vmem:[%s16395_s3 + $0x1d4] sm:$0xf0]  ;;  %v8717_v0 = vld [vmem:[%s16395_s3 + $0x220] sm:$0xf] }
 0x155   : > { %v1400_v51 = vrot.slane %v1398_v56, 1  ;;  %v1408_v22 = vrot.slane %v1406_v32, 1  ;;  %v1240_v23 = vpack.c.bf16 %v1225_v12, %v1224_v40  ;;  %v8726_v26 = vor.u32 %v10483_v62, %v8725_v57  ;;  %v8727_v32 = vld [vmem:[%s16395_s3 + $0x238] sm:$0xf0]  ;;  %v10472_v12 = vld [vmem:[%s16395_s3 + $0x1e4] sm:$0xf] }
 0x156   : > { %1933 = vmatpush.bf16.msrb.mxu2 %v8504_v10  ;;  %v8698_v56 = vor.u32 %v10474_v15, %v8695_v42  ;;  %v8730_v5 = vor.u32 %v10482_v53, %v8727_v32  ;;  %v8682_v45 = vor.u32 %v10470_v46, %v8679_v44  ;;  %v8661_v57 = vld [vmem:[%s16395_s3 + $0x1b0] sm:$0xf]  ;;  %v10479_v42 = vld [vmem:[%s16395_s3 + $0x214] sm:$0xf0] }
 0x157   : > { %v1401_v35 = vsel %vm460_vm1, %v1396_v50, %v1400_v51  ;;  %v1409_v36 = vsel %vm460_vm1, %v1404_v21, %v1408_v22  ;;  %v1304_v47 = vunpack.c.l.b16 %v1240_v23  ;;  %v1305_v8 = vunpack.c.h.b16 %v1240_v23  ;;  %2352 = vmatpush.bf16.msra.mxu3 %v8726_v26  ;;  %v8709_v62 = vld [vmem:[%s16395_s3 + $0x210] sm:$0xf] }
 0x158   : > { %v10853_v48 = vpop.eup %10852  ;;  %1637 = vmatmul.bf16.gmra.mxu2 %v1401_v35  ;;  %1725 = vmatmul.bf16.gmra.mxu0 %v1401_v35  ;;  %v1412_v9 = vor.u32 %v1410_v61, %v1400_v51  ;;  %v1420_v14 = vor.u32 %v1418_v11, %v1408_v22  ;;  %v8710_v26 = vor.u32 %v10479_v42, %v8709_v62  ;;  %v10462_v62 = vld [vmem:[%s16395_s3 + $0x194] sm:$0xf]  ;;  %v10476_v42 = vld [vmem:[%s16395_s3 + $0x204] sm:$0xf] }
 0x159   : > { %v10855_v58 = vpop.eup %10854  ;;  %v8365_v55 = vadd.f32 -1.0, %v10853_v48  ;;  %8491 = vmatmul.msk.bf16.gmra.mxu3 %vm1587_vm15, %v1409_v36  ;;  %8498 = vmatmul.msk.bf16.gmra.mxu1 %vm1587_vm15, %v1409_v36  ;;  %v8685_v36 = vld [vmem:[%s16395_s3 + $0x1e0] sm:$0xf]  ;;  %v10473_v48 = vld [vmem:[%s16395_s3 + $0x1e4] sm:$0xf0] }
 0x15a   : > { %v8366_v49 = vadd.f32 -1.0, %v10855_v58  ;;  %2304 = vmatpush.bf16.msra.mxu2 %v8694_v63  ;;  %2392 = vmatpush.bf16.msra.mxu0 %v8698_v56  ;;  %v8686_v40 = vor.u32 %v10473_v48, %v8685_v36  ;;  %v8687_v58 = vld [vmem:[%s16395_s3 + $0x1e8] sm:$0xf0]  ;;  %v10467_v63 = vld [vmem:[%s16395_s3 + $0x1b4] sm:$0xf0] }
 0x15b   : > { %v1226_v38 = vsel %vm1086_vm10, %v1058_v30, %v8365_v55  ;;  %2440 = vmatpush.bf16.msra.mxu1 %v8730_v5  ;;  %v8690_v55 = vor.u32 %v10472_v12, %v8687_v58  ;;  %v8662_v15 = vor.u32 %v10467_v63, %v8661_v57  ;;  %v8711_v36 = vld [vmem:[%s16395_s3 + $0x218] sm:$0xf0] }
 0x15c   : > { %v1227_v3 = vsel %vm1087_vm11, %v11958_v4, %v8366_v49  ;;  %v8677_v49 = vld [vmem:[%s16395_s3 + $0x1d0] sm:$0xf]  ;;  %vm3041_vm11 = vcmask 261120  }
 0x15d   : > { %v1241_v54 = vpack.c.bf16 %v1227_v3, %v1226_v38  ;;  %v8678_v23 = vor.u32 %v10471_v27, %v8677_v49  ;;  %v10481_v38 = vld [vmem:[%s16395_s3 + $0x224] sm:$0xf0]  ;;  %v10480_v3 = vld [vmem:[%s16395_s3 + $0x224] sm:$0xf] }
 0x15e   : > { %2305 = vmatpush.bf16.msra.mxu2 %v8686_v40  ;;  %2393 = vmatpush.bf16.msra.mxu0 %v8690_v55  ;;  %v8718_v10 = vor.u32 %v10481_v38, %v8717_v0  ;;  %v8653_v0 = vld [vmem:[%s16395_s3 + $0x1a0] sm:$0xf] }
 0x15f   : > { %v1306_v30 = vunpack.c.l.b16 %v1241_v54  ;;  %v1307_v39 = vunpack.c.h.b16 %v1241_v54  ;;  %v8719_v54 = vld [vmem:[%s16395_s3 + $0x228] sm:$0xf0] }
 0x160   : > { %2353 = vmatpush.bf16.msra.mxu3 %v8718_v10 }
 0x161   : > { %v12002_v52 = vpack.c.b16 %v1306_v30, %v1304_v47  ;;  %v12004_v25 = vpack.c.b16 %v1307_v39, %v1305_v8  ;;  %v8722_v47 = vor.u32 %v10480_v3, %v8719_v54  ;;  %v8669_v8 = vld [vmem:[%s16395_s3 + $0x1c0] sm:$0xf]  ;;  %v10469_v30 = vld [vmem:[%s16395_s3 + $0x1c4] sm:$0xf0]  ;;  %v10464_v3 = vld [vmem:[%s16395_s3 + $0x1a4] sm:$0xf] }
 0x162   : > { %2306 = vmatpush.bf16.msra.mxu2 %v8678_v23  ;;  %2394 = vmatpush.bf16.msra.mxu0 %v8682_v45  ;;  %v8670_v39 = vor.u32 %v10469_v30, %v8669_v8  ;;  %v10465_v23 = vld [vmem:[%s16395_s3 + $0x1a4] sm:$0xf0]  ;;  %v8655_v45 = vld [vmem:[%s16395_s3 + $0x1a8] sm:$0xf0] }
 0x163   : > { %v1414_v28 = vshll.u32 %v12002_v52, 16  ;;  %v1422_v4 = vshll.u32 %v12004_v25, 16  ;;  %v1426_v59 = vshrl.u32 %v12002_v52, 16  ;;  %v1429_v50 = vshrl.u32 %v12004_v25, 16  ;;  %2441 = vmatpush.bf16.msra.mxu1 %v8722_v47 }
 0x164   : > { %2354 = vmatpush.bf16.msra.mxu3 %v8710_v26  ;;  %v8654_v38 = vor.u32 %v10465_v23, %v8653_v0  ;;  %v8658_v54 = vor.u32 %v10464_v3, %v8655_v45 }
 0x165   : > { %v1416_v7 = vrot.slane %v1414_v28, 1  ;;  %v1424_v19 = vrot.slane %v1422_v4, 1  ;;  %v10468_v4 = vld [vmem:[%s16395_s3 + $0x1c4] sm:$0xf] }
 0x166   : > { %2307 = vmatpush.bf16.msra.mxu2 %v8670_v39 }
 0x167   : > { %v1417_v37 = vsel %vm460_vm1, %v1412_v9, %v1416_v7  ;;  %v1425_v6 = vsel %vm460_vm1, %v1420_v14, %v1424_v19  ;;  %v1428_v51 = vor.u32 %v1426_v59, %v1416_v7  ;;  %v1431_v21 = vor.u32 %v1429_v50, %v1424_v19  ;;  %v8671_v9 = vld [vmem:[%s16395_s3 + $0x1c8] sm:$0xf0] }
 0x168   : > { %1642 = vmatmul.bf16.gmra.mxu2 %v1417_v37  ;;  %1730 = vmatmul.bf16.gmra.mxu0 %v1417_v37  ;;  %v8674_v7 = vor.u32 %v10468_v4, %v8671_v9  ;;  %v8645_v4 = vld [vmem:[%s16395_s3 + $0x190] sm:$0xf]  ;;  %v10463_v9 = vld [vmem:[%s16395_s3 + $0x194] sm:$0xf0] }
 0x169   : > { %8492 = vmatmul.msk.bf16.gmra.mxu3 %vm1587_vm15, %v1425_v6  ;;  %8499 = vmatmul.msk.bf16.gmra.mxu1 %vm1587_vm15, %v1425_v6  ;;  %v1440_v22 = vsel %vm11288_vm4, %v1428_v51, 0  ;;  %v1441_v35 = vsel %vm11288_vm4, %v1431_v21, 0  ;;  %v10466_v51 = vld [vmem:[%s16395_s3 + $0x1b4] sm:$0xf]  ;;  %v8663_v21 = vld [vmem:[%s16395_s3 + $0x1b8] sm:$0xf0] }
 0x16a   : > { %2395 = vmatpush.bf16.msra.mxu0 %v8674_v7  ;;  %2308 = vmatpush.bf16.msra.mxu2 %v8662_v15  ;;  %v8701_v7 = vld [vmem:[%s16395_s3 + $0x200] sm:$0xf]  ;;  %v8647_v15 = vld [vmem:[%s16395_s3 + $0x198] sm:$0xf0] }
 0x16b   : > { %v8650_v26 = vor.u32 %v10462_v62, %v8647_v15 }
 0x16e   : > { %2309 = vmatpush.bf16.msra.mxu2 %v8654_v38 }
 0x178   : > { %1647 = vmatmul.bf16.gmra.mxu2 %v1440_v22  ;;  %1735 = vmatmul.bf16.gmra.mxu0 %v1440_v22  ;;  %v10478_v22 = vld [vmem:[%s16395_s3 + $0x214] sm:$0xf] }
 0x179   : > { %8493 = vmatmul.msk.bf16.gmra.mxu3 %vm1587_vm15, %v1441_v35  ;;  %8500 = vmatmul.msk.bf16.gmra.mxu1 %vm1587_vm15, %v1441_v35  ;;  %v8666_v35 = vor.u32 %v10466_v51, %v8663_v21  ;;  %v8714_v48 = vor.u32 %v10478_v22, %v8711_v36  ;;  %v8637_v36 = vld [vmem:[%s16395_s3 + $0x180] sm:$0xf] }
 0x17b   : > { %2396 = vmatpush.bf16.msra.mxu0 %v8666_v35  ;;  %2442 = vmatpush.bf16.msra.mxu1 %v8714_v48  ;;  %v10461_v48 = vld [vmem:[%s16395_s3 + $0x184] sm:$0xf0] }
 0x17f   : > { %2397 = vmatpush.bf16.msra.mxu0 %v8658_v54 }
 0x183   : > { %2398 = vmatpush.bf16.msra.mxu0 %v8650_v26 }
 0x188   : > { %1934 = vmatmul.bf16.vlgmr.msrb.gmra.mxu2 %v11606_v2  ;;  %2022 = vmatmul.bf16.vlgmr.msrb.gmra.mxu0 %v11606_v2 }
 0x189   : > { %8597 = vmatmul.msk.bf16.vlgmr.msrb.gmra.mxu3 %vm1587_vm15, %v11625_v33  ;;  %8604 = vmatmul.msk.bf16.vlgmr.msrb.gmra.mxu1 %vm1587_vm15, %v11625_v33 }
 0x195   : > { %v1706_v61 = vpop.f32.mrf.mxu0 }
 0x196   : > { %v1750_v28 = vpop.f32.mrf.mxu1 }
 0x197   : > { %v12094_v11 = vadd.f32 %v1750_v28, %v1706_v61 }
 0x198   : > { %1939 = vmatmul.bf16.gmra.mxu2 %v11648_v17  ;;  %2027 = vmatmul.bf16.gmra.mxu0 %v11648_v17 }
 0x199   : > { %8598 = vmatmul.msk.bf16.gmra.mxu3 %vm1587_vm15, %v11650_v24  ;;  %8605 = vmatmul.msk.bf16.gmra.mxu1 %vm1587_vm15, %v11650_v24 }
 0x19b   : > { %v1618_v14 = vpop.f32.mrf.mxu2 }
 0x19c   : > { %v1662_v19 = vpop.f32.mrf.mxu3 }
 0x19d   : > { %v12108_v37 = vadd.f32 %v1662_v19, %v1618_v14  ;;  %v1708_v6 = vpop.f32.mrf.mxu0  ;;  %v8646_v14 = vor.u32 %v10463_v9, %v8645_v4  ;;  %v10477_v19 = vld [vmem:[%s16395_s3 + $0x204] sm:$0xf0] }
 0x19e   : > { %v1752_v18 = vpop.f32.mrf.mxu1  ;;  %v8702_v57 = vor.u32 %v10477_v19, %v8701_v7 }
 0x19f   : > { %v12110_v13 = vadd.f32 %v1752_v18, %v1708_v6  ;;  %2310 = vmatpush.bf16.msra.mxu2 %v8646_v14 }
 0x1a0   : > { %2355 = vmatpush.bf16.msra.mxu3 %v8702_v57 }
 0x1a3   : > { %v1620_v56 = vpop.f32.mrf.mxu2 }
 0x1a4   : > { %v1664_v53 = vpop.f32.mrf.mxu3 }
 0x1a5   : > { %v12124_v32 = vadd.f32 %v1664_v53, %v1620_v56  ;;  %v1711_v5 = vpop.f32.mrf.mxu0  ;;  %v8703_v56 = vld [vmem:[%s16395_s3 + $0x208] sm:$0xf0] }
 0x1a6   : > { %v1755_v59 = vpop.f32.mrf.mxu1  ;;  %v8706_v53 = vor.u32 %v10476_v42, %v8703_v56 }
 0x1a7   : > { %v12126_v50 = vadd.f32 %v1755_v59, %v1711_v5 }
 0x1a8   : > { %1944 = vmatmul.bf16.gmra.mxu2 %v11715_v34  ;;  %2032 = vmatmul.bf16.gmra.mxu0 %v11715_v34 }
 0x1a9   : > { %8599 = vmatmul.msk.bf16.gmra.mxu3 %vm1587_vm15, %v11717_v41  ;;  %8606 = vmatmul.msk.bf16.gmra.mxu1 %vm1587_vm15, %v11717_v41 }
 0x1aa   : > { %2443 = vmatpush.bf16.msra.mxu1 %v8706_v53 }
 0x1ab   : > { %v1623_v40 = vpop.f32.mrf.mxu2 }
 0x1ac   : > { %v1667_v12 = vpop.f32.mrf.mxu3 }
 0x1ad   : > { %v12146_v58 = vadd.f32 %v1667_v12, %v1623_v40  ;;  %v1713_v55 = vpop.f32.mrf.mxu0  ;;  %v8638_v40 = vor.u32 %v10461_v48, %v8637_v36 }
 0x1ae   : > { %v1757_v49 = vpop.f32.mrf.mxu1 }
 0x1af   : > { %v12148_v27 = vadd.f32 %v1757_v49, %v1713_v55  ;;  %2311 = vmatpush.bf16.msra.mxu2 %v8638_v40  ;;  %v2103_v40 = vrot.slane %v11648_v17, 1 }
 0x1b3   : > { %v1625_v10 = vpop.f32.mrf.mxu2 }
 0x1b4   : > { %v1669_v46 = vpop.f32.mrf.mxu3 }
 0x1b5   : > { %v12156_v44 = vadd.f32 %v1669_v46, %v1625_v10  ;;  %v1716_v47 = vpop.f32.mrf.mxu0  ;;  %v10460_v10 = vld [vmem:[%s16395_s3 + $0x184] sm:$0xf]  ;;  %v8639_v46 = vld [vmem:[%s16395_s3 + $0x188] sm:$0xf0] }
 0x1b6   : > { %v1760_v8 = vpop.f32.mrf.mxu1  ;;  %v8642_v3 = vor.u32 %v10460_v10, %v8639_v46 }
 0x1b7   : > { %v12164_v30 = vadd.f32 %v1760_v8, %v1716_v47 }
 0x1b8   : > { %1949 = vmatmul.bf16.gmra.mxu2 %v11783_v1  ;;  %2037 = vmatmul.bf16.gmra.mxu0 %v11783_v1 }
 0x1b9   : > { %8600 = vmatmul.msk.bf16.gmra.mxu3 %vm1587_vm15, %v11785_v20  ;;  %8607 = vmatmul.msk.bf16.gmra.mxu1 %vm1587_vm15, %v11785_v20 }
 0x1ba   : > { %2399 = vmatpush.bf16.msra.mxu0 %v8642_v3 }
 0x1bb   : > { %v1628_v39 = vpop.f32.mrf.mxu2 }
 0x1bc   : > { %v1672_v61 = vpop.f32.mrf.mxu3 }
 0x1bd   : > { %v12172_v28 = vadd.f32 %v1672_v61, %v1628_v39  ;;  %v1718_v6 = vpop.f32.mrf.mxu0 }
 0x1be   : > { %v1762_v18 = vpop.f32.mrf.mxu1 }
 0x1bf   : > { %v12186_v63 = vadd.f32 %v1762_v18, %v1718_v6 }
 0x1c3   : > { %v1630_v5 = vpop.f32.mrf.mxu2 }
 0x1c4   : > { %v1674_v59 = vpop.f32.mrf.mxu3 }
 0x1c5   : > { %v12200_v51 = vadd.f32 %v1674_v59, %v1630_v5  ;;  %v1721_v21 = vpop.f32.mrf.mxu0 }
 0x1c6   : > { %v1765_v22 = vpop.f32.mrf.mxu1 }
 0x1c7   : > { %v12202_v35 = vadd.f32 %v1765_v22, %v1721_v21 }
 0x1c8   : > { %1954 = vmatmul.bf16.gmra.mxu2 %v11861_v60  ;;  %2042 = vmatmul.bf16.gmra.mxu0 %v11861_v60 }
 0x1c9   : > { %8601 = vmatmul.msk.bf16.gmra.mxu3 %vm1587_vm15, %v11863_v43  ;;  %8608 = vmatmul.msk.bf16.gmra.mxu1 %vm1587_vm15, %v11863_v43 }
 0x1cb   : > { %v1633_v12 = vpop.f32.mrf.mxu2 }
 0x1cc   : > { %v1677_v55 = vpop.f32.mrf.mxu3 }
 0x1cd   : > { %v12216_v49 = vadd.f32 %v1677_v55, %v1633_v12  ;;  %v1723_v0 = vpop.f32.mrf.mxu0  ;;  %v2106_v12 = vrot.slane %v11650_v24, 1 }
 0x1ce   : > { %v1767_v23 = vpop.f32.mrf.mxu1 }
 0x1cf   : > { %v12218_v38 = vadd.f32 %v1767_v23, %v1723_v0  ;;  %v2102_v0 = vrot.slane %v11606_v2, 1  ;;  %v2105_v23 = vrot.slane %v11625_v33, 1 }
 0x1d3   : > { %v1635_v45 = vpop.f32.mrf.mxu2 }
 0x1d4   : > { %v1679_v54 = vpop.f32.mrf.mxu3 }
 0x1d5   : > { %v12226_v47 = vadd.f32 %v1679_v54, %v1635_v45  ;;  %v1726_v8 = vpop.f32.mrf.mxu0  ;;  %v2104_v45 = vsel %vm823_vm5, %v2102_v0, %v2103_v40  ;;  %v2107_v54 = vsel %vm823_vm5, %v2105_v23, %v2106_v12 }
 0x1d6   : > { %v1770_v39 = vpop.f32.mrf.mxu1 }
 0x1d7   : > { %v12228_v61 = vadd.f32 %v1770_v39, %v1726_v8 }
 0x1d8   : > { %1959 = vmatmul.bf16.gmra.mxu2 %v11970_v29  ;;  %2047 = vmatmul.bf16.gmra.mxu0 %v11970_v29 }
 0x1d9   : > { %8602 = vmatmul.msk.bf16.gmra.mxu3 %vm1587_vm15, %v11972_v16  ;;  %8609 = vmatmul.msk.bf16.gmra.mxu1 %vm1587_vm15, %v11972_v16 }
 0x1db   : > { %v1638_v4 = vpop.f32.mrf.mxu2 }
 0x1dc   : > { %v1682_v9 = vpop.f32.mrf.mxu3 }
 0x1dd   : > { %v12236_v7 = vadd.f32 %v1682_v9, %v1638_v4  ;;  %v1728_v14 = vpop.f32.mrf.mxu0 }
 0x1de   : > { %v1772_v19 = vpop.f32.mrf.mxu1 }
 0x1df   : > { %v12238_v6 = vadd.f32 %v1772_v19, %v1728_v14  ;;  %v2108_v14 = vrot.slane %v11715_v34, 1  ;;  %v2110_v19 = vrot.slane %v11717_v41, 1 }
 0x1e3   : > { %v1640_v18 = vpop.f32.mrf.mxu2 }
 0x1e4   : > { %v1684_v57 = vpop.f32.mrf.mxu3 }
 0x1e5   : > { %v12240_v62 = vadd.f32 %v1684_v57, %v1640_v18  ;;  %v1731_v15 = vpop.f32.mrf.mxu0 }
 0x1e6   : > { %v1775_v42 = vpop.f32.mrf.mxu1 }
 0x1e7   : > { %v12242_v26 = vadd.f32 %v1775_v42, %v1731_v15 }
 0x1e8   : > { %1964 = vmatmul.bf16.gmra.mxu2 %v12002_v52  ;;  %2052 = vmatmul.bf16.gmra.mxu0 %v12002_v52 }
 0x1e9   : > { %8603 = vmatmul.msk.bf16.gmra.mxu3 %vm1587_vm15, %v12004_v25  ;;  %8610 = vmatmul.msk.bf16.gmra.mxu1 %vm1587_vm15, %v12004_v25 }
 0x1eb   : > { %v1643_v56 = vpop.f32.mrf.mxu2 }
 0x1ec   : > { %v1687_v53 = vpop.f32.mrf.mxu3 }
 0x1ed   : > { %v12250_v5 = vadd.f32 %v1687_v53, %v1643_v56  ;;  %v1733_v59 = vpop.f32.mrf.mxu0  ;;  %v2109_v56 = vsel %vm823_vm5, %v2103_v40, %v2108_v14  ;;  %v2111_v53 = vsel %vm823_vm5, %v2106_v12, %v2110_v19 }
 0x1ee   : > { %v1777_v21 = vpop.f32.mrf.mxu1 }
 0x1ef   : > { %v12252_v22 = vadd.f32 %v1777_v21, %v1733_v59 }
 0x1f3   : > { %v1645_v36 = vpop.f32.mrf.mxu2 }
 0x1f4   : > { %v1689_v48 = vpop.f32.mrf.mxu3 }
 0x1f5   : > { %v12256_v55 = vadd.f32 %v1689_v48, %v1645_v36  ;;  %v1736_v10 = vpop.f32.mrf.mxu0 }
 0x1f6   : > { %v1780_v46 = vpop.f32.mrf.mxu1 }
 0x1f7   : > { %v12260_v3 = vadd.f32 %v1780_v46, %v1736_v10  ;;  %v2112_v10 = vrot.slane %v11783_v1, 1  ;;  %v2114_v46 = vrot.slane %v11785_v20, 1 }
 0x1f8   : > { %2312 = vmatmul.bf16.vlgmr.msra.gmra.mxu2 %v2104_v45  ;;  %2400 = vmatmul.bf16.vlgmr.msra.gmra.mxu0 %v2104_v45 }
 0x1f9   : > { %8732 = vmatmul.msk.bf16.vlgmr.msra.gmra.mxu3 %vm1587_vm15, %v2107_v54  ;;  %8740 = vmatmul.msk.bf16.vlgmr.msra.gmra.mxu1 %vm1587_vm15, %v2107_v54 }
 0x1fb   : > { %v1648_v17 = vpop.f32.mrf.mxu2 }
 0x1fc   : > { %v1692_v24 = vpop.f32.mrf.mxu3 }
 0x1fd   : > { %v12266_v8 = vadd.f32 %v1692_v24, %v1648_v17  ;;  %v1738_v2 = vpop.f32.mrf.mxu0 }
 0x1fe   : > { %v1782_v33 = vpop.f32.mrf.mxu1 }
 0x1ff   : > { %v12268_v39 = vadd.f32 %v1782_v33, %v1738_v2  ;;  %v2113_v2 = vsel %vm823_vm5, %v2108_v14, %v2112_v10 }
 0x203   : > { %v1650_v4 = vpop.f32.mrf.mxu2 }
 0x204   : > { %v1694_v9 = vpop.f32.mrf.mxu3 }
 0x205   : > { %v12272_v18 = vadd.f32 %v1694_v9, %v1650_v4  ;;  %v2023_v57 = vpop.f32.mrf.mxu0 }
 0x206   : > { %v2067_v15 = vpop.f32.mrf.mxu1  ;;  %v2024_v42 = vadd.f32 %v2023_v57, %v12094_v11 }
 0x208   : > { %2317 = vmatmul.bf16.gmra.mxu2 %v2109_v56  ;;  %v12278_v59 = vadd.f32 %v2067_v15, %v2024_v42  ;;  %2405 = vmatmul.bf16.gmra.mxu0 %v2109_v56  ;;  %v2116_v42 = vrot.slane %v11861_v60, 1  ;;  %v2118_v56 = vrot.slane %v11863_v43, 1  ;;  %v8869_v60 = vld [vmem:[%s16397_s5 + $0x130] sm:$0xf] }
 0x209   : > { %8733 = vmatmul.msk.bf16.gmra.mxu3 %vm1587_vm15, %v2111_v53  ;;  %8741 = vmatmul.msk.bf16.gmra.mxu1 %vm1587_vm15, %v2111_v53 }
 0x20b   : > { %v1935_v34 = vpop.f32.mrf.mxu2 }
 0x20c   : > { %v1979_v41 = vpop.f32.mrf.mxu3  ;;  %v1936_v21 = vadd.f32 %v1935_v34, %v12108_v37 }
 0x20d   : > { %v2025_v48 = vpop.f32.mrf.mxu0 }
 0x20e   : > { %v12282_v36 = vadd.f32 %v1979_v41, %v1936_v21  ;;  %v2069_v11 = vpop.f32.mrf.mxu1  ;;  %v2026_v40 = vadd.f32 %v2025_v48, %v12110_v13  ;;  %v2115_v13 = vsel %vm823_vm5, %v2110_v19, %v2114_v46  ;;  %v8853_v21 = vld [vmem:[%s16397_s5 + $0x110] sm:$0xf]  ;;  %v2119_v48 = vsel %vm823_vm5, %v2114_v46, %v2118_v56  ;;  %v10522_v46 = vld [vmem:[%s16397_s5 + $0x134] sm:$0xf] }
 0x210   : > { %v12285_v0 = vadd.f32 %v2069_v11, %v2026_v40  ;;  %v10523_v40 = vld [vmem:[%s16397_s5 + $0x134] sm:$0xf0] }
 0x213   : > { %v1937_v12 = vpop.f32.mrf.mxu2 }
 0x214   : > { %v1981_v23 = vpop.f32.mrf.mxu3  ;;  %v1938_v45 = vadd.f32 %v1937_v12, %v12124_v32  ;;  %v8870_v12 = vor.u32 %v10523_v40, %v8869_v60 }
 0x215   : > { %v2028_v17 = vpop.f32.mrf.mxu0 }
 0x216   : > { %v12290_v54 = vadd.f32 %v1981_v23, %v1938_v45  ;;  %v2072_v37 = vpop.f32.mrf.mxu1  ;;  %v2029_v24 = vadd.f32 %v2028_v17, %v12126_v50  ;;  %3113 = vmatpush.bf16.msrb.mxu3 %v8870_v12  ;;  %v8871_v17 = vld [vmem:[%s16397_s5 + $0x138] sm:$0xf0]  ;;  %v8837_v12 = vld [vmem:[%s16397_s5 + $0xf0] sm:$0xf] }
 0x218   : > { %2322 = vmatmul.bf16.gmra.mxu2 %v2113_v2  ;;  %v12296_v33 = vadd.f32 %v2072_v37, %v2029_v24  ;;  %2410 = vmatmul.bf16.gmra.mxu0 %v2113_v2  ;;  %v8874_v2 = vor.u32 %v10522_v46, %v8871_v17  ;;  %v2126_v17 = vrot.slane %v12004_v25, 1  ;;  %v8839_v25 = vld [vmem:[%s16397_s5 + $0xf8] sm:$0xf0] }
 0x219   : > { %8734 = vmatmul.msk.bf16.gmra.mxu3 %vm1587_vm15, %v2115_v13  ;;  %8742 = vmatmul.msk.bf16.gmra.mxu1 %vm1587_vm15, %v2115_v13 }
 0x21a   : > { %3201 = vmatpush.bf16.msrb.mxu1 %v8874_v2 }
 0x21b   : > { %v1940_v1 = vpop.f32.mrf.mxu2 }
 0x21c   : > { %v1984_v20 = vpop.f32.mrf.mxu3  ;;  %v1941_v32 = vadd.f32 %v1940_v1, %v12146_v58 }
 0x21d   : > { %v2030_v9 = vpop.f32.mrf.mxu0 }
 0x21e   : > { %v12300_v4 = vadd.f32 %v1984_v20, %v1941_v32  ;;  %v2074_v50 = vpop.f32.mrf.mxu1  ;;  %v2031_v14 = vadd.f32 %v2030_v9, %v12148_v27  ;;  %v10519_v27 = vld [vmem:[%s16397_s5 + $0x114] sm:$0xf0]  ;;  %v8845_v9 = vld [vmem:[%s16397_s5 + $0x100] sm:$0xf] }
 0x21f   : > { %v8854_v11 = vor.u32 %v10519_v27, %v8853_v21 }
 0x220   : > { %v12303_v57 = vadd.f32 %v2074_v50, %v2031_v14  ;;  %v10517_v50 = vld [vmem:[%s16397_s5 + $0x104] sm:$0xf0] }
 0x221   : > { %3063 = vmatpush.bf16.msrb.mxu2 %v8854_v11  ;;  %v8846_v14 = vor.u32 %v10517_v50, %v8845_v9 }
 0x223   : > { %v1942_v19 = vpop.f32.mrf.mxu2 }
 0x224   : > { %v1986_v15 = vpop.f32.mrf.mxu3  ;;  %v1943_v53 = vadd.f32 %v1942_v19, %v12156_v44  ;;  %v2117_v44 = vsel %vm823_vm5, %v2112_v10, %v2116_v42  ;;  %v8855_v10 = vld [vmem:[%s16397_s5 + $0x118] sm:$0xf0] }
 0x225   : > { %v2033_v41 = vpop.f32.mrf.mxu0  ;;  %3064 = vmatpush.bf16.msrb.mxu2 %v8846_v14 }
 0x226   : > { %v12308_v34 = vadd.f32 %v1986_v15, %v1943_v53  ;;  %v2077_v58 = vpop.f32.mrf.mxu1  ;;  %v2034_v43 = vadd.f32 %v2033_v41, %v12164_v30  ;;  %v10518_v30 = vld [vmem:[%s16397_s5 + $0x114] sm:$0xf]  ;;  %v2120_v15 = vrot.slane %v11970_v29, 1  ;;  %v2122_v53 = vrot.slane %v11972_v16, 1  ;;  %v10516_v29 = vld [vmem:[%s16397_s5 + $0x104] sm:$0xf] }
 0x227   : > { %v8858_v45 = vor.u32 %v10518_v30, %v8855_v10  ;;  %v8847_v16 = vld [vmem:[%s16397_s5 + $0x108] sm:$0xf0]  ;;  %v10515_v30 = vld [vmem:[%s16397_s5 + $0xf4] sm:$0xf0] }
 0x228   : > { %2327 = vmatmul.bf16.gmra.mxu2 %v2117_v44  ;;  %v12326_v23 = vadd.f32 %v2077_v58, %v2034_v43  ;;  %2415 = vmatmul.bf16.gmra.mxu0 %v2117_v44  ;;  %v2121_v27 = vsel %vm823_vm5, %v2116_v42, %v2120_v15  ;;  %v2123_v60 = vsel %vm823_vm5, %v2118_v56, %v2122_v53 }
 0x229   : > { %8735 = vmatmul.msk.bf16.gmra.mxu3 %vm1587_vm15, %v2119_v48  ;;  %8743 = vmatmul.msk.bf16.gmra.mxu1 %vm1587_vm15, %v2119_v48  ;;  %v8838_v10 = vor.u32 %v10515_v30, %v8837_v12  ;;  %v2127_v9 = vsel %vm823_vm5, %v2122_v53, %v2126_v17  ;;  %v2138_v30 = vsel %vm823_vm5, %v2126_v17, 0 }
 0x22a   : > { %3151 = vmatpush.bf16.msrb.mxu0 %v8858_v45 }
 0x22b   : > { %v1945_v37 = vpop.f32.mrf.mxu2  ;;  %3065 = vmatpush.bf16.msrb.mxu2 %v8838_v10 }
 0x22c   : > { %v1989_v24 = vpop.f32.mrf.mxu3  ;;  %v1946_v13 = vadd.f32 %v1945_v37, %v12172_v28 }
 0x22d   : > { %v12344_v20 = vpop.f32.mrf.mxu0 }
 0x22e   : > { %v12342_v1 = vadd.f32 %v1989_v24, %v1946_v13  ;;  %v12346_v32 = vpop.f32.mrf.mxu1 }
 0x233   : > { %v12354_v19 = vpop.f32.mrf.mxu2 }
 0x234   : > { %v12356_v28 = vpop.f32.mrf.mxu3 }
 0x235   : > { %v2038_v41 = vpop.f32.mrf.mxu0 }
 0x236   : > { %v2082_v58 = vpop.f32.mrf.mxu1  ;;  %v2039_v21 = vadd.f32 %v2038_v41, %v12202_v35  ;;  %v8850_v35 = vor.u32 %v10516_v29, %v8847_v16 }
 0x238   : > { %2332 = vmatmul.bf16.gmra.mxu2 %v2121_v27  ;;  %v12364_v43 = vadd.f32 %v2082_v58, %v2039_v21  ;;  %2420 = vmatmul.bf16.gmra.mxu0 %v2121_v27  ;;  %v8829_v27 = vld [vmem:[%s16397_s5 + $0xe0] sm:$0xf] }
 0x239   : > { %8736 = vmatmul.msk.bf16.gmra.mxu3 %vm1587_vm15, %v2123_v60  ;;  %8744 = vmatmul.msk.bf16.gmra.mxu1 %vm1587_vm15, %v2123_v60  ;;  %v10513_v60 = vld [vmem:[%s16397_s5 + $0xe4] sm:$0xf0] }
 0x23a   : > { %3152 = vmatpush.bf16.msrb.mxu0 %v8850_v35  ;;  %v8830_v29 = vor.u32 %v10513_v60, %v8829_v27 }
 0x23b   : > { %v1950_v42 = vpop.f32.mrf.mxu2 }
 0x23c   : > { %v1994_v44 = vpop.f32.mrf.mxu3  ;;  %v1951_v56 = vadd.f32 %v1950_v42, %v12216_v49  ;;  %v2124_v49 = vrot.slane %v12002_v52, 1  ;;  %v10514_v52 = vld [vmem:[%s16397_s5 + $0xf4] sm:$0xf]  ;;  %3066 = vmatpush.bf16.msrb.mxu2 %v8830_v29 }
 0x23d   : > { %v12376_v11 = vpop.f32.mrf.mxu0 }
 0x23e   : > { %v12374_v48 = vadd.f32 %v1994_v44, %v1951_v56  ;;  %v12378_v40 = vpop.f32.mrf.mxu1  ;;  %v2125_v13 = vsel %vm823_vm5, %v2120_v15, %v2124_v49  ;;  %v10512_v44 = vld [vmem:[%s16397_s5 + $0xe4] sm:$0xf]  ;;  %v8831_v56 = vld [vmem:[%s16397_s5 + $0xe8] sm:$0xf0] }
 0x23f   : > { %v8834_v10 = vor.u32 %v10512_v44, %v8831_v56  ;;  %v8861_v44 = vld [vmem:[%s16397_s5 + $0x120] sm:$0xf] }
 0x243   : > { %v12386_v46 = vpop.f32.mrf.mxu2 }
 0x244   : > { %v12388_v45 = vpop.f32.mrf.mxu3 }
 0x245   : > { %v2043_v37 = vpop.f32.mrf.mxu0 }
 0x246   : > { %v2087_v24 = vpop.f32.mrf.mxu1  ;;  %v2044_v2 = vadd.f32 %v2043_v37, %v12228_v61  ;;  %v8842_v61 = vor.u32 %v10514_v52, %v8839_v25 }
 0x248   : > { %2337 = vmatmul.bf16.gmra.mxu2 %v2125_v13  ;;  %v12396_v50 = vadd.f32 %v2087_v24, %v2044_v2  ;;  %2425 = vmatmul.bf16.gmra.mxu0 %v2125_v13 }
 0x249   : > { %8737 = vmatmul.msk.bf16.gmra.mxu3 %vm1587_vm15, %v2127_v9  ;;  %8745 = vmatmul.msk.bf16.gmra.mxu1 %vm1587_vm15, %v2127_v9 }
 0x24a   : > { %3153 = vmatpush.bf16.msrb.mxu0 %v8842_v61 }
 0x24b   : > { %v1955_v14 = vpop.f32.mrf.mxu2 }
 0x24c   : > { %v1999_v15 = vpop.f32.mrf.mxu3  ;;  %v1956_v53 = vadd.f32 %v1955_v14, %v12236_v7 }
 0x24d   : > { %v12408_v58 = vpop.f32.mrf.mxu0 }
 0x24e   : > { %v12406_v41 = vadd.f32 %v1999_v15, %v1956_v53  ;;  %v12410_v21 = vpop.f32.mrf.mxu1  ;;  %3154 = vmatpush.bf16.msrb.mxu0 %v8834_v10  ;;  %v10510_v10 = vld [vmem:[%s16397_s5 + $0xd4] sm:$0xf] }
 0x253   : > { %v12418_v16 = vpop.f32.mrf.mxu2 }
 0x254   : > { %v12420_v35 = vpop.f32.mrf.mxu3 }
 0x255   : > { %v2048_v7 = vpop.f32.mrf.mxu0 }
 0x256   : > { %v2092_v42 = vpop.f32.mrf.mxu1  ;;  %v2049_v12 = vadd.f32 %v2048_v7, %v12242_v26 }
 0x258   : > { %8731 = vmatmul.msk.bf16.gmra.mxu2 %vm823_vm5, %v2124_v49  ;;  %v12432_v37 = vadd.f32 %v2092_v42, %v2049_v12  ;;  %8739 = vmatmul.msk.bf16.gmra.mxu0 %vm823_vm5, %v2124_v49  ;;  %v8821_v42 = vld [vmem:[%s16397_s5 + $0xd0] sm:$0xf] }
 0x259   : > { %8738 = vmatmul.msk.bf16.gmra.mxu3 %vm1587_vm15, %v2138_v30  ;;  %8746 = vmatmul.msk.bf16.gmra.mxu1 %vm1587_vm15, %v2138_v30  ;;  %v10521_v30 = vld [vmem:[%s16397_s5 + $0x124] sm:$0xf0] }
 0x25b   : > { %v1960_v24 = vpop.f32.mrf.mxu2 }
 0x25c   : > { %v2004_v2 = vpop.f32.mrf.mxu3  ;;  %v1961_v13 = vadd.f32 %v1960_v24, %v12250_v5  ;;  %v8823_v24 = vld [vmem:[%s16397_s5 + $0xd8] sm:$0xf0] }
 0x25d   : > { %v12439_v26 = vpop.f32.mrf.mxu0 }
 0x25e   : > { %v12437_v9 = vadd.f32 %v2004_v2, %v1961_v13  ;;  %v12441_v17 = vpop.f32.mrf.mxu1  ;;  %v2508_v2 = vld [vmem:[%s16396_s4] sm:$0x3]  ;;  %v8862_v13 = vor.u32 %v10521_v30, %v8861_v44 }
 0x260   : > { %3114 = vmatpush.bf16.msrb.mxu3 %v8862_v13  ;;  %v10509_v13 = vld [vmem:[%s16397_s5 + $0xc4] sm:$0xf0] }
 0x263   : > { %v12443_v52 = vpop.f32.mrf.mxu2 }
 0x264   : > { %v12445_v25 = vpop.f32.mrf.mxu3 }
 0x265   : > { %v2053_v61 = vpop.f32.mrf.mxu0 }
 0x266   : > { %v2097_v14 = vpop.f32.mrf.mxu1  ;;  %v2054_v49 = vadd.f32 %v2053_v61, %v12260_v3  ;;  %v10511_v3 = vld [vmem:[%s16397_s5 + $0xd4] sm:$0xf0]  ;;  %v8826_v61 = vor.u32 %v10510_v10, %v8823_v24 }
 0x267   : > { %v8822_v12 = vor.u32 %v10511_v3, %v8821_v42  ;;  %v12488_v3 = vperm.slane %v2508_v2, 1 }
 0x268   : > { %v12448_v15 = vadd.f32 %v2097_v14, %v2054_v49  ;;  %v10520_v14 = vld [vmem:[%s16397_s5 + $0x124] sm:$0xf]  ;;  %v8863_v49 = vld [vmem:[%s16397_s5 + $0x128] sm:$0xf0]  ;;  %3155 = vmatpush.bf16.msrb.mxu0 %v8826_v61 }
 0x269   : > { %3067 = vmatpush.bf16.msrb.mxu2 %v8822_v12  ;;  %v8813_v12 = vld [vmem:[%s16397_s5 + $0xc0] sm:$0xf] }
 0x26a   : > { %16431 = vst [vmem:[#allocation3_spill] sm:$0xff] %v12448_v15 }
 0x26b   : > { %v1965_v53 = vpop.f32.mrf.mxu2 }
 0x26c   : > { %v2009_v27 = vpop.f32.mrf.mxu3  ;;  %v1966_v5 = vadd.f32 %v1965_v53, %v12266_v8  ;;  %v8866_v53 = vor.u32 %v10520_v14, %v8863_v49  ;;  %v8814_v14 = vor.u32 %v10509_v13, %v8813_v12 }
 0x26d   : > { %v12453_v29 = vpop.f32.mrf.mxu0 }
 0x26e   : > { %v12451_v60 = vadd.f32 %v2009_v27, %v1966_v5  ;;  %v12455_v7 = vpop.f32.mrf.mxu1  ;;  %3202 = vmatpush.bf16.msrb.mxu1 %v8866_v53  ;;  %3068 = vmatpush.bf16.msrb.mxu2 %v8814_v14 }
 0x26f   : > { %16433 = vst [vmem:[#allocation5_spill] sm:$0xff] %v12455_v7 }
 0x270   : > { %16432 = vst [vmem:[#allocation4_spill] sm:$0xff] %v12451_v60  ;;  %v12492_v60 = vperm.slane %v2508_v2, 0 }
 0x273   : > { %v12466_v56 = vpop.f32.mrf.mxu2 }
 0x274   : > { %v12468_v8 = vpop.f32.mrf.mxu3 }
 0x275   : > { %16434 = vst [vmem:[#allocation6_spill] sm:$0xff] %v12468_v8  ;;  %v2401_v27 = vpop.f32.mrf.mxu0 }
 0x276   : > { %v2445_v5 = vpop.f32.mrf.mxu1 }
 0x277   : > { %v2446_v42 = vadd.f32 %v2445_v5, %v2401_v27 }
 0x279   : > { %v2481_v44 = vadd.f32 %v2446_v42, %v12278_v59 }
 0x27b   : > { %v2515_v30 = vadd.f32 %v12488_v3, %v2481_v44  ;;  %v2313_v10 = vpop.f32.mrf.mxu2 }
 0x27c   : > { %v2357_v24 = vpop.f32.mrf.mxu3 }
 0x27d   : > { %v2358_v31 = vadd.f32 %v2357_v24, %v2313_v10  ;;  %v2571_v61 = vmin.f32 %v2515_v30, 0.0  ;;  %v2403_v59 = vpop.f32.mrf.mxu0  ;;  %vm2543_vm12 = vcmp.gt.f32.partialorder %v2515_v30, 0.0 }
 0x27e   : > { %v2447_v53 = vpop.f32.mrf.mxu1 }
 0x27f   : > { %v2480_v49 = vadd.f32 %v2358_v31, %v12282_v36  ;;  %v2600_v27 = vmul.f32 1.442695, %v2571_v61  ;;  %v2448_v5 = vadd.f32 %v2447_v53, %v2403_v59  ;;  %v10508_v31 = vld [vmem:[%s16397_s5 + $0xc4] sm:$0xf]  ;;  %v8815_v36 = vld [vmem:[%s16397_s5 + $0xc8] sm:$0xf0] }
 0x280   : > { %v8818_v61 = vor.u32 %v10508_v31, %v8815_v36 }
 0x281   : > { %v2514_v2 = vadd.f32 %v12492_v60, %v2480_v49  ;;  %10856 = vpow2.f32 %v2600_v27  ;;  %v2483_v42 = vadd.f32 %v2448_v5, %v12285_v0 }
 0x282   : > { %3156 = vmatpush.bf16.msrb.mxu0 %v8818_v61 }
 0x283   : > { %v2570_v44 = vmin.f32 %v2514_v2, 0.0  ;;  %v12504_v10 = vadd.f32 %v12488_v3, %v2483_v42  ;;  %v2315_v24 = vpop.f32.mrf.mxu2  ;;  %vm2542_vm13 = vcmp.gt.f32.partialorder %v2514_v2, 0.0 }
 0x284   : > { %v2359_v15 = vpop.f32.mrf.mxu3 }
 0x285   : > { %v2598_v12 = vmul.f32 1.442695, %v2570_v44  ;;  %v2360_v13 = vadd.f32 %v2359_v15, %v2315_v24  ;;  %v2573_v14 = vmin.f32 %v12504_v10, 0.0  ;;  %v2406_v49 = vpop.f32.mrf.mxu0  ;;  %vm2545_vm14 = vcmp.gt.f32.partialorder %v12504_v10, 0.0 }
 0x286   : > { %v2450_v59 = vpop.f32.mrf.mxu1 }
 0x287   : > { %10858 = vpow2.f32 %v2598_v12  ;;  %v2482_v0 = vadd.f32 %v2360_v13, %v12290_v54  ;;  %v10857_v53 = vpop.eup %10856  ;;  %v2604_v27 = vmul.f32 1.442695, %v2573_v14  ;;  %v2451_v5 = vadd.f32 %v2450_v59, %v2406_v49  ;;  %v8805_v14 = vld [vmem:[%s16397_s5 + $0xb0] sm:$0xf]  ;;  %v10507_v59 = vld [vmem:[%s16397_s5 + $0xb4] sm:$0xf0] }
 0x288   : > { %v8748_v7 = vadd.f32 -1.0, %v10857_v53 }
 0x289   : > { %v2516_v42 = vadd.f32 %v12492_v60, %v2482_v0  ;;  %10860 = vpow2.f32 %v2604_v27  ;;  %v2485_v8 = vadd.f32 %v2451_v5, %v12296_v33 }
 0x28a   : > { %v2683_v0 = vsel %vm2543_vm12, %v2515_v30, %v8748_v7 }
 0x28b   : > { %v2572_v44 = vmin.f32 %v2516_v42, 0.0  ;;  %v12517_v15 = vadd.f32 %v12488_v3, %v2485_v8  ;;  %v2318_v24 = vpop.f32.mrf.mxu2  ;;  %vm2544_vm2 = vcmp.gt.f32.partialorder %v2516_v42, 0.0 }
 0x28c   : > { %v2362_v31 = vpop.f32.mrf.mxu3 }
 0x28d   : > { %v10859_v36 = vpop.eup %10858  ;;  %v2602_v54 = vmul.f32 1.442695, %v2572_v44  ;;  %v2363_v12 = vadd.f32 %v2362_v31, %v2318_v24  ;;  %v2575_v61 = vmin.f32 %v12517_v15, 0.0  ;;  %v2408_v8 = vpop.f32.mrf.mxu0  ;;  %v8806_v24 = vor.u32 %v10507_v59, %v8805_v14 }
 0x28e   : > { %v8747_v13 = vadd.f32 -1.0, %v10859_v36  ;;  %v2452_v49 = vpop.f32.mrf.mxu1  ;;  %vm2547_vm3 = vcmp.gt.f32.partialorder %v12517_v15, 0.0 }
 0x28f   : > { %10862 = vpow2.f32 %v2602_v54  ;;  %v2484_v33 = vadd.f32 %v2363_v12, %v12300_v4  ;;  %v10861_v53 = vpop.eup %10860  ;;  %v2608_v5 = vmul.f32 1.442695, %v2575_v61  ;;  %v2453_v44 = vadd.f32 %v2452_v49, %v2408_v8  ;;  %3069 = vmatpush.bf16.msrb.mxu2 %v8806_v24  ;;  %v10506_v4 = vld [vmem:[%s16397_s5 + $0xb4] sm:$0xf]  ;;  %v8807_v54 = vld [vmem:[%s16397_s5 + $0xb8] sm:$0xf0] }
 0x290   : > { %v2682_v27 = vsel %vm2542_vm13, %v2514_v2, %v8747_v13  ;;  %v8750_v30 = vadd.f32 -1.0, %v10861_v53  ;;  %v8810_v14 = vor.u32 %v10506_v4, %v8807_v54 }
 0x291   : > { %v2710_v31 = vpack.c.bf16 %v2683_v0, %v2682_v27  ;;  %v12528_v36 = vadd.f32 %v12492_v60, %v2484_v33  ;;  %v2487_v7 = vadd.f32 %v2453_v44, %v12303_v57  ;;  %10864 = vpow2.f32 %v2608_v5 }
 0x292   : > { %3157 = vmatpush.bf16.msrb.mxu0 %v8810_v14  ;;  %v2685_v59 = vsel %vm2545_vm14, %v12504_v10, %v8750_v30  ;;  %v10504_v30 = vld [vmem:[%s16397_s5 + $0xa4] sm:$0xf] }
 0x293   : > { %v2574_v2 = vmin.f32 %v12528_v36, 0.0  ;;  %v12539_v12 = vadd.f32 %v12488_v3, %v2487_v7  ;;  %v2320_v13 = vpop.f32.mrf.mxu2  ;;  %v2759_v14 = vunpack.c.h.b16 %v2710_v31  ;;  %vm2546_vm6 = vcmp.gt.f32.partialorder %v12528_v36, 0.0 }
 0x294   : > { %v2364_v61 = vpop.f32.mrf.mxu3 }
 0x295   : > { %v10863_v57 = vpop.eup %10862  ;;  %v2365_v0 = vadd.f32 %v2364_v61, %v2320_v13  ;;  %v2606_v8 = vmul.f32 1.442695, %v2574_v2  ;;  %v2577_v49 = vmin.f32 %v12539_v12, 0.0  ;;  %v2411_v27 = vpop.f32.mrf.mxu0  ;;  %v2036_v2 = vadd.f32 %v12344_v20, %v12186_v63  ;;  %v8799_v63 = vld [vmem:[%s16397_s5 + $0xa8] sm:$0xf0] }
 0x296   : > { %v8749_v33 = vadd.f32 -1.0, %v10863_v57  ;;  %v2455_v5 = vpop.f32.mrf.mxu1  ;;  %v2758_v61 = vunpack.c.l.b16 %v2710_v31  ;;  %vm2549_vm7 = vcmp.gt.f32.partialorder %v12539_v12, 0.0 }
 0x297   : > { %v2486_v53 = vadd.f32 %v2365_v0, %v12308_v34  ;;  %10866 = vpow2.f32 %v2606_v8  ;;  %v2612_v24 = vmul.f32 1.442695, %v2577_v49  ;;  %v2456_v7 = vadd.f32 %v2455_v5, %v2411_v27  ;;  %v10865_v13 = vpop.eup %10864  ;;  %v8797_v34 = vld [vmem:[%s16397_s5 + $0xa0] sm:$0xf] }
 0x298   : > { %v2684_v44 = vsel %vm2544_vm2, %v2516_v42, %v8749_v33  ;;  %v10505_v42 = vld [vmem:[%s16397_s5 + $0xa4] sm:$0xf0]  ;;  %v8752_v31 = vadd.f32 -1.0, %v10865_v13 }
 0x299   : > { %v2711_v4 = vpack.c.bf16 %v2685_v59, %v2684_v44  ;;  %v12546_v54 = vadd.f32 %v12492_v60, %v2486_v53  ;;  %v2489_v10 = vadd.f32 %v2456_v7, %v12326_v23  ;;  %10868 = vpow2.f32 %v2612_v24 }
 0x29a   : > { %v8798_v49 = vor.u32 %v10505_v42, %v8797_v34  ;;  %v8802_v59 = vor.u32 %v10504_v30, %v8799_v63  ;;  %v2080_v24 = vadd.f32 %v12346_v32, %v2036_v2  ;;  %v1948_v7 = vadd.f32 %v12354_v19, %v12200_v51 }
 0x29b   : > { %v2760_v57 = vunpack.c.l.b16 %v2711_v4  ;;  %v2761_v0 = vunpack.c.h.b16 %v2711_v4  ;;  %v2576_v23 = vmin.f32 %v12546_v54, 0.0  ;;  %v12565_v20 = vadd.f32 %v12488_v3, %v2489_v10  ;;  %v2323_v33 = vpop.f32.mrf.mxu2 }
 0x29c   : > { %v2367_v8 = vpop.f32.mrf.mxu3  ;;  %3070 = vmatpush.bf16.msrb.mxu2 %v8798_v49  ;;  %3158 = vmatpush.bf16.msrb.mxu0 %v8802_v59  ;;  %v2041_v34 = vadd.f32 %v12376_v11, %v12218_v38  ;;  %v2687_v2 = vsel %vm2547_vm3, %v12517_v15, %v8752_v31  ;;  %vm2548_vm8 = vcmp.gt.f32.partialorder %v12546_v54, 0.0 }
 0x29d   : > { %v12567_v53 = vpack.c.b16 %v2760_v57, %v2758_v61  ;;  %v12569_v27 = vpack.c.b16 %v2761_v0, %v2759_v14  ;;  %v2368_v5 = vadd.f32 %v2367_v8, %v2323_v33  ;;  %v10867_v44 = vpop.eup %10866  ;;  %v2610_v4 = vmul.f32 1.442695, %v2576_v23  ;;  %v2413_v42 = vpop.f32.mrf.mxu0 }
 0x29e   : > { %v2579_v10 = vmin.f32 %v12565_v20, 0.0  ;;  %v8751_v61 = vadd.f32 -1.0, %v10867_v44  ;;  %v2457_v30 = vpop.f32.mrf.mxu1  ;;  %v1992_v0 = vadd.f32 %v12356_v28, %v1948_v7  ;;  %v12588_v63 = vadd.f32 %v12378_v40, %v2041_v34 }
 0x29f   : > { %v2488_v13 = vadd.f32 %v2368_v5, %v12342_v1  ;;  %10870 = vpow2.f32 %v2610_v4  ;;  %v2458_v51 = vadd.f32 %v2457_v30, %v2413_v42  ;;  %v10869_v19 = vpop.eup %10868  ;;  %v1953_v23 = vadd.f32 %v12386_v46, %v12226_v47 }
 0x2a0   : > { %v2616_v32 = vmul.f32 1.442695, %v2579_v10  ;;  %v2686_v14 = vsel %vm2546_vm6, %v12528_v36, %v8751_v61  ;;  %v8754_v8 = vadd.f32 -1.0, %v10869_v19  ;;  %v2803_v31 = vshll.u32 %v12567_v53, 16 }
 0x2a1   : > { %v12583_v57 = vadd.f32 %v12492_v60, %v2488_v13  ;;  %v2712_v38 = vpack.c.bf16 %v2687_v2, %v2686_v14  ;;  %v2491_v11 = vadd.f32 %v2458_v51, %v2080_v24  ;;  %vm2551_vm9 = vcmp.gt.f32.partialorder %v12565_v20, 0.0 }
 0x2a2   : > { %10872 = vpow2.f32 %v2616_v32  ;;  %v2801_v24 = vshrl.u32 %v12567_v53, 16  ;;  %v2813_v34 = vshrl.u32 %v12569_v27, 16  ;;  %v2815_v61 = vshll.u32 %v12569_v27, 16 }
 0x2a3   : > { %v2578_v1 = vmin.f32 %v12583_v57, 0.0  ;;  %v12593_v15 = vadd.f32 %v12488_v3, %v2491_v11  ;;  %v2325_v36 = vpop.f32.mrf.mxu2  ;;  %v2689_v13 = vsel %vm2549_vm7, %v12539_v12, %v8754_v8  ;;  %v2805_v32 = vrot.slane %v2803_v31, 1 }
 0x2a4   : > { %v2369_v33 = vpop.f32.mrf.mxu3  ;;  %v2762_v14 = vunpack.c.l.b16 %v2712_v38  ;;  %v2763_v11 = vunpack.c.h.b16 %v2712_v38  ;;  %vm2550_vm10 = vcmp.gt.f32.partialorder %v12583_v57, 0.0  ;;  %v2817_v8 = vrot.slane %v2815_v61, 1 }
 0x2a5   : > { %v2614_v49 = vmul.f32 1.442695, %v2578_v1  ;;  %v2370_v59 = vadd.f32 %v2369_v33, %v2325_v36  ;;  %v10871_v5 = vpop.eup %10870  ;;  %v2581_v28 = vmin.f32 %v12593_v15, 0.0  ;;  %v2416_v46 = vpop.f32.mrf.mxu0  ;;  %vm2553_vm12 = vcmp.gt.f32.partialorder %v12593_v15, 0.0 }
 0x2a6   : > { %v8753_v47 = vadd.f32 -1.0, %v10871_v5  ;;  %v2460_v44 = vpop.f32.mrf.mxu1  ;;  %v8947_v5 = vld [vmem:[%s16397_s5 + $0x70] sm:$0xf] }
 0x2a7   : > { %10874 = vpow2.f32 %v2614_v49  ;;  %v2490_v40 = vadd.f32 %v2370_v59, %v1992_v0  ;;  %v2620_v4 = vmul.f32 1.442695, %v2581_v28  ;;  %v2461_v10 = vadd.f32 %v2460_v44, %v2416_v46  ;;  %v10499_v28 = vld [vmem:[%s16397_s5 + $0x74] sm:$0xf0] }
 0x2a8   : > { %v10873_v7 = vpop.eup %10872  ;;  %v2688_v42 = vsel %vm2548_vm8, %v12546_v54, %v8753_v47  ;;  %v12615_v59 = vadd.f32 %v12388_v45, %v1953_v23 }
 0x2a9   : > { %v12606_v30 = vadd.f32 %v12492_v60, %v2490_v40  ;;  %v2713_v51 = vpack.c.bf16 %v2689_v13, %v2688_v42  ;;  %v8756_v19 = vadd.f32 -1.0, %v10873_v7  ;;  %10876 = vpow2.f32 %v2620_v4  ;;  %v8963_v4 = vld [vmem:[%s16397_s5 + $0x90] sm:$0xf] }
 0x2aa   : > { %v2493_v2 = vadd.f32 %v2461_v10, %v12364_v43  ;;  %v2046_v43 = vadd.f32 %v12408_v58, %v12238_v6  ;;  %v8948_v7 = vor.u32 %v10499_v28, %v8947_v5  ;;  %v10503_v10 = vld [vmem:[%s16397_s5 + $0x94] sm:$0xf0] }
 0x2ab   : > { %v2580_v1 = vmin.f32 %v12606_v30, 0.0  ;;  %v2764_v0 = vunpack.c.l.b16 %v2713_v51  ;;  %v2765_v36 = vunpack.c.h.b16 %v2713_v51  ;;  %v2328_v54 = vpop.f32.mrf.mxu2  ;;  %v2691_v45 = vsel %vm2551_vm9, %v12565_v20, %v8756_v19 }
 0x2ac   : > { %v12612_v12 = vadd.f32 %v12488_v3, %v2493_v2  ;;  %v2372_v33 = vpop.f32.mrf.mxu3  ;;  %3360 = vmatpush.bf16.msra.mxu2 %v8948_v7  ;;  %vm2552_vm13 = vcmp.gt.f32.partialorder %v12606_v30, 0.0 }
 0x2ad   : > { %v10875_v49 = vpop.eup %10874  ;;  %v2618_v38 = vmul.f32 1.442695, %v2580_v1  ;;  %v2373_v31 = vadd.f32 %v2372_v33, %v2328_v54  ;;  %v12625_v47 = vpack.c.b16 %v2764_v0, %v2762_v14  ;;  %v12627_v40 = vpack.c.b16 %v2765_v36, %v2763_v11  ;;  %v2418_v46 = vpop.f32.mrf.mxu0  ;;  %v10498_v36 = vld [vmem:[%s16397_s5 + $0x74] sm:$0xf]  ;;  %v8949_v54 = vld [vmem:[%s16397_s5 + $0x78] sm:$0xf0] }
 0x2ae   : > { %v8755_v23 = vadd.f32 -1.0, %v10875_v49  ;;  %v2583_v6 = vmin.f32 %v12612_v12, 0.0  ;;  %v2462_v44 = vpop.f32.mrf.mxu1  ;;  %v2806_v14 = vor.u32 %v2805_v32, %v2801_v24  ;;  %v2818_v49 = vor.u32 %v2817_v8, %v2813_v34  ;;  %v8965_v24 = vld [vmem:[%s16397_s5 + $0x98] sm:$0xf0]  ;;  %v8939_v8 = vld [vmem:[%s16397_s5 + $0x60] sm:$0xf] }
 0x2af   : > { %10878 = vpow2.f32 %v2618_v38  ;;  %v2492_v58 = vadd.f32 %v2373_v31, %v12374_v48  ;;  %v10877_v61 = vpop.eup %10876  ;;  %v2463_v13 = vadd.f32 %v2462_v44, %v2418_v46  ;;  %v2808_v42 = vshll.u32 %v12625_v47, 16 }
 0x2b0   : > { %v2690_v20 = vsel %vm2550_vm10, %v12583_v57, %v8755_v23  ;;  %v2820_v48 = vshll.u32 %v12627_v40, 16  ;;  %v2624_v19 = vmul.f32 1.442695, %v2583_v6  ;;  %v8964_v57 = vor.u32 %v10503_v10, %v8963_v4 }
 0x2b1   : > { %v12645_v51 = vpack.c.bf16 %v2691_v45, %v2690_v20  ;;  %v12648_v2 = vadd.f32 %v12492_v60, %v2492_v58  ;;  %v2495_v11 = vadd.f32 %v2463_v13, %v12588_v63  ;;  %v12651_v1 = vrot.slane %v2808_v42, 1  ;;  %v10502_v63 = vld [vmem:[%s16397_s5 + $0x94] sm:$0xf] }
 0x2b2   : > { %v12653_v0 = vrot.slane %v2820_v48, 1  ;;  %v8758_v33 = vadd.f32 -1.0, %v10877_v61  ;;  %10880 = vpow2.f32 %v2624_v19  ;;  %v12668_v32 = vadd.f32 %v12410_v21, %v2046_v43  ;;  %3410 = vmatpush.bf16.msra.mxu3 %v8964_v57  ;;  %v10497_v21 = vld [vmem:[%s16397_s5 + $0x64] sm:$0xf0] }
 0x2b3   : > { %v2582_v38 = vmin.f32 %v12648_v2, 0.0  ;;  %v12672_v31 = vadd.f32 %v12488_v3, %v2495_v11  ;;  %v2330_v5 = vpop.f32.mrf.mxu2  ;;  %v2811_v34 = vsel %vm460_vm1, %v2806_v14, %v12651_v1  ;;  %v8952_v6 = vor.u32 %v10498_v36, %v8949_v54 }
 0x2b4   : > { %v2374_v28 = vpop.f32.mrf.mxu3  ;;  %3071 = vmatmul.bf16.vlgmr.msrb.gmra.mxu2 %v2811_v34  ;;  %v2823_v23 = vsel %vm460_vm1, %v2818_v49, %v12653_v0  ;;  %3159 = vmatmul.bf16.vlgmr.msrb.gmra.mxu0 %v2811_v34  ;;  %v2693_v7 = vsel %vm2553_vm12, %v12593_v15, %v8758_v33  ;;  %v8968_v20 = vor.u32 %v10502_v63, %v8965_v24  ;;  %v2766_v15 = vunpack.c.l.b16 %v12645_v51 }
 0x2b5   : > { %v10879_v43 = vpop.eup %10878  ;;  %v2375_v45 = vadd.f32 %v2374_v28, %v2330_v5  ;;  %v2622_v46 = vmul.f32 1.442695, %v2582_v38  ;;  %v2585_v44 = vmin.f32 %v12672_v31, 0.0  ;;  %8875 = vmatmul.msk.bf16.vlgmr.msrb.gmra.mxu3 %vm3041_vm11, %v2823_v23  ;;  %8882 = vmatmul.msk.bf16.vlgmr.msrb.gmra.mxu1 %vm3041_vm11, %v2823_v23  ;;  %v2421_v10 = vpop.f32.mrf.mxu0  ;;  %v8940_v13 = vor.u32 %v10497_v21, %v8939_v8  ;;  %v10496_v23 = vld [vmem:[%s16397_s5 + $0x64] sm:$0xf] }
 0x2b6   : > { %v8757_v58 = vadd.f32 -1.0, %v10879_v43  ;;  %v2465_v61 = vpop.f32.mrf.mxu1  ;;  %3448 = vmatpush.bf16.msra.mxu0 %v8952_v6  ;;  %v1958_v11 = vadd.f32 %v12418_v16, %v12240_v62  ;;  %3498 = vmatpush.bf16.msra.mxu1 %v8968_v20  ;;  %vm2555_vm14 = vcmp.gt.f32.partialorder %v12612_v12, 0.0  ;;  %vm2554_vm2 = vcmp.gt.f32.partialorder %v12648_v2, 0.0  ;;  %v8941_v6 = vld [vmem:[%s16397_s5 + $0x68] sm:$0xf0] }
 0x2b7   : > { %v2494_v4 = vadd.f32 %v2375_v45, %v12615_v59  ;;  %10882 = vpow2.f32 %v2622_v46  ;;  %v2628_v48 = vmul.f32 1.442695, %v2585_v44  ;;  %v2466_v19 = vadd.f32 %v2465_v61, %v2421_v10  ;;  %3361 = vmatpush.bf16.msra.mxu2 %v8940_v13 }
 0x2b8   : > { %v2692_v42 = vsel %vm2552_vm13, %v12606_v30, %v8757_v58  ;;  %v10881_v14 = vpop.eup %10880  ;;  %v2767_v59 = vunpack.c.h.b16 %v12645_v51  ;;  %v2824_v38 = vshrl.u32 %v12625_v47, 16  ;;  %v2832_v45 = vshrl.u32 %v12627_v40, 16 }
 0x2b9   : > { %v2715_v57 = vpack.c.bf16 %v2693_v7, %v2692_v42  ;;  %v12695_v36 = vadd.f32 %v12492_v60, %v2494_v4  ;;  %v8760_v54 = vadd.f32 -1.0, %v10881_v14  ;;  %v2497_v30 = vadd.f32 %v2466_v19, %v12396_v50 }
 0x2ba   : > { %10884 = vpow2.f32 %v2628_v48  ;;  %v2826_v43 = vor.u32 %v2824_v38, %v12651_v1  ;;  %v8944_v61 = vor.u32 %v10496_v23, %v8941_v6  ;;  %vm2557_vm3 = vcmp.gt.f32.partialorder %v12672_v31, 0.0 }
 0x2bb   : > { %v2768_v33 = vunpack.c.l.b16 %v2715_v57  ;;  %v2769_v49 = vunpack.c.h.b16 %v2715_v57  ;;  %v2584_v63 = vmin.f32 %v12695_v36, 0.0  ;;  %v12704_v62 = vadd.f32 %v12488_v3, %v2497_v30  ;;  %v2333_v16 = vpop.f32.mrf.mxu2 }
 0x2bc   : > { %v2377_v24 = vpop.f32.mrf.mxu3  ;;  %v2695_v8 = vsel %vm2555_vm14, %v12612_v12, %v8760_v54  ;;  %3449 = vmatpush.bf16.msra.mxu0 %v8944_v61  ;;  %vm2556_vm6 = vcmp.gt.f32.partialorder %v12695_v36, 0.0 }
 0x2bd   : > { %v12707_v51 = vpack.c.b16 %v2768_v33, %v2766_v15  ;;  %v12709_v5 = vpack.c.b16 %v2769_v49, %v2767_v59  ;;  %v2626_v50 = vmul.f32 1.442695, %v2584_v63  ;;  %v2378_v28 = vadd.f32 %v2377_v24, %v2333_v16  ;;  %v10883_v34 = vpop.eup %10882  ;;  %v2423_v44 = vpop.f32.mrf.mxu0  ;;  %v10495_v63 = vld [vmem:[%s16397_s5 + $0x54] sm:$0xf0] }
 0x2be   : > { %v2587_v21 = vmin.f32 %v12704_v62, 0.0  ;;  %v8759_v58 = vadd.f32 -1.0, %v10883_v34  ;;  %v2467_v12 = vpop.f32.mrf.mxu1  ;;  %vm2559_vm7 = vcmp.gt.f32.partialorder %v12704_v62, 0.0 }
 0x2bf   : > { %10886 = vpow2.f32 %v2626_v50  ;;  %v2496_v46 = vadd.f32 %v2378_v28, %v12406_v41  ;;  %v2828_v7 = vshll.u32 %v12707_v51, 16  ;;  %v2468_v1 = vadd.f32 %v2467_v12, %v2423_v44 }
 0x2c0   : > { %v2632_v4 = vmul.f32 1.442695, %v2587_v21  ;;  %v2836_v10 = vshll.u32 %v12709_v5, 16  ;;  %v10885_v20 = vpop.eup %10884  ;;  %v2694_v13 = vsel %vm2554_vm2, %v12648_v2, %v8759_v58  ;;  %v2834_v41 = vor.u32 %v2832_v45, %v12653_v0 }
 0x2c1   : > { %v12728_v42 = vadd.f32 %v12492_v60, %v2496_v46  ;;  %v12730_v48 = vrot.slane %v2828_v7, 1  ;;  %v2716_v19 = vpack.c.bf16 %v2695_v8, %v2694_v13  ;;  %v2499_v14 = vadd.f32 %v2468_v1, %v12668_v32  ;;  %v8931_v32 = vld [vmem:[%s16397_s5 + $0x50] sm:$0xf] }
 0x2c2   : > { %10888 = vpow2.f32 %v2632_v4  ;;  %v12734_v57 = vrot.slane %v2836_v10, 1  ;;  %v2002_v2 = vadd.f32 %v12420_v35, %v1958_v11  ;;  %v8762_v54 = vadd.f32 -1.0, %v10885_v20 }
 0x2c3   : > { %v2586_v15 = vmin.f32 %v12728_v42, 0.0  ;;  %v2831_v59 = vsel %vm460_vm1, %v2826_v43, %v12730_v48  ;;  %v12741_v30 = vadd.f32 %v12488_v3, %v2499_v14  ;;  %v2335_v33 = vpop.f32.mrf.mxu2  ;;  %v2051_v35 = vadd.f32 %v12439_v26, %v12252_v22  ;;  %v10494_v14 = vld [vmem:[%s16397_s5 + $0x54] sm:$0xf] }
 0x2c4   : > { %v2379_v0 = vpop.f32.mrf.mxu3  ;;  %v2839_v49 = vsel %vm460_vm1, %v2834_v41, %v12734_v57  ;;  %3076 = vmatmul.bf16.gmra.mxu2 %v2831_v59  ;;  %3164 = vmatmul.bf16.gmra.mxu0 %v2831_v59  ;;  %v8932_v38 = vor.u32 %v10495_v63, %v8931_v32  ;;  %v2697_v21 = vsel %vm2557_vm3, %v12672_v31, %v8762_v54  ;;  %vm2558_vm8 = vcmp.gt.f32.partialorder %v12728_v42, 0.0 }
 0x2c5   : > { %v10887_v16 = vpop.eup %10886  ;;  %v2630_v11 = vmul.f32 1.442695, %v2586_v15  ;;  %v2380_v24 = vadd.f32 %v2379_v0, %v2335_v33  ;;  %v2589_v28 = vmin.f32 %v12741_v30, 0.0  ;;  %8876 = vmatmul.msk.bf16.gmra.mxu3 %vm3041_vm11, %v2839_v49  ;;  %8883 = vmatmul.msk.bf16.gmra.mxu1 %vm3041_vm11, %v2839_v49  ;;  %v2426_v8 = vpop.f32.mrf.mxu0  ;;  %v2095_v6 = vadd.f32 %v12441_v17, %v2051_v35  ;;  %v8933_v15 = vld [vmem:[%s16397_s5 + $0x58] sm:$0xf0] }
 0x2c6   : > { %v8761_v50 = vadd.f32 -1.0, %v10887_v16  ;;  %v2470_v22 = vpop.f32.mrf.mxu1  ;;  %3362 = vmatpush.bf16.msra.mxu2 %v8932_v38  ;;  %v1963_v58 = vadd.f32 %v12443_v52, %v12256_v55  ;;  %v2770_v7 = vunpack.c.l.b16 %v2716_v19  ;;  %v2840_v61 = vshrl.u32 %v12707_v51, 16 }
 0x2c7   : > { %10890 = vpow2.f32 %v2630_v11  ;;  %v2498_v34 = vadd.f32 %v2380_v24, %v2002_v2  ;;  %v2636_v45 = vmul.f32 1.442695, %v2589_v28  ;;  %v2471_v23 = vadd.f32 %v2470_v22, %v2426_v8 }
 0x2c8   : > { %v10889_v26 = vpop.eup %10888  ;;  %v2696_v43 = vsel %vm2556_vm6, %v12695_v36, %v8761_v50  ;;  %v2771_v36 = vunpack.c.h.b16 %v2716_v19  ;;  %v2848_v19 = vshrl.u32 %v12709_v5, 16  ;;  %v8936_v35 = vor.u32 %v10494_v14, %v8933_v15  ;;  %v16436_v15 = vld [vmem:[#allocation6_spill] sm:$0xff] }
 0x2c9   : > { %v2717_v46 = vpack.c.bf16 %v2697_v21, %v2696_v43  ;;  %v12764_v44 = vadd.f32 %v12492_v60, %v2498_v34  ;;  %v8764_v12 = vadd.f32 -1.0, %v10889_v26  ;;  %v2501_v31 = vadd.f32 %v2471_v23, %v12432_v37  ;;  %v8923_v21 = vld [vmem:[%s16397_s5 + $0x40] sm:$0xf]  ;;  %v10493_v43 = vld [vmem:[%s16397_s5 + $0x44] sm:$0xf0] }
 0x2ca   : > { %10892 = vpow2.f32 %v2636_v45  ;;  %3450 = vmatpush.bf16.msra.mxu0 %v8936_v35  ;;  %v2842_v8 = vor.u32 %v2840_v61, %v12730_v48  ;;  %v2850_v22 = vor.u32 %v2848_v19, %v12734_v57  ;;  %vm2561_vm9 = vcmp.gt.f32.partialorder %v12741_v30, 0.0 }
 0x2cb   : > { %v2772_v4 = vunpack.c.l.b16 %v2717_v46  ;;  %v2773_v1 = vunpack.c.h.b16 %v2717_v46  ;;  %v2588_v17 = vmin.f32 %v12764_v44, 0.0  ;;  %v12771_v55 = vadd.f32 %v12488_v3, %v2501_v31  ;;  %v2338_v52 = vpop.f32.mrf.mxu2 }
 0x2cc   : > { %v2382_v10 = vpop.f32.mrf.mxu3  ;;  %v2699_v59 = vsel %vm2559_vm7, %v12704_v62, %v8764_v12  ;;  %v8924_v31 = vor.u32 %v10493_v43, %v8923_v21  ;;  %vm2560_vm10 = vcmp.gt.f32.partialorder %v12764_v44, 0.0  ;;  %v10492_v21 = vld [vmem:[%s16397_s5 + $0x44] sm:$0xf]  ;;  %v8925_v43 = vld [vmem:[%s16397_s5 + $0x48] sm:$0xf0] }
 0x2cd   : > { %v10891_v20 = vpop.eup %10890  ;;  %v12774_v13 = vpack.c.b16 %v2772_v4, %v2770_v7  ;;  %v12776_v41 = vpack.c.b16 %v2773_v1, %v2771_v36  ;;  %v2383_v37 = vadd.f32 %v2382_v10, %v2338_v52  ;;  %v2634_v54 = vmul.f32 1.442695, %v2588_v17  ;;  %v2428_v49 = vpop.f32.mrf.mxu0 }
 0x2ce   : > { %v8763_v2 = vadd.f32 -1.0, %v10891_v20  ;;  %v2591_v33 = vmin.f32 %v12771_v55, 0.0  ;;  %v2472_v32 = vpop.f32.mrf.mxu1  ;;  %v1968_v36 = vadd.f32 %v12466_v56, %v12272_v18  ;;  %3363 = vmatpush.bf16.msra.mxu2 %v8924_v31  ;;  %v16435_v56 = vld [vmem:[#allocation5_spill] sm:$0xff]  ;;  %vm2563_vm12 = vcmp.gt.f32.partialorder %v12771_v55, 0.0 }
 0x2cf   : > { %v2500_v0 = vadd.f32 %v2383_v37, %v12437_v9  ;;  %v2844_v63 = vshll.u32 %v12774_v13, 16  ;;  %v2852_v16 = vshll.u32 %v12776_v41, 16  ;;  %10894 = vpow2.f32 %v2634_v54  ;;  %v16437_v54 = vld [vmem:[#allocation3_spill] sm:$0xff] }
 0x2d0   : > { %v2698_v11 = vsel %vm2558_vm8, %v12728_v42, %v8763_v2  ;;  %v2640_v24 = vmul.f32 1.442695, %v2591_v33  ;;  %v2473_v62 = vadd.f32 %v2472_v32, %v2428_v49  ;;  %v10893_v28 = vpop.eup %10892  ;;  %v2007_v42 = vadd.f32 %v12445_v25, %v1963_v58 }
 0x2d1   : > { %v12795_v38 = vpack.c.bf16 %v2699_v59, %v2698_v11  ;;  %v12798_v50 = vadd.f32 %v12492_v60, %v2500_v0  ;;  %v12800_v9 = vrot.slane %v2844_v63, 1  ;;  %v12804_v26 = vrot.slane %v2852_v16, 1 }
 0x2d2   : > { %v2503_v34 = vadd.f32 %v2473_v62, %v2095_v6  ;;  %10896 = vpow2.f32 %v2640_v24  ;;  %v2056_v58 = vadd.f32 %v12453_v29, %v12268_v39  ;;  %v8766_v46 = vadd.f32 -1.0, %v10893_v28 }
 0x2d3   : > { %v2590_v45 = vmin.f32 %v12798_v50, 0.0  ;;  %v2340_v48 = vpop.f32.mrf.mxu2  ;;  %v2847_v6 = vsel %vm460_vm1, %v2842_v8, %v12800_v9  ;;  %v2855_v25 = vsel %vm460_vm1, %v2850_v22, %v12804_v26  ;;  %v12837_v59 = vadd.f32 %v16436_v15, %v1968_v36 }
 0x2d4   : > { %v12815_v23 = vadd.f32 %v12488_v3, %v2503_v34  ;;  %v2384_v57 = vpop.f32.mrf.mxu3  ;;  %3081 = vmatmul.bf16.gmra.mxu2 %v2847_v6  ;;  %3169 = vmatmul.bf16.gmra.mxu0 %v2847_v6  ;;  %v2100_v20 = vadd.f32 %v16435_v56, %v2056_v58  ;;  %v2701_v37 = vsel %vm2561_vm9, %v12741_v30, %v8766_v46  ;;  %v2774_v0 = vunpack.c.l.b16 %v12795_v38  ;;  %v8915_v46 = vld [vmem:[%s16397_s5 + $0x30] sm:$0xf] }
 0x2d5   : > { %v2385_v12 = vadd.f32 %v2384_v57, %v2340_v48  ;;  %v10895_v7 = vpop.eup %10894  ;;  %v2638_v4 = vmul.f32 1.442695, %v2590_v45  ;;  %8877 = vmatmul.msk.bf16.gmra.mxu3 %vm3041_vm11, %v2855_v25  ;;  %8884 = vmatmul.msk.bf16.gmra.mxu1 %vm3041_vm11, %v2855_v25  ;;  %v2431_v29 = vpop.f32.mrf.mxu0  ;;  %v2856_v30 = vshrl.u32 %v12774_v13, 16  ;;  %vm2562_vm13 = vcmp.gt.f32.partialorder %v12798_v50, 0.0  ;;  %v16438_v48 = vld [vmem:[#allocation4_spill] sm:$0xff] }
 0x2d6   : > { %v2593_v1 = vmin.f32 %v12815_v23, 0.0  ;;  %v8765_v17 = vadd.f32 -1.0, %v10895_v7  ;;  %v2475_v52 = vpop.f32.mrf.mxu1  ;;  %v8928_v58 = vor.u32 %v10492_v21, %v8925_v43  ;;  %vm2565_vm14 = vcmp.gt.f32.partialorder %v12815_v23, 0.0  ;;  %v8909_v43 = vld [vmem:[%s16397_s5 + $0x28] sm:$0xf0] }
 0x2d7   : > { %v2502_v39 = vadd.f32 %v2385_v12, %v2007_v42  ;;  %10898 = vpow2.f32 %v2638_v4  ;;  %v2476_v61 = vadd.f32 %v2475_v52, %v2431_v29  ;;  %v10491_v12 = vld [vmem:[%s16397_s5 + $0x34] sm:$0xf0] }
 0x2d8   : > { %v2644_v10 = vmul.f32 1.442695, %v2593_v1  ;;  %v10897_v18 = vpop.eup %10896  ;;  %v2700_v19 = vsel %vm2560_vm10, %v12764_v44, %v8765_v17  ;;  %v2775_v44 = vunpack.c.h.b16 %v12795_v38  ;;  %v2864_v38 = vshrl.u32 %v12776_v41, 16  ;;  %3451 = vmatpush.bf16.msra.mxu0 %v8928_v58 }
 0x2d9   : > { %v12834_v14 = vadd.f32 %v12492_v60, %v2502_v39  ;;  %v2719_v2 = vpack.c.bf16 %v2701_v37, %v2700_v19  ;;  %v2505_v33 = vadd.f32 %v2476_v61, %v16437_v54  ;;  %v8768_v24 = vadd.f32 -1.0, %v10897_v18 }
 0x2da   : > { %10900 = vpow2.f32 %v2644_v10  ;;  %v8916_v52 = vor.u32 %v10491_v12, %v8915_v46  ;;  %v2858_v18 = vor.u32 %v2856_v30, %v12800_v9  ;;  %v2866_v19 = vor.u32 %v2864_v38, %v12804_v26  ;;  %v10490_v9 = vld [vmem:[%s16397_s5 + $0x34] sm:$0xf]  ;;  %v8957_v30 = vld [vmem:[%s16397_s5 + $0x88] sm:$0xf0] }
 0x2db   : > { %v2592_v49 = vmin.f32 %v12834_v14, 0.0  ;;  %v2776_v32 = vunpack.c.l.b16 %v2719_v2  ;;  %v2777_v63 = vunpack.c.h.b16 %v2719_v2  ;;  %v12846_v16 = vadd.f32 %v12488_v3, %v2505_v33  ;;  %v2343_v35 = vpop.f32.mrf.mxu2 }
 0x2dc   : > { %v2387_v11 = vpop.f32.mrf.mxu3  ;;  %v2703_v17 = vsel %vm2563_vm12, %v12771_v55, %v8768_v24  ;;  %v8955_v55 = vld [vmem:[%s16397_s5 + $0x80] sm:$0xf]  ;;  %3364 = vmatpush.bf16.msra.mxu2 %v8916_v52  ;;  %v10489_v24 = vld [vmem:[%s16397_s5 + $0x24] sm:$0xf0]  ;;  %vm2564_vm2 = vcmp.gt.f32.partialorder %v12834_v14, 0.0 }
 0x2dd   : > { %v2642_v62 = vmul.f32 1.442695, %v2592_v49  ;;  %v2388_v28 = vadd.f32 %v2387_v11, %v2343_v35  ;;  %v10899_v34 = vpop.eup %10898  ;;  %v12849_v8 = vpack.c.b16 %v2776_v32, %v2774_v0  ;;  %v12851_v22 = vpack.c.b16 %v2777_v63, %v2775_v44  ;;  %v2433_v6 = vpop.f32.mrf.mxu0  ;;  %v10500_v49 = vld [vmem:[%s16397_s5 + $0x84] sm:$0xf]  ;;  %v8907_v11 = vld [vmem:[%s16397_s5 + $0x20] sm:$0xf] }
 0x2de   : > { %v2595_v42 = vmin.f32 %v12846_v16, 0.0  ;;  %v8767_v45 = vadd.f32 -1.0, %v10899_v34  ;;  %v2477_v25 = vpop.f32.mrf.mxu1  ;;  %v8960_v21 = vor.u32 %v10500_v49, %v8957_v30  ;;  %vm2567_vm3 = vcmp.gt.f32.partialorder %v12846_v16, 0.0 }
 0x2df   : > { %10902 = vpow2.f32 %v2642_v62  ;;  %v2504_v57 = vadd.f32 %v2388_v28, %v16438_v48  ;;  %v2478_v7 = vadd.f32 %v2477_v25, %v2433_v6  ;;  %v2860_v36 = vshll.u32 %v12849_v8, 16  ;;  %v10487_v48 = vld [vmem:[%s16397_s5 + $0x14] sm:$0xf0] }
 0x2e0   : > { %v2648_v31 = vmul.f32 1.442695, %v2595_v42  ;;  %v2868_v4 = vshll.u32 %v12851_v22, 16  ;;  %v10901_v1 = vpop.eup %10900  ;;  %v2702_v39 = vsel %vm2562_vm13, %v12798_v50, %v8767_v45  ;;  %v10501_v50 = vld [vmem:[%s16397_s5 + $0x84] sm:$0xf0]  ;;  %v8908_v25 = vor.u32 %v10489_v24, %v8907_v11  ;;  %3499 = vmatpush.bf16.msra.mxu1 %v8960_v21 }
 0x2e1   : > { %v12877_v29 = vadd.f32 %v12492_v60, %v2504_v57  ;;  %v12879_v10 = vpack.c.bf16 %v2703_v17, %v2702_v39  ;;  %v2507_v61 = vadd.f32 %v2478_v7, %v2100_v20  ;;  %v12882_v56 = vrot.slane %v2860_v36, 1  ;;  %v8917_v20 = vld [vmem:[%s16397_s5 + $0x38] sm:$0xf0]  ;;  %v10488_v42 = vld [vmem:[%s16397_s5 + $0x24] sm:$0xf] }
 0x2e2   : > { %10904 = vpow2.f32 %v2648_v31  ;;  %v12892_v15 = vrot.slane %v2868_v4, 1  ;;  %v8770_v2 = vadd.f32 -1.0, %v10901_v1  ;;  %v8956_v35 = vor.u32 %v10501_v50, %v8955_v55  ;;  %v8899_v45 = vld [vmem:[%s16397_s5 + $0x10] sm:$0xf]  ;;  %v10486_v31 = vld [vmem:[%s16397_s5 + $0x14] sm:$0xf]  ;;  %3365 = vmatpush.bf16.msra.mxu2 %v8908_v25 }
 0x2e3   : > { %v2594_v37 = vmin.f32 %v12877_v29, 0.0  ;;  %v12902_v54 = vadd.f32 %v12488_v3, %v2507_v61  ;;  %v2345_v33 = vpop.f32.mrf.mxu2  ;;  %v2863_v26 = vsel %vm460_vm1, %v2858_v18, %v12882_v56  ;;  %v8920_v34 = vor.u32 %v10490_v9, %v8917_v20  ;;  %v8901_v7 = vld [vmem:[%s16397_s5 + $0x18] sm:$0xf0] }
 0x2e4   : > { %v2389_v0 = vpop.f32.mrf.mxu3  ;;  %3086 = vmatmul.bf16.gmra.mxu2 %v2863_v26  ;;  %v2871_v3 = vsel %vm460_vm1, %v2866_v19, %v12892_v15  ;;  %3174 = vmatmul.bf16.gmra.mxu0 %v2863_v26  ;;  %v2705_v57 = vsel %vm2565_vm14, %v12815_v23, %v8770_v2  ;;  %v8912_v23 = vor.u32 %v10488_v42, %v8909_v43  ;;  %v2779_v4 = vunpack.c.h.b16 %v12879_v10 }
 0x2e5   : > { %v10903_v44 = vpop.eup %10902  ;;  %v2646_v32 = vmul.f32 1.442695, %v2594_v37  ;;  %v2390_v63 = vadd.f32 %v2389_v0, %v2345_v33  ;;  %v2597_v28 = vmin.f32 %v12902_v54, 0.0  ;;  %8878 = vmatmul.msk.bf16.gmra.mxu3 %vm3041_vm11, %v2871_v3  ;;  %8885 = vmatmul.msk.bf16.gmra.mxu1 %vm3041_vm11, %v2871_v3  ;;  %v8900_v36 = vor.u32 %v10487_v48, %v8899_v45 }
 0x2e6   : > { %v8769_v62 = vadd.f32 -1.0, %v10903_v44  ;;  %3411 = vmatpush.bf16.msra.mxu3 %v8956_v35  ;;  %3452 = vmatpush.bf16.msra.mxu0 %v8920_v34  ;;  %v8904_v52 = vor.u32 %v10486_v31, %v8901_v7  ;;  %vm2566_vm6 = vcmp.gt.f32.partialorder %v12877_v29, 0.0  ;;  %v2880_v33 = vshrl.u32 %v12851_v22, 16 }
 0x2e7   : > { %10906 = vpow2.f32 %v2646_v32  ;;  %v2506_v38 = vadd.f32 %v2390_v63, %v12837_v59  ;;  %v2652_v6 = vmul.f32 1.442695, %v2597_v28  ;;  %3366 = vmatpush.bf16.msra.mxu2 %v8900_v36  ;;  %vm2569_vm7 = vcmp.gt.f32.partialorder %v12902_v54, 0.0 }
 0x2e8   : > { %v2704_v59 = vsel %vm2564_vm2, %v12834_v14, %v8769_v62  ;;  %v10905_v58 = vpop.eup %10904  ;;  %v2778_v14 = vunpack.c.l.b16 %v12879_v10  ;;  %v2872_v10 = vshrl.u32 %v12849_v8, 16  ;;  %v2882_v32 = vor.u32 %v2880_v33, %v12892_v15  ;;  %v10484_v15 = vld [vmem:[%s16397_s5 + $0x4] sm:$0xf]  ;;  %v8893_v62 = vld [vmem:[%s16397_s5 + $0x8] sm:$0xf0] }
 0x2e9   : > { %v2721_v46 = vpack.c.bf16 %v2705_v57, %v2704_v59  ;;  %v2540_v12 = vadd.f32 %v12492_v60, %v2506_v38  ;;  %v8772_v39 = vadd.f32 -1.0, %v10905_v58  ;;  %10908 = vpow2.f32 %v2652_v6 }
 0x2ea   : > { %3453 = vmatpush.bf16.msra.mxu0 %v8912_v23  ;;  %v2874_v26 = vor.u32 %v2872_v10, %v12882_v56  ;;  %v10485_v56 = vld [vmem:[%s16397_s5 + $0x4] sm:$0xf0]  ;;  %v8896_v28 = vor.u32 %v10484_v15, %v8893_v62  ;;  %v10534_v15 = vld [vmem:[%s16397_s5 + $0x194] sm:$0xf]  ;;  %v9037_v62 = vld [vmem:[%s16397_s5 + $0x180] sm:$0xf] }
 0x2eb   : > { %v2780_v1 = vunpack.c.l.b16 %v2721_v46  ;;  %v2781_v17 = vunpack.c.h.b16 %v2721_v46  ;;  %v2596_v60 = vmin.f32 %v2540_v12, 0.0  ;;  %v2707_v20 = vsel %vm2567_vm3, %v12846_v16, %v8772_v39  ;;  %v10543_v39 = vld [vmem:[%s16397_s5 + $0x1d4] sm:$0xf0] }
 0x2ec   : > { %vm2568_vm8 = vcmp.gt.f32.partialorder %v2540_v12, 0.0 }
 0x2ed   : > { %v10907_v61 = vpop.eup %10906  ;;  %v12950_v18 = vpack.c.b16 %v2780_v1, %v2778_v14  ;;  %v12952_v55 = vpack.c.b16 %v2781_v17, %v2779_v4  ;;  %v2650_v37 = vmul.f32 1.442695, %v2596_v60  ;;  %v9061_v14 = vld [vmem:[%s16397_s5 + $0x1b0] sm:$0xf]  ;;  %v10539_v4 = vld [vmem:[%s16397_s5 + $0x1b4] sm:$0xf0] }
 0x2ee   : > { %v8771_v50 = vadd.f32 -1.0, %v10907_v61  ;;  %3454 = vmatpush.bf16.msra.mxu0 %v8904_v52  ;;  %v9062_v1 = vor.u32 %v10539_v4, %v9061_v14  ;;  %v9077_v17 = vld [vmem:[%s16397_s5 + $0x1d0] sm:$0xf]  ;;  %v10538_v60 = vld [vmem:[%s16397_s5 + $0x1b4] sm:$0xf] }
 0x2ef   : > { %v2876_v19 = vshll.u32 %v12950_v18, 16  ;;  %v2884_v9 = vshll.u32 %v12952_v55, 16  ;;  %10910 = vpow2.f32 %v2650_v37  ;;  %v10909_v44 = vpop.eup %10908  ;;  %v2888_v6 = vshrl.u32 %v12950_v18, 16  ;;  %v9063_v61 = vld [vmem:[%s16397_s5 + $0x1b8] sm:$0xf0] }
 0x2f0   : > { %v2706_v2 = vsel %vm2566_vm6, %v12877_v29, %v8771_v50  ;;  %v8774_v35 = vadd.f32 -1.0, %v10909_v44  ;;  %v8891_v29 = vld [vmem:[%s16397_s5] sm:$0xf]  ;;  %v2896_v58 = vshrl.u32 %v12952_v55, 16  ;;  %v9078_v52 = vor.u32 %v10543_v39, %v9077_v17  ;;  %v10542_v50 = vld [vmem:[%s16397_s5 + $0x1d4] sm:$0xf] }
 0x2f1   : > { %v2722_v0 = vpack.c.bf16 %v2707_v20, %v2706_v2  ;;  %v2878_v49 = vrot.slane %v2876_v19, 1  ;;  %v2886_v30 = vrot.slane %v2884_v9, 1  ;;  %v8892_v24 = vor.u32 %v10485_v56, %v8891_v29  ;;  %v9079_v37 = vld [vmem:[%s16397_s5 + $0x1d8] sm:$0xf0]  ;;  %v10535_v29 = vld [vmem:[%s16397_s5 + $0x194] sm:$0xf0] }
 0x2f2   : > { %v2709_v34 = vsel %vm2569_vm7, %v12902_v54, %v8774_v35  ;;  %3455 = vmatpush.bf16.msra.mxu0 %v8896_v28  ;;  %v9066_v10 = vor.u32 %v10538_v60, %v9063_v61  ;;  %v9082_v19 = vor.u32 %v10542_v50, %v9079_v37  ;;  %3764 = vmatpush.bf16.msrb.mxu3 %v9078_v52  ;;  %v10533_v28 = vld [vmem:[%s16397_s5 + $0x184] sm:$0xf0]  ;;  %v10530_v50 = vld [vmem:[%s16397_s5 + $0x174] sm:$0xf]  ;;  %v9031_v37 = vld [vmem:[%s16397_s5 + $0x178] sm:$0xf0] }
 0x2f3   : > { %v2879_v63 = vsel %vm460_vm1, %v2874_v26, %v2878_v49  ;;  %v2887_v3 = vsel %vm460_vm1, %v2882_v32, %v2886_v30  ;;  %3367 = vmatpush.bf16.msra.mxu2 %v8892_v24  ;;  %v2782_v21 = vunpack.c.l.b16 %v2722_v0  ;;  %v2783_v43 = vunpack.c.h.b16 %v2722_v0  ;;  %v10541_v14 = vld [vmem:[%s16397_s5 + $0x1c4] sm:$0xf0] }
 0x2f4   : > { %3091 = vmatmul.bf16.gmra.mxu2 %v2879_v63  ;;  %3179 = vmatmul.bf16.gmra.mxu0 %v2879_v63  ;;  %v2890_v46 = vor.u32 %v2888_v6, %v2878_v49  ;;  %v2898_v31 = vor.u32 %v2896_v58, %v2886_v30  ;;  %v9053_v49 = vld [vmem:[%s16397_s5 + $0x1a0] sm:$0xf]  ;;  %v10537_v30 = vld [vmem:[%s16397_s5 + $0x1a4] sm:$0xf0]  ;;  %v10536_v63 = vld [vmem:[%s16397_s5 + $0x1a4] sm:$0xf] }
 0x2f5   : > { %v10911_v16 = vpop.eup %10910  ;;  %8879 = vmatmul.msk.bf16.gmra.mxu3 %vm3041_vm11, %v2887_v3  ;;  %8886 = vmatmul.msk.bf16.gmra.mxu1 %vm3041_vm11, %v2887_v3  ;;  %v9054_v32 = vor.u32 %v10537_v30, %v9053_v49  ;;  %v9055_v3 = vld [vmem:[%s16397_s5 + $0x1a8] sm:$0xf0] }
 0x2f6   : > { %v8773_v11 = vadd.f32 -1.0, %v10911_v16  ;;  %3802 = vmatpush.bf16.msrb.mxu0 %v9066_v10  ;;  %3852 = vmatpush.bf16.msrb.mxu1 %v9082_v19  ;;  %v9058_v35 = vor.u32 %v10536_v63, %v9055_v3  ;;  %v9045_v16 = vld [vmem:[%s16397_s5 + $0x190] sm:$0xf]  ;;  %v10540_v10 = vld [vmem:[%s16397_s5 + $0x1c4] sm:$0xf]  ;;  %v9034_v19 = vor.u32 %v10530_v50, %v9031_v37 }
 0x2f7   : > { %3714 = vmatpush.bf16.msrb.mxu2 %v9062_v1  ;;  %v9046_v56 = vor.u32 %v10535_v29, %v9045_v16  ;;  %v10529_v63 = vld [vmem:[%s16397_s5 + $0x164] sm:$0xf0] }
 0x2f8   : > { %v2708_v42 = vsel %vm2568_vm8, %v2540_v12, %v8773_v11  ;;  %v9047_v11 = vld [vmem:[%s16397_s5 + $0x198] sm:$0xf0] }
 0x2f9   : > { %v2723_v38 = vpack.c.bf16 %v2709_v34, %v2708_v42  ;;  %v9050_v24 = vor.u32 %v10534_v15, %v9047_v11  ;;  %v9038_v34 = vor.u32 %v10533_v28, %v9037_v62  ;;  %v10528_v15 = vld [vmem:[%s16397_s5 + $0x164] sm:$0xf]  ;;  %v9023_v11 = vld [vmem:[%s16397_s5 + $0x168] sm:$0xf0] }
 0x2fa   : > { %3803 = vmatpush.bf16.msrb.mxu0 %v9058_v35  ;;  %v9026_v62 = vor.u32 %v10528_v15, %v9023_v11 }
 0x2fb   : > { %v2784_v45 = vunpack.c.l.b16 %v2723_v38  ;;  %v2785_v48 = vunpack.c.h.b16 %v2723_v38  ;;  %3715 = vmatpush.bf16.msrb.mxu2 %v9054_v32  ;;  %v9021_v32 = vld [vmem:[%s16397_s5 + $0x160] sm:$0xf] }
 0x2fc   : > { %v9022_v3 = vor.u32 %v10529_v63, %v9021_v32 }
 0x2fd   : > { %v12982_v57 = vpack.c.b16 %v2784_v45, %v2782_v21  ;;  %v12984_v59 = vpack.c.b16 %v2785_v48, %v2783_v43  ;;  %v10532_v43 = vld [vmem:[%s16397_s5 + $0x184] sm:$0xf]  ;;  %v9039_v45 = vld [vmem:[%s16397_s5 + $0x188] sm:$0xf0] }
 0x2fe   : > { %3804 = vmatpush.bf16.msrb.mxu0 %v9050_v24  ;;  %v9042_v48 = vor.u32 %v10532_v43, %v9039_v45  ;;  %v9013_v45 = vld [vmem:[%s16397_s5 + $0x150] sm:$0xf] }
 0x2ff   : > { %v2892_v25 = vshll.u32 %v12982_v57, 16  ;;  %v2900_v54 = vshll.u32 %v12984_v59, 16  ;;  %v2904_v9 = vshrl.u32 %v12982_v57, 16  ;;  %v2907_v20 = vshrl.u32 %v12984_v59, 16  ;;  %3716 = vmatpush.bf16.msrb.mxu2 %v9046_v56 }
 0x301   : > { %v2894_v12 = vrot.slane %v2892_v25, 1  ;;  %v2902_v7 = vrot.slane %v2900_v54, 1 }
 0x302   : > { %3805 = vmatpush.bf16.msrb.mxu0 %v9042_v48  ;;  %v10527_v48 = vld [vmem:[%s16397_s5 + $0x154] sm:$0xf0] }
 0x303   : > { %v2895_v23 = vsel %vm460_vm1, %v2890_v46, %v2894_v12  ;;  %v2903_v36 = vsel %vm460_vm1, %v2898_v31, %v2902_v7  ;;  %v2906_v2 = vor.u32 %v2904_v9, %v2894_v12  ;;  %v2909_v33 = vor.u32 %v2907_v20, %v2902_v7  ;;  %3717 = vmatpush.bf16.msrb.mxu2 %v9038_v34  ;;  %v9029_v31 = vld [vmem:[%s16397_s5 + $0x170] sm:$0xf]  ;;  %v10531_v7 = vld [vmem:[%s16397_s5 + $0x174] sm:$0xf0]  ;;  %v9071_v9 = vld [vmem:[%s16397_s5 + $0x1c8] sm:$0xf0] }
 0x304   : > { %3096 = vmatmul.bf16.gmra.mxu2 %v2895_v23  ;;  %3184 = vmatmul.bf16.gmra.mxu0 %v2895_v23  ;;  %v9069_v23 = vld [vmem:[%s16397_s5 + $0x1c0] sm:$0xf]  ;;  %v9074_v20 = vor.u32 %v10540_v10, %v9071_v9 }
 0x305   : > { %8880 = vmatmul.msk.bf16.gmra.mxu3 %vm3041_vm11, %v2903_v36  ;;  %8887 = vmatmul.msk.bf16.gmra.mxu1 %vm3041_vm11, %v2903_v36  ;;  %v2918_v26 = vsel %vm11288_vm4, %v2906_v2, 0  ;;  %v2919_v44 = vsel %vm11288_vm4, %v2909_v33, 0  ;;  %v9030_v36 = vor.u32 %v10531_v7, %v9029_v31  ;;  %v9070_v4 = vor.u32 %v10541_v14, %v9069_v23  ;;  %v9015_v31 = vld [vmem:[%s16397_s5 + $0x158] sm:$0xf0] }
 0x306   : > { %3806 = vmatpush.bf16.msrb.mxu0 %v9034_v19  ;;  %3853 = vmatpush.bf16.msrb.mxu1 %v9074_v20 }
 0x307   : > { %3718 = vmatpush.bf16.msrb.mxu2 %v9030_v36  ;;  %3765 = vmatpush.bf16.msrb.mxu3 %v9070_v4 }
 0x30a   : > { %3807 = vmatpush.bf16.msrb.mxu0 %v9026_v62 }
 0x30b   : > { %3719 = vmatpush.bf16.msrb.mxu2 %v9022_v3 }
 0x314   : > { %3101 = vmatmul.bf16.gmra.mxu2 %v2918_v26  ;;  %3189 = vmatmul.bf16.gmra.mxu0 %v2918_v26 }
 0x315   : > { %8881 = vmatmul.msk.bf16.gmra.mxu3 %vm3041_vm11, %v2919_v44  ;;  %8888 = vmatmul.msk.bf16.gmra.mxu1 %vm3041_vm11, %v2919_v44 }
 0x324   : > { %3368 = vmatmul.bf16.vlgmr.msra.gmra.mxu2 %v12567_v53  ;;  %3456 = vmatmul.bf16.vlgmr.msra.gmra.mxu0 %v12567_v53 }
 0x325   : > { %8969 = vmatmul.msk.bf16.vlgmr.msra.gmra.mxu3 %vm3041_vm11, %v12569_v27  ;;  %8976 = vmatmul.msk.bf16.vlgmr.msra.gmra.mxu1 %vm3041_vm11, %v12569_v27 }
 0x331   : > { %v3160_v42 = vpop.f32.mrf.mxu0 }
 0x332   : > { %v3204_v38 = vpop.f32.mrf.mxu1 }
 0x333   : > { %v13062_v21 = vadd.f32 %v3204_v38, %v3160_v42 }
 0x334   : > { %3373 = vmatmul.bf16.gmra.mxu2 %v12625_v47  ;;  %3461 = vmatmul.bf16.gmra.mxu0 %v12625_v47 }
 0x335   : > { %8970 = vmatmul.msk.bf16.gmra.mxu3 %vm3041_vm11, %v12627_v40  ;;  %8977 = vmatmul.msk.bf16.gmra.mxu1 %vm3041_vm11, %v12627_v40 }
 0x337   : > { %v3072_v6 = vpop.f32.mrf.mxu2 }
 0x338   : > { %v3116_v25 = vpop.f32.mrf.mxu3 }
 0x339   : > { %v13076_v58 = vadd.f32 %v3116_v25, %v3072_v6  ;;  %v3162_v54 = vpop.f32.mrf.mxu0  ;;  %v9014_v25 = vor.u32 %v10527_v48, %v9013_v45 }
 0x33a   : > { %v3206_v46 = vpop.f32.mrf.mxu1 }
 0x33b   : > { %v13078_v12 = vadd.f32 %v3206_v46, %v3162_v54  ;;  %v10526_v46 = vld [vmem:[%s16397_s5 + $0x154] sm:$0xf]  ;;  %3720 = vmatpush.bf16.msrb.mxu2 %v9014_v25 }
 0x33c   : > { %v9018_v7 = vor.u32 %v10526_v46, %v9015_v31 }
 0x33e   : > { %3808 = vmatpush.bf16.msrb.mxu0 %v9018_v7 }
 0x33f   : > { %v3074_v1 = vpop.f32.mrf.mxu2 }
 0x340   : > { %v3118_v17 = vpop.f32.mrf.mxu3 }
 0x341   : > { %v13092_v39 = vadd.f32 %v3118_v17, %v3074_v1  ;;  %v3165_v60 = vpop.f32.mrf.mxu0 }
 0x342   : > { %v3209_v52 = vpop.f32.mrf.mxu1 }
 0x343   : > { %v13094_v61 = vadd.f32 %v3209_v52, %v3165_v60  ;;  %v9005_v60 = vld [vmem:[%s16397_s5 + $0x140] sm:$0xf]  ;;  %v10525_v52 = vld [vmem:[%s16397_s5 + $0x144] sm:$0xf0] }
 0x344   : > { %3378 = vmatmul.bf16.gmra.mxu2 %v12707_v51  ;;  %3466 = vmatmul.bf16.gmra.mxu0 %v12707_v51  ;;  %v9006_v50 = vor.u32 %v10525_v52, %v9005_v60  ;;  %v3537_v52 = vrot.slane %v12625_v47, 1 }
 0x345   : > { %8971 = vmatmul.msk.bf16.gmra.mxu3 %vm3041_vm11, %v12709_v5  ;;  %8978 = vmatmul.msk.bf16.gmra.mxu1 %vm3041_vm11, %v12709_v5 }
 0x346   : > { %3721 = vmatpush.bf16.msrb.mxu2 %v9006_v50 }
 0x347   : > { %v3077_v2 = vpop.f32.mrf.mxu2 }
 0x348   : > { %v3121_v33 = vpop.f32.mrf.mxu3 }
 0x349   : > { %v13114_v26 = vadd.f32 %v3121_v33, %v3077_v2  ;;  %v3167_v49 = vpop.f32.mrf.mxu0  ;;  %v10524_v33 = vld [vmem:[%s16397_s5 + $0x144] sm:$0xf] }
 0x34a   : > { %v3211_v30 = vpop.f32.mrf.mxu1 }
 0x34b   : > { %v13116_v44 = vadd.f32 %v3211_v30, %v3167_v49  ;;  %v9007_v49 = vld [vmem:[%s16397_s5 + $0x148] sm:$0xf0] }
 0x34c   : > { %v9010_v30 = vor.u32 %v10524_v33, %v9007_v49  ;;  %v3539_v49 = vrot.slane %v12569_v27, 1 }
 0x34e   : > { %3809 = vmatpush.bf16.msrb.mxu0 %v9010_v30 }
 0x34f   : > { %v3079_v35 = vpop.f32.mrf.mxu2 }
 0x350   : > { %v3123_v16 = vpop.f32.mrf.mxu3 }
 0x351   : > { %v13124_v29 = vadd.f32 %v3123_v16, %v3079_v35  ;;  %v3170_v56 = vpop.f32.mrf.mxu0 }
 0x352   : > { %v3214_v24 = vpop.f32.mrf.mxu1 }
 0x353   : > { %v13132_v28 = vadd.f32 %v3214_v24, %v3170_v56 }
 0x354   : > { %3383 = vmatmul.bf16.gmra.mxu2 %v12774_v13  ;;  %3471 = vmatmul.bf16.gmra.mxu0 %v12774_v13 }
 0x355   : > { %8972 = vmatmul.msk.bf16.gmra.mxu3 %vm3041_vm11, %v12776_v41  ;;  %8979 = vmatmul.msk.bf16.gmra.mxu1 %vm3041_vm11, %v12776_v41 }
 0x357   : > { %v3082_v34 = vpop.f32.mrf.mxu2 }
 0x358   : > { %v3126_v42 = vpop.f32.mrf.mxu3 }
 0x359   : > { %v13140_v38 = vadd.f32 %v3126_v42, %v3082_v34  ;;  %v3172_v43 = vpop.f32.mrf.mxu0 }
 0x35a   : > { %v3216_v6 = vpop.f32.mrf.mxu1 }
 0x35b   : > { %v13148_v54 = vadd.f32 %v3216_v6, %v3172_v43 }
 0x35f   : > { %v3084_v23 = vpop.f32.mrf.mxu2 }
 0x360   : > { %v3128_v36 = vpop.f32.mrf.mxu3 }
 0x361   : > { %v13156_v14 = vadd.f32 %v3128_v36, %v3084_v23  ;;  %v3175_v4 = vpop.f32.mrf.mxu0 }
 0x362   : > { %v3219_v1 = vpop.f32.mrf.mxu1 }
 0x363   : > { %v13158_v17 = vadd.f32 %v3219_v1, %v3175_v4 }
 0x364   : > { %3388 = vmatmul.bf16.gmra.mxu2 %v12849_v8  ;;  %3476 = vmatmul.bf16.gmra.mxu0 %v12849_v8 }
 0x365   : > { %8973 = vmatmul.msk.bf16.gmra.mxu3 %vm3041_vm11, %v12851_v22  ;;  %8980 = vmatmul.msk.bf16.gmra.mxu1 %vm3041_vm11, %v12851_v22 }
 0x367   : > { %v3087_v37 = vpop.f32.mrf.mxu2 }
 0x368   : > { %v3131_v10 = vpop.f32.mrf.mxu3 }
 0x369   : > { %v13172_v19 = vadd.f32 %v3131_v10, %v3087_v37  ;;  %v3177_v9 = vpop.f32.mrf.mxu0  ;;  %v3540_v37 = vrot.slane %v12627_v40, 1 }
 0x36a   : > { %v3221_v20 = vpop.f32.mrf.mxu1 }
 0x36b   : > { %v13174_v2 = vadd.f32 %v3221_v20, %v3177_v9  ;;  %v3536_v20 = vrot.slane %v12567_v53, 1 }
 0x36f   : > { %v3089_v32 = vpop.f32.mrf.mxu2 }
 0x370   : > { %v3133_v63 = vpop.f32.mrf.mxu3 }
 0x371   : > { %v13182_v3 = vadd.f32 %v3133_v63, %v3089_v32  ;;  %v3180_v35 = vpop.f32.mrf.mxu0  ;;  %v3538_v32 = vsel %vm823_vm5, %v3536_v20, %v3537_v52  ;;  %v3541_v63 = vsel %vm823_vm5, %v3539_v49, %v3540_v37 }
 0x372   : > { %v3224_v16 = vpop.f32.mrf.mxu1 }
 0x373   : > { %v13184_v56 = vadd.f32 %v3224_v16, %v3180_v35 }
 0x374   : > { %3393 = vmatmul.bf16.gmra.mxu2 %v12950_v18  ;;  %3481 = vmatmul.bf16.gmra.mxu0 %v12950_v18 }
 0x375   : > { %8974 = vmatmul.msk.bf16.gmra.mxu3 %vm3041_vm11, %v12952_v55  ;;  %8981 = vmatmul.msk.bf16.gmra.mxu1 %vm3041_vm11, %v12952_v55 }
 0x377   : > { %v3092_v15 = vpop.f32.mrf.mxu2 }
 0x378   : > { %v3136_v11 = vpop.f32.mrf.mxu3 }
 0x379   : > { %v13192_v24 = vadd.f32 %v3136_v11, %v3092_v15  ;;  %v3182_v62 = vpop.f32.mrf.mxu0  ;;  %v3542_v11 = vrot.slane %v12707_v51, 1 }
 0x37a   : > { %v3226_v34 = vpop.f32.mrf.mxu1 }
 0x37b   : > { %v13194_v42 = vadd.f32 %v3226_v34, %v3182_v62  ;;  %v3544_v34 = vrot.slane %v12709_v5, 1 }
 0x37f   : > { %v3094_v43 = vpop.f32.mrf.mxu2 }
 0x380   : > { %v3138_v45 = vpop.f32.mrf.mxu3 }
 0x381   : > { %v13196_v48 = vadd.f32 %v3138_v45, %v3094_v43  ;;  %v3185_v6 = vpop.f32.mrf.mxu0 }
 0x382   : > { %v3229_v25 = vpop.f32.mrf.mxu1 }
 0x383   : > { %v13198_v46 = vadd.f32 %v3229_v25, %v3185_v6 }
 0x384   : > { %3398 = vmatmul.bf16.gmra.mxu2 %v12982_v57  ;;  %3486 = vmatmul.bf16.gmra.mxu0 %v12982_v57 }
 0x385   : > { %8975 = vmatmul.msk.bf16.gmra.mxu3 %vm3041_vm11, %v12984_v59  ;;  %8982 = vmatmul.msk.bf16.gmra.mxu1 %vm3041_vm11, %v12984_v59 }
 0x387   : > { %v3097_v31 = vpop.f32.mrf.mxu2 }
 0x388   : > { %v3141_v7 = vpop.f32.mrf.mxu3 }
 0x389   : > { %v13206_v23 = vadd.f32 %v3141_v7, %v3097_v31  ;;  %v3187_v36 = vpop.f32.mrf.mxu0  ;;  %v3543_v31 = vsel %vm823_vm5, %v3537_v52, %v3542_v11 }
 0x38a   : > { %v3231_v4 = vpop.f32.mrf.mxu1 }
 0x38b   : > { %v13208_v1 = vadd.f32 %v3231_v4, %v3187_v36  ;;  %v3545_v36 = vsel %vm823_vm5, %v3540_v37, %v3544_v34  ;;  %v3546_v37 = vrot.slane %v12774_v13, 1 }
 0x38f   : > { %v3099_v60 = vpop.f32.mrf.mxu2 }
 0x390   : > { %v3143_v50 = vpop.f32.mrf.mxu3 }
 0x391   : > { %v13212_v10 = vadd.f32 %v3143_v50, %v3099_v60  ;;  %v3190_v9 = vpop.f32.mrf.mxu0 }
 0x392   : > { %v3234_v33 = vpop.f32.mrf.mxu1 }
 0x393   : > { %v13216_v30 = vadd.f32 %v3234_v33, %v3190_v9 }
 0x394   : > { %3722 = vmatmul.bf16.vlgmr.msrb.gmra.mxu2 %v3538_v32  ;;  %3810 = vmatmul.bf16.vlgmr.msrb.gmra.mxu0 %v3538_v32  ;;  %v3548_v32 = vrot.slane %v12776_v41, 1 }
 0x395   : > { %9084 = vmatmul.msk.bf16.vlgmr.msrb.gmra.mxu3 %vm3041_vm11, %v3541_v63  ;;  %9092 = vmatmul.msk.bf16.vlgmr.msrb.gmra.mxu1 %vm3041_vm11, %v3541_v63 }
 0x397   : > { %v3102_v47 = vpop.f32.mrf.mxu2 }
 0x398   : > { %v3146_v40 = vpop.f32.mrf.mxu3 }
 0x399   : > { %v13222_v35 = vadd.f32 %v3146_v40, %v3102_v47  ;;  %v3192_v53 = vpop.f32.mrf.mxu0 }
 0x39a   : > { %v3236_v16 = vpop.f32.mrf.mxu1 }
 0x39b   : > { %v13224_v15 = vadd.f32 %v3236_v16, %v3192_v53  ;;  %v3547_v53 = vsel %vm823_vm5, %v3542_v11, %v3546_v37  ;;  %v3549_v16 = vsel %vm823_vm5, %v3544_v34, %v3548_v32  ;;  %v3550_v34 = vrot.slane %v12849_v8, 1  ;;  %v9281_v8 = vld [vmem:[%s16399_s7 + $0x1f0] sm:$0xf] }
 0x39d   : > { %16440 = vst [vmem:[#allocation5_spill] sm:$0xff] %v13224_v15 }
 0x39f   : > { %v3104_v27 = vpop.f32.mrf.mxu2 }
 0x3a0   : > { %v3148_v62 = vpop.f32.mrf.mxu3 }
 0x3a1   : > { %v13228_v43 = vadd.f32 %v3148_v62, %v3104_v27  ;;  %v3457_v45 = vpop.f32.mrf.mxu0 }
 0x3a2   : > { %v3458_v6 = vadd.f32 %v3457_v45, %v13062_v21  ;;  %v3501_v25 = vpop.f32.mrf.mxu1 }
 0x3a3   : > { %16441 = vst [vmem:[#allocation6_spill] sm:$0xff] %v13228_v43 }
 0x3a4   : > { %v13232_v7 = vadd.f32 %v3501_v25, %v3458_v6  ;;  %3727 = vmatmul.bf16.gmra.mxu2 %v3543_v31  ;;  %3815 = vmatmul.bf16.gmra.mxu0 %v3543_v31 }
 0x3a5   : > { %9085 = vmatmul.msk.bf16.gmra.mxu3 %vm3041_vm11, %v3545_v36  ;;  %9093 = vmatmul.msk.bf16.gmra.mxu1 %vm3041_vm11, %v3545_v36  ;;  %v3552_v36 = vrot.slane %v12851_v22, 1  ;;  %v3551_v22 = vsel %vm823_vm5, %v3546_v37, %v3550_v34  ;;  %v10590_v37 = vld [vmem:[%s16399_s7 + $0x174] sm:$0xf] }
 0x3a7   : > { %v3369_v51 = vpop.f32.mrf.mxu2 }
 0x3a8   : > { %v3370_v5 = vadd.f32 %v3369_v51, %v13076_v58  ;;  %v3413_v4 = vpop.f32.mrf.mxu3 }
 0x3a9   : > { %v3459_v60 = vpop.f32.mrf.mxu0 }
 0x3aa   : > { %v13238_v50 = vadd.f32 %v3413_v4, %v3370_v5  ;;  %v3460_v21 = vadd.f32 %v3459_v60, %v13078_v12  ;;  %v3503_v52 = vpop.f32.mrf.mxu1  ;;  %v10591_v60 = vld [vmem:[%s16399_s7 + $0x174] sm:$0xf0] }
 0x3ac   : > { %v13241_v9 = vadd.f32 %v3503_v52, %v3460_v21  ;;  %v3553_v52 = vsel %vm823_vm5, %v3548_v32, %v3552_v36 }
 0x3af   : > { %v3371_v20 = vpop.f32.mrf.mxu2 }
 0x3b0   : > { %v3372_v33 = vadd.f32 %v3371_v20, %v13092_v39  ;;  %v3415_v49 = vpop.f32.mrf.mxu3 }
 0x3b1   : > { %v3462_v63 = vpop.f32.mrf.mxu0 }
 0x3b2   : > { %v13246_v47 = vadd.f32 %v3415_v49, %v3372_v33  ;;  %v3463_v58 = vadd.f32 %v3462_v63, %v13094_v61  ;;  %v3506_v40 = vpop.f32.mrf.mxu1  ;;  %v9219_v33 = vld [vmem:[%s16399_s7 + $0x178] sm:$0xf0]  ;;  %v10606_v49 = vld [vmem:[%s16399_s7 + $0x1f4] sm:$0xf] }
 0x3b3   : > { %v9222_v32 = vor.u32 %v10590_v37, %v9219_v33  ;;  %v9283_v63 = vld [vmem:[%s16399_s7 + $0x1f8] sm:$0xf0] }
 0x3b4   : > { %v13250_v12 = vadd.f32 %v3506_v40, %v3463_v58  ;;  %3732 = vmatmul.bf16.gmra.mxu2 %v3547_v53  ;;  %3820 = vmatmul.bf16.gmra.mxu0 %v3547_v53  ;;  %v9286_v40 = vor.u32 %v10606_v49, %v9283_v63 }
 0x3b5   : > { %9086 = vmatmul.msk.bf16.gmra.mxu3 %vm3041_vm11, %v3549_v16  ;;  %9094 = vmatmul.msk.bf16.gmra.mxu1 %vm3041_vm11, %v3549_v16 }
 0x3b6   : > { %4629 = vmatpush.bf16.msra.mxu0 %v9222_v32  ;;  %4673 = vmatpush.bf16.msra.mxu1 %v9286_v40  ;;  %v10587_v40 = vld [vmem:[%s16399_s7 + $0x154] sm:$0xf0] }
 0x3b7   : > { %v3374_v13 = vpop.f32.mrf.mxu2 }
 0x3b8   : > { %v3375_v41 = vadd.f32 %v3374_v13, %v13114_v26  ;;  %v3418_v39 = vpop.f32.mrf.mxu3 }
 0x3b9   : > { %v3464_v27 = vpop.f32.mrf.mxu0 }
 0x3ba   : > { %v13256_v62 = vadd.f32 %v3418_v39, %v3375_v41  ;;  %v3465_v61 = vadd.f32 %v3464_v27, %v13116_v44  ;;  %v3508_v11 = vpop.f32.mrf.mxu1  ;;  %v9217_v44 = vld [vmem:[%s16399_s7 + $0x170] sm:$0xf]  ;;  %v9209_v27 = vld [vmem:[%s16399_s7 + $0x160] sm:$0xf] }
 0x3bc   : > { %v13259_v45 = vadd.f32 %v3508_v11, %v3465_v61  ;;  %v10589_v61 = vld [vmem:[%s16399_s7 + $0x164] sm:$0xf0] }
 0x3bd   : > { %v9210_v11 = vor.u32 %v10589_v61, %v9209_v27 }
 0x3bf   : > { %v3376_v6 = vpop.f32.mrf.mxu2 }
 0x3c0   : > { %v3377_v25 = vadd.f32 %v3376_v6, %v13124_v29  ;;  %v3420_v31 = vpop.f32.mrf.mxu3  ;;  %v9218_v29 = vor.u32 %v10591_v60, %v9217_v44  ;;  %v10605_v6 = vld [vmem:[%s16399_s7 + $0x1e4] sm:$0xf0] }
 0x3c1   : > { %v3467_v51 = vpop.f32.mrf.mxu0 }
 0x3c2   : > { %v13264_v5 = vadd.f32 %v3420_v31, %v3377_v25  ;;  %v3468_v26 = vadd.f32 %v3467_v51, %v13132_v28  ;;  %v3511_v4 = vpop.f32.mrf.mxu1  ;;  %v10607_v28 = vld [vmem:[%s16399_s7 + $0x1f4] sm:$0xf0]  ;;  %4541 = vmatpush.bf16.msra.mxu2 %v9218_v29  ;;  %v3554_v51 = vrot.slane %v12950_v18, 1  ;;  %v10588_v18 = vld [vmem:[%s16399_s7 + $0x164] sm:$0xf] }
 0x3c3   : > { %v9282_v20 = vor.u32 %v10607_v28, %v9281_v8 }
 0x3c4   : > { %v13280_v21 = vadd.f32 %v3511_v4, %v3468_v26  ;;  %3737 = vmatmul.bf16.gmra.mxu2 %v3551_v22  ;;  %3825 = vmatmul.bf16.gmra.mxu0 %v3551_v22  ;;  %v3556_v4 = vrot.slane %v12952_v55, 1  ;;  %v3555_v22 = vsel %vm823_vm5, %v3550_v34, %v3554_v51  ;;  %v9211_v55 = vld [vmem:[%s16399_s7 + $0x168] sm:$0xf0] }
 0x3c5   : > { %9087 = vmatmul.msk.bf16.gmra.mxu3 %vm3041_vm11, %v3553_v52  ;;  %9095 = vmatmul.msk.bf16.gmra.mxu1 %vm3041_vm11, %v3553_v52  ;;  %v9214_v34 = vor.u32 %v10588_v18, %v9211_v55 }
 0x3c6   : > { %4585 = vmatpush.bf16.msra.mxu3 %v9282_v20  ;;  %4542 = vmatpush.bf16.msra.mxu2 %v9210_v11  ;;  %v3557_v28 = vsel %vm823_vm5, %v3552_v36, %v3556_v4  ;;  %v9275_v36 = vld [vmem:[%s16399_s7 + $0x1e8] sm:$0xf0] }
 0x3c7   : > { %v3379_v58 = vpop.f32.mrf.mxu2  ;;  %4630 = vmatpush.bf16.msra.mxu0 %v9214_v34 }
 0x3c8   : > { %v3380_v53 = vadd.f32 %v3379_v58, %v13140_v38  ;;  %v3423_v16 = vpop.f32.mrf.mxu3  ;;  %v9273_v38 = vld [vmem:[%s16399_s7 + $0x1e0] sm:$0xf]  ;;  %v9201_v58 = vld [vmem:[%s16399_s7 + $0x150] sm:$0xf] }
 0x3c9   : > { %v13298_v13 = vpop.f32.mrf.mxu0  ;;  %v9274_v25 = vor.u32 %v10605_v6, %v9273_v38  ;;  %v3558_v38 = vrot.slane %v12982_v57, 1  ;;  %v3560_v6 = vrot.slane %v12984_v59, 1  ;;  %v10586_v57 = vld [vmem:[%s16399_s7 + $0x154] sm:$0xf]  ;;  %v9203_v59 = vld [vmem:[%s16399_s7 + $0x158] sm:$0xf0] }
 0x3ca   : > { %v13300_v41 = vadd.f32 %v3423_v16, %v3380_v53  ;;  %v13302_v39 = vpop.f32.mrf.mxu1  ;;  %v9202_v53 = vor.u32 %v10587_v40, %v9201_v58  ;;  %v10603_v16 = vld [vmem:[%s16399_s7 + $0x1d4] sm:$0xf0]  ;;  %v10601_v40 = vld [vmem:[%s16399_s7 + $0x1c4] sm:$0xf0] }
 0x3cb   : > { %4586 = vmatpush.bf16.msra.mxu3 %v9274_v25 }
 0x3cc   : > { %4543 = vmatpush.bf16.msra.mxu2 %v9202_v53 }
 0x3cf   : > { %v13316_v31 = vpop.f32.mrf.mxu2 }
 0x3d0   : > { %v13319_v26 = vpop.f32.mrf.mxu3 }
 0x3d1   : > { %v3472_v44 = vpop.f32.mrf.mxu0 }
 0x3d2   : > { %v3473_v60 = vadd.f32 %v3472_v44, %v13158_v17  ;;  %v3516_v8 = vpop.f32.mrf.mxu1  ;;  %v10604_v17 = vld [vmem:[%s16399_s7 + $0x1e4] sm:$0xf] }
 0x3d3   : > { %v9278_v52 = vor.u32 %v10604_v17, %v9275_v36 }
 0x3d4   : > { %v13324_v29 = vadd.f32 %v3516_v8, %v3473_v60  ;;  %3742 = vmatmul.bf16.gmra.mxu2 %v3555_v22  ;;  %3830 = vmatmul.bf16.gmra.mxu0 %v3555_v22  ;;  %v3559_v8 = vsel %vm823_vm5, %v3554_v51, %v3558_v38  ;;  %v9206_v51 = vor.u32 %v10586_v57, %v9203_v59  ;;  %v9259_v59 = vld [vmem:[%s16399_s7 + $0x1c8] sm:$0xf0] }
 0x3d5   : > { %9088 = vmatmul.msk.bf16.gmra.mxu3 %vm3041_vm11, %v3557_v28  ;;  %9096 = vmatmul.msk.bf16.gmra.mxu1 %vm3041_vm11, %v3557_v28  ;;  %v3561_v28 = vsel %vm823_vm5, %v3556_v4, %v3560_v6  ;;  %v9267_v4 = vld [vmem:[%s16399_s7 + $0x1d8] sm:$0xf0] }
 0x3d6   : > { %4674 = vmatpush.bf16.msra.mxu1 %v9278_v52  ;;  %4631 = vmatpush.bf16.msra.mxu0 %v9206_v51 }
 0x3d7   : > { %v3384_v20 = vpop.f32.mrf.mxu2 }
 0x3d8   : > { %v3385_v37 = vadd.f32 %v3384_v20, %v13172_v19  ;;  %v3428_v33 = vpop.f32.mrf.mxu3  ;;  %v9265_v19 = vld [vmem:[%s16399_s7 + $0x1d0] sm:$0xf] }
 0x3d9   : > { %v13342_v49 = vpop.f32.mrf.mxu0  ;;  %v9266_v27 = vor.u32 %v10603_v16, %v9265_v19 }
 0x3da   : > { %v13344_v32 = vadd.f32 %v3428_v33, %v3385_v37  ;;  %v13346_v63 = vpop.f32.mrf.mxu1  ;;  %v9193_v37 = vld [vmem:[%s16399_s7 + $0x140] sm:$0xf]  ;;  %v10585_v33 = vld [vmem:[%s16399_s7 + $0x144] sm:$0xf0] }
 0x3db   : > { %4587 = vmatpush.bf16.msra.mxu3 %v9266_v27  ;;  %v9194_v58 = vor.u32 %v10585_v33, %v9193_v37 }
 0x3dd   : > { %4544 = vmatpush.bf16.msra.mxu2 %v9194_v58 }
 0x3df   : > { %v13360_v61 = vpop.f32.mrf.mxu2 }
 0x3e0   : > { %v13363_v11 = vpop.f32.mrf.mxu3 }
 0x3e1   : > { %v3477_v25 = vpop.f32.mrf.mxu0 }
 0x3e2   : > { %v3478_v44 = vadd.f32 %v3477_v25, %v13184_v56  ;;  %v3521_v60 = vpop.f32.mrf.mxu1  ;;  %v10602_v56 = vld [vmem:[%s16399_s7 + $0x1d4] sm:$0xf] }
 0x3e3   : > { %v9270_v18 = vor.u32 %v10602_v56, %v9267_v4 }
 0x3e4   : > { %v13368_v22 = vadd.f32 %v3521_v60, %v3478_v44  ;;  %3747 = vmatmul.bf16.gmra.mxu2 %v3559_v8  ;;  %3835 = vmatmul.bf16.gmra.mxu0 %v3559_v8  ;;  %v10584_v60 = vld [vmem:[%s16399_s7 + $0x144] sm:$0xf]  ;;  %v9195_v8 = vld [vmem:[%s16399_s7 + $0x148] sm:$0xf0] }
 0x3e5   : > { %9089 = vmatmul.msk.bf16.gmra.mxu3 %vm3041_vm11, %v3561_v28  ;;  %9097 = vmatmul.msk.bf16.gmra.mxu1 %vm3041_vm11, %v3561_v28  ;;  %v10600_v28 = vld [vmem:[%s16399_s7 + $0x1c4] sm:$0xf]  ;;  %v9198_v57 = vor.u32 %v10584_v60, %v9195_v8  ;;  %v3918_v8 = vld [vmem:[%s16398_s6] sm:$0x3] }
 0x3e6   : > { %4675 = vmatpush.bf16.msra.mxu1 %v9270_v18  ;;  %v9262_v51 = vor.u32 %v10600_v28, %v9259_v59 }
 0x3e7   : > { %v3389_v55 = vpop.f32.mrf.mxu2  ;;  %4632 = vmatpush.bf16.msra.mxu0 %v9198_v57  ;;  %v9249_v57 = vld [vmem:[%s16399_s7 + $0x1b0] sm:$0xf] }
 0x3e8   : > { %v3390_v17 = vadd.f32 %v3389_v55, %v13192_v24  ;;  %v3433_v34 = vpop.f32.mrf.mxu3  ;;  %v9257_v24 = vld [vmem:[%s16399_s7 + $0x1c0] sm:$0xf] }
 0x3e9   : > { %v13386_v36 = vpop.f32.mrf.mxu0  ;;  %v9258_v19 = vor.u32 %v10601_v40, %v9257_v24 }
 0x3ea   : > { %v13388_v52 = vadd.f32 %v3433_v34, %v3390_v17  ;;  %v13390_v20 = vpop.f32.mrf.mxu1  ;;  %4676 = vmatpush.bf16.msra.mxu1 %v9262_v51  ;;  %v10599_v51 = vld [vmem:[%s16399_s7 + $0x1b4] sm:$0xf0] }
 0x3eb   : > { %4588 = vmatpush.bf16.msra.mxu3 %v9258_v19 }
 0x3ef   : > { %v13404_v53 = vpop.f32.mrf.mxu2 }
 0x3f0   : > { %v13406_v16 = vpop.f32.mrf.mxu3 }
 0x3f1   : > { %v3482_v27 = vpop.f32.mrf.mxu0 }
 0x3f2   : > { %v3483_v25 = vadd.f32 %v3482_v27, %v13198_v46  ;;  %v3526_v44 = vpop.f32.mrf.mxu1  ;;  %v3572_v46 = vsel %vm823_vm5, %v3560_v6, 0 }
 0x3f4   : > { %v13421_v56 = vadd.f32 %v3526_v44, %v3483_v25  ;;  %9083 = vmatmul.msk.bf16.gmra.mxu2 %vm823_vm5, %v3558_v38  ;;  %9091 = vmatmul.msk.bf16.gmra.mxu0 %vm823_vm5, %v3558_v38 }
 0x3f5   : > { %9090 = vmatmul.msk.bf16.gmra.mxu3 %vm3041_vm11, %v3572_v46  ;;  %9098 = vmatmul.msk.bf16.gmra.mxu1 %vm3041_vm11, %v3572_v46 }
 0x3f7   : > { %v3394_v4 = vpop.f32.mrf.mxu2 }
 0x3f8   : > { %v3395_v18 = vadd.f32 %v3394_v4, %v13206_v23  ;;  %v3438_v55 = vpop.f32.mrf.mxu3  ;;  %v10582_v4 = vld [vmem:[%s16399_s7 + $0x134] sm:$0xf] }
 0x3f9   : > { %v13429_v17 = vpop.f32.mrf.mxu0 }
 0x3fa   : > { %v13431_v34 = vadd.f32 %v3438_v55, %v3395_v18  ;;  %v13433_v37 = vpop.f32.mrf.mxu1  ;;  %v9187_v18 = vld [vmem:[%s16399_s7 + $0x138] sm:$0xf0] }
 0x3fc   : > { %16442 = vst [vmem:[#allocation3_spill] sm:$0xff] %v13431_v34 }
 0x3ff   : > { %v13435_v6 = vpop.f32.mrf.mxu2 }
 0x400   : > { %v13437_v38 = vpop.f32.mrf.mxu3 }
 0x401   : > { %v3487_v33 = vpop.f32.mrf.mxu0 }
 0x402   : > { %v3488_v24 = vadd.f32 %v3487_v33, %v13216_v30  ;;  %v3531_v58 = vpop.f32.mrf.mxu1  ;;  %v9185_v30 = vld [vmem:[%s16399_s7 + $0x130] sm:$0xf]  ;;  %v9250_v33 = vor.u32 %v10599_v51, %v9249_v57 }
 0x404   : > { %v13440_v40 = vadd.f32 %v3531_v58, %v3488_v24  ;;  %v9190_v24 = vor.u32 %v10582_v4, %v9187_v18  ;;  %v10598_v58 = vld [vmem:[%s16399_s7 + $0x1b4] sm:$0xf]  ;;  %4589 = vmatpush.bf16.msra.mxu3 %v9250_v33  ;;  %v10581_v33 = vld [vmem:[%s16399_s7 + $0x124] sm:$0xf0] }
 0x406   : > { %16443 = vst [vmem:[#allocation4_spill] sm:$0xff] %v13440_v40  ;;  %4633 = vmatpush.bf16.msra.mxu0 %v9190_v24 }
 0x407   : > { %v3399_v19 = vpop.f32.mrf.mxu2 }
 0x408   : > { %v3400_v23 = vadd.f32 %v3399_v19, %v13222_v35  ;;  %v3443_v27 = vpop.f32.mrf.mxu3  ;;  %v10583_v35 = vld [vmem:[%s16399_s7 + $0x134] sm:$0xf0]  ;;  %v9251_v19 = vld [vmem:[%s16399_s7 + $0x1b8] sm:$0xf0] }
 0x409   : > { %v13443_v25 = vpop.f32.mrf.mxu0  ;;  %v9186_v46 = vor.u32 %v10583_v35, %v9185_v30  ;;  %v13480_v35 = vperm.slane %v3918_v8, 1 }
 0x40a   : > { %16444 = vst [vmem:[#allocation7_spill] sm:$0xff] %v13443_v25  ;;  %v13445_v44 = vadd.f32 %v3443_v27, %v3400_v23  ;;  %v13447_v60 = vpop.f32.mrf.mxu1  ;;  %v9254_v27 = vor.u32 %v10598_v58, %v9251_v19  ;;  %v9241_v58 = vld [vmem:[%s16399_s7 + $0x1a0] sm:$0xf] }
 0x40b   : > { %16446 = vst [vmem:[#allocation9_spill] sm:$0xff] %v13447_v60  ;;  %4545 = vmatpush.bf16.msra.mxu2 %v9186_v46 }
 0x40c   : > { %16445 = vst [vmem:[#allocation8_spill] sm:$0xff] %v13445_v44  ;;  %4677 = vmatpush.bf16.msra.mxu1 %v9254_v27  ;;  %v13487_v44 = vperm.slane %v3918_v8, 0  ;;  %v10597_v8 = vld [vmem:[%s16399_s7 + $0x1a4] sm:$0xf0] }
 0x40f   : > { %v13452_v28 = vpop.f32.mrf.mxu2 }
 0x410   : > { %16447 = vst [vmem:[#allocation10_spill] sm:$0xff] %v13452_v28  ;;  %v13463_v59 = vpop.f32.mrf.mxu3 }
 0x411   : > { %16448 = vst [vmem:[#allocation11_spill] sm:$0xff] %v13463_v59  ;;  %v3811_v55 = vpop.f32.mrf.mxu0 }
 0x412   : > { %v3855_v23 = vpop.f32.mrf.mxu1 }
 0x413   : > { %v3856_v30 = vadd.f32 %v3855_v23, %v3811_v55  ;;  %v9177_v55 = vld [vmem:[%s16399_s7 + $0x120] sm:$0xf] }
 0x414   : > { %v9178_v24 = vor.u32 %v10581_v33, %v9177_v55 }
 0x415   : > { %v3891_v57 = vadd.f32 %v3856_v30, %v13232_v7  ;;  %v9242_v30 = vor.u32 %v10597_v8, %v9241_v58 }
 0x416   : > { %4546 = vmatpush.bf16.msra.mxu2 %v9178_v24 }
 0x417   : > { %v13484_v51 = vadd.f32 %v13480_v35, %v3891_v57  ;;  %v3723_v4 = vpop.f32.mrf.mxu2  ;;  %4590 = vmatpush.bf16.msra.mxu3 %v9242_v30 }
 0x418   : > { %v3767_v18 = vpop.f32.mrf.mxu3 }
 0x419   : > { %v3981_v0 = vmin.f32 %v13484_v51, 0.0  ;;  %v3768_v59 = vadd.f32 %v3767_v18, %v3723_v4  ;;  %v3813_v46 = vpop.f32.mrf.mxu0  ;;  %vm3953_vm11 = vcmp.gt.f32.partialorder %v13484_v51, 0.0 }
 0x41a   : > { %v3857_v7 = vpop.f32.mrf.mxu1 }
 0x41b   : > { %v4010_v19 = vmul.f32 1.442695, %v3981_v0  ;;  %v3890_v23 = vadd.f32 %v3768_v59, %v13238_v50  ;;  %v3858_v27 = vadd.f32 %v3857_v7, %v3813_v46  ;;  %v10580_v0 = vld [vmem:[%s16399_s7 + $0x124] sm:$0xf]  ;;  %v9179_v50 = vld [vmem:[%s16399_s7 + $0x128] sm:$0xf0] }
 0x41c   : > { %v9182_v46 = vor.u32 %v10580_v0, %v9179_v50  ;;  %v9243_v7 = vld [vmem:[%s16399_s7 + $0x1a8] sm:$0xf0] }
 0x41d   : > { %v3924_v57 = vadd.f32 %v13487_v44, %v3890_v23  ;;  %v3893_v4 = vadd.f32 %v3858_v27, %v13241_v9  ;;  %10912 = vpow2.f32 %v4010_v19  ;;  %v10596_v9 = vld [vmem:[%s16399_s7 + $0x1a4] sm:$0xf] }
 0x41e   : > { %4634 = vmatpush.bf16.msra.mxu0 %v9182_v46  ;;  %v9246_v27 = vor.u32 %v10596_v9, %v9243_v7 }
 0x41f   : > { %v3980_v18 = vmin.f32 %v3924_v57, 0.0  ;;  %v13505_v55 = vadd.f32 %v13480_v35, %v3893_v4  ;;  %v3725_v33 = vpop.f32.mrf.mxu2  ;;  %vm3952_vm9 = vcmp.gt.f32.partialorder %v3924_v57, 0.0 }
 0x420   : > { %v3769_v59 = vpop.f32.mrf.mxu3  ;;  %4678 = vmatpush.bf16.msra.mxu1 %v9246_v27  ;;  %v9233_v27 = vld [vmem:[%s16399_s7 + $0x190] sm:$0xf] }
 0x421   : > { %v4008_v24 = vmul.f32 1.442695, %v3980_v18  ;;  %v3983_v58 = vmin.f32 %v13505_v55, 0.0  ;;  %v3770_v8 = vadd.f32 %v3769_v59, %v3725_v33  ;;  %v3816_v19 = vpop.f32.mrf.mxu0  ;;  %vm3955_vm10 = vcmp.gt.f32.partialorder %v13505_v55, 0.0 }
 0x422   : > { %v3860_v23 = vpop.f32.mrf.mxu1 }
 0x423   : > { %10914 = vpow2.f32 %v4008_v24  ;;  %v4014_v30 = vmul.f32 1.442695, %v3983_v58  ;;  %v3892_v4 = vadd.f32 %v3770_v8, %v13246_v47  ;;  %v3861_v0 = vadd.f32 %v3860_v23, %v3816_v19  ;;  %v10913_v50 = vpop.eup %10912 }
 0x424   : > { %v9100_v46 = vadd.f32 -1.0, %v10913_v50  ;;  %v10595_v50 = vld [vmem:[%s16399_s7 + $0x194] sm:$0xf0] }
 0x425   : > { %v13522_v40 = vadd.f32 %v13487_v44, %v3892_v4  ;;  %v3895_v28 = vadd.f32 %v3861_v0, %v13250_v12  ;;  %10916 = vpow2.f32 %v4014_v30  ;;  %v9169_v12 = vld [vmem:[%s16399_s7 + $0x110] sm:$0xf]  ;;  %v9234_v43 = vor.u32 %v10595_v50, %v9233_v27 }
 0x427   : > { %v3982_v18 = vmin.f32 %v13522_v40, 0.0  ;;  %v13527_v33 = vadd.f32 %v13480_v35, %v3895_v28  ;;  %v3728_v59 = vpop.f32.mrf.mxu2  ;;  %v10579_v28 = vld [vmem:[%s16399_s7 + $0x114] sm:$0xf0]  ;;  %4591 = vmatpush.bf16.msra.mxu3 %v9234_v43  ;;  %v10594_v43 = vld [vmem:[%s16399_s7 + $0x194] sm:$0xf]  ;;  %vm3954_vm12 = vcmp.gt.f32.partialorder %v13522_v40, 0.0 }
 0x428   : > { %v3772_v9 = vpop.f32.mrf.mxu3 }
 0x429   : > { %v10915_v7 = vpop.eup %10914  ;;  %v4012_v47 = vmul.f32 1.442695, %v3982_v18  ;;  %v3985_v24 = vmin.f32 %v13527_v33, 0.0  ;;  %v3773_v58 = vadd.f32 %v3772_v9, %v3728_v59  ;;  %v3818_v8 = vpop.f32.mrf.mxu0  ;;  %v4093_v59 = vsel %vm3953_vm11, %v13484_v51, %v9100_v46  ;;  %v9171_v46 = vld [vmem:[%s16399_s7 + $0x118] sm:$0xf0] }
 0x42a   : > { %v9099_v19 = vadd.f32 -1.0, %v10915_v7  ;;  %v3862_v23 = vpop.f32.mrf.mxu1  ;;  %v9170_v7 = vor.u32 %v10579_v28, %v9169_v12  ;;  %vm3957_vm13 = vcmp.gt.f32.partialorder %v13527_v33, 0.0 }
 0x42b   : > { %10918 = vpow2.f32 %v4012_v47  ;;  %v4018_v30 = vmul.f32 1.442695, %v3985_v24  ;;  %v3894_v4 = vadd.f32 %v3773_v58, %v13256_v62  ;;  %v3863_v0 = vadd.f32 %v3862_v23, %v3818_v8  ;;  %v10917_v18 = vpop.eup %10916 }
 0x42c   : > { %v4092_v9 = vsel %vm3952_vm9, %v3924_v57, %v9099_v19  ;;  %4547 = vmatpush.bf16.msra.mxu2 %v9170_v7  ;;  %v9102_v24 = vadd.f32 -1.0, %v10917_v18  ;;  %v10578_v57 = vld [vmem:[%s16399_s7 + $0x114] sm:$0xf] }
 0x42d   : > { %v13547_v60 = vpack.c.bf16 %v4093_v59, %v4092_v9  ;;  %10920 = vpow2.f32 %v4018_v30  ;;  %v13550_v47 = vadd.f32 %v13487_v44, %v3894_v4  ;;  %v3897_v62 = vadd.f32 %v3863_v0, %v13259_v45  ;;  %v9235_v30 = vld [vmem:[%s16399_s7 + $0x198] sm:$0xf0] }
 0x42e   : > { %v9174_v27 = vor.u32 %v10578_v57, %v9171_v46  ;;  %v9238_v18 = vor.u32 %v10594_v43, %v9235_v30 }
 0x42f   : > { %v3984_v58 = vmin.f32 %v13550_v47, 0.0  ;;  %v3730_v8 = vpop.f32.mrf.mxu2  ;;  %v13555_v23 = vadd.f32 %v13480_v35, %v3897_v62  ;;  %v4095_v62 = vsel %vm3955_vm10, %v13505_v55, %v9102_v24  ;;  %v3470_v55 = vadd.f32 %v13298_v13, %v13148_v54 }
 0x430   : > { %v3774_v51 = vpop.f32.mrf.mxu3  ;;  %4635 = vmatpush.bf16.msra.mxu0 %v9174_v27  ;;  %4679 = vmatpush.bf16.msra.mxu1 %v9238_v18  ;;  %v4180_v24 = vunpack.c.l.b16 %v13547_v60  ;;  %v9163_v27 = vld [vmem:[%s16399_s7 + $0x108] sm:$0xf0]  ;;  %vm3956_vm14 = vcmp.gt.f32.partialorder %v13550_v47, 0.0 }
 0x431   : > { %v10919_v45 = vpop.eup %10918  ;;  %v4016_v12 = vmul.f32 1.442695, %v3984_v58  ;;  %v3775_v19 = vadd.f32 %v3774_v51, %v3730_v8  ;;  %v3821_v28 = vpop.f32.mrf.mxu0  ;;  %v3987_v0 = vmin.f32 %v13555_v23, 0.0  ;;  %v3514_v25 = vadd.f32 %v13302_v39, %v3470_v55 }
 0x432   : > { %v9101_v4 = vadd.f32 -1.0, %v10919_v45  ;;  %v3865_v50 = vpop.f32.mrf.mxu1  ;;  %v9161_v45 = vld [vmem:[%s16399_s7 + $0x100] sm:$0xf]  ;;  %vm3959_vm2 = vcmp.gt.f32.partialorder %v13555_v23, 0.0 }
 0x433   : > { %v10921_v59 = vpop.eup %10920  ;;  %10922 = vpow2.f32 %v4016_v12  ;;  %v3896_v9 = vadd.f32 %v3775_v19, %v13264_v5  ;;  %v3866_v7 = vadd.f32 %v3865_v50, %v3821_v28  ;;  %v4022_v51 = vmul.f32 1.442695, %v3987_v0  ;;  %v10577_v5 = vld [vmem:[%s16399_s7 + $0x104] sm:$0xf0]  ;;  %v10576_v28 = vld [vmem:[%s16399_s7 + $0x104] sm:$0xf] }
 0x434   : > { %v4094_v58 = vsel %vm3954_vm12, %v13522_v40, %v9101_v4  ;;  %v9104_v8 = vadd.f32 -1.0, %v10921_v59  ;;  %v9225_v40 = vld [vmem:[%s16399_s7 + $0x180] sm:$0xf]  ;;  %v4181_v12 = vunpack.c.h.b16 %v13547_v60  ;;  %v10593_v19 = vld [vmem:[%s16399_s7 + $0x184] sm:$0xf0] }
 0x435   : > { %v4121_v57 = vpack.c.bf16 %v4095_v62, %v4094_v58  ;;  %v13576_v46 = vadd.f32 %v13487_v44, %v3896_v9  ;;  %v3899_v43 = vadd.f32 %v3866_v7, %v13280_v21  ;;  %v9162_v21 = vor.u32 %v10577_v5, %v9161_v45  ;;  %v10592_v60 = vld [vmem:[%s16399_s7 + $0x184] sm:$0xf]  ;;  %v9227_v0 = vld [vmem:[%s16399_s7 + $0x188] sm:$0xf0] }
 0x436   : > { %10924 = vpow2.f32 %v4022_v51  ;;  %v9226_v59 = vor.u32 %v10593_v19, %v9225_v40  ;;  %v9166_v9 = vor.u32 %v10576_v28, %v9163_v27  ;;  %v9230_v7 = vor.u32 %v10592_v60, %v9227_v0 }
 0x437   : > { %v4182_v30 = vunpack.c.l.b16 %v4121_v57  ;;  %v4183_v4 = vunpack.c.h.b16 %v4121_v57  ;;  %v3986_v54 = vmin.f32 %v13576_v46, 0.0  ;;  %v3733_v13 = vpop.f32.mrf.mxu2  ;;  %v13609_v50 = vadd.f32 %v13480_v35, %v3899_v43  ;;  %4548 = vmatpush.bf16.msra.mxu2 %v9162_v21 }
 0x438   : > { %v3777_v18 = vpop.f32.mrf.mxu3  ;;  %4592 = vmatpush.bf16.msra.mxu3 %v9226_v59  ;;  %4636 = vmatpush.bf16.msra.mxu0 %v9166_v9  ;;  %v4097_v39 = vsel %vm3957_vm13, %v13527_v33, %v9104_v8  ;;  %v3475_v28 = vadd.f32 %v13342_v49, %v13174_v2  ;;  %v13639_v2 = vadd.f32 %v13360_v61, %v13182_v3  ;;  %vm3958_vm3 = vcmp.gt.f32.partialorder %v13576_v46, 0.0 }
 0x439   : > { %v10923_v62 = vpop.eup %10922  ;;  %v13611_v58 = vpack.c.b16 %v4182_v30, %v4180_v24  ;;  %v13613_v51 = vpack.c.b16 %v4183_v4, %v4181_v12  ;;  %v4020_v57 = vmul.f32 1.442695, %v3986_v54  ;;  %v3778_v45 = vadd.f32 %v3777_v18, %v3733_v13  ;;  %v3823_v5 = vpop.f32.mrf.mxu0  ;;  %4680 = vmatpush.bf16.msra.mxu1 %v9230_v7 }
 0x43a   : > { %v9103_v15 = vadd.f32 -1.0, %v10923_v62  ;;  %v3989_v43 = vmin.f32 %v13609_v50, 0.0  ;;  %v3867_v34 = vpop.f32.mrf.mxu1  ;;  %v3382_v12 = vadd.f32 %v13316_v31, %v13156_v14  ;;  %vm3961_vm6 = vcmp.gt.f32.partialorder %v13609_v50, 0.0 }
 0x43b   : > { %10926 = vpow2.f32 %v4020_v57  ;;  %v3898_v40 = vadd.f32 %v3778_v45, %v13300_v41  ;;  %v3868_v24 = vadd.f32 %v3867_v34, %v3823_v5  ;;  %v4225_v8 = vshll.u32 %v13611_v58, 16 }
 0x43c   : > { %v4096_v55 = vsel %vm3956_vm14, %v13550_v47, %v9103_v15  ;;  %v4026_v21 = vmul.f32 1.442695, %v3989_v43  ;;  %v10925_v19 = vpop.eup %10924  ;;  %v3426_v34 = vadd.f32 %v13319_v26, %v3382_v12  ;;  %v13635_v47 = vadd.f32 %v13346_v63, %v3475_v28 }
 0x43d   : > { %v4122_v27 = vpack.c.bf16 %v4097_v39, %v4096_v55  ;;  %v13627_v30 = vadd.f32 %v13487_v44, %v3898_v40  ;;  %v3901_v4 = vadd.f32 %v3868_v24, %v3514_v25  ;;  %v9106_v54 = vadd.f32 -1.0, %v10925_v19 }
 0x43e   : > { %10928 = vpow2.f32 %v4026_v21  ;;  %v13644_v26 = vadd.f32 %v13386_v36, %v13194_v42  ;;  %v4227_v57 = vrot.slane %v4225_v8, 1  ;;  %v4223_v5 = vshrl.u32 %v13611_v58, 16 }
 0x43f   : > { %v3735_v41 = vpop.f32.mrf.mxu2  ;;  %v3988_v14 = vmin.f32 %v13627_v30, 0.0  ;;  %v13632_v31 = vadd.f32 %v13480_v35, %v3901_v4  ;;  %v4099_v61 = vsel %vm3959_vm2, %v13555_v23, %v9106_v54  ;;  %v4184_v45 = vunpack.c.l.b16 %v4122_v27  ;;  %v10559_v54 = vld [vmem:[%s16399_s7 + $0x74] sm:$0xf0] }
 0x440   : > { %v3779_v15 = vpop.f32.mrf.mxu3  ;;  %v4235_v43 = vshrl.u32 %v13613_v51, 16  ;;  %v4237_v23 = vshll.u32 %v13613_v51, 16  ;;  %vm3960_vm7 = vcmp.gt.f32.partialorder %v13627_v30, 0.0 }
 0x441   : > { %v10927_v33 = vpop.eup %10926  ;;  %v3780_v49 = vadd.f32 %v3779_v15, %v3735_v41  ;;  %v3826_v25 = vpop.f32.mrf.mxu0  ;;  %v4024_v60 = vmul.f32 1.442695, %v3988_v14  ;;  %v3991_v0 = vmin.f32 %v13632_v31, 0.0  ;;  %v9409_v14 = vld [vmem:[%s16399_s7 + $0xf0] sm:$0xf]  ;;  %vm3963_vm8 = vcmp.gt.f32.partialorder %v13632_v31, 0.0 }
 0x442   : > { %v9105_v13 = vadd.f32 -1.0, %v10927_v33  ;;  %v3870_v18 = vpop.f32.mrf.mxu1  ;;  %v4239_v8 = vrot.slane %v4237_v23, 1 }
 0x443   : > { %v3900_v63 = vadd.f32 %v3780_v49, %v3426_v34  ;;  %v3871_v3 = vadd.f32 %v3870_v18, %v3826_v25  ;;  %10930 = vpow2.f32 %v4024_v60  ;;  %v4030_v42 = vmul.f32 1.442695, %v3991_v0  ;;  %v9345_v34 = vld [vmem:[%s16399_s7 + $0x70] sm:$0xf]  ;;  %v10575_v60 = vld [vmem:[%s16399_s7 + $0xf4] sm:$0xf0] }
 0x444   : > { %v4098_v59 = vsel %vm3958_vm3, %v13576_v46, %v9105_v13  ;;  %v10929_v36 = vpop.eup %10928  ;;  %v4185_v46 = vunpack.c.h.b16 %v4122_v27  ;;  %v4228_v27 = vor.u32 %v4227_v57, %v4223_v5  ;;  %v9346_v13 = vor.u32 %v10559_v54, %v9345_v34  ;;  %v9337_v34 = vld [vmem:[%s16399_s7 + $0x60] sm:$0xf]  ;;  %v10557_v54 = vld [vmem:[%s16399_s7 + $0x64] sm:$0xf0] }
 0x445   : > { %v4123_v9 = vpack.c.bf16 %v4099_v61, %v4098_v59  ;;  %v13653_v7 = vadd.f32 %v13487_v44, %v3900_v63  ;;  %v3903_v62 = vadd.f32 %v3871_v3, %v13324_v29  ;;  %v9108_v39 = vadd.f32 -1.0, %v10929_v36 }
 0x446   : > { %10932 = vpow2.f32 %v4030_v42  ;;  %4891 = vmatpush.bf16.msrb.mxu2 %v9346_v13  ;;  %v9410_v42 = vor.u32 %v10575_v60, %v9409_v14  ;;  %v4240_v23 = vor.u32 %v4239_v8, %v4235_v43  ;;  %v10574_v43 = vld [vmem:[%s16399_s7 + $0xf4] sm:$0xf]  ;;  %v9338_v13 = vor.u32 %v10557_v54, %v9337_v34 }
 0x447   : > { %v4186_v40 = vunpack.c.l.b16 %v4123_v9  ;;  %v4187_v24 = vunpack.c.h.b16 %v4123_v9  ;;  %v3738_v12 = vpop.f32.mrf.mxu2  ;;  %v3990_v55 = vmin.f32 %v13653_v7, 0.0  ;;  %v13662_v29 = vadd.f32 %v13480_v35, %v3903_v62 }
 0x448   : > { %v3782_v21 = vpop.f32.mrf.mxu3  ;;  %v4101_v36 = vsel %vm3961_vm6, %v13609_v50, %v9108_v39  ;;  %4935 = vmatpush.bf16.msrb.mxu3 %v9410_v42  ;;  %v10558_v50 = vld [vmem:[%s16399_s7 + $0x74] sm:$0xf]  ;;  %v3431_v39 = vadd.f32 %v13363_v11, %v13639_v2  ;;  %v9401_v11 = vld [vmem:[%s16399_s7 + $0xe0] sm:$0xf]  ;;  %vm3962_vm11 = vcmp.gt.f32.partialorder %v13653_v7, 0.0 }
 0x449   : > { %v13664_v19 = vpack.c.b16 %v4186_v40, %v4184_v45  ;;  %v13666_v28 = vpack.c.b16 %v4187_v24, %v4185_v46  ;;  %v3783_v4 = vadd.f32 %v3782_v21, %v3738_v12  ;;  %v3828_v41 = vpop.f32.mrf.mxu0  ;;  %v10931_v15 = vpop.eup %10930  ;;  %v4028_v33 = vmul.f32 1.442695, %v3990_v55  ;;  %v9411_v12 = vld [vmem:[%s16399_s7 + $0xf8] sm:$0xf0] }
 0x44a   : > { %v3993_v49 = vmin.f32 %v13662_v29, 0.0  ;;  %v3872_v25 = vpop.f32.mrf.mxu1  ;;  %v9107_v0 = vadd.f32 -1.0, %v10931_v15  ;;  %v13720_v55 = vadd.f32 %v13390_v20, %v13644_v26  ;;  %v10573_v15 = vld [vmem:[%s16399_s7 + $0xe4] sm:$0xf0]  ;;  %v9414_v8 = vor.u32 %v10574_v43, %v9411_v12  ;;  %4892 = vmatpush.bf16.msrb.mxu2 %v9338_v13 }
 0x44b   : > { %v3902_v18 = vadd.f32 %v3783_v4, %v13344_v32  ;;  %v3873_v63 = vadd.f32 %v3872_v25, %v3828_v41  ;;  %v4230_v3 = vshll.u32 %v13664_v19, 16  ;;  %10934 = vpow2.f32 %v4028_v33 }
 0x44c   : > { %v4034_v61 = vmul.f32 1.442695, %v3993_v49  ;;  %v4242_v59 = vshll.u32 %v13666_v28, 16  ;;  %v4100_v9 = vsel %vm3960_vm7, %v13627_v30, %v9107_v0  ;;  %v10933_v57 = vpop.eup %10932  ;;  %v9347_v30 = vld [vmem:[%s16399_s7 + $0x78] sm:$0xf0]  ;;  %5023 = vmatpush.bf16.msrb.mxu1 %v9414_v8  ;;  %vm3965_vm9 = vcmp.gt.f32.partialorder %v13662_v29, 0.0 }
 0x44d   : > { %v13691_v62 = vadd.f32 %v13487_v44, %v3902_v18  ;;  %v3905_v32 = vadd.f32 %v3873_v63, %v13635_v47  ;;  %v13694_v45 = vpack.c.bf16 %v4101_v36, %v4100_v9  ;;  %v13696_v5 = vrot.slane %v4230_v3, 1 }
 0x44e   : > { %v13698_v46 = vrot.slane %v4242_v59, 1  ;;  %10936 = vpow2.f32 %v4034_v61  ;;  %v9110_v20 = vadd.f32 -1.0, %v10933_v57  ;;  %v9350_v25 = vor.u32 %v10558_v50, %v9347_v30 }
 0x44f   : > { %v3992_v47 = vmin.f32 %v13691_v62, 0.0  ;;  %v13708_v40 = vadd.f32 %v13480_v35, %v3905_v32  ;;  %v3740_v24 = vpop.f32.mrf.mxu2  ;;  %v4233_v4 = vsel %vm460_vm1, %v4228_v27, %v13696_v5  ;;  %v9402_v3 = vor.u32 %v10573_v15, %v9401_v11 }
 0x450   : > { %v3784_v21 = vpop.f32.mrf.mxu3  ;;  %v4245_v41 = vsel %vm460_vm1, %v4240_v23, %v13698_v46  ;;  %4549 = vmatmul.bf16.vlgmr.msra.gmra.mxu2 %v4233_v4  ;;  %4637 = vmatmul.bf16.vlgmr.msra.gmra.mxu0 %v4233_v4  ;;  %v3392_v59 = vadd.f32 %v13404_v53, %v13196_v48  ;;  %v4103_v42 = vsel %vm3963_vm8, %v13632_v31, %v9110_v20  ;;  %v4188_v23 = vunpack.c.l.b16 %v13694_v45 }
 0x451   : > { %v4032_v2 = vmul.f32 1.442695, %v3992_v47  ;;  %v3995_v26 = vmin.f32 %v13708_v40, 0.0  ;;  %v3785_v27 = vadd.f32 %v3784_v21, %v3740_v24  ;;  %4593 = vmatmul.bf16.vlgmr.msra.gmra.mxu3 %v4245_v41  ;;  %v3831_v14 = vpop.f32.mrf.mxu0  ;;  %v10935_v33 = vpop.eup %10934  ;;  %4681 = vmatmul.bf16.vlgmr.msra.gmra.mxu1 %v4245_v41  ;;  %v4189_v50 = vunpack.c.h.b16 %v13694_v45 }
 0x452   : > { %v3875_v49 = vpop.f32.mrf.mxu1  ;;  %v9109_v60 = vadd.f32 -1.0, %v10935_v33  ;;  %4979 = vmatpush.bf16.msrb.mxu0 %v9350_v25  ;;  %4936 = vmatpush.bf16.msrb.mxu3 %v9402_v3  ;;  %v4246_v31 = vshrl.u32 %v13664_v19, 16  ;;  %vm3964_vm10 = vcmp.gt.f32.partialorder %v13691_v62, 0.0  ;;  %v4254_v11 = vshrl.u32 %v13666_v28, 16  ;;  %v9403_v3 = vld [vmem:[%s16399_s7 + $0xe8] sm:$0xf0] }
 0x453   : > { %10938 = vpow2.f32 %v4032_v2  ;;  %v4038_v0 = vmul.f32 1.442695, %v3995_v26  ;;  %v3904_v18 = vadd.f32 %v3785_v27, %v3431_v39  ;;  %v3876_v63 = vadd.f32 %v3875_v49, %v3831_v14  ;;  %v10556_v27 = vld [vmem:[%s16399_s7 + $0x64] sm:$0xf] }
 0x454   : > { %v10937_v61 = vpop.eup %10936  ;;  %v4102_v36 = vsel %vm3962_vm11, %v13653_v7, %v9109_v60  ;;  %v4248_v45 = vor.u32 %v4246_v31, %v13696_v5  ;;  %v9339_v5 = vld [vmem:[%s16399_s7 + $0x68] sm:$0xf0]  ;;  %vm3967_vm12 = vcmp.gt.f32.partialorder %v13708_v40, 0.0 }
 0x455   : > { %v13746_v9 = vadd.f32 %v13487_v44, %v3904_v18  ;;  %v4125_v32 = vpack.c.bf16 %v4103_v42, %v4102_v36  ;;  %10940 = vpow2.f32 %v4038_v0  ;;  %v3907_v57 = vadd.f32 %v3876_v63, %v13368_v22 }
 0x456   : > { %v9112_v47 = vadd.f32 -1.0, %v10937_v61  ;;  %v9342_v63 = vor.u32 %v10556_v27, %v9339_v5  ;;  %v3436_v61 = vadd.f32 %v13406_v16, %v3392_v59  ;;  %v9393_v59 = vld [vmem:[%s16399_s7 + $0xd0] sm:$0xf] }
 0x457   : > { %v3994_v48 = vmin.f32 %v13746_v9, 0.0  ;;  %v3743_v53 = vpop.f32.mrf.mxu2  ;;  %v4190_v7 = vunpack.c.l.b16 %v4125_v32  ;;  %v4191_v30 = vunpack.c.h.b16 %v4125_v32  ;;  %v13755_v24 = vadd.f32 %v13480_v35, %v3907_v57  ;;  %v10555_v32 = vld [vmem:[%s16399_s7 + $0x54] sm:$0xf0] }
 0x458   : > { %v3787_v43 = vpop.f32.mrf.mxu3  ;;  %v4105_v15 = vsel %vm3965_vm9, %v13662_v29, %v9112_v47  ;;  %v4256_v29 = vor.u32 %v4254_v11, %v13698_v46  ;;  %v9329_v46 = vld [vmem:[%s16399_s7 + $0x50] sm:$0xf]  ;;  %4980 = vmatpush.bf16.msrb.mxu0 %v9342_v63  ;;  %vm3966_vm13 = vcmp.gt.f32.partialorder %v13746_v9, 0.0 }
 0x459   : > { %v10939_v12 = vpop.eup %10938  ;;  %v4036_v22 = vmul.f32 1.442695, %v3994_v48  ;;  %v3788_v39 = vadd.f32 %v3787_v43, %v3743_v53  ;;  %v3833_v21 = vpop.f32.mrf.mxu0  ;;  %v13759_v4 = vpack.c.b16 %v4190_v7, %v4188_v23  ;;  %v13761_v41 = vpack.c.b16 %v4191_v30, %v4189_v50  ;;  %v10571_v50 = vld [vmem:[%s16399_s7 + $0xd4] sm:$0xf0] }
 0x45a   : > { %v9111_v34 = vadd.f32 -1.0, %v10939_v12  ;;  %v3877_v54 = vpop.f32.mrf.mxu1  ;;  %v3997_v20 = vmin.f32 %v13755_v24, 0.0  ;;  %v9330_v30 = vor.u32 %v10555_v32, %v9329_v46  ;;  %vm3969_vm14 = vcmp.gt.f32.partialorder %v13755_v24, 0.0  ;;  %v10554_v46 = vld [vmem:[%s16399_s7 + $0x54] sm:$0xf] }
 0x45b   : > { %10942 = vpow2.f32 %v4036_v22  ;;  %v3906_v2 = vadd.f32 %v3788_v39, %v13388_v52  ;;  %v3878_v26 = vadd.f32 %v3877_v54, %v3833_v21  ;;  %v10941_v14 = vpop.eup %10940  ;;  %v4250_v52 = vshll.u32 %v13759_v4, 16  ;;  %v9331_v32 = vld [vmem:[%s16399_s7 + $0x58] sm:$0xf0] }
 0x45c   : > { %v4104_v33 = vsel %vm3964_vm10, %v13691_v62, %v9111_v34  ;;  %v4258_v49 = vshll.u32 %v13761_v41, 16  ;;  %v4042_v8 = vmul.f32 1.442695, %v3997_v20  ;;  %v10572_v62 = vld [vmem:[%s16399_s7 + $0xe4] sm:$0xf]  ;;  %v9114_v42 = vadd.f32 -1.0, %v10941_v14  ;;  %4893 = vmatpush.bf16.msrb.mxu2 %v9330_v30 }
 0x45d   : > { %v13780_v25 = vpack.c.bf16 %v4105_v15, %v4104_v33  ;;  %v13783_v13 = vadd.f32 %v13487_v44, %v3906_v2  ;;  %v3909_v60 = vadd.f32 %v3878_v26, %v13720_v55  ;;  %v13786_v0 = vrot.slane %v4250_v52, 1 }
 0x45e   : > { %v13789_v18 = vrot.slane %v4258_v49, 1  ;;  %v3485_v55 = vadd.f32 %v13429_v17, %v13208_v1  ;;  %10944 = vpow2.f32 %v4042_v8  ;;  %v9406_v7 = vor.u32 %v10572_v62, %v9403_v3 }
 0x45f   : > { %v3745_v36 = vpop.f32.mrf.mxu2  ;;  %v3996_v57 = vmin.f32 %v13783_v13, 0.0  ;;  %v13808_v23 = vadd.f32 %v13480_v35, %v3909_v60  ;;  %v4253_v1 = vsel %vm460_vm1, %v4248_v45, %v13786_v0  ;;  %v9394_v45 = vor.u32 %v10571_v50, %v9393_v59 }
 0x460   : > { %v3789_v16 = vpop.f32.mrf.mxu3  ;;  %v4261_v17 = vsel %vm460_vm1, %v4256_v29, %v13789_v18  ;;  %4554 = vmatmul.bf16.gmra.mxu2 %v4253_v1  ;;  %4642 = vmatmul.bf16.gmra.mxu0 %v4253_v1  ;;  %v4107_v34 = vsel %vm3967_vm12, %v13708_v40, %v9114_v42  ;;  %v3529_v2 = vadd.f32 %v13433_v37, %v3485_v55  ;;  %v4192_v15 = vunpack.c.l.b16 %v13780_v25 }
 0x461   : > { %v10943_v48 = vpop.eup %10942  ;;  %v3790_v53 = vadd.f32 %v3789_v16, %v3745_v36  ;;  %4598 = vmatmul.bf16.gmra.mxu3 %v4261_v17  ;;  %v3836_v31 = vpop.f32.mrf.mxu0  ;;  %v4040_v43 = vmul.f32 1.442695, %v3996_v57  ;;  %v3999_v12 = vmin.f32 %v13808_v23, 0.0  ;;  %4686 = vmatmul.bf16.gmra.mxu1 %v4261_v17  ;;  %v3397_v14 = vadd.f32 %v13435_v6, %v13212_v10  ;;  %v16449_v16 = vld [vmem:[#allocation3_spill] sm:$0xff] }
 0x462   : > { %v9113_v47 = vadd.f32 -1.0, %v10943_v48  ;;  %v3880_v22 = vpop.f32.mrf.mxu1  ;;  %5024 = vmatpush.bf16.msrb.mxu1 %v9406_v7  ;;  %4937 = vmatpush.bf16.msrb.mxu3 %v9394_v45  ;;  %v4193_v40 = vunpack.c.h.b16 %v13780_v25  ;;  %vm3968_vm2 = vcmp.gt.f32.partialorder %v13783_v13, 0.0  ;;  %v4262_v10 = vshrl.u32 %v13759_v4, 16 }
 0x463   : > { %v3908_v39 = vadd.f32 %v3790_v53, %v3436_v61  ;;  %v3881_v21 = vadd.f32 %v3880_v22, %v3836_v31  ;;  %10946 = vpow2.f32 %v4040_v43  ;;  %v4046_v11 = vmul.f32 1.442695, %v3999_v12 }
 0x464   : > { %v4106_v54 = vsel %vm3966_vm13, %v13746_v9, %v9113_v47  ;;  %v10945_v20 = vpop.eup %10944  ;;  %v3441_v3 = vadd.f32 %v13437_v38, %v3397_v14  ;;  %v4264_v42 = vor.u32 %v4262_v10, %v13786_v0  ;;  %v4270_v36 = vshrl.u32 %v13761_v41, 16 }
 0x465   : > { %v4127_v26 = vpack.c.bf16 %v4107_v34, %v4106_v54  ;;  %v13827_v27 = vadd.f32 %v13487_v44, %v3908_v39  ;;  %v3911_v5 = vadd.f32 %v3881_v21, %v13421_v56  ;;  %10948 = vpow2.f32 %v4046_v11  ;;  %v16450_v39 = vld [vmem:[#allocation5_spill] sm:$0xff]  ;;  %v16451_v21 = vld [vmem:[#allocation7_spill] sm:$0xff]  ;;  %v9321_v11 = vld [vmem:[%s16399_s7 + $0x40] sm:$0xf] }
 0x466   : > { %v9116_v49 = vadd.f32 -1.0, %v10945_v20  ;;  %v9334_v50 = vor.u32 %v10554_v46, %v9331_v32  ;;  %v4272_v12 = vor.u32 %v4270_v36, %v13789_v18  ;;  %v3490_v45 = vadd.f32 %v16451_v21, %v16450_v39  ;;  %v10553_v20 = vld [vmem:[%s16399_s7 + $0x44] sm:$0xf0]  ;;  %v16452_v32 = vld [vmem:[#allocation9_spill] sm:$0xff] }
 0x467   : > { %v4194_v9 = vunpack.c.l.b16 %v4127_v26  ;;  %v4195_v33 = vunpack.c.h.b16 %v4127_v26  ;;  %v3998_v37 = vmin.f32 %v13827_v27, 0.0  ;;  %v3748_v52 = vpop.f32.mrf.mxu2  ;;  %v13838_v56 = vadd.f32 %v13480_v35, %v3911_v5 }
 0x468   : > { %v3792_v8 = vpop.f32.mrf.mxu3  ;;  %v4109_v53 = vsel %vm3969_vm14, %v13755_v24, %v9116_v49  ;;  %4981 = vmatpush.bf16.msrb.mxu0 %v9334_v50  ;;  %v10570_v24 = vld [vmem:[%s16399_s7 + $0xd4] sm:$0xf]  ;;  %vm3971_vm3 = vcmp.gt.f32.partialorder %v13808_v23, 0.0  ;;  %vm3970_vm6 = vcmp.gt.f32.partialorder %v13827_v27, 0.0 }
 0x469   : > { %v13841_v6 = vpack.c.b16 %v4194_v9, %v4192_v15  ;;  %v13843_v25 = vpack.c.b16 %v4195_v33, %v4193_v40  ;;  %v4044_v60 = vmul.f32 1.442695, %v3998_v37  ;;  %v3793_v29 = vadd.f32 %v3792_v8, %v3748_v52  ;;  %v3838_v63 = vpop.f32.mrf.mxu0  ;;  %v10947_v62 = vpop.eup %10946  ;;  %v9385_v15 = vld [vmem:[%s16399_s7 + $0xc0] sm:$0xf]  ;;  %v10569_v40 = vld [vmem:[%s16399_s7 + $0xc4] sm:$0xf0] }
 0x46a   : > { %v4001_v61 = vmin.f32 %v13838_v56, 0.0  ;;  %v3882_v55 = vpop.f32.mrf.mxu1  ;;  %v9115_v57 = vadd.f32 -1.0, %v10947_v62  ;;  %vm3973_vm7 = vcmp.gt.f32.partialorder %v13838_v56, 0.0 }
 0x46b   : > { %10950 = vpow2.f32 %v4044_v60  ;;  %v3910_v1 = vadd.f32 %v3793_v29, %v16449_v16  ;;  %v3883_v38 = vadd.f32 %v3882_v55, %v3838_v63  ;;  %v4266_v59 = vshll.u32 %v13841_v6, 16  ;;  %v10949_v48 = vpop.eup %10948  ;;  %v16453_v16 = vld [vmem:[#allocation6_spill] sm:$0xff] }
 0x46c   : > { %v4050_v17 = vmul.f32 1.442695, %v4001_v61  ;;  %v4274_v0 = vshll.u32 %v13843_v25, 16  ;;  %v4108_v31 = vsel %vm3968_vm2, %v13783_v13, %v9115_v57  ;;  %v9395_v13 = vld [vmem:[%s16399_s7 + $0xd8] sm:$0xf0]  ;;  %v9322_v29 = vor.u32 %v10553_v20, %v9321_v11 }
 0x46d   : > { %v13865_v7 = vadd.f32 %v13487_v44, %v3910_v1  ;;  %v3913_v30 = vadd.f32 %v3883_v38, %v3529_v2  ;;  %v13867_v47 = vpack.c.bf16 %v4109_v53, %v4108_v31  ;;  %v13869_v43 = vrot.slane %v4266_v59, 1  ;;  %v16454_v1 = vld [vmem:[#allocation10_spill] sm:$0xff] }
 0x46e   : > { %v13872_v22 = vrot.slane %v4274_v0, 1  ;;  %10952 = vpow2.f32 %v4050_v17  ;;  %v9118_v2 = vadd.f32 -1.0, %v10949_v48  ;;  %v9398_v60 = vor.u32 %v10570_v24, %v9395_v13  ;;  %4894 = vmatpush.bf16.msrb.mxu2 %v9322_v29  ;;  %v9387_v29 = vld [vmem:[%s16399_s7 + $0xc8] sm:$0xf0] }
 0x46f   : > { %v4000_v34 = vmin.f32 %v13865_v7, 0.0  ;;  %v13884_v54 = vadd.f32 %v13480_v35, %v3913_v30  ;;  %v3750_v18 = vpop.f32.mrf.mxu2  ;;  %v4269_v5 = vsel %vm460_vm1, %v4264_v42, %v13869_v43  ;;  %v9386_v63 = vor.u32 %v10569_v40, %v9385_v15  ;;  %v16456_v15 = vld [vmem:[#allocation8_spill] sm:$0xff] }
 0x470   : > { %v3794_v26 = vpop.f32.mrf.mxu3  ;;  %v4277_v14 = vsel %vm460_vm1, %v4272_v12, %v13872_v22  ;;  %4559 = vmatmul.bf16.gmra.mxu2 %v4269_v5  ;;  %4647 = vmatmul.bf16.gmra.mxu0 %v4269_v5  ;;  %v4111_v42 = vsel %vm3971_vm3, %v13808_v23, %v9118_v2  ;;  %v3534_v57 = vadd.f32 %v16452_v32, %v3490_v45  ;;  %vm3972_vm8 = vcmp.gt.f32.partialorder %v13865_v7, 0.0  ;;  %v16455_v23 = vld [vmem:[#allocation4_spill] sm:$0xff] }
 0x471   : > { %v10951_v9 = vpop.eup %10950  ;;  %v4048_v33 = vmul.f32 1.442695, %v4000_v34  ;;  %v4003_v37 = vmin.f32 %v13884_v54, 0.0  ;;  %v3795_v52 = vadd.f32 %v3794_v26, %v3750_v18  ;;  %4603 = vmatmul.bf16.gmra.mxu3 %v4277_v14  ;;  %v3841_v49 = vpop.f32.mrf.mxu0  ;;  %4691 = vmatmul.bf16.gmra.mxu1 %v4277_v14  ;;  %v3402_v38 = vadd.f32 %v16454_v1, %v16453_v16  ;;  %v10552_v14 = vld [vmem:[%s16399_s7 + $0x44] sm:$0xf]  ;;  %v16457_v1 = vld [vmem:[#allocation11_spill] sm:$0xff] }
 0x472   : > { %v9117_v8 = vadd.f32 -1.0, %v10951_v9  ;;  %v3885_v10 = vpop.f32.mrf.mxu1  ;;  %5025 = vmatpush.bf16.msrb.mxu1 %v9398_v60  ;;  %4938 = vmatpush.bf16.msrb.mxu3 %v9386_v63  ;;  %v4196_v59 = vunpack.c.l.b16 %v13867_v47  ;;  %v4197_v0 = vunpack.c.h.b16 %v13867_v47  ;;  %v4278_v13 = vshrl.u32 %v13841_v6, 16  ;;  %v9313_v63 = vld [vmem:[%s16399_s7 + $0x30] sm:$0xf]  ;;  %v10550_v16 = vld [vmem:[%s16399_s7 + $0x34] sm:$0xf] }
 0x473   : > { %10954 = vpow2.f32 %v4048_v33  ;;  %v4054_v62 = vmul.f32 1.442695, %v4003_v37  ;;  %v3912_v61 = vadd.f32 %v3795_v52, %v3441_v3  ;;  %v3886_v55 = vadd.f32 %v3885_v10, %v3841_v49  ;;  %v9323_v52 = vld [vmem:[%s16399_s7 + $0x48] sm:$0xf0]  ;;  %v10568_v49 = vld [vmem:[%s16399_s7 + $0xc4] sm:$0xf] }
 0x474   : > { %v4110_v36 = vsel %vm3970_vm6, %v13827_v27, %v9117_v8  ;;  %v10953_v46 = vpop.eup %10952  ;;  %v4286_v47 = vshrl.u32 %v13843_v25, 16  ;;  %v4280_v5 = vor.u32 %v4278_v13, %v13869_v43  ;;  %v9326_v32 = vor.u32 %v10552_v14, %v9323_v52 }
 0x475   : > { %v4129_v17 = vpack.c.bf16 %v4111_v42, %v4110_v36  ;;  %v13915_v3 = vadd.f32 %v13487_v44, %v3912_v61  ;;  %10956 = vpow2.f32 %v4054_v62  ;;  %v3915_v27 = vadd.f32 %v3886_v55, %v16455_v23  ;;  %v9377_v42 = vld [vmem:[%s16399_s7 + $0xb0] sm:$0xf] }
 0x476   : > { %v9120_v31 = vadd.f32 -1.0, %v10953_v46  ;;  %v4288_v36 = vor.u32 %v4286_v47, %v13872_v22  ;;  %v9315_v22 = vld [vmem:[%s16399_s7 + $0x38] sm:$0xf0]  ;;  %4982 = vmatpush.bf16.msrb.mxu0 %v9326_v32  ;;  %v9369_v47 = vld [vmem:[%s16399_s7 + $0xa0] sm:$0xf]  ;;  %vm3975_vm11 = vcmp.gt.f32.partialorder %v13884_v54, 0.0 }
 0x477   : > { %v4198_v50 = vunpack.c.l.b16 %v4129_v17  ;;  %v4199_v48 = vunpack.c.h.b16 %v4129_v17  ;;  %v3753_v53 = vpop.f32.mrf.mxu2  ;;  %v4002_v30 = vmin.f32 %v13915_v3, 0.0  ;;  %v13924_v12 = vadd.f32 %v13480_v35, %v3915_v27 }
 0x478   : > { %v3797_v24 = vpop.f32.mrf.mxu3  ;;  %v4113_v8 = vsel %vm3973_vm7, %v13838_v56, %v9120_v31  ;;  %v3446_v17 = vadd.f32 %v16457_v1, %v3402_v38  ;;  %v9390_v31 = vor.u32 %v10568_v49, %v9387_v29  ;;  %vm3974_vm9 = vcmp.gt.f32.partialorder %v13915_v3, 0.0 }
 0x479   : > { %v10955_v39 = vpop.eup %10954  ;;  %v13927_v21 = vpack.c.b16 %v4198_v50, %v4196_v59  ;;  %v13929_v45 = vpack.c.b16 %v4199_v48, %v4197_v0  ;;  %v3798_v34 = vadd.f32 %v3797_v24, %v3753_v53  ;;  %v3843_v18 = vpop.f32.mrf.mxu0  ;;  %v4052_v20 = vmul.f32 1.442695, %v4002_v30  ;;  %v10566_v0 = vld [vmem:[%s16399_s7 + $0xb4] sm:$0xf]  ;;  %v9379_v30 = vld [vmem:[%s16399_s7 + $0xb8] sm:$0xf0] }
 0x47a   : > { %v9119_v11 = vadd.f32 -1.0, %v10955_v39  ;;  %v4005_v2 = vmin.f32 %v13924_v12, 0.0  ;;  %v3887_v26 = vpop.f32.mrf.mxu1  ;;  %v9305_v24 = vld [vmem:[%s16399_s7 + $0x20] sm:$0xf]  ;;  %5026 = vmatpush.bf16.msrb.mxu1 %v9390_v31  ;;  %vm3977_vm10 = vcmp.gt.f32.partialorder %v13924_v12, 0.0 }
 0x47b   : > { %v3914_v40 = vadd.f32 %v3798_v34, %v16456_v15  ;;  %v3888_v9 = vadd.f32 %v3887_v26, %v3843_v18  ;;  %v4282_v33 = vshll.u32 %v13927_v21, 16  ;;  %v4290_v37 = vshll.u32 %v13929_v45, 16  ;;  %v10957_v43 = vpop.eup %10956 }
 0x47c   : > { %v4112_v10 = vsel %vm3972_vm8, %v13865_v7, %v9119_v11  ;;  %10958 = vpow2.f32 %v4052_v20  ;;  %v4058_v60 = vmul.f32 1.442695, %v4005_v2  ;;  %v10551_v7 = vld [vmem:[%s16399_s7 + $0x34] sm:$0xf0]  ;;  %v9122_v23 = vadd.f32 -1.0, %v10957_v43 }
 0x47d   : > { %v13958_v62 = vpack.c.bf16 %v4113_v8, %v4112_v10  ;;  %v13961_v61 = vadd.f32 %v13487_v44, %v3914_v40  ;;  %v3917_v56 = vadd.f32 %v3888_v9, %v3534_v57  ;;  %v13963_v55 = vrot.slane %v4282_v33, 1  ;;  %v10567_v57 = vld [vmem:[%s16399_s7 + $0xb4] sm:$0xf0]  ;;  %v10565_v11 = vld [vmem:[%s16399_s7 + $0xa4] sm:$0xf0] }
 0x47e   : > { %10960 = vpow2.f32 %v4058_v60  ;;  %v13972_v46 = vrot.slane %v4290_v37, 1  ;;  %v9314_v34 = vor.u32 %v10551_v7, %v9313_v63  ;;  %v9378_v18 = vor.u32 %v10567_v57, %v9377_v42  ;;  %v9307_v9 = vld [vmem:[%s16399_s7 + $0x28] sm:$0xf0]  ;;  %v10564_v33 = vld [vmem:[%s16399_s7 + $0xa4] sm:$0xf] }
 0x47f   : > { %v4004_v27 = vmin.f32 %v13961_v61, 0.0  ;;  %v3755_v59 = vpop.f32.mrf.mxu2  ;;  %v13989_v50 = vadd.f32 %v13480_v35, %v3917_v56  ;;  %v4285_v53 = vsel %vm460_vm1, %v4280_v5, %v13963_v55  ;;  %v10549_v35 = vld [vmem:[%s16399_s7 + $0x24] sm:$0xf0]  ;;  %v9318_v26 = vor.u32 %v10550_v16, %v9315_v22  ;;  %v10548_v5 = vld [vmem:[%s16399_s7 + $0x24] sm:$0xf] }
 0x480   : > { %v3799_v48 = vpop.f32.mrf.mxu3  ;;  %v4293_v38 = vsel %vm460_vm1, %v4288_v36, %v13972_v46  ;;  %4564 = vmatmul.bf16.gmra.mxu2 %v4285_v53  ;;  %4652 = vmatmul.bf16.gmra.mxu0 %v4285_v53  ;;  %v9382_v40 = vor.u32 %v10566_v0, %v9379_v30  ;;  %v9306_v49 = vor.u32 %v10549_v35, %v9305_v24  ;;  %v9371_v8 = vld [vmem:[%s16399_s7 + $0xa8] sm:$0xf0]  ;;  %v9297_v10 = vld [vmem:[%s16399_s7 + $0x10] sm:$0xf]  ;;  %v10547_v56 = vld [vmem:[%s16399_s7 + $0x14] sm:$0xf0]  ;;  %v4201_v36 = vunpack.c.h.b16 %v13958_v62 }
 0x481   : > { %v4056_v13 = vmul.f32 1.442695, %v4004_v27  ;;  %v3800_v39 = vadd.f32 %v3799_v48, %v3755_v59  ;;  %4608 = vmatmul.bf16.gmra.mxu3 %v4293_v38  ;;  %v4007_v2 = vmin.f32 %v13989_v50, 0.0  ;;  %4696 = vmatmul.bf16.gmra.mxu1 %v4293_v38  ;;  %v9370_v43 = vor.u32 %v10565_v11, %v9369_v47  ;;  %v9361_v7 = vld [vmem:[%s16399_s7 + $0x90] sm:$0xf] }
 0x482   : > { %v10959_v20 = vpop.eup %10958  ;;  %4895 = vmatpush.bf16.msrb.mxu2 %v9314_v34  ;;  %4939 = vmatpush.bf16.msrb.mxu3 %v9378_v18  ;;  %v4115_v60 = vsel %vm3975_vm11, %v13884_v54, %v9122_v23  ;;  %v10563_v42 = vld [vmem:[%s16399_s7 + $0x94] sm:$0xf0]  ;;  %v4200_v54 = vunpack.c.l.b16 %v13958_v62  ;;  %v9310_v32 = vor.u32 %v10548_v5, %v9307_v9  ;;  %v9299_v57 = vld [vmem:[%s16399_s7 + $0x18] sm:$0xf0]  ;;  %v9298_v62 = vor.u32 %v10547_v56, %v9297_v10  ;;  %v10562_v22 = vld [vmem:[%s16399_s7 + $0x94] sm:$0xf] }
 0x483   : > { %v9121_v14 = vadd.f32 -1.0, %v10959_v20  ;;  %10962 = vpow2.f32 %v4056_v13  ;;  %v3916_v15 = vadd.f32 %v3800_v39, %v3446_v17  ;;  %v4062_v52 = vmul.f32 1.442695, %v4007_v2  ;;  %4983 = vmatpush.bf16.msrb.mxu0 %v9318_v26  ;;  %5027 = vmatpush.bf16.msrb.mxu1 %v9382_v40  ;;  %v9363_v0 = vld [vmem:[%s16399_s7 + $0x98] sm:$0xf0] }
 0x484   : > { %v10961_v37 = vpop.eup %10960  ;;  %v9374_v17 = vor.u32 %v10564_v33, %v9371_v8  ;;  %v9362_v59 = vor.u32 %v10563_v42, %v9361_v7  ;;  %vm3976_vm12 = vcmp.gt.f32.partialorder %v13961_v61, 0.0  ;;  %v4294_v35 = vshrl.u32 %v13927_v21, 16  ;;  %v10560_v56 = vld [vmem:[%s16399_s7 + $0x84] sm:$0xf]  ;;  %v9355_v7 = vld [vmem:[%s16399_s7 + $0x88] sm:$0xf0] }
 0x485   : > { %v4114_v29 = vsel %vm3974_vm9, %v13915_v3, %v9121_v14  ;;  %v14035_v63 = vadd.f32 %v13487_v44, %v3916_v15  ;;  %v10546_v44 = vld [vmem:[%s16399_s7 + $0x14] sm:$0xf]  ;;  %v9124_v16 = vadd.f32 -1.0, %v10961_v37  ;;  %10964 = vpow2.f32 %v4062_v52  ;;  %v9353_v52 = vld [vmem:[%s16399_s7 + $0x80] sm:$0xf] }
 0x486   : > { %v4131_v3 = vpack.c.bf16 %v4115_v60, %v4114_v29  ;;  %4896 = vmatpush.bf16.msrb.mxu2 %v9306_v49  ;;  %4940 = vmatpush.bf16.msrb.mxu3 %v9370_v43  ;;  %v9302_v38 = vor.u32 %v10546_v44, %v9299_v57  ;;  %v4302_v13 = vshrl.u32 %v13929_v45, 16  ;;  %v9366_v39 = vor.u32 %v10562_v22, %v9363_v0  ;;  %v10561_v49 = vld [vmem:[%s16399_s7 + $0x84] sm:$0xf0]  ;;  %v10544_v43 = vld [vmem:[%s16399_s7 + $0x4] sm:$0xf] }
 0x487   : > { %v4006_v1 = vmin.f32 %v14035_v63, 0.0  ;;  %4984 = vmatpush.bf16.msrb.mxu0 %v9310_v32  ;;  %5028 = vmatpush.bf16.msrb.mxu1 %v9374_v17  ;;  %v4117_v34 = vsel %vm3977_vm10, %v13924_v12, %v9124_v16  ;;  %v4296_v26 = vor.u32 %v4294_v35, %v13963_v55  ;;  %vm3979_vm13 = vcmp.gt.f32.partialorder %v13989_v50, 0.0  ;;  %v9289_v55 = vld [vmem:[%s16399_s7] sm:$0xf]  ;;  %v9291_v29 = vld [vmem:[%s16399_s7 + $0x8] sm:$0xf0] }
 0x488   : > { %v4202_v23 = vunpack.c.l.b16 %v4131_v3  ;;  %v4203_v27 = vunpack.c.h.b16 %v4131_v3  ;;  %v4304_v14 = vor.u32 %v4302_v13, %v13972_v46  ;;  %vm3978_vm14 = vcmp.gt.f32.partialorder %v14035_v63, 0.0  ;;  %v10545_v46 = vld [vmem:[%s16399_s7 + $0x4] sm:$0xf0]  ;;  %v10639_v13 = vld [vmem:[%s16399_s7 + $0x2f4] sm:$0xf0] }
 0x489   : > { %v10963_v48 = vpop.eup %10962  ;;  %v4060_v53 = vmul.f32 1.442695, %v4006_v1  ;;  %v9290_v37 = vor.u32 %v10545_v46, %v9289_v55  ;;  %v9354_v60 = vor.u32 %v10561_v49, %v9353_v52  ;;  %v9561_v55 = vld [vmem:[%s16399_s7 + $0x2e0] sm:$0xf]  ;;  %v10620_v49 = vld [vmem:[%s16399_s7 + $0x264] sm:$0xf] }
 0x48a   : > { %v14062_v31 = vpack.c.b16 %v4202_v23, %v4200_v54  ;;  %v14064_v30 = vpack.c.b16 %v4203_v27, %v4201_v36  ;;  %v9123_v24 = vadd.f32 -1.0, %v10963_v48  ;;  %4897 = vmatpush.bf16.msrb.mxu2 %v9298_v62  ;;  %4941 = vmatpush.bf16.msrb.mxu3 %v9362_v59  ;;  %v9294_v54 = vor.u32 %v10544_v43, %v9291_v29  ;;  %v9499_v43 = vld [vmem:[%s16399_s7 + $0x268] sm:$0xf0] }
 0x48b   : > { %10966 = vpow2.f32 %v4060_v53  ;;  %4985 = vmatpush.bf16.msrb.mxu0 %v9302_v38  ;;  %v10965_v20 = vpop.eup %10964  ;;  %5029 = vmatpush.bf16.msrb.mxu1 %v9366_v39  ;;  %v9358_v36 = vor.u32 %v10560_v56, %v9355_v7  ;;  %v9505_v53 = vld [vmem:[%s16399_s7 + $0x270] sm:$0xf]  ;;  %v10623_v38 = vld [vmem:[%s16399_s7 + $0x274] sm:$0xf0]  ;;  %v10622_v39 = vld [vmem:[%s16399_s7 + $0x274] sm:$0xf] }
 0x48c   : > { %v4116_v18 = vsel %vm3976_vm12, %v13961_v61, %v9123_v24  ;;  %v4298_v47 = vshll.u32 %v14062_v31, 16  ;;  %v4306_v11 = vshll.u32 %v14064_v30, 16  ;;  %v9126_v40 = vadd.f32 -1.0, %v10965_v20  ;;  %v9569_v24 = vld [vmem:[%s16399_s7 + $0x2f0] sm:$0xf] }
 0x48d   : > { %v4132_v2 = vpack.c.bf16 %v4117_v34, %v4116_v18  ;;  %v4310_v16 = vshrl.u32 %v14062_v31, 16  ;;  %v4318_v17 = vshrl.u32 %v14064_v30, 16  ;;  %v9506_v35 = vor.u32 %v10623_v38, %v9505_v53  ;;  %v9507_v34 = vld [vmem:[%s16399_s7 + $0x278] sm:$0xf0]  ;;  %v9489_v56 = vld [vmem:[%s16399_s7 + $0x250] sm:$0xf] }
 0x48e   : > { %v4300_v5 = vrot.slane %v4298_v47, 1  ;;  %v4308_v15 = vrot.slane %v4306_v11, 1  ;;  %v4119_v8 = vsel %vm3979_vm13, %v13989_v50, %v9126_v40  ;;  %4898 = vmatpush.bf16.msrb.mxu2 %v9290_v37  ;;  %4942 = vmatpush.bf16.msrb.mxu3 %v9354_v60  ;;  %v9570_v18 = vor.u32 %v10639_v13, %v9569_v24  ;;  %v10638_v11 = vld [vmem:[%s16399_s7 + $0x2f4] sm:$0xf]  ;;  %v9571_v20 = vld [vmem:[%s16399_s7 + $0x2f8] sm:$0xf0] }
 0x48f   : > { %v4204_v50 = vunpack.c.l.b16 %v4132_v2  ;;  %4986 = vmatpush.bf16.msrb.mxu0 %v9294_v54  ;;  %5030 = vmatpush.bf16.msrb.mxu1 %v9358_v36  ;;  %v9510_v47 = vor.u32 %v10622_v39, %v9507_v34  ;;  %v10637_v37 = vld [vmem:[%s16399_s7 + $0x2e4] sm:$0xf0]  ;;  %v9563_v60 = vld [vmem:[%s16399_s7 + $0x2e8] sm:$0xf0]  ;;  %v10619_v7 = vld [vmem:[%s16399_s7 + $0x254] sm:$0xf0] }
 0x490   : > { %v4301_v12 = vsel %vm460_vm1, %v4296_v26, %v4300_v5  ;;  %v4309_v61 = vsel %vm460_vm1, %v4304_v14, %v4308_v15  ;;  %v4312_v27 = vor.u32 %v4310_v16, %v4300_v5  ;;  %v4320_v59 = vor.u32 %v4318_v17, %v4308_v15  ;;  %v10635_v36 = vld [vmem:[%s16399_s7 + $0x2d4] sm:$0xf0]  ;;  %v10616_v24 = vld [vmem:[%s16399_s7 + $0x244] sm:$0xf]  ;;  %v9547_v34 = vld [vmem:[%s16399_s7 + $0x2c8] sm:$0xf0] }
 0x491   : > { %v10967_v9 = vpop.eup %10966  ;;  %4569 = vmatmul.bf16.gmra.mxu2 %v4301_v12  ;;  %4613 = vmatmul.bf16.gmra.mxu3 %v4309_v61  ;;  %v9562_v52 = vor.u32 %v10637_v37, %v9561_v55  ;;  %v9490_v54 = vor.u32 %v10619_v7, %v9489_v56  ;;  %v10632_v13 = vld [vmem:[%s16399_s7 + $0x2c4] sm:$0xf]  ;;  %v9539_v56 = vld [vmem:[%s16399_s7 + $0x2b8] sm:$0xf0] }
 0x492   : > { %v9125_v33 = vadd.f32 -1.0, %v10967_v9  ;;  %4657 = vmatmul.bf16.gmra.mxu0 %v4301_v12  ;;  %4701 = vmatmul.bf16.gmra.mxu1 %v4309_v61  ;;  %v9497_v9 = vld [vmem:[%s16399_s7 + $0x260] sm:$0xf] }
 0x493   : > { %5304 = vmatpush.bf16.msra.mxu2 %v9506_v35  ;;  %5348 = vmatpush.bf16.msra.mxu3 %v9570_v18  ;;  %v9483_v35 = vld [vmem:[%s16399_s7 + $0x248] sm:$0xf0] }
 0x494   : > { %v4118_v10 = vsel %vm3978_vm14, %v14035_v63, %v9125_v33  ;;  %v4205_v63 = vunpack.c.h.b16 %v4132_v2  ;;  %v9574_v2 = vor.u32 %v10638_v11, %v9571_v20  ;;  %5392 = vmatpush.bf16.msra.mxu0 %v9510_v47  ;;  %v10621_v33 = vld [vmem:[%s16399_s7 + $0x264] sm:$0xf0]  ;;  %v9486_v39 = vor.u32 %v10616_v24, %v9483_v35  ;;  %v9531_v35 = vld [vmem:[%s16399_s7 + $0x2a8] sm:$0xf0] }
 0x495   : > { %v4133_v42 = vpack.c.bf16 %v4119_v8, %v4118_v10  ;;  %v9498_v46 = vor.u32 %v10621_v33, %v9497_v9  ;;  %v10636_v8 = vld [vmem:[%s16399_s7 + $0x2e4] sm:$0xf]  ;;  %v9502_v10 = vor.u32 %v10620_v49, %v9499_v43  ;;  %v9550_v11 = vor.u32 %v10632_v13, %v9547_v34  ;;  %v10631_v9 = vld [vmem:[%s16399_s7 + $0x2b4] sm:$0xf0] }
 0x496   : > { %5436 = vmatpush.bf16.msra.mxu1 %v9574_v2  ;;  %v9566_v29 = vor.u32 %v10636_v8, %v9563_v60  ;;  %v10614_v8 = vld [vmem:[%s16399_s7 + $0x234] sm:$0xf] }
 0x497   : > { %v4206_v3 = vunpack.c.l.b16 %v4133_v42  ;;  %v4207_v32 = vunpack.c.h.b16 %v4133_v42  ;;  %5305 = vmatpush.bf16.msra.mxu2 %v9498_v46  ;;  %5349 = vmatpush.bf16.msra.mxu3 %v9562_v52  ;;  %v9553_v42 = vld [vmem:[%s16399_s7 + $0x2d0] sm:$0xf]  ;;  %v10630_v60 = vld [vmem:[%s16399_s7 + $0x2b4] sm:$0xf] }
 0x498   : > { %5393 = vmatpush.bf16.msra.mxu0 %v9502_v10  ;;  %v9475_v10 = vld [vmem:[%s16399_s7 + $0x238] sm:$0xf0]  ;;  %v9542_v7 = vor.u32 %v10630_v60, %v9539_v56 }
 0x499   : > { %v14105_v44 = vpack.c.b16 %v4206_v3, %v4204_v50  ;;  %v14107_v57 = vpack.c.b16 %v4207_v32, %v4205_v63  ;;  %v9554_v50 = vor.u32 %v10635_v36, %v9553_v42  ;;  %v10618_v63 = vld [vmem:[%s16399_s7 + $0x254] sm:$0xf]  ;;  %v9491_v3 = vld [vmem:[%s16399_s7 + $0x258] sm:$0xf0] }
 0x49a   : > { %5437 = vmatpush.bf16.msra.mxu1 %v9566_v29  ;;  %v10634_v32 = vld [vmem:[%s16399_s7 + $0x2d4] sm:$0xf]  ;;  %v9494_v16 = vor.u32 %v10618_v63, %v9491_v3  ;;  %v9478_v29 = vor.u32 %v10614_v8, %v9475_v10  ;;  %v9523_v60 = vld [vmem:[%s16399_s7 + $0x298] sm:$0xf0] }
 0x49b   : > { %v4314_v1 = vshll.u32 %v14105_v44, 16  ;;  %v4322_v23 = vshll.u32 %v14107_v57, 16  ;;  %v4326_v26 = vshrl.u32 %v14105_v44, 16  ;;  %v4329_v5 = vshrl.u32 %v14107_v57, 16  ;;  %5306 = vmatpush.bf16.msra.mxu2 %v9490_v54  ;;  %5350 = vmatpush.bf16.msra.mxu3 %v9554_v50  ;;  %v10626_v8 = vld [vmem:[%s16399_s7 + $0x294] sm:$0xf] }
 0x49c   : > { %5394 = vmatpush.bf16.msra.mxu0 %v9494_v16  ;;  %v10613_v16 = vld [vmem:[%s16399_s7 + $0x224] sm:$0xf0] }
 0x49d   : > { %v4316_v62 = vrot.slane %v4314_v1, 1  ;;  %v4324_v22 = vrot.slane %v4322_v23, 1  ;;  %v9555_v1 = vld [vmem:[%s16399_s7 + $0x2d8] sm:$0xf0]  ;;  %v9481_v23 = vld [vmem:[%s16399_s7 + $0x240] sm:$0xf] }
 0x49e   : > { %v9558_v17 = vor.u32 %v10634_v32, %v9555_v1  ;;  %v9465_v32 = vld [vmem:[%s16399_s7 + $0x220] sm:$0xf] }
 0x49f   : > { %v4317_v0 = vsel %vm460_vm1, %v4312_v27, %v4316_v62  ;;  %v4325_v48 = vsel %vm460_vm1, %v4320_v59, %v4324_v22  ;;  %v4328_v14 = vor.u32 %v4326_v26, %v4316_v62  ;;  %v4331_v15 = vor.u32 %v4329_v5, %v4324_v22  ;;  %v10617_v27 = vld [vmem:[%s16399_s7 + $0x244] sm:$0xf0]  ;;  %v9545_v62 = vld [vmem:[%s16399_s7 + $0x2c0] sm:$0xf] }
 0x4a0   : > { %5438 = vmatpush.bf16.msra.mxu1 %v9558_v17  ;;  %v9482_v59 = vor.u32 %v10617_v27, %v9481_v23  ;;  %v10633_v22 = vld [vmem:[%s16399_s7 + $0x2c4] sm:$0xf0]  ;;  %5395 = vmatpush.bf16.msra.mxu0 %v9486_v39  ;;  %v9529_v1 = vld [vmem:[%s16399_s7 + $0x2a0] sm:$0xf]  ;;  %v9466_v17 = vor.u32 %v10613_v16, %v9465_v32 }
 0x4a1   : > { %4574 = vmatmul.bf16.gmra.mxu2 %v4317_v0  ;;  %4618 = vmatmul.bf16.gmra.mxu3 %v4325_v48  ;;  %v4346_v12 = vsel %vm11288_vm4, %v4328_v14, 0  ;;  %v4347_v61 = vsel %vm11288_vm4, %v4331_v15, 0  ;;  %v9473_v14 = vld [vmem:[%s16399_s7 + $0x230] sm:$0xf]  ;;  %v10615_v15 = vld [vmem:[%s16399_s7 + $0x234] sm:$0xf0] }
 0x4a2   : > { %4662 = vmatmul.bf16.gmra.mxu0 %v4317_v0  ;;  %4706 = vmatmul.bf16.gmra.mxu1 %v4325_v48  ;;  %v9546_v0 = vor.u32 %v10633_v22, %v9545_v62  ;;  %v10629_v23 = vld [vmem:[%s16399_s7 + $0x2a4] sm:$0xf0]  ;;  %v9449_v32 = vld [vmem:[%s16399_s7 + $0x200] sm:$0xf] }
 0x4a3   : > { %5307 = vmatpush.bf16.msra.mxu2 %v9482_v59  ;;  %v9530_v27 = vor.u32 %v10629_v23, %v9529_v1  ;;  %v10609_v16 = vld [vmem:[%s16399_s7 + $0x204] sm:$0xf0]  ;;  %v9513_v1 = vld [vmem:[%s16399_s7 + $0x280] sm:$0xf] }
 0x4a4   : > { %5351 = vmatpush.bf16.msra.mxu3 %v9546_v0  ;;  %5439 = vmatpush.bf16.msra.mxu1 %v9550_v11  ;;  %v10612_v0 = vld [vmem:[%s16399_s7 + $0x224] sm:$0xf]  ;;  %v10625_v23 = vld [vmem:[%s16399_s7 + $0x284] sm:$0xf0] }
 0x4a5   : > { %5396 = vmatpush.bf16.msra.mxu0 %v9478_v29  ;;  %v9526_v29 = vor.u32 %v10626_v8, %v9523_v60 }
 0x4a8   : > { %5440 = vmatpush.bf16.msra.mxu1 %v9542_v7 }
 0x4b1   : > { %4579 = vmatmul.bf16.gmra.mxu2 %v4346_v12  ;;  %4623 = vmatmul.bf16.gmra.mxu3 %v4347_v61 }
 0x4b2   : > { %4667 = vmatmul.bf16.gmra.mxu0 %v4346_v12  ;;  %4711 = vmatmul.bf16.gmra.mxu1 %v4347_v61  ;;  %v9537_v12 = vld [vmem:[%s16399_s7 + $0x2b0] sm:$0xf]  ;;  %v9474_v61 = vor.u32 %v10615_v15, %v9473_v14  ;;  %v10611_v14 = vld [vmem:[%s16399_s7 + $0x214] sm:$0xf0] }
 0x4b3   : > { %v9538_v33 = vor.u32 %v10631_v9, %v9537_v12  ;;  %v9521_v15 = vld [vmem:[%s16399_s7 + $0x290] sm:$0xf] }
 0x4b4   : > { %5308 = vmatpush.bf16.msra.mxu2 %v9474_v61  ;;  %v10627_v61 = vld [vmem:[%s16399_s7 + $0x294] sm:$0xf0] }
 0x4b5   : > { %5352 = vmatpush.bf16.msra.mxu3 %v9538_v33 }
 0x4b8   : > { %5309 = vmatpush.bf16.msra.mxu2 %v9466_v17  ;;  %v9450_v17 = vor.u32 %v10609_v16, %v9449_v32 }
 0x4b9   : > { %5353 = vmatpush.bf16.msra.mxu3 %v9530_v27 }
 0x4c1   : > { %4899 = vmatmul.bf16.vlgmr.msrb.gmra.mxu2 %v13611_v58  ;;  %4943 = vmatmul.bf16.vlgmr.msrb.gmra.mxu3 %v13613_v51 }
 0x4c2   : > { %4987 = vmatmul.bf16.vlgmr.msrb.gmra.mxu0 %v13611_v58  ;;  %5031 = vmatmul.bf16.vlgmr.msrb.gmra.mxu1 %v13613_v51 }
 0x4cd   : > { %v4638_v48 = vpop.f32.mrf.mxu0 }
 0x4ce   : > { %v4682_v53 = vpop.f32.mrf.mxu1 }
 0x4cf   : > { %v14209_v38 = vadd.f32 %v4682_v53, %v4638_v48  ;;  %v9467_v48 = vld [vmem:[%s16399_s7 + $0x228] sm:$0xf0]  ;;  %v10628_v53 = vld [vmem:[%s16399_s7 + $0x2a4] sm:$0xf] }
 0x4d0   : > { %v9470_v24 = vor.u32 %v10612_v0, %v9467_v48  ;;  %v9534_v34 = vor.u32 %v10628_v53, %v9531_v35  ;;  %v10608_v35 = vld [vmem:[%s16399_s7 + $0x204] sm:$0xf] }
 0x4d1   : > { %4904 = vmatmul.bf16.gmra.mxu2 %v13664_v19  ;;  %4948 = vmatmul.bf16.gmra.mxu3 %v13666_v28 }
 0x4d2   : > { %4992 = vmatmul.bf16.gmra.mxu0 %v13664_v19  ;;  %5036 = vmatmul.bf16.gmra.mxu1 %v13666_v28 }
 0x4d3   : > { %v4550_v18 = vpop.f32.mrf.mxu2  ;;  %5397 = vmatpush.bf16.msra.mxu0 %v9470_v24  ;;  %5441 = vmatpush.bf16.msra.mxu1 %v9534_v34 }
 0x4d4   : > { %v4594_v47 = vpop.f32.mrf.mxu3 }
 0x4d5   : > { %v14227_v20 = vadd.f32 %v4594_v47, %v4550_v18  ;;  %v4640_v2 = vpop.f32.mrf.mxu0 }
 0x4d6   : > { %v4684_v26 = vpop.f32.mrf.mxu1 }
 0x4d7   : > { %v14229_v5 = vadd.f32 %v4684_v26, %v4640_v2  ;;  %v9457_v26 = vld [vmem:[%s16399_s7 + $0x210] sm:$0xf]  ;;  %5442 = vmatpush.bf16.msra.mxu1 %v9526_v29 }
 0x4d8   : > { %v9458_v12 = vor.u32 %v10611_v14, %v9457_v26 }
 0x4da   : > { %5310 = vmatpush.bf16.msra.mxu2 %v9458_v12 }
 0x4db   : > { %v4552_v55 = vpop.f32.mrf.mxu2 }
 0x4dc   : > { %v4596_v46 = vpop.f32.mrf.mxu3 }
 0x4dd   : > { %v14243_v37 = vadd.f32 %v4596_v46, %v4552_v55  ;;  %v4643_v52 = vpop.f32.mrf.mxu0  ;;  %v9522_v55 = vor.u32 %v10627_v61, %v9521_v15 }
 0x4de   : > { %v4687_v49 = vpop.f32.mrf.mxu1  ;;  %5311 = vmatpush.bf16.msra.mxu2 %v9450_v17 }
 0x4df   : > { %v14245_v43 = vadd.f32 %v4687_v49, %v4643_v52  ;;  %v10610_v52 = vld [vmem:[%s16399_s7 + $0x214] sm:$0xf]  ;;  %v9459_v49 = vld [vmem:[%s16399_s7 + $0x218] sm:$0xf0]  ;;  %5354 = vmatpush.bf16.msra.mxu3 %v9522_v55 }
 0x4e0   : > { %v9462_v10 = vor.u32 %v10610_v52, %v9459_v49 }
 0x4e1   : > { %4909 = vmatmul.bf16.gmra.mxu2 %v13759_v4  ;;  %4953 = vmatmul.bf16.gmra.mxu3 %v13761_v41 }
 0x4e2   : > { %4997 = vmatmul.bf16.gmra.mxu0 %v13759_v4  ;;  %5041 = vmatmul.bf16.gmra.mxu1 %v13761_v41 }
 0x4e3   : > { %v4555_v42 = vpop.f32.mrf.mxu2  ;;  %5398 = vmatpush.bf16.msra.mxu0 %v9462_v10 }
 0x4e4   : > { %v4599_v54 = vpop.f32.mrf.mxu3 }
 0x4e5   : > { %v14263_v36 = vadd.f32 %v4599_v54, %v4555_v42  ;;  %v4645_v50 = vpop.f32.mrf.mxu0 }
 0x4e6   : > { %v4689_v63 = vpop.f32.mrf.mxu1 }
 0x4e7   : > { %v14265_v3 = vadd.f32 %v4689_v63, %v4645_v50 }
 0x4eb   : > { %v4557_v62 = vpop.f32.mrf.mxu2 }
 0x4ec   : > { %v4601_v59 = vpop.f32.mrf.mxu3 }
 0x4ed   : > { %v14279_v22 = vadd.f32 %v4601_v59, %v4557_v62  ;;  %v4648_v13 = vpop.f32.mrf.mxu0  ;;  %v9514_v59 = vor.u32 %v10625_v23, %v9513_v1 }
 0x4ee   : > { %v4692_v39 = vpop.f32.mrf.mxu1 }
 0x4ef   : > { %v14293_v18 = vadd.f32 %v4692_v39, %v4648_v13  ;;  %5355 = vmatpush.bf16.msra.mxu3 %v9514_v59  ;;  %v9451_v13 = vld [vmem:[%s16399_s7 + $0x208] sm:$0xf0]  ;;  %v10624_v39 = vld [vmem:[%s16399_s7 + $0x284] sm:$0xf] }
 0x4f0   : > { %v9454_v34 = vor.u32 %v10608_v35, %v9451_v13  ;;  %v5067_v13 = vrot.slane %v13611_v58, 1 }
 0x4f1   : > { %4914 = vmatmul.bf16.gmra.mxu2 %v13841_v6  ;;  %4958 = vmatmul.bf16.gmra.mxu3 %v13843_v25 }
 0x4f2   : > { %5002 = vmatmul.bf16.gmra.mxu0 %v13841_v6  ;;  %5046 = vmatmul.bf16.gmra.mxu1 %v13843_v25 }
 0x4f3   : > { %v4560_v47 = vpop.f32.mrf.mxu2  ;;  %5399 = vmatpush.bf16.msra.mxu0 %v9454_v34 }
 0x4f4   : > { %v4604_v11 = vpop.f32.mrf.mxu3 }
 0x4f5   : > { %v14299_v2 = vadd.f32 %v4604_v11, %v4560_v47  ;;  %v4650_v9 = vpop.f32.mrf.mxu0  ;;  %v9515_v47 = vld [vmem:[%s16399_s7 + $0x288] sm:$0xf0] }
 0x4f6   : > { %v4694_v33 = vpop.f32.mrf.mxu1  ;;  %v9518_v11 = vor.u32 %v10624_v39, %v9515_v47  ;;  %v5070_v39 = vrot.slane %v13613_v51, 1 }
 0x4f7   : > { %v14313_v46 = vadd.f32 %v4694_v33, %v4650_v9 }
 0x4f8   : > { %5443 = vmatpush.bf16.msra.mxu1 %v9518_v11 }
 0x4fb   : > { %v4562_v56 = vpop.f32.mrf.mxu2 }
 0x4fc   : > { %v4606_v7 = vpop.f32.mrf.mxu3 }
 0x4fd   : > { %v14327_v42 = vadd.f32 %v4606_v7, %v4562_v56  ;;  %v4653_v54 = vpop.f32.mrf.mxu0 }
 0x4fe   : > { %v4697_v50 = vpop.f32.mrf.mxu1 }
 0x4ff   : > { %v14329_v63 = vadd.f32 %v4697_v50, %v4653_v54 }
 0x501   : > { %4919 = vmatmul.bf16.gmra.mxu2 %v13927_v21  ;;  %4963 = vmatmul.bf16.gmra.mxu3 %v13929_v45 }
 0x502   : > { %5007 = vmatmul.bf16.gmra.mxu0 %v13927_v21  ;;  %5051 = vmatmul.bf16.gmra.mxu1 %v13929_v45 }
 0x503   : > { %v4565_v27 = vpop.f32.mrf.mxu2 }
 0x504   : > { %v4609_v62 = vpop.f32.mrf.mxu3 }
 0x505   : > { %v14347_v0 = vadd.f32 %v4609_v62, %v4565_v27  ;;  %v4655_v48 = vpop.f32.mrf.mxu0 }
 0x506   : > { %v4699_v53 = vpop.f32.mrf.mxu1 }
 0x507   : > { %v14349_v24 = vadd.f32 %v4699_v53, %v4655_v48  ;;  %v5068_v48 = vrot.slane %v13664_v19, 1  ;;  %v5071_v53 = vrot.slane %v13666_v28, 1 }
 0x50b   : > { %v4567_v26 = vpop.f32.mrf.mxu2 }
 0x50c   : > { %v4611_v14 = vpop.f32.mrf.mxu3 }
 0x50d   : > { %v14363_v15 = vadd.f32 %v4611_v14, %v4567_v26  ;;  %v5069_v26 = vsel %vm823_vm5, %v5067_v13, %v5068_v48  ;;  %v5072_v14 = vsel %vm823_vm5, %v5070_v39, %v5071_v53 }
 0x50f   : > { %v4658_v12 = vpop.f32.mrf.mxu0  ;;  %v4702_v61 = vpop.f32.mrf.mxu1 }
 0x510   : > { %v14365_v9 = vadd.f32 %v4702_v61, %v4658_v12 }
 0x511   : > { %4924 = vmatmul.bf16.gmra.mxu2 %v14062_v31  ;;  %4968 = vmatmul.bf16.gmra.mxu3 %v14064_v30 }
 0x512   : > { %5012 = vmatmul.bf16.gmra.mxu0 %v14062_v31  ;;  %5056 = vmatmul.bf16.gmra.mxu1 %v14064_v30 }
 0x514   : > { %v4570_v33 = vpop.f32.mrf.mxu2  ;;  %v4614_v55 = vpop.f32.mrf.mxu3 }
 0x515   : > { %v14371_v52 = vadd.f32 %v4614_v55, %v4570_v33 }
 0x517   : > { %v4660_v49 = vpop.f32.mrf.mxu0  ;;  %v4704_v8 = vpop.f32.mrf.mxu1 }
 0x518   : > { %v14373_v10 = vadd.f32 %v4704_v8, %v4660_v49  ;;  %v5073_v49 = vrot.slane %v13759_v4, 1  ;;  %v5075_v8 = vrot.slane %v13761_v41, 1 }
 0x51c   : > { %v4572_v60 = vpop.f32.mrf.mxu2  ;;  %v4616_v29 = vpop.f32.mrf.mxu3 }
 0x51d   : > { %v14375_v56 = vadd.f32 %v4616_v29, %v4572_v60 }
 0x51f   : > { %v4663_v7 = vpop.f32.mrf.mxu0  ;;  %v4707_v54 = vpop.f32.mrf.mxu1 }
 0x520   : > { %v14377_v50 = vadd.f32 %v4707_v54, %v4663_v7 }
 0x521   : > { %4929 = vmatmul.bf16.gmra.mxu2 %v14105_v44  ;;  %4973 = vmatmul.bf16.gmra.mxu3 %v14107_v57 }
 0x522   : > { %5017 = vmatmul.bf16.gmra.mxu0 %v14105_v44  ;;  %5061 = vmatmul.bf16.gmra.mxu1 %v14107_v57 }
 0x524   : > { %v4575_v32 = vpop.f32.mrf.mxu2  ;;  %v4619_v16 = vpop.f32.mrf.mxu3 }
 0x525   : > { %v14383_v1 = vadd.f32 %v4619_v16, %v4575_v32  ;;  %v5074_v32 = vsel %vm823_vm5, %v5068_v48, %v5073_v49  ;;  %v5076_v16 = vsel %vm823_vm5, %v5071_v53, %v5075_v8 }
 0x527   : > { %v4665_v17 = vpop.f32.mrf.mxu0  ;;  %v4709_v23 = vpop.f32.mrf.mxu1 }
 0x528   : > { %v14385_v27 = vadd.f32 %v4709_v23, %v4665_v17 }
 0x52c   : > { %v4577_v62 = vpop.f32.mrf.mxu2  ;;  %v4621_v59 = vpop.f32.mrf.mxu3 }
 0x52d   : > { %v14389_v35 = vadd.f32 %v4621_v59, %v4577_v62 }
 0x52f   : > { %v4668_v34 = vpop.f32.mrf.mxu0  ;;  %v4712_v47 = vpop.f32.mrf.mxu1 }
 0x530   : > { %v14393_v11 = vadd.f32 %v4712_v47, %v4668_v34  ;;  %v5077_v34 = vrot.slane %v13841_v6, 1  ;;  %v5079_v47 = vrot.slane %v13843_v25, 1 }
 0x531   : > { %5312 = vmatmul.bf16.vlgmr.msra.gmra.mxu2 %v5069_v26  ;;  %5356 = vmatmul.bf16.vlgmr.msra.gmra.mxu3 %v5072_v14 }
 0x532   : > { %5400 = vmatmul.bf16.vlgmr.msra.gmra.mxu0 %v5069_v26  ;;  %5444 = vmatmul.bf16.vlgmr.msra.gmra.mxu1 %v5072_v14 }
 0x534   : > { %v4580_v19 = vpop.f32.mrf.mxu2  ;;  %v4624_v28 = vpop.f32.mrf.mxu3 }
 0x535   : > { %v14397_v12 = vadd.f32 %v4624_v28, %v4580_v19 }
 0x537   : > { %v4670_v61 = vpop.f32.mrf.mxu0  ;;  %v4714_v58 = vpop.f32.mrf.mxu1 }
 0x538   : > { %v14399_v33 = vadd.f32 %v4714_v58, %v4670_v61  ;;  %v5078_v61 = vsel %vm823_vm5, %v5073_v49, %v5077_v34 }
 0x53c   : > { %v4582_v51 = vpop.f32.mrf.mxu2  ;;  %v4626_v55 = vpop.f32.mrf.mxu3 }
 0x53d   : > { %v14403_v60 = vadd.f32 %v4626_v55, %v4582_v51 }
 0x53f   : > { %16459 = vst [vmem:[#allocation3_spill] sm:$0xff] %v14403_v60  ;;  %v4988_v29 = vpop.f32.mrf.mxu0  ;;  %v5032_v7 = vpop.f32.mrf.mxu1  ;;  %v10666_v60 = vld [vmem:[%s16401_s9 + $0xd4] sm:$0xf] }
 0x540   : > { %v4989_v54 = vadd.f32 %v4988_v29, %v14209_v38 }
 0x541   : > { %5317 = vmatmul.bf16.gmra.mxu2 %v5074_v32  ;;  %5361 = vmatmul.bf16.gmra.mxu3 %v5076_v16 }
 0x542   : > { %v14408_v17 = vadd.f32 %v5032_v7, %v4989_v54  ;;  %5405 = vmatmul.bf16.gmra.mxu0 %v5074_v32  ;;  %5449 = vmatmul.bf16.gmra.mxu1 %v5076_v16  ;;  %v5081_v54 = vrot.slane %v13927_v21, 1  ;;  %v5083_v32 = vrot.slane %v13929_v45, 1  ;;  %v9721_v21 = vld [vmem:[%s16401_s9 + $0x170] sm:$0xf] }
 0x544   : > { %v4900_v23 = vpop.f32.mrf.mxu2  ;;  %v4944_v4 = vpop.f32.mrf.mxu3 }
 0x545   : > { %v4901_v41 = vadd.f32 %v4900_v23, %v14227_v20 }
 0x547   : > { %v14411_v62 = vadd.f32 %v4944_v4, %v4901_v41  ;;  %v4990_v59 = vpop.f32.mrf.mxu0  ;;  %v5034_v13 = vpop.f32.mrf.mxu1  ;;  %v9689_v41 = vld [vmem:[%s16401_s9 + $0x130] sm:$0xf] }
 0x548   : > { %v4991_v38 = vadd.f32 %v4990_v59, %v14229_v5  ;;  %v5080_v5 = vsel %vm823_vm5, %v5075_v8, %v5079_v47  ;;  %v5084_v59 = vsel %vm823_vm5, %v5079_v47, %v5083_v32  ;;  %v10686_v47 = vld [vmem:[%s16401_s9 + $0x174] sm:$0xf] }
 0x54a   : > { %v14414_v39 = vadd.f32 %v5034_v13, %v4991_v38  ;;  %v10687_v38 = vld [vmem:[%s16401_s9 + $0x174] sm:$0xf0] }
 0x54c   : > { %v4902_v48 = vpop.f32.mrf.mxu2  ;;  %v4946_v53 = vpop.f32.mrf.mxu3 }
 0x54d   : > { %v4903_v26 = vadd.f32 %v4902_v48, %v14243_v37  ;;  %v9722_v48 = vor.u32 %v10687_v38, %v9721_v21 }
 0x54f   : > { %v14419_v14 = vadd.f32 %v4946_v53, %v4903_v26  ;;  %v4993_v19 = vpop.f32.mrf.mxu0  ;;  %v5037_v20 = vpop.f32.mrf.mxu1  ;;  %6132 = vmatpush.bf16.msrb.mxu3 %v9722_v48  ;;  %v9673_v48 = vld [vmem:[%s16401_s9 + $0x110] sm:$0xf] }
 0x550   : > { %v4994_v28 = vadd.f32 %v4993_v19, %v14245_v43  ;;  %v9723_v19 = vld [vmem:[%s16401_s9 + $0x178] sm:$0xf0] }
 0x551   : > { %5322 = vmatmul.bf16.gmra.mxu2 %v5078_v61  ;;  %5366 = vmatmul.bf16.gmra.mxu3 %v5080_v5 }
 0x552   : > { %v14424_v58 = vadd.f32 %v5037_v20, %v4994_v28  ;;  %5410 = vmatmul.bf16.gmra.mxu0 %v5078_v61  ;;  %5454 = vmatmul.bf16.gmra.mxu1 %v5080_v5  ;;  %v9726_v61 = vor.u32 %v10686_v47, %v9723_v19  ;;  %v10685_v47 = vld [vmem:[%s16401_s9 + $0x164] sm:$0xf0] }
 0x554   : > { %v4905_v6 = vpop.f32.mrf.mxu2  ;;  %v4949_v25 = vpop.f32.mrf.mxu3  ;;  %6208 = vmatpush.bf16.msrb.mxu1 %v9726_v61 }
 0x555   : > { %v4906_v37 = vadd.f32 %v4905_v6, %v14263_v36 }
 0x557   : > { %v14427_v51 = vadd.f32 %v4949_v25, %v4906_v37  ;;  %v4995_v55 = vpop.f32.mrf.mxu0  ;;  %v5039_v29 = vpop.f32.mrf.mxu1 }
 0x558   : > { %v4996_v43 = vadd.f32 %v4995_v55, %v14265_v3  ;;  %v10679_v3 = vld [vmem:[%s16401_s9 + $0x134] sm:$0xf0]  ;;  %v9681_v55 = vld [vmem:[%s16401_s9 + $0x120] sm:$0xf] }
 0x559   : > { %v9690_v13 = vor.u32 %v10679_v3, %v9689_v41 }
 0x55a   : > { %v14430_v7 = vadd.f32 %v5039_v29, %v4996_v43  ;;  %v10677_v29 = vld [vmem:[%s16401_s9 + $0x124] sm:$0xf0] }
 0x55b   : > { %6090 = vmatpush.bf16.msrb.mxu2 %v9690_v13  ;;  %v9682_v43 = vor.u32 %v10677_v29, %v9681_v55 }
 0x55c   : > { %v4907_v49 = vpop.f32.mrf.mxu2  ;;  %v4951_v8 = vpop.f32.mrf.mxu3 }
 0x55d   : > { %v4908_v16 = vadd.f32 %v4907_v49, %v14279_v22  ;;  %v5082_v22 = vsel %vm823_vm5, %v5077_v34, %v5081_v54  ;;  %v9691_v34 = vld [vmem:[%s16401_s9 + $0x138] sm:$0xf0] }
 0x55f   : > { %v14435_v23 = vadd.f32 %v4951_v8, %v4908_v16  ;;  %v4998_v4 = vpop.f32.mrf.mxu0  ;;  %v5042_v36 = vpop.f32.mrf.mxu1  ;;  %v5085_v8 = vrot.slane %v14062_v31, 1  ;;  %v5087_v16 = vrot.slane %v14064_v30, 1  ;;  %6091 = vmatpush.bf16.msrb.mxu2 %v9682_v43  ;;  %v10676_v31 = vld [vmem:[%s16401_s9 + $0x124] sm:$0xf]  ;;  %v9683_v30 = vld [vmem:[%s16401_s9 + $0x128] sm:$0xf0] }
 0x560   : > { %v4999_v45 = vadd.f32 %v4998_v4, %v14293_v18  ;;  %v10678_v18 = vld [vmem:[%s16401_s9 + $0x134] sm:$0xf] }
 0x561   : > { %5327 = vmatmul.bf16.gmra.mxu2 %v5082_v22  ;;  %5371 = vmatmul.bf16.gmra.mxu3 %v5084_v59  ;;  %v9694_v26 = vor.u32 %v10678_v18, %v9691_v34  ;;  %v5086_v3 = vsel %vm823_vm5, %v5081_v54, %v5085_v8  ;;  %v5088_v21 = vsel %vm823_vm5, %v5083_v32, %v5087_v16  ;;  %v10675_v18 = vld [vmem:[%s16401_s9 + $0x114] sm:$0xf0]  ;;  %v9713_v34 = vld [vmem:[%s16401_s9 + $0x160] sm:$0xf] }
 0x562   : > { %v14452_v53 = vadd.f32 %v5042_v36, %v4999_v45  ;;  %5415 = vmatmul.bf16.gmra.mxu0 %v5082_v22  ;;  %5459 = vmatmul.bf16.gmra.mxu1 %v5084_v59  ;;  %v9686_v22 = vor.u32 %v10676_v31, %v9683_v30  ;;  %v9714_v61 = vor.u32 %v10685_v47, %v9713_v34  ;;  %v10672_v47 = vld [vmem:[%s16401_s9 + $0x104] sm:$0xf] }
 0x563   : > { %6166 = vmatpush.bf16.msrb.mxu0 %v9694_v26 }
 0x564   : > { %v4910_v20 = vpop.f32.mrf.mxu2  ;;  %v4954_v28 = vpop.f32.mrf.mxu3  ;;  %6133 = vmatpush.bf16.msrb.mxu3 %v9714_v61  ;;  %v9667_v61 = vld [vmem:[%s16401_s9 + $0x108] sm:$0xf0] }
 0x565   : > { %v4911_v5 = vadd.f32 %v4910_v20, %v14299_v2  ;;  %v5089_v20 = vrot.slane %v14105_v44, 1  ;;  %v10674_v44 = vld [vmem:[%s16401_s9 + $0x114] sm:$0xf] }
 0x567   : > { %v14467_v6 = vadd.f32 %v4954_v28, %v4911_v5  ;;  %v14469_v25 = vpop.f32.mrf.mxu0  ;;  %v14471_v37 = vpop.f32.mrf.mxu1  ;;  %6167 = vmatpush.bf16.msrb.mxu0 %v9686_v22  ;;  %v5091_v28 = vrot.slane %v14107_v57, 1  ;;  %v5090_v43 = vsel %vm823_vm5, %v5085_v8, %v5089_v20  ;;  %v9675_v57 = vld [vmem:[%s16401_s9 + $0x118] sm:$0xf0] }
 0x568   : > { %v9678_v8 = vor.u32 %v10674_v44, %v9675_v57 }
 0x56b   : > { %6168 = vmatpush.bf16.msrb.mxu0 %v9678_v8 }
 0x56c   : > { %v14479_v49 = vpop.f32.mrf.mxu2  ;;  %v14481_v2 = vpop.f32.mrf.mxu3 }
 0x56f   : > { %v5003_v4 = vpop.f32.mrf.mxu0  ;;  %v5047_v36 = vpop.f32.mrf.mxu1 }
 0x570   : > { %v5004_v41 = vadd.f32 %v5003_v4, %v14329_v63  ;;  %v5092_v4 = vsel %vm823_vm5, %v5087_v16, %v5091_v28  ;;  %v9715_v16 = vld [vmem:[%s16401_s9 + $0x168] sm:$0xf0] }
 0x571   : > { %5332 = vmatmul.bf16.gmra.mxu2 %v5086_v3  ;;  %5376 = vmatmul.bf16.gmra.mxu3 %v5088_v21 }
 0x572   : > { %v14488_v45 = vadd.f32 %v5047_v36, %v5004_v41  ;;  %5420 = vmatmul.bf16.gmra.mxu0 %v5086_v3  ;;  %5464 = vmatmul.bf16.gmra.mxu1 %v5088_v21 }
 0x574   : > { %v4915_v63 = vpop.f32.mrf.mxu2  ;;  %v4959_v59 = vpop.f32.mrf.mxu3 }
 0x575   : > { %v4916_v54 = vadd.f32 %v4915_v63, %v14347_v0  ;;  %v9674_v0 = vor.u32 %v10675_v18, %v9673_v48 }
 0x577   : > { %v14497_v32 = vadd.f32 %v4959_v59, %v4916_v54  ;;  %v14499_v13 = vpop.f32.mrf.mxu0  ;;  %v14501_v38 = vpop.f32.mrf.mxu1  ;;  %6092 = vmatpush.bf16.msrb.mxu2 %v9674_v0  ;;  %v9665_v59 = vld [vmem:[%s16401_s9 + $0x100] sm:$0xf]  ;;  %v10673_v54 = vld [vmem:[%s16401_s9 + $0x104] sm:$0xf0] }
 0x578   : > { %v9666_v48 = vor.u32 %v10673_v54, %v9665_v59 }
 0x57b   : > { %6093 = vmatpush.bf16.msrb.mxu2 %v9666_v48 }
 0x57c   : > { %v14515_v26 = vpop.f32.mrf.mxu2  ;;  %v14517_v19 = vpop.f32.mrf.mxu3 }
 0x57f   : > { %v5008_v5 = vpop.f32.mrf.mxu0  ;;  %v5052_v55 = vpop.f32.mrf.mxu1 }
 0x580   : > { %v5009_v29 = vadd.f32 %v5008_v5, %v14365_v9  ;;  %v10684_v9 = vld [vmem:[%s16401_s9 + $0x164] sm:$0xf] }
 0x581   : > { %5337 = vmatmul.bf16.gmra.mxu2 %v5090_v43  ;;  %5381 = vmatmul.bf16.gmra.mxu3 %v5092_v4  ;;  %v9718_v21 = vor.u32 %v10684_v9, %v9715_v16 }
 0x582   : > { %v14524_v36 = vadd.f32 %v5052_v55, %v5009_v29  ;;  %5425 = vmatmul.bf16.gmra.mxu0 %v5090_v43  ;;  %5469 = vmatmul.bf16.gmra.mxu1 %v5092_v4  ;;  %v9670_v55 = vor.u32 %v10672_v47, %v9667_v61 }
 0x583   : > { %6209 = vmatpush.bf16.msrb.mxu1 %v9718_v21 }
 0x584   : > { %v4920_v41 = vpop.f32.mrf.mxu2  ;;  %v4964_v3 = vpop.f32.mrf.mxu3  ;;  %6169 = vmatpush.bf16.msrb.mxu0 %v9670_v55  ;;  %v10670_v55 = vld [vmem:[%s16401_s9 + $0xf4] sm:$0xf] }
 0x585   : > { %v4921_v31 = vadd.f32 %v4920_v41, %v14371_v52 }
 0x587   : > { %v14539_v30 = vadd.f32 %v4964_v3, %v4921_v31  ;;  %v14541_v22 = vpop.f32.mrf.mxu0  ;;  %v14543_v63 = vpop.f32.mrf.mxu1 }
 0x58c   : > { %v14551_v18 = vpop.f32.mrf.mxu2  ;;  %v14553_v52 = vpop.f32.mrf.mxu3 }
 0x58f   : > { %v5013_v34 = vpop.f32.mrf.mxu0  ;;  %v5057_v0 = vpop.f32.mrf.mxu1 }
 0x590   : > { %v5014_v5 = vadd.f32 %v5013_v34, %v14377_v50  ;;  %v9657_v34 = vld [vmem:[%s16401_s9 + $0xf0] sm:$0xf] }
 0x591   : > { %9575 = vmatmul.msk.bf16.gmra.mxu2 %vm823_vm5, %v5089_v20  ;;  %9576 = vmatmul.msk.bf16.gmra.mxu3 %vm823_vm5, %v5091_v28 }
 0x592   : > { %v14564_v29 = vadd.f32 %v5057_v0, %v5014_v5  ;;  %9577 = vmatmul.msk.bf16.gmra.mxu0 %vm823_vm5, %v5089_v20  ;;  %9578 = vmatmul.msk.bf16.gmra.mxu1 %vm823_vm5, %v5091_v28  ;;  %v9705_v0 = vld [vmem:[%s16401_s9 + $0x150] sm:$0xf]  ;;  %v10683_v5 = vld [vmem:[%s16401_s9 + $0x154] sm:$0xf0] }
 0x594   : > { %v4925_v43 = vpop.f32.mrf.mxu2  ;;  %v4969_v4 = vpop.f32.mrf.mxu3 }
 0x595   : > { %v4926_v44 = vadd.f32 %v4925_v43, %v14383_v1  ;;  %v9659_v43 = vld [vmem:[%s16401_s9 + $0xf8] sm:$0xf0] }
 0x597   : > { %v14569_v57 = vadd.f32 %v4969_v4, %v4926_v44  ;;  %v14571_v9 = vpop.f32.mrf.mxu0  ;;  %v14573_v50 = vpop.f32.mrf.mxu1  ;;  %v5508_v4 = vld [vmem:[%s16400_s8] sm:$0x3]  ;;  %v9706_v44 = vor.u32 %v10683_v5, %v9705_v0 }
 0x599   : > { %6134 = vmatpush.bf16.msrb.mxu3 %v9706_v44  ;;  %v10669_v44 = vld [vmem:[%s16401_s9 + $0xe4] sm:$0xf0] }
 0x59c   : > { %v14575_v8 = vpop.f32.mrf.mxu2  ;;  %v14577_v16 = vpop.f32.mrf.mxu3 }
 0x59f   : > { %v5018_v41 = vpop.f32.mrf.mxu0  ;;  %v5062_v3 = vpop.f32.mrf.mxu1 }
 0x5a0   : > { %v5019_v20 = vadd.f32 %v5018_v41, %v14393_v11  ;;  %v10671_v11 = vld [vmem:[%s16401_s9 + $0xf4] sm:$0xf0]  ;;  %v9662_v41 = vor.u32 %v10670_v55, %v9659_v43 }
 0x5a1   : > { %v9658_v61 = vor.u32 %v10671_v11, %v9657_v34  ;;  %v14620_v11 = vperm.slane %v5508_v4, 1 }
 0x5a2   : > { %v14580_v28 = vadd.f32 %v5062_v3, %v5019_v20  ;;  %v10682_v3 = vld [vmem:[%s16401_s9 + $0x154] sm:$0xf]  ;;  %v9707_v20 = vld [vmem:[%s16401_s9 + $0x158] sm:$0xf0]  ;;  %6170 = vmatpush.bf16.msrb.mxu0 %v9662_v41 }
 0x5a3   : > { %6094 = vmatpush.bf16.msrb.mxu2 %v9658_v61  ;;  %v9649_v61 = vld [vmem:[%s16401_s9 + $0xe0] sm:$0xf] }
 0x5a4   : > { %16460 = vst [vmem:[#allocation5_spill] sm:$0xff] %v14580_v28  ;;  %v4930_v21 = vpop.f32.mrf.mxu2  ;;  %v4974_v31 = vpop.f32.mrf.mxu3 }
 0x5a5   : > { %v4931_v1 = vadd.f32 %v4930_v21, %v14397_v12  ;;  %v9710_v21 = vor.u32 %v10682_v3, %v9707_v20  ;;  %v9650_v3 = vor.u32 %v10669_v44, %v9649_v61 }
 0x5a7   : > { %v14583_v59 = vadd.f32 %v4974_v31, %v4931_v1  ;;  %v14585_v54 = vpop.f32.mrf.mxu0  ;;  %v14587_v48 = vpop.f32.mrf.mxu1  ;;  %6210 = vmatpush.bf16.msrb.mxu1 %v9710_v21  ;;  %6095 = vmatpush.bf16.msrb.mxu2 %v9650_v3 }
 0x5a9   : > { %16461 = vst [vmem:[#allocation7_spill] sm:$0xff] %v14583_v59 }
 0x5ac   : > { %v14598_v47 = vpop.f32.mrf.mxu2  ;;  %v14600_v12 = vpop.f32.mrf.mxu3 }
 0x5ad   : > { %16462 = vst [vmem:[#allocation9_spill] sm:$0xff] %v14598_v47 }
 0x5ae   : > { %16463 = vst [vmem:[#allocation6_spill] sm:$0xff] %v14600_v12  ;;  %v14624_v12 = vperm.slane %v5508_v4, 0 }
 0x5af   : > { %v5401_v31 = vpop.f32.mrf.mxu0  ;;  %v5445_v1 = vpop.f32.mrf.mxu1 }
 0x5b0   : > { %v5446_v34 = vadd.f32 %v5445_v1, %v5401_v31 }
 0x5b2   : > { %v5481_v0 = vadd.f32 %v5446_v34, %v14408_v17 }
 0x5b4   : > { %v5515_v5 = vadd.f32 %v14620_v11, %v5481_v0  ;;  %v5313_v55 = vpop.f32.mrf.mxu2  ;;  %v5357_v43 = vpop.f32.mrf.mxu3 }
 0x5b5   : > { %v5358_v40 = vadd.f32 %v5357_v43, %v5313_v55 }
 0x5b6   : > { %v5571_v41 = vmin.f32 %v5515_v5, 0.0  ;;  %vm5543_vm2 = vcmp.gt.f32.partialorder %v5515_v5, 0.0 }
 0x5b7   : > { %v5480_v20 = vadd.f32 %v5358_v40, %v14411_v62  ;;  %v5403_v17 = vpop.f32.mrf.mxu0  ;;  %v5447_v21 = vpop.f32.mrf.mxu1  ;;  %v10668_v40 = vld [vmem:[%s16401_s9 + $0xe4] sm:$0xf]  ;;  %v9651_v62 = vld [vmem:[%s16401_s9 + $0xe8] sm:$0xf0] }
 0x5b8   : > { %v5600_v31 = vmul.f32 1.442695, %v5571_v41  ;;  %v5448_v1 = vadd.f32 %v5447_v21, %v5403_v17  ;;  %v9654_v41 = vor.u32 %v10668_v40, %v9651_v62 }
 0x5b9   : > { %v5514_v4 = vadd.f32 %v14624_v12, %v5480_v20 }
 0x5ba   : > { %10968 = vpow2.f32 %v5600_v31  ;;  %v5483_v34 = vadd.f32 %v5448_v1, %v14414_v39  ;;  %6171 = vmatpush.bf16.msrb.mxu0 %v9654_v41 }
 0x5bb   : > { %v5570_v0 = vmin.f32 %v5514_v4, 0.0  ;;  %vm5542_vm3 = vcmp.gt.f32.partialorder %v5514_v4, 0.0 }
 0x5bc   : > { %v14636_v55 = vadd.f32 %v14620_v11, %v5483_v34  ;;  %v5315_v43 = vpop.f32.mrf.mxu2  ;;  %v5359_v59 = vpop.f32.mrf.mxu3 }
 0x5bd   : > { %v5598_v61 = vmul.f32 1.442695, %v5570_v0  ;;  %v5360_v44 = vadd.f32 %v5359_v59, %v5315_v43 }
 0x5be   : > { %v5573_v3 = vmin.f32 %v14636_v55, 0.0  ;;  %vm5545_vm6 = vcmp.gt.f32.partialorder %v14636_v55, 0.0 }
 0x5bf   : > { %10970 = vpow2.f32 %v5598_v61  ;;  %v5482_v39 = vadd.f32 %v5360_v44, %v14419_v14  ;;  %v5406_v20 = vpop.f32.mrf.mxu0  ;;  %v5450_v17 = vpop.f32.mrf.mxu1 }
 0x5c0   : > { %v10969_v21 = vpop.eup %10968  ;;  %v5604_v31 = vmul.f32 1.442695, %v5573_v3  ;;  %v5451_v1 = vadd.f32 %v5450_v17, %v5406_v20  ;;  %v9641_v3 = vld [vmem:[%s16401_s9 + $0xd0] sm:$0xf]  ;;  %v10667_v17 = vld [vmem:[%s16401_s9 + $0xd4] sm:$0xf0] }
 0x5c1   : > { %v5516_v34 = vadd.f32 %v14624_v12, %v5482_v39  ;;  %v9580_v47 = vadd.f32 -1.0, %v10969_v21  ;;  %v9697_v21 = vld [vmem:[%s16401_s9 + $0x140] sm:$0xf] }
 0x5c2   : > { %10972 = vpow2.f32 %v5604_v31  ;;  %v5485_v28 = vadd.f32 %v5451_v1, %v14424_v58  ;;  %v10681_v31 = vld [vmem:[%s16401_s9 + $0x144] sm:$0xf0] }
 0x5c3   : > { %v5572_v0 = vmin.f32 %v5516_v34, 0.0  ;;  %v5683_v58 = vsel %vm5543_vm2, %v5515_v5, %v9580_v47  ;;  %vm5544_vm7 = vcmp.gt.f32.partialorder %v5516_v34, 0.0 }
 0x5c4   : > { %v14649_v59 = vadd.f32 %v14620_v11, %v5485_v28  ;;  %v5318_v43 = vpop.f32.mrf.mxu2  ;;  %v5362_v40 = vpop.f32.mrf.mxu3 }
 0x5c5   : > { %v10971_v62 = vpop.eup %10970  ;;  %v5602_v14 = vmul.f32 1.442695, %v5572_v0  ;;  %v5363_v61 = vadd.f32 %v5362_v40, %v5318_v43  ;;  %v9642_v43 = vor.u32 %v10667_v17, %v9641_v3 }
 0x5c6   : > { %v9579_v44 = vadd.f32 -1.0, %v10971_v62  ;;  %v5575_v41 = vmin.f32 %v14649_v59, 0.0  ;;  %v9698_v62 = vor.u32 %v10681_v31, %v9697_v21  ;;  %vm5547_vm8 = vcmp.gt.f32.partialorder %v14649_v59, 0.0 }
 0x5c7   : > { %10974 = vpow2.f32 %v5602_v14  ;;  %v5484_v39 = vadd.f32 %v5363_v61, %v14427_v51  ;;  %v5408_v28 = vpop.f32.mrf.mxu0  ;;  %v5452_v20 = vpop.f32.mrf.mxu1  ;;  %6096 = vmatpush.bf16.msrb.mxu2 %v9642_v43 }
 0x5c8   : > { %v10973_v1 = vpop.eup %10972  ;;  %v5682_v0 = vsel %vm5542_vm3, %v5514_v4, %v9579_v44  ;;  %v5608_v47 = vmul.f32 1.442695, %v5575_v41  ;;  %v5453_v5 = vadd.f32 %v5452_v20, %v5408_v28  ;;  %6135 = vmatpush.bf16.msrb.mxu3 %v9698_v62  ;;  %v9643_v4 = vld [vmem:[%s16401_s9 + $0xd8] sm:$0xf0]  ;;  %v9699_v28 = vld [vmem:[%s16401_s9 + $0x148] sm:$0xf0] }
 0x5c9   : > { %v5710_v51 = vpack.c.bf16 %v5683_v58, %v5682_v0  ;;  %v14666_v40 = vadd.f32 %v14624_v12, %v5484_v39  ;;  %v9582_v61 = vadd.f32 -1.0, %v10973_v1  ;;  %v10680_v39 = vld [vmem:[%s16401_s9 + $0x144] sm:$0xf] }
 0x5ca   : > { %v5487_v14 = vadd.f32 %v5453_v5, %v14430_v7  ;;  %10976 = vpow2.f32 %v5608_v47  ;;  %v9646_v7 = vor.u32 %v10666_v60, %v9643_v4  ;;  %v9702_v21 = vor.u32 %v10680_v39, %v9699_v28 }
 0x5cb   : > { %v5574_v44 = vmin.f32 %v14666_v40, 0.0  ;;  %v5001_v60 = vadd.f32 %v14469_v25, %v14313_v46  ;;  %v5685_v47 = vsel %vm5545_vm6, %v14636_v55, %v9582_v61  ;;  %v5762_v46 = vunpack.c.l.b16 %v5710_v51 }
 0x5cc   : > { %v14677_v41 = vadd.f32 %v14620_v11, %v5487_v14  ;;  %v5320_v3 = vpop.f32.mrf.mxu2  ;;  %v5364_v58 = vpop.f32.mrf.mxu3  ;;  %6172 = vmatpush.bf16.msrb.mxu0 %v9646_v7  ;;  %6211 = vmatpush.bf16.msrb.mxu1 %v9702_v21  ;;  %v5763_v25 = vunpack.c.h.b16 %v5710_v51  ;;  %v9633_v51 = vld [vmem:[%s16401_s9 + $0xc0] sm:$0xf]  ;;  %vm5546_vm11 = vcmp.gt.f32.partialorder %v14666_v40, 0.0 }
 0x5cd   : > { %v10975_v20 = vpop.eup %10974  ;;  %v5365_v17 = vadd.f32 %v5364_v58, %v5320_v3  ;;  %v5606_v1 = vmul.f32 1.442695, %v5574_v44 }
 0x5ce   : > { %v9581_v31 = vadd.f32 -1.0, %v10975_v20  ;;  %v5577_v0 = vmin.f32 %v14677_v41, 0.0  ;;  %vm5549_vm9 = vcmp.gt.f32.partialorder %v14677_v41, 0.0 }
 0x5cf   : > { %v5486_v5 = vadd.f32 %v5365_v17, %v14435_v23  ;;  %v5411_v43 = vpop.f32.mrf.mxu0  ;;  %v5455_v62 = vpop.f32.mrf.mxu1  ;;  %10978 = vpow2.f32 %v5606_v1  ;;  %v5045_v23 = vadd.f32 %v14471_v37, %v5001_v60  ;;  %v10665_v37 = vld [vmem:[%s16401_s9 + $0xc4] sm:$0xf0]  ;;  %v4913_v60 = vadd.f32 %v14479_v49, %v14327_v42 }
 0x5d0   : > { %v5684_v14 = vsel %vm5544_vm7, %v5516_v34, %v9581_v31  ;;  %v5612_v4 = vmul.f32 1.442695, %v5577_v0  ;;  %v5456_v3 = vadd.f32 %v5455_v62, %v5411_v43  ;;  %v10977_v7 = vpop.eup %10976  ;;  %v9634_v43 = vor.u32 %v10665_v37, %v9633_v51 }
 0x5d1   : > { %v5711_v58 = vpack.c.bf16 %v5685_v47, %v5684_v14  ;;  %v14692_v44 = vadd.f32 %v14624_v12, %v5486_v5  ;;  %v9584_v1 = vadd.f32 -1.0, %v10977_v7  ;;  %v5006_v62 = vadd.f32 %v14499_v13, %v14349_v24 }
 0x5d2   : > { %v5489_v39 = vadd.f32 %v5456_v3, %v14452_v53  ;;  %10980 = vpow2.f32 %v5612_v4  ;;  %6097 = vmatpush.bf16.msrb.mxu2 %v9634_v43 }
 0x5d3   : > { %v5764_v55 = vunpack.c.l.b16 %v5711_v58  ;;  %v5765_v61 = vunpack.c.h.b16 %v5711_v58  ;;  %v5576_v28 = vmin.f32 %v14692_v44, 0.0  ;;  %v5687_v42 = vsel %vm5547_vm8, %v14649_v59, %v9584_v1 }
 0x5d4   : > { %v14698_v34 = vadd.f32 %v14620_v11, %v5489_v39  ;;  %v5323_v20 = vpop.f32.mrf.mxu2  ;;  %v5367_v17 = vpop.f32.mrf.mxu3  ;;  %vm5548_vm10 = vcmp.gt.f32.partialorder %v14692_v44, 0.0 }
 0x5d5   : > { %v14700_v21 = vpack.c.b16 %v5764_v55, %v5762_v46  ;;  %v14702_v31 = vpack.c.b16 %v5765_v61, %v5763_v25  ;;  %v5368_v53 = vadd.f32 %v5367_v17, %v5323_v20  ;;  %v10979_v0 = vpop.eup %10978  ;;  %v5610_v47 = vmul.f32 1.442695, %v5576_v28 }
 0x5d6   : > { %v5579_v5 = vmin.f32 %v14698_v34, 0.0  ;;  %v9583_v14 = vadd.f32 -1.0, %v10979_v0  ;;  %v4957_v55 = vadd.f32 %v14481_v2, %v4913_v60  ;;  %v14726_v61 = vadd.f32 %v14501_v38, %v5006_v62 }
 0x5d7   : > { %16464 = vst [vmem:[#allocation10_spill] sm:$0xff] %v14700_v21  ;;  %v5488_v4 = vadd.f32 %v5368_v53, %v14467_v6  ;;  %v5413_v3 = vpop.f32.mrf.mxu0  ;;  %v5457_v58 = vpop.f32.mrf.mxu1  ;;  %10982 = vpow2.f32 %v5610_v47  ;;  %v14738_v17 = vshll.u32 %v14700_v21, 16  ;;  %vm5551_vm12 = vcmp.gt.f32.partialorder %v14698_v34, 0.0 }
 0x5d8   : > { %16465 = vst [vmem:[#allocation4_spill] sm:$0xff] %v14702_v31  ;;  %v5616_v7 = vmul.f32 1.442695, %v5579_v5  ;;  %v5458_v39 = vadd.f32 %v5457_v58, %v5413_v3  ;;  %v5686_v49 = vsel %vm5546_vm11, %v14666_v40, %v9583_v14  ;;  %v10981_v24 = vpop.eup %10980  ;;  %v10664_v40 = vld [vmem:[%s16401_s9 + $0xc4] sm:$0xf]  ;;  %v14745_v43 = vshrl.u32 %v14700_v21, 16 }
 0x5d9   : > { %v14721_v46 = vadd.f32 %v14624_v12, %v5488_v4  ;;  %v5712_v13 = vpack.c.bf16 %v5687_v42, %v5686_v49  ;;  %v9586_v2 = vadd.f32 -1.0, %v10981_v24  ;;  %v14748_v3 = vshrl.u32 %v14702_v31, 16 }
 0x5da   : > { %10984 = vpow2.f32 %v5616_v7  ;;  %v5491_v25 = vadd.f32 %v5458_v39, %v5045_v23  ;;  %v9635_v23 = vld [vmem:[%s16401_s9 + $0xc8] sm:$0xf0]  ;;  %v14751_v58 = vshll.u32 %v14702_v31, 16  ;;  %v5809_v49 = vrot.slane %v14738_v17, 1 }
 0x5db   : > { %v5578_v6 = vmin.f32 %v14721_v46, 0.0  ;;  %v9638_v53 = vor.u32 %v10664_v40, %v9635_v23  ;;  %v5689_v7 = vsel %vm5549_vm9, %v14677_v41, %v9586_v2  ;;  %vm5550_vm13 = vcmp.gt.f32.partialorder %v14721_v46, 0.0 }
 0x5dc   : > { %v14729_v28 = vadd.f32 %v14620_v11, %v5491_v25  ;;  %v5325_v59 = vpop.f32.mrf.mxu2  ;;  %v5369_v20 = vpop.f32.mrf.mxu3 }
 0x5dd   : > { %v5614_v1 = vmul.f32 1.442695, %v5578_v6  ;;  %v5370_v38 = vadd.f32 %v5369_v20, %v5325_v59  ;;  %v10983_v51 = vpop.eup %10982  ;;  %6173 = vmatpush.bf16.msrb.mxu0 %v9638_v53  ;;  %v5767_v59 = vunpack.c.h.b16 %v5712_v13  ;;  %v4918_v53 = vadd.f32 %v14515_v26, %v14363_v15 }
 0x5de   : > { %v5581_v37 = vmin.f32 %v14729_v28, 0.0  ;;  %v9585_v0 = vadd.f32 -1.0, %v10983_v51  ;;  %vm5553_vm14 = vcmp.gt.f32.partialorder %v14729_v28, 0.0 }
 0x5df   : > { %10986 = vpow2.f32 %v5614_v1  ;;  %v5490_v60 = vadd.f32 %v5370_v38, %v4957_v55  ;;  %v5416_v47 = vpop.f32.mrf.mxu0  ;;  %v5460_v5 = vpop.f32.mrf.mxu1  ;;  %v5766_v55 = vunpack.c.l.b16 %v5712_v13  ;;  %v5821_v1 = vrot.slane %v14751_v58, 1 }
 0x5e0   : > { %v10985_v62 = vpop.eup %10984  ;;  %v5620_v14 = vmul.f32 1.442695, %v5581_v37  ;;  %v5461_v4 = vadd.f32 %v5460_v5, %v5416_v47  ;;  %v5688_v39 = vsel %vm5548_vm10, %v14692_v44, %v9585_v0  ;;  %v9799_v37 = vld [vmem:[%s16401_s9 + $0x70] sm:$0xf]  ;;  %v10655_v0 = vld [vmem:[%s16401_s9 + $0x74] sm:$0xf0] }
 0x5e1   : > { %v14760_v42 = vadd.f32 %v14624_v12, %v5490_v60  ;;  %v5713_v24 = vpack.c.bf16 %v5689_v7, %v5688_v39  ;;  %v9588_v25 = vadd.f32 -1.0, %v10985_v62  ;;  %v10663_v7 = vld [vmem:[%s16401_s9 + $0xb4] sm:$0xf0] }
 0x5e2   : > { %10988 = vpow2.f32 %v5620_v14  ;;  %v5493_v6 = vadd.f32 %v5461_v4, %v14488_v45  ;;  %v5011_v45 = vadd.f32 %v14541_v22, %v14373_v10  ;;  %v9800_v14 = vor.u32 %v10655_v0, %v9799_v37  ;;  %v9831_v4 = vld [vmem:[%s16401_s9 + $0xb0] sm:$0xf]  ;;  %v9833_v37 = vld [vmem:[%s16401_s9 + $0xb8] sm:$0xf0] }
 0x5e3   : > { %v5580_v41 = vmin.f32 %v14760_v42, 0.0  ;;  %v5768_v20 = vunpack.c.l.b16 %v5713_v24  ;;  %v5769_v40 = vunpack.c.h.b16 %v5713_v24  ;;  %v5691_v15 = vsel %vm5551_vm12, %v14698_v34, %v9588_v25 }
 0x5e4   : > { %v14767_v44 = vadd.f32 %v14620_v11, %v5493_v6  ;;  %v5328_v23 = vpop.f32.mrf.mxu2  ;;  %v5372_v2 = vpop.f32.mrf.mxu3  ;;  %6383 = vmatpush.bf16.msra.mxu2 %v9800_v14  ;;  %v14828_v0 = vadd.f32 %v14543_v63, %v5011_v45  ;;  %v10653_v63 = vld [vmem:[%s16401_s9 + $0x64] sm:$0xf0]  ;;  %vm5552_vm2 = vcmp.gt.f32.partialorder %v14760_v42, 0.0 }
 0x5e5   : > { %v10987_v38 = vpop.eup %10986  ;;  %v5618_v13 = vmul.f32 1.442695, %v5580_v41  ;;  %v5373_v51 = vadd.f32 %v5372_v2, %v5328_v23  ;;  %v14780_v60 = vpack.c.b16 %v5768_v20, %v5766_v55  ;;  %v14782_v47 = vpack.c.b16 %v5769_v40, %v5767_v59  ;;  %v10654_v2 = vld [vmem:[%s16401_s9 + $0x74] sm:$0xf] }
 0x5e6   : > { %v9587_v26 = vadd.f32 -1.0, %v10987_v38  ;;  %v5583_v10 = vmin.f32 %v14767_v44, 0.0  ;;  %v5810_v41 = vor.u32 %v5809_v49, %v14745_v43  ;;  %v9832_v23 = vor.u32 %v10663_v7, %v9831_v4  ;;  %v9801_v38 = vld [vmem:[%s16401_s9 + $0x78] sm:$0xf0] }
 0x5e7   : > { %16466 = vst [vmem:[#allocation8_spill] sm:$0xff] %v14780_v60  ;;  %10990 = vpow2.f32 %v5618_v13  ;;  %v5492_v22 = vadd.f32 %v5373_v51, %v14497_v32  ;;  %v5418_v5 = vpop.f32.mrf.mxu0  ;;  %v5462_v62 = vpop.f32.mrf.mxu1  ;;  %v14799_v25 = vshll.u32 %v14780_v60, 16  ;;  %v14802_v32 = vshll.u32 %v14782_v47, 16 }
 0x5e8   : > { %16467 = vst [vmem:[#allocation11_spill] sm:$0xff] %v14782_v47  ;;  %v10989_v39 = vpop.eup %10988  ;;  %v5690_v34 = vsel %vm5550_vm13, %v14721_v46, %v9587_v26  ;;  %v5463_v24 = vadd.f32 %v5462_v62, %v5418_v5  ;;  %v5624_v55 = vmul.f32 1.442695, %v5583_v10  ;;  %v4962_v13 = vadd.f32 %v14517_v19, %v4918_v53  ;;  %6425 = vmatpush.bf16.msra.mxu3 %v9832_v23  ;;  %v9791_v10 = vld [vmem:[%s16401_s9 + $0x60] sm:$0xf] }
 0x5e9   : > { %16468 = vst [vmem:[#allocation12_spill] sm:$0xff] %v14799_v25  ;;  %v14804_v6 = vpack.c.bf16 %v5691_v15, %v5690_v34  ;;  %v14807_v59 = vadd.f32 %v14624_v12, %v5492_v22  ;;  %v5814_v46 = vrot.slane %v14799_v25, 1  ;;  %v5826_v40 = vrot.slane %v14802_v32, 1 }
 0x5ea   : > { %16469 = vst [vmem:[#allocation13_spill] sm:$0xff] %v14802_v32  ;;  %v5495_v20 = vadd.f32 %v5463_v24, %v14726_v61  ;;  %v9590_v51 = vadd.f32 -1.0, %v10989_v39  ;;  %10992 = vpow2.f32 %v5624_v55  ;;  %v5822_v49 = vor.u32 %v5821_v1, %v14748_v3  ;;  %v10662_v61 = vld [vmem:[%s16401_s9 + $0xb4] sm:$0xf] }
 0x5eb   : > { %v5582_v15 = vmin.f32 %v14807_v59, 0.0  ;;  %v5815_v1 = vsel %vm460_vm1, %v5810_v41, %v5814_v46  ;;  %v9804_v62 = vor.u32 %v10654_v2, %v9801_v38  ;;  %v9836_v41 = vor.u32 %v10662_v61, %v9833_v37 }
 0x5ec   : > { %v14832_v26 = vadd.f32 %v14620_v11, %v5495_v20  ;;  %v5330_v19 = vpop.f32.mrf.mxu2  ;;  %v5374_v53 = vpop.f32.mrf.mxu3  ;;  %6098 = vmatmul.bf16.vlgmr.msrb.gmra.mxu2 %v5815_v1  ;;  %v5827_v5 = vsel %vm460_vm1, %v5822_v49, %v5826_v40  ;;  %6174 = vmatmul.bf16.vlgmr.msrb.gmra.mxu0 %v5815_v1  ;;  %v5693_v39 = vsel %vm5553_vm14, %v14729_v28, %v9590_v51  ;;  %v5770_v28 = vunpack.c.l.b16 %v14804_v6 }
 0x5ed   : > { %v10991_v45 = vpop.eup %10990  ;;  %v5375_v22 = vadd.f32 %v5374_v53, %v5330_v19  ;;  %v5622_v4 = vmul.f32 1.442695, %v5582_v15  ;;  %9727 = vmatmul.msk.bf16.vlgmr.msrb.gmra.mxu3 %vm1587_vm15, %v5827_v5  ;;  %9734 = vmatmul.msk.bf16.vlgmr.msrb.gmra.mxu1 %vm1587_vm15, %v5827_v5  ;;  %v9792_v20 = vor.u32 %v10653_v63, %v9791_v10  ;;  %v4923_v15 = vadd.f32 %v14551_v18, %v14375_v56 }
 0x5ee   : > { %v9589_v14 = vadd.f32 -1.0, %v10991_v45  ;;  %v5585_v7 = vmin.f32 %v14832_v26, 0.0  ;;  %6459 = vmatpush.bf16.msra.mxu0 %v9804_v62  ;;  %6501 = vmatpush.bf16.msra.mxu1 %v9836_v41  ;;  %vm5555_vm3 = vcmp.gt.f32.partialorder %v14767_v44, 0.0  ;;  %vm5554_vm6 = vcmp.gt.f32.partialorder %v14807_v59, 0.0 }
 0x5ef   : > { %v5494_v34 = vadd.f32 %v5375_v22, %v4962_v13  ;;  %v5421_v24 = vpop.f32.mrf.mxu0  ;;  %v5465_v55 = vpop.f32.mrf.mxu1  ;;  %10994 = vpow2.f32 %v5622_v4  ;;  %6384 = vmatpush.bf16.msra.mxu2 %v9792_v20  ;;  %v14868_v63 = vshrl.u32 %v14780_v60, 16  ;;  %vm5557_vm7 = vcmp.gt.f32.partialorder %v14832_v26, 0.0 }
 0x5f0   : > { %v5692_v23 = vsel %vm5552_vm2, %v14760_v42, %v9589_v14  ;;  %v5628_v2 = vmul.f32 1.442695, %v5585_v7  ;;  %v5466_v38 = vadd.f32 %v5465_v55, %v5421_v24  ;;  %v10993_v49 = vpop.eup %10992  ;;  %v5771_v42 = vunpack.c.h.b16 %v14804_v6 }
 0x5f1   : > { %v5715_v19 = vpack.c.bf16 %v5693_v39, %v5692_v23  ;;  %v14856_v53 = vadd.f32 %v14624_v12, %v5494_v34  ;;  %v9592_v13 = vadd.f32 -1.0, %v10993_v49  ;;  %v5830_v4 = vor.u32 %v14868_v63, %v5814_v46  ;;  %v10652_v39 = vld [vmem:[%s16401_s9 + $0x64] sm:$0xf]  ;;  %v9793_v34 = vld [vmem:[%s16401_s9 + $0x68] sm:$0xf0] }
 0x5f2   : > { %10996 = vpow2.f32 %v5628_v2  ;;  %v5497_v51 = vadd.f32 %v5466_v38, %v14524_v36  ;;  %v14880_v7 = vshrl.u32 %v14782_v47, 16  ;;  %v9796_v49 = vor.u32 %v10652_v39, %v9793_v34  ;;  %v10661_v34 = vld [vmem:[%s16401_s9 + $0xa4] sm:$0xf0] }
 0x5f3   : > { %v5772_v61 = vunpack.c.l.b16 %v5715_v19  ;;  %v5773_v37 = vunpack.c.h.b16 %v5715_v19  ;;  %v5584_v1 = vmin.f32 %v14856_v53, 0.0  ;;  %v5695_v62 = vsel %vm5555_vm3, %v14767_v44, %v9592_v13 }
 0x5f4   : > { %v14865_v56 = vadd.f32 %v14620_v11, %v5497_v51  ;;  %v5333_v18 = vpop.f32.mrf.mxu2  ;;  %v5377_v10 = vpop.f32.mrf.mxu3  ;;  %16471 = vst [vmem:[#allocation15_spill] sm:$0xff] %v14880_v7  ;;  %v5838_v13 = vor.u32 %v14880_v7, %v5826_v40  ;;  %6460 = vmatpush.bf16.msra.mxu0 %v9796_v49  ;;  %vm5556_vm8 = vcmp.gt.f32.partialorder %v14856_v53, 0.0 }
 0x5f5   : > { %v14870_v45 = vpack.c.b16 %v5772_v61, %v5770_v28  ;;  %v14872_v36 = vpack.c.b16 %v5773_v37, %v5771_v42  ;;  %v5626_v6 = vmul.f32 1.442695, %v5584_v1  ;;  %v5378_v22 = vadd.f32 %v5377_v10, %v5333_v18  ;;  %v10995_v5 = vpop.eup %10994 }
 0x5f6   : > { %v5587_v14 = vmin.f32 %v14865_v56, 0.0  ;;  %v9591_v24 = vadd.f32 -1.0, %v10995_v5  ;;  %v4967_v18 = vadd.f32 %v14553_v52, %v4923_v15  ;;  %v10651_v5 = vld [vmem:[%s16401_s9 + $0x54] sm:$0xf0]  ;;  %v9823_v52 = vld [vmem:[%s16401_s9 + $0xa0] sm:$0xf] }
 0x5f7   : > { %16470 = vst [vmem:[#allocation14_spill] sm:$0xff] %v14872_v36  ;;  %10998 = vpow2.f32 %v5626_v6  ;;  %v5496_v44 = vadd.f32 %v5378_v22, %v14539_v30  ;;  %v5423_v55 = vpop.f32.mrf.mxu0  ;;  %v5467_v41 = vpop.f32.mrf.mxu1  ;;  %v14890_v20 = vshll.u32 %v14870_v45, 16  ;;  %v14893_v38 = vshll.u32 %v14872_v36, 16  ;;  %v9783_v22 = vld [vmem:[%s16401_s9 + $0x50] sm:$0xf] }
 0x5f8   : > { %v10997_v46 = vpop.eup %10996  ;;  %v5632_v23 = vmul.f32 1.442695, %v5587_v14  ;;  %v5468_v2 = vadd.f32 %v5467_v41, %v5423_v55  ;;  %v5694_v19 = vsel %vm5554_vm6, %v14807_v59, %v9591_v24  ;;  %v9784_v39 = vor.u32 %v10651_v5, %v9783_v22 }
 0x5f9   : > { %v14899_v28 = vadd.f32 %v14624_v12, %v5496_v44  ;;  %v5834_v30 = vrot.slane %v14890_v20, 1  ;;  %v14905_v51 = vpack.c.bf16 %v5695_v62, %v5694_v19  ;;  %v5842_v61 = vrot.slane %v14893_v38, 1 }
 0x5fa   : > { %11000 = vpow2.f32 %v5632_v23  ;;  %v5499_v42 = vadd.f32 %v5468_v2, %v14828_v0  ;;  %v9594_v37 = vadd.f32 -1.0, %v10997_v46  ;;  %v5016_v62 = vadd.f32 %v14571_v9, %v14385_v27  ;;  %6385 = vmatpush.bf16.msra.mxu2 %v9784_v39 }
 0x5fb   : > { %v5586_v59 = vmin.f32 %v14899_v28, 0.0  ;;  %v5835_v1 = vsel %vm460_vm1, %v5830_v4, %v5834_v30  ;;  %v5843_v0 = vsel %vm460_vm1, %v5838_v13, %v5842_v61  ;;  %v9824_v55 = vor.u32 %v10661_v34, %v9823_v52 }
 0x5fc   : > { %v14915_v10 = vadd.f32 %v14620_v11, %v5499_v42  ;;  %v5335_v40 = vpop.f32.mrf.mxu2  ;;  %v5379_v6 = vpop.f32.mrf.mxu3  ;;  %6103 = vmatmul.bf16.gmra.mxu2 %v5835_v1  ;;  %6179 = vmatmul.bf16.gmra.mxu0 %v5835_v1  ;;  %v5697_v23 = vsel %vm5557_vm7, %v14832_v26, %v9594_v37  ;;  %v5060_v13 = vadd.f32 %v14573_v50, %v5016_v62  ;;  %vm5559_vm11 = vcmp.gt.f32.partialorder %v14865_v56, 0.0  ;;  %v10650_v62 = vld [vmem:[%s16401_s9 + $0x54] sm:$0xf] }
 0x5fd   : > { %v10999_v15 = vpop.eup %10998  ;;  %v5630_v14 = vmul.f32 1.442695, %v5586_v59  ;;  %v5380_v4 = vadd.f32 %v5379_v6, %v5335_v40  ;;  %9728 = vmatmul.msk.bf16.gmra.mxu3 %vm1587_vm15, %v5843_v0  ;;  %9735 = vmatmul.msk.bf16.gmra.mxu1 %vm1587_vm15, %v5843_v0  ;;  %v4928_v42 = vadd.f32 %v14575_v8, %v14389_v35  ;;  %vm5558_vm9 = vcmp.gt.f32.partialorder %v14899_v28, 0.0 }
 0x5fe   : > { %v9593_v24 = vadd.f32 -1.0, %v10999_v15  ;;  %v5589_v44 = vmin.f32 %v14915_v10, 0.0  ;;  %6426 = vmatpush.bf16.msra.mxu3 %v9824_v55  ;;  %v5775_v37 = vunpack.c.h.b16 %v14905_v51  ;;  %v14957_v22 = vshrl.u32 %v14870_v45, 16 }
 0x5ff   : > { %11002 = vpow2.f32 %v5630_v14  ;;  %v5498_v27 = vadd.f32 %v5380_v4, %v4967_v18  ;;  %v5426_v9 = vpop.f32.mrf.mxu0  ;;  %v5470_v41 = vpop.f32.mrf.mxu1  ;;  %v9785_v14 = vld [vmem:[%s16401_s9 + $0x58] sm:$0xf0]  ;;  %vm5561_vm10 = vcmp.gt.f32.partialorder %v14915_v10, 0.0 }
 0x600   : > { %v11001_v46 = vpop.eup %11000  ;;  %v5696_v2 = vsel %vm5556_vm8, %v14856_v53, %v9593_v24  ;;  %v5636_v49 = vmul.f32 1.442695, %v5589_v44  ;;  %v5471_v19 = vadd.f32 %v5470_v41, %v5426_v9  ;;  %v5774_v53 = vunpack.c.l.b16 %v14905_v51 }
 0x601   : > { %v5717_v59 = vpack.c.bf16 %v5697_v23, %v5696_v2  ;;  %v14945_v1 = vadd.f32 %v14624_v12, %v5498_v27  ;;  %v9596_v18 = vadd.f32 -1.0, %v11001_v46  ;;  %v14964_v51 = vshrl.u32 %v14872_v36, 16  ;;  %v10660_v23 = vld [vmem:[%s16401_s9 + $0xa4] sm:$0xf] }
 0x602   : > { %v5501_v26 = vadd.f32 %v5471_v19, %v14564_v29  ;;  %11004 = vpow2.f32 %v5636_v49  ;;  %v9788_v46 = vor.u32 %v10650_v62, %v9785_v14 }
 0x603   : > { %v5776_v40 = vunpack.c.l.b16 %v5717_v59  ;;  %v5777_v50 = vunpack.c.h.b16 %v5717_v59  ;;  %v5588_v35 = vmin.f32 %v14945_v1, 0.0  ;;  %v5699_v4 = vsel %vm5559_vm11, %v14865_v56, %v9596_v18  ;;  %v9825_v56 = vld [vmem:[%s16401_s9 + $0xa8] sm:$0xf0] }
 0x604   : > { %v14954_v8 = vadd.f32 %v14620_v11, %v5501_v26  ;;  %v5338_v6 = vpop.f32.mrf.mxu2  ;;  %v5382_v0 = vpop.f32.mrf.mxu3  ;;  %v5846_v18 = vor.u32 %v14957_v22, %v5834_v30  ;;  %6461 = vmatpush.bf16.msra.mxu0 %v9788_v46  ;;  %v9775_v30 = vld [vmem:[%s16401_s9 + $0x40] sm:$0xf]  ;;  %vm5560_vm12 = vcmp.gt.f32.partialorder %v14945_v1, 0.0 }
 0x605   : > { %v11003_v5 = vpop.eup %11002  ;;  %v14959_v52 = vpack.c.b16 %v5776_v40, %v5774_v53  ;;  %v14961_v29 = vpack.c.b16 %v5777_v50, %v5775_v37  ;;  %v5383_v15 = vadd.f32 %v5382_v0, %v5338_v6  ;;  %v5634_v34 = vmul.f32 1.442695, %v5588_v35  ;;  %v10649_v6 = vld [vmem:[%s16401_s9 + $0x44] sm:$0xf0] }
 0x606   : > { %v9595_v39 = vadd.f32 -1.0, %v11003_v5  ;;  %v5591_v24 = vmin.f32 %v14954_v8, 0.0  ;;  %v9828_v50 = vor.u32 %v10660_v23, %v9825_v56  ;;  %v5021_v35 = vadd.f32 %v14585_v54, %v14399_v33 }
 0x607   : > { %v5500_v44 = vadd.f32 %v5383_v15, %v14569_v57  ;;  %v5428_v55 = vpop.f32.mrf.mxu0  ;;  %v5472_v27 = vpop.f32.mrf.mxu1  ;;  %v14978_v9 = vshll.u32 %v14959_v52, 16  ;;  %v14981_v41 = vshll.u32 %v14961_v29, 16  ;;  %11006 = vpow2.f32 %v5634_v34 }
 0x608   : > { %v5698_v57 = vsel %vm5558_vm9, %v14899_v28, %v9595_v39  ;;  %v5640_v2 = vmul.f32 1.442695, %v5591_v24  ;;  %v5473_v49 = vadd.f32 %v5472_v27, %v5428_v55  ;;  %v11005_v53 = vpop.eup %11004  ;;  %v5854_v28 = vor.u32 %v14964_v51, %v5842_v61  ;;  %6502 = vmatpush.bf16.msra.mxu1 %v9828_v50  ;;  %v16474_v50 = vld [vmem:[#allocation5_spill] sm:$0xff] }
 0x609   : > { %v14992_v19 = vpack.c.bf16 %v5699_v4, %v5698_v57  ;;  %v14995_v59 = vadd.f32 %v14624_v12, %v5500_v44  ;;  %v5850_v26 = vrot.slane %v14978_v9, 1  ;;  %v5858_v40 = vrot.slane %v14981_v41, 1  ;;  %v16472_v57 = vld [vmem:[#allocation3_spill] sm:$0xff] }
 0x60a   : > { %v5503_v37 = vadd.f32 %v5473_v49, %v5060_v13  ;;  %11008 = vpow2.f32 %v5640_v2  ;;  %v4972_v15 = vadd.f32 %v14577_v16, %v4928_v42  ;;  %v9598_v62 = vadd.f32 -1.0, %v11005_v53  ;;  %v16473_v2 = vld [vmem:[#allocation9_spill] sm:$0xff] }
 0x60b   : > { %v5590_v13 = vmin.f32 %v14995_v59, 0.0  ;;  %v5851_v33 = vsel %vm460_vm1, %v5846_v18, %v5850_v26  ;;  %v5859_v54 = vsel %vm460_vm1, %v5854_v28, %v5858_v40  ;;  %v9776_v4 = vor.u32 %v10649_v6, %v9775_v30 }
 0x60c   : > { %v15015_v0 = vadd.f32 %v14620_v11, %v5503_v37  ;;  %v5340_v61 = vpop.f32.mrf.mxu2  ;;  %v5384_v5 = vpop.f32.mrf.mxu3  ;;  %6107 = vmatmul.bf16.gmra.mxu2 %v5851_v33  ;;  %6183 = vmatmul.bf16.gmra.mxu0 %v5851_v33  ;;  %v5065_v44 = vadd.f32 %v14587_v48, %v5021_v35  ;;  %v4933_v49 = vadd.f32 %v16473_v2, %v16472_v57  ;;  %v5778_v37 = vunpack.c.l.b16 %v14992_v19  ;;  %v9767_v2 = vld [vmem:[%s16401_s9 + $0x30] sm:$0xf] }
 0x60d   : > { %v5385_v14 = vadd.f32 %v5384_v5, %v5340_v61  ;;  %v11007_v39 = vpop.eup %11006  ;;  %v5638_v34 = vmul.f32 1.442695, %v5590_v13  ;;  %9729 = vmatmul.msk.bf16.gmra.mxu3 %vm1587_vm15, %v5859_v54  ;;  %9736 = vmatmul.msk.bf16.gmra.mxu1 %vm1587_vm15, %v5859_v54  ;;  %v5701_v18 = vsel %vm5561_vm10, %v14915_v10, %v9598_v62  ;;  %vm5563_vm13 = vcmp.gt.f32.partialorder %v14954_v8, 0.0 }
 0x60e   : > { %v5593_v24 = vmin.f32 %v15015_v0, 0.0  ;;  %v9597_v55 = vadd.f32 -1.0, %v11007_v39  ;;  %6386 = vmatpush.bf16.msra.mxu2 %v9776_v4  ;;  %v5779_v30 = vunpack.c.h.b16 %v14992_v19  ;;  %vm5562_vm14 = vcmp.gt.f32.partialorder %v14995_v59, 0.0 }
 0x60f   : > { %v5502_v27 = vadd.f32 %v5385_v14, %v4972_v15  ;;  %v5431_v16 = vpop.f32.mrf.mxu0  ;;  %v5475_v42 = vpop.f32.mrf.mxu1  ;;  %11010 = vpow2.f32 %v5638_v34  ;;  %v15047_v33 = vshrl.u32 %v14959_v52, 16  ;;  %v15050_v19 = vshrl.u32 %v14961_v29, 16 }
 0x610   : > { %v5644_v46 = vmul.f32 1.442695, %v5593_v24  ;;  %v5476_v23 = vadd.f32 %v5475_v42, %v5431_v16  ;;  %v11009_v56 = vpop.eup %11008  ;;  %v5700_v48 = vsel %vm5560_vm12, %v14945_v1, %v9597_v55  ;;  %v10648_v55 = vld [vmem:[%s16401_s9 + $0x44] sm:$0xf]  ;;  %v16476_v42 = vld [vmem:[#allocation7_spill] sm:$0xff]  ;;  %vm5565_vm2 = vcmp.gt.f32.partialorder %v15015_v0, 0.0 }
 0x611   : > { %v15035_v53 = vadd.f32 %v14624_v12, %v5502_v27  ;;  %v5719_v28 = vpack.c.bf16 %v5701_v18, %v5700_v48  ;;  %v9600_v54 = vadd.f32 -1.0, %v11009_v56  ;;  %v5862_v24 = vor.u32 %v15047_v33, %v5850_v26  ;;  %v9777_v27 = vld [vmem:[%s16401_s9 + $0x48] sm:$0xf0]  ;;  %v10647_v26 = vld [vmem:[%s16401_s9 + $0x34] sm:$0xf0] }
 0x612   : > { %v5505_v35 = vadd.f32 %v5476_v23, %v16474_v50  ;;  %11012 = vpow2.f32 %v5644_v46  ;;  %v9780_v57 = vor.u32 %v10648_v55, %v9777_v27  ;;  %v9769_v55 = vld [vmem:[%s16401_s9 + $0x38] sm:$0xf0]  ;;  %vm7305_vm10 = vcmask 1045504  }
 0x613   : > { %v5592_v6 = vmin.f32 %v15035_v53, 0.0  ;;  %v5780_v10 = vunpack.c.l.b16 %v5719_v28  ;;  %v5781_v13 = vunpack.c.h.b16 %v5719_v28  ;;  %vm5564_vm3 = vcmp.gt.f32.partialorder %v15035_v53, 0.0 }
 0x614   : > { %v15044_v1 = vadd.f32 %v14620_v11, %v5505_v35  ;;  %v5343_v61 = vpop.f32.mrf.mxu2  ;;  %v5387_v5 = vpop.f32.mrf.mxu3  ;;  %v5703_v35 = vsel %vm5563_vm13, %v14954_v8, %v9600_v54  ;;  %6462 = vmatpush.bf16.msra.mxu0 %v9780_v57  ;;  %v10659_v8 = vld [vmem:[%s16401_s9 + $0x94] sm:$0xf0]  ;;  %vm8122_vm13 = vcmask 1041408  }
 0x615   : > { %v5642_v15 = vmul.f32 1.442695, %v5592_v6  ;;  %v5388_v62 = vadd.f32 %v5387_v5, %v5343_v61  ;;  %v11011_v14 = vpop.eup %11010  ;;  %v15052_v4 = vpack.c.b16 %v5780_v10, %v5778_v37  ;;  %v15054_v39 = vpack.c.b16 %v5781_v13, %v5779_v30 }
 0x616   : > { %v5595_v34 = vmin.f32 %v15044_v1, 0.0  ;;  %v9599_v16 = vadd.f32 -1.0, %v11011_v14  ;;  %v9768_v10 = vor.u32 %v10647_v26, %v9767_v2  ;;  %v5870_v14 = vor.u32 %v15050_v19, %v5858_v40 }
 0x617   : > { %16475 = vst [vmem:[#allocation3_spill] sm:$0xff] %v15054_v39  ;;  %11014 = vpow2.f32 %v5642_v15  ;;  %v5504_v46 = vadd.f32 %v5388_v62, %v16476_v42  ;;  %v5433_v23 = vpop.f32.mrf.mxu0  ;;  %v5477_v56 = vpop.f32.mrf.mxu1  ;;  %v15074_v37 = vshll.u32 %v15052_v4, 16  ;;  %v15077_v28 = vshll.u32 %v15054_v39, 16  ;;  %v9815_v15 = vld [vmem:[%s16401_s9 + $0x90] sm:$0xf] }
 0x618   : > { %v5648_v18 = vmul.f32 1.442695, %v5595_v34  ;;  %v5478_v48 = vadd.f32 %v5477_v56, %v5433_v23  ;;  %v11013_v50 = vpop.eup %11012  ;;  %v5702_v30 = vsel %vm5562_vm14, %v14995_v59, %v9599_v16  ;;  %v16477_v59 = vld [vmem:[#allocation6_spill] sm:$0xff]  ;;  %6387 = vmatpush.bf16.msra.mxu2 %v9768_v10  ;;  %v10646_v34 = vld [vmem:[%s16401_s9 + $0x34] sm:$0xf]  ;;  %v9816_v26 = vor.u32 %v10659_v8, %v9815_v15 }
 0x619   : > { %v15086_v6 = vadd.f32 %v14624_v12, %v5504_v46  ;;  %v15088_v13 = vpack.c.bf16 %v5703_v35, %v5702_v30  ;;  %v5866_v5 = vrot.slane %v15074_v37, 1  ;;  %v4977_v54 = vadd.f32 %v16477_v59, %v4933_v49  ;;  %v10658_v46 = vld [vmem:[%s16401_s9 + $0x94] sm:$0xf]  ;;  %v9817_v23 = vld [vmem:[%s16401_s9 + $0x98] sm:$0xf0] }
 0x61a   : > { %11016 = vpow2.f32 %v5648_v18  ;;  %v5507_v61 = vadd.f32 %v5478_v48, %v5065_v44  ;;  %v5874_v44 = vrot.slane %v15077_v28, 1  ;;  %v9602_v49 = vadd.f32 -1.0, %v11013_v50  ;;  %v10645_v18 = vld [vmem:[%s16401_s9 + $0x24] sm:$0xf0]  ;;  %v10644_v30 = vld [vmem:[%s16401_s9 + $0x24] sm:$0xf]  ;;  %6427 = vmatpush.bf16.msra.mxu3 %v9816_v26 }
 0x61b   : > { %v5594_v62 = vmin.f32 %v15086_v6, 0.0  ;;  %v5867_v40 = vsel %vm460_vm1, %v5862_v24, %v5866_v5  ;;  %v9759_v24 = vld [vmem:[%s16401_s9 + $0x20] sm:$0xf]  ;;  %v9772_v35 = vor.u32 %v10646_v34, %v9769_v55  ;;  %v9761_v15 = vld [vmem:[%s16401_s9 + $0x28] sm:$0xf0]  ;;  %vm5567_vm6 = vcmp.gt.f32.partialorder %v15044_v1, 0.0 }
 0x61c   : > { %v15111_v27 = vadd.f32 %v14620_v11, %v5507_v61  ;;  %v5345_v16 = vpop.f32.mrf.mxu2  ;;  %v5389_v42 = vpop.f32.mrf.mxu3  ;;  %6111 = vmatmul.bf16.gmra.mxu2 %v5867_v40  ;;  %v5875_v11 = vsel %vm460_vm1, %v5870_v14, %v5874_v44  ;;  %6187 = vmatmul.bf16.gmra.mxu0 %v5867_v40  ;;  %v9820_v61 = vor.u32 %v10658_v46, %v9817_v23  ;;  %v9751_v8 = vld [vmem:[%s16401_s9 + $0x10] sm:$0xf]  ;;  %v10643_v59 = vld [vmem:[%s16401_s9 + $0x14] sm:$0xf0]  ;;  %v5782_v46 = vunpack.c.l.b16 %v15088_v13 }
 0x61d   : > { %v11015_v56 = vpop.eup %11014  ;;  %v5646_v57 = vmul.f32 1.442695, %v5594_v62  ;;  %v5390_v2 = vadd.f32 %v5389_v42, %v5345_v16  ;;  %9730 = vmatmul.msk.bf16.gmra.mxu3 %vm1587_vm15, %v5875_v11  ;;  %9737 = vmatmul.msk.bf16.gmra.mxu1 %vm1587_vm15, %v5875_v11  ;;  %v5705_v14 = vsel %vm5565_vm2, %v15015_v0, %v9602_v49  ;;  %v9760_v55 = vor.u32 %v10645_v18, %v9759_v24  ;;  %v9807_v16 = vld [vmem:[%s16401_s9 + $0x80] sm:$0xf]  ;;  %v10657_v0 = vld [vmem:[%s16401_s9 + $0x84] sm:$0xf0] }
 0x61e   : > { %v9601_v48 = vadd.f32 -1.0, %v11015_v56  ;;  %v5597_v50 = vmin.f32 %v15111_v27, 0.0  ;;  %6463 = vmatpush.bf16.msra.mxu0 %v9772_v35  ;;  %6503 = vmatpush.bf16.msra.mxu1 %v9820_v61  ;;  %v9753_v49 = vld [vmem:[%s16401_s9 + $0x18] sm:$0xf0]  ;;  %v5783_v23 = vunpack.c.h.b16 %v15088_v13  ;;  %v9752_v56 = vor.u32 %v10643_v59, %v9751_v8 }
 0x61f   : > { %11018 = vpow2.f32 %v5646_v57  ;;  %v5506_v10 = vadd.f32 %v5390_v2, %v4977_v54  ;;  %6388 = vmatpush.bf16.msra.mxu2 %v9760_v55  ;;  %v10656_v57 = vld [vmem:[%s16401_s9 + $0x84] sm:$0xf]  ;;  %v9809_v2 = vld [vmem:[%s16401_s9 + $0x88] sm:$0xf0]  ;;  %vm5566_vm7 = vcmp.gt.f32.partialorder %v15086_v6, 0.0  ;;  %v15184_v8 = vshrl.u32 %v15052_v4, 16 }
 0x620   : > { %v11017_v62 = vpop.eup %11016  ;;  %v5704_v54 = vsel %vm5564_vm3, %v15035_v53, %v9601_v48  ;;  %v5652_v34 = vmul.f32 1.442695, %v5597_v50  ;;  %v10642_v53 = vld [vmem:[%s16401_s9 + $0x14] sm:$0xf]  ;;  %v9808_v48 = vor.u32 %v10657_v0, %v9807_v16  ;;  %v9812_v50 = vor.u32 %v10656_v57, %v9809_v2  ;;  %v9745_v2 = vld [vmem:[%s16401_s9 + $0x8] sm:$0xf0] }
 0x621   : > { %v5721_v42 = vpack.c.bf16 %v5705_v14, %v5704_v54  ;;  %v15157_v40 = vadd.f32 %v14624_v12, %v5506_v10  ;;  %v9764_v12 = vor.u32 %v10644_v30, %v9761_v15  ;;  %v9604_v24 = vadd.f32 -1.0, %v11017_v62 }
 0x622   : > { %11020 = vpow2.f32 %v5652_v34  ;;  %v9756_v13 = vor.u32 %v10642_v53, %v9753_v49  ;;  %6428 = vmatpush.bf16.msra.mxu3 %v9808_v48  ;;  %6504 = vmatpush.bf16.msra.mxu1 %v9812_v50  ;;  %v15195_v34 = vshrl.u32 %v15054_v39, 16  ;;  %vm5569_vm8 = vcmp.gt.f32.partialorder %v15111_v27, 0.0 }
 0x623   : > { %v5784_v11 = vunpack.c.l.b16 %v5721_v42  ;;  %v5785_v26 = vunpack.c.h.b16 %v5721_v42  ;;  %v5596_v18 = vmin.f32 %v15157_v40, 0.0  ;;  %6464 = vmatpush.bf16.msra.mxu0 %v9764_v12  ;;  %6389 = vmatpush.bf16.msra.mxu2 %v9752_v56  ;;  %v5707_v14 = vsel %vm5567_vm6, %v15044_v1, %v9604_v24  ;;  %v10640_v12 = vld [vmem:[%s16401_s9 + $0x4] sm:$0xf] }
 0x624   : > { %v5878_v42 = vor.u32 %v15184_v8, %v5866_v5  ;;  %v5886_v1 = vor.u32 %v15195_v34, %v5874_v44  ;;  %v9743_v5 = vld [vmem:[%s16401_s9] sm:$0xf]  ;;  %v10641_v44 = vld [vmem:[%s16401_s9 + $0x4] sm:$0xf0]  ;;  %vm5568_vm11 = vcmp.gt.f32.partialorder %v15157_v40, 0.0  ;;  %vm8125_vm14 = vcmask 1042432  }
 0x625   : > { %v11019_v35 = vpop.eup %11018  ;;  %v15177_v30 = vpack.c.b16 %v5784_v11, %v5782_v46  ;;  %v15179_v10 = vpack.c.b16 %v5785_v26, %v5783_v23  ;;  %v5650_v15 = vmul.f32 1.442695, %v5596_v18  ;;  %v9744_v57 = vor.u32 %v10641_v44, %v9743_v5  ;;  %v10711_v5 = vld [vmem:[%s16401_s9 + $0x234] sm:$0xf0]  ;;  %v10702_v44 = vld [vmem:[%s16401_s9 + $0x1f4] sm:$0xf] }
 0x626   : > { %v9603_v61 = vadd.f32 -1.0, %v11019_v35  ;;  %v9748_v11 = vor.u32 %v10640_v12, %v9745_v2  ;;  %v9967_v2 = vld [vmem:[%s16401_s9 + $0x238] sm:$0xf0]  ;;  %vm8130_vm2 = vcmask 1044480  }
 0x627   : > { %v15187_v59 = vshll.u32 %v15177_v30, 16  ;;  %v15190_v62 = vshll.u32 %v15179_v10, 16  ;;  %11022 = vpow2.f32 %v5650_v15  ;;  %6465 = vmatpush.bf16.msra.mxu0 %v9756_v13  ;;  %6390 = vmatpush.bf16.msra.mxu2 %v9744_v57  ;;  %v10710_v57 = vld [vmem:[%s16401_s9 + $0x234] sm:$0xf] }
 0x628   : > { %v5706_v54 = vsel %vm5566_vm7, %v15086_v6, %v9603_v61  ;;  %v11021_v55 = vpop.eup %11020 }
 0x629   : > { %16478 = vst [vmem:[#allocation9_spill] sm:$0xff] %v15187_v59  ;;  %v5722_v16 = vpack.c.bf16 %v5707_v14, %v5706_v54  ;;  %v5882_v0 = vrot.slane %v15187_v59, 1  ;;  %v5890_v53 = vrot.slane %v15190_v62, 1  ;;  %v9606_v46 = vadd.f32 -1.0, %v11021_v55 }
 0x62a   : > { %16479 = vst [vmem:[#allocation5_spill] sm:$0xff] %v15190_v62  ;;  %v15230_v14 = vshrl.u32 %v15177_v30, 16 }
 0x62b   : > { %v5883_v6 = vsel %vm460_vm1, %v5878_v42, %v5882_v0  ;;  %v5891_v49 = vsel %vm460_vm1, %v5886_v1, %v5890_v53  ;;  %v5709_v26 = vsel %vm5569_vm8, %v15111_v27, %v9606_v46  ;;  %6466 = vmatpush.bf16.msra.mxu0 %v9748_v11  ;;  %v5786_v48 = vunpack.c.l.b16 %v5722_v16 }
 0x62c   : > { %6115 = vmatmul.bf16.gmra.mxu2 %v5883_v6  ;;  %6191 = vmatmul.bf16.gmra.mxu0 %v5883_v6  ;;  %v5787_v13 = vunpack.c.h.b16 %v5722_v16  ;;  %16480 = vst [vmem:[#allocation7_spill] sm:$0xff] %v15230_v14  ;;  %v15236_v27 = vshrl.u32 %v15179_v10, 16  ;;  %v5894_v55 = vor.u32 %v15230_v14, %v5882_v0  ;;  %v9933_v0 = vld [vmem:[%s16401_s9 + $0x1f0] sm:$0xf] }
 0x62d   : > { %v11023_v23 = vpop.eup %11022  ;;  %9731 = vmatmul.msk.bf16.gmra.mxu3 %vm1587_vm15, %v5891_v49  ;;  %9738 = vmatmul.msk.bf16.gmra.mxu1 %vm1587_vm15, %v5891_v49 }
 0x62e   : > { %v9605_v56 = vadd.f32 -1.0, %v11023_v23  ;;  %16481 = vst [vmem:[#allocation6_spill] sm:$0xff] %v15236_v27  ;;  %v5902_v42 = vor.u32 %v15236_v27, %v5890_v53  ;;  %v10703_v53 = vld [vmem:[%s16401_s9 + $0x1f4] sm:$0xf0]  ;;  %v9965_v23 = vld [vmem:[%s16401_s9 + $0x230] sm:$0xf] }
 0x62f   : > { %v9934_v46 = vor.u32 %v10703_v53, %v9933_v0  ;;  %v9966_v12 = vor.u32 %v10711_v5, %v9965_v23 }
 0x630   : > { %v5708_v24 = vsel %vm5568_vm11, %v15157_v40, %v9605_v56  ;;  %v9935_v56 = vld [vmem:[%s16401_s9 + $0x1f8] sm:$0xf0] }
 0x631   : > { %v5723_v18 = vpack.c.bf16 %v5709_v26, %v5708_v24  ;;  %6737 = vmatpush.bf16.msrb.mxu2 %v9934_v46  ;;  %v9938_v11 = vor.u32 %v10702_v44, %v9935_v56  ;;  %v9970_v26 = vor.u32 %v10710_v57, %v9967_v2  ;;  %v6928_v24 = vrot.slane %v15047_v33, 1  ;;  %6779 = vmatpush.bf16.msrb.mxu3 %v9966_v12 }
 0x633   : > { %v5788_v50 = vunpack.c.l.b16 %v5723_v18  ;;  %v5789_v35 = vunpack.c.h.b16 %v5723_v18  ;;  %v6929_v18 = vrot.slane %v14978_v9, 2  ;;  %6813 = vmatpush.bf16.msrb.mxu0 %v9938_v11  ;;  %6855 = vmatpush.bf16.msrb.mxu1 %v9970_v26  ;;  %v9925_v11 = vld [vmem:[%s16401_s9 + $0x1e0] sm:$0xf] }
 0x635   : > { %v15225_v61 = vpack.c.b16 %v5788_v50, %v5786_v48  ;;  %v15227_v15 = vpack.c.b16 %v5789_v35, %v5787_v13  ;;  %v6932_v48 = vrot.slane %v15050_v19, 1  ;;  %v6933_v13 = vrot.slane %v14981_v41, 2 }
 0x636   : > { %v6936_v50 = vrot.slane %v15184_v8, 1  ;;  %v6937_v35 = vrot.slane %v15074_v37, 2 }
 0x637   : > { %v15233_v54 = vshll.u32 %v15225_v61, 16  ;;  %v15239_v40 = vshll.u32 %v15227_v15, 16  ;;  %v15286_v0 = vor.u32 %v6933_v13, %v6932_v48  ;;  %v15289_v23 = vshrl.u32 %v15227_v15, 16 }
 0x638   : > { %v6938_v53 = vor.u32 %v6937_v35, %v6936_v50  ;;  %v6944_v13 = vrot.slane %v15230_v14, 1  ;;  %v6945_v50 = vrot.slane %v15187_v59, 2  ;;  %v6948_v35 = vrot.slane %v15236_v27, 1 }
 0x639   : > { %v5898_v16 = vrot.slane %v15233_v54, 1  ;;  %v5906_v1 = vrot.slane %v15239_v40, 1 }
 0x63b   : > { %v5899_v6 = vsel %vm460_vm1, %v5894_v55, %v5898_v16  ;;  %v5907_v49 = vsel %vm460_vm1, %v5902_v42, %v5906_v1  ;;  %v6940_v55 = vrot.slane %v15195_v34, 1  ;;  %v6941_v42 = vrot.slane %v15077_v28, 2 }
 0x63c   : > { %6119 = vmatmul.bf16.gmra.mxu2 %v5899_v6  ;;  %6195 = vmatmul.bf16.gmra.mxu0 %v5899_v6  ;;  %v15281_v6 = vor.u32 %v6929_v18, %v6928_v24  ;;  %vm6905_vm1 = vsmask.f32 6400  ;;  %v5913_v56 = vor.u32 %v15289_v23, %v5906_v1  ;;  %v10700_v1 = vld [vmem:[%s16401_s9 + $0x1e4] sm:$0xf]  ;;  %v9927_v18 = vld [vmem:[%s16401_s9 + $0x1e8] sm:$0xf0] }
 0x63d   : > { %9732 = vmatmul.msk.bf16.gmra.mxu3 %vm1587_vm15, %v5907_v49  ;;  %9739 = vmatmul.msk.bf16.gmra.mxu1 %vm1587_vm15, %v5907_v49  ;;  %v15284_v49 = vshrl.u32 %v15225_v61, 16  ;;  %v6942_v46 = vor.u32 %v6941_v42, %v6940_v55  ;;  %v9930_v48 = vor.u32 %v10700_v1, %v9927_v18  ;;  %v6949_v55 = vrot.slane %v15190_v62, 2  ;;  %vm6968_vm9 = vmand %vm823_vm5, %vm6905_vm1 }
 0x63e   : > { %v15294_v44 = vsel %vm6905_vm1, %v15281_v6, %v6938_v53  ;;  %v5923_v26 = vsel %vm11288_vm4, %v5913_v56, 0  ;;  %v15323_v42 = vor.u32 %v6945_v50, %v6944_v13  ;;  %v7712_v18 = vrot.slane %v15195_v34, 2  ;;  %v10698_v13 = vld [vmem:[%s16401_s9 + $0x1d4] sm:$0xf] }
 0x63f   : > { %v5910_v5 = vor.u32 %v15284_v49, %v5898_v16  ;;  %v15298_v12 = vsel %vm6905_vm1, %v15286_v0, %v6942_v46  ;;  %v10701_v16 = vld [vmem:[%s16401_s9 + $0x1e4] sm:$0xf0]  ;;  %6814 = vmatpush.bf16.msrb.mxu0 %v9930_v48  ;;  %v7713_v48 = vrot.slane %v15077_v28, 3 }
 0x640   : > { %v9926_v24 = vor.u32 %v10701_v16, %v9925_v11  ;;  %v15329_v56 = vsel %vm6905_vm1, %v6938_v53, %v15323_v42  ;;  %v7701_v11 = vrot.slane %v14978_v9, 3  ;;  %v7704_v16 = vrot.slane %v15050_v19, 2  ;;  %v10699_v53 = vld [vmem:[%s16401_s9 + $0x1d4] sm:$0xf0]  ;;  %v10709_v9 = vld [vmem:[%s16401_s9 + $0x224] sm:$0xf0] }
 0x641   : > { %v5922_v2 = vsel %vm11288_vm4, %v5910_v5, 0  ;;  %v15325_v5 = vor.u32 %v6949_v55, %v6948_v35  ;;  %v7709_v19 = vrot.slane %v15074_v37, 3  ;;  %v10708_v37 = vld [vmem:[%s16401_s9 + $0x224] sm:$0xf]  ;;  %v9959_v35 = vld [vmem:[%s16401_s9 + $0x228] sm:$0xf0] }
 0x642   : > { %6738 = vmatpush.bf16.msrb.mxu2 %v9926_v24  ;;  %v9917_v24 = vld [vmem:[%s16401_s9 + $0x1d0] sm:$0xf]  ;;  %vm7677_vm4 = vsmask.f32 5376 }
 0x643   : > { %16483 = vst [vmem:[#allocation2_spill] sm:$0xff] %v15325_v5  ;;  %v15333_v57 = vsel %vm6905_vm1, %v6942_v46, %v15325_v5  ;;  %v9957_v46 = vld [vmem:[%s16401_s9 + $0x220] sm:$0xf]  ;;  %v9918_v1 = vor.u32 %v10699_v53, %v9917_v24  ;;  %v15379_v24 = vor.u32 %v7713_v48, %v7712_v18  ;;  %v9962_v53 = vor.u32 %v10708_v37, %v9959_v35  ;;  %vm7740_vm12 = vmand %vm7305_vm10, %vm7677_vm4 }
 0x644   : > { %v10045_v5 = vld [vmem:[%s16401_s9 + $0x280] sm:$0xf] }
 0x645   : > { %16487 = vst [vmem:[#allocation19_spill] sm:$0xff] %v15379_v24  ;;  %6856 = vmatpush.bf16.msrb.mxu1 %v9962_v53  ;;  %v9901_v53 = vld [vmem:[%s16401_s9 + $0x1b0] sm:$0xf] }
 0x646   : > { %6739 = vmatpush.bf16.msrb.mxu2 %v9918_v1 }
 0x64c   : > { %6123 = vmatmul.bf16.gmra.mxu2 %v5922_v2  ;;  %6199 = vmatmul.bf16.gmra.mxu0 %v5922_v2  ;;  %v7700_v2 = vrot.slane %v15047_v33, 2  ;;  %v9958_v33 = vor.u32 %v10709_v9, %v9957_v46 }
 0x64d   : > { %9733 = vmatmul.msk.bf16.gmra.mxu3 %vm1587_vm15, %v5923_v26  ;;  %9740 = vmatmul.msk.bf16.gmra.mxu1 %vm1587_vm15, %v5923_v26  ;;  %v7705_v26 = vrot.slane %v14981_v41, 3  ;;  %v7708_v41 = vrot.slane %v15184_v8, 2  ;;  %v9919_v8 = vld [vmem:[%s16401_s9 + $0x1d8] sm:$0xf0] }
 0x64e   : > { %v15370_v34 = vor.u32 %v7701_v11, %v7700_v2  ;;  %6780 = vmatpush.bf16.msrb.mxu3 %v9958_v33  ;;  %v9922_v50 = vor.u32 %v10698_v13, %v9919_v8 }
 0x64f   : > { %v15372_v28 = vor.u32 %v7705_v26, %v7704_v16  ;;  %v15377_v55 = vor.u32 %v7709_v19, %v7708_v41  ;;  %v9909_v16 = vld [vmem:[%s16401_s9 + $0x1c0] sm:$0xf]  ;;  %v10697_v26 = vld [vmem:[%s16401_s9 + $0x1c4] sm:$0xf0]  ;;  %v10696_v41 = vld [vmem:[%s16401_s9 + $0x1c4] sm:$0xf] }
 0x650   : > { %16484 = vst [vmem:[#allocation16_spill] sm:$0xff] %v15370_v34  ;;  %6815 = vmatpush.bf16.msrb.mxu0 %v9922_v50  ;;  %v9910_v46 = vor.u32 %v10697_v26, %v9909_v16  ;;  %v9911_v19 = vld [vmem:[%s16401_s9 + $0x1c8] sm:$0xf0]  ;;  %v10695_v16 = vld [vmem:[%s16401_s9 + $0x1b4] sm:$0xf0] }
 0x651   : > { %16485 = vst [vmem:[#allocation17_spill] sm:$0xff] %v15372_v28  ;;  %v15384_v2 = vsel %vm7677_vm4, %v15370_v34, %v15377_v55  ;;  %v15389_v11 = vsel %vm7677_vm4, %v15372_v28, %v15379_v24  ;;  %v9914_v18 = vor.u32 %v10696_v41, %v9911_v19  ;;  %v9949_v26 = vld [vmem:[%s16401_s9 + $0x210] sm:$0xf] }
 0x652   : > { %16486 = vst [vmem:[#allocation18_spill] sm:$0xff] %v15377_v55  ;;  %6740 = vmatpush.bf16.msrb.mxu2 %v9910_v46  ;;  %v9902_v46 = vor.u32 %v10695_v16, %v9901_v53  ;;  %v10706_v53 = vld [vmem:[%s16401_s9 + $0x214] sm:$0xf]  ;;  %v10053_v34 = vld [vmem:[%s16401_s9 + $0x290] sm:$0xf] }
 0x653   : > { %16488 = vst [vmem:[#allocation20_spill] sm:$0xff] %v15384_v2 }
 0x654   : > { %16489 = vst [vmem:[#allocation21_spill] sm:$0xff] %v15389_v11  ;;  %6816 = vmatpush.bf16.msrb.mxu0 %v9914_v18  ;;  %v10726_v11 = vld [vmem:[%s16401_s9 + $0x2b4] sm:$0xf] }
 0x656   : > { %6741 = vmatpush.bf16.msrb.mxu2 %v9902_v46 }
 0x65c   : > { %6391 = vmatmul.bf16.vlgmr.msra.gmra.mxu2 %v14700_v21  ;;  %6467 = vmatmul.bf16.vlgmr.msra.gmra.mxu0 %v14700_v21 }
 0x65d   : > { %9837 = vmatmul.msk.bf16.vlgmr.msra.gmra.mxu3 %vm1587_vm15, %v14702_v31  ;;  %9844 = vmatmul.msk.bf16.vlgmr.msra.gmra.mxu1 %vm1587_vm15, %v14702_v31 }
 0x669   : > { %v6175_v1 = vpop.f32.mrf.mxu0 }
 0x66a   : > { %v6213_v9 = vpop.f32.mrf.mxu1 }
 0x66b   : > { %v15397_v33 = vadd.f32 %v6213_v9, %v6175_v1  ;;  %v10707_v1 = vld [vmem:[%s16401_s9 + $0x214] sm:$0xf0] }
 0x66c   : > { %6396 = vmatmul.bf16.gmra.mxu2 %v14780_v60  ;;  %6472 = vmatmul.bf16.gmra.mxu0 %v14780_v60  ;;  %v9950_v9 = vor.u32 %v10707_v1, %v9949_v26  ;;  %v9951_v26 = vld [vmem:[%s16401_s9 + $0x218] sm:$0xf0] }
 0x66d   : > { %9838 = vmatmul.msk.bf16.gmra.mxu3 %vm1587_vm15, %v14782_v47  ;;  %9845 = vmatmul.msk.bf16.gmra.mxu1 %vm1587_vm15, %v14782_v47  ;;  %v9954_v46 = vor.u32 %v10706_v53, %v9951_v26 }
 0x66e   : > { %6781 = vmatpush.bf16.msrb.mxu3 %v9950_v9 }
 0x66f   : > { %v6099_v48 = vpop.f32.mrf.mxu2  ;;  %6857 = vmatpush.bf16.msrb.mxu1 %v9954_v46 }
 0x670   : > { %v6137_v13 = vpop.f32.mrf.mxu3 }
 0x671   : > { %v15411_v8 = vadd.f32 %v6137_v13, %v6099_v48  ;;  %v6177_v37 = vpop.f32.mrf.mxu0 }
 0x672   : > { %v6215_v50 = vpop.f32.mrf.mxu1 }
 0x673   : > { %v15413_v35 = vadd.f32 %v6215_v50, %v6177_v37  ;;  %v10694_v37 = vld [vmem:[%s16401_s9 + $0x1b4] sm:$0xf]  ;;  %v9903_v50 = vld [vmem:[%s16401_s9 + $0x1b8] sm:$0xf0] }
 0x674   : > { %v9906_v16 = vor.u32 %v10694_v37, %v9903_v50  ;;  %v10693_v37 = vld [vmem:[%s16401_s9 + $0x1a4] sm:$0xf0] }
 0x676   : > { %6817 = vmatpush.bf16.msrb.mxu0 %v9906_v16 }
 0x677   : > { %v6101_v41 = vpop.f32.mrf.mxu2 }
 0x678   : > { %v6139_v19 = vpop.f32.mrf.mxu3 }
 0x679   : > { %v15427_v18 = vadd.f32 %v6139_v19, %v6101_v41  ;;  %v6180_v48 = vpop.f32.mrf.mxu0 }
 0x67a   : > { %v6218_v13 = vpop.f32.mrf.mxu1 }
 0x67b   : > { %v9893_v13 = vld [vmem:[%s16401_s9 + $0x1a0] sm:$0xf] }
 0x67c   : > { %6400 = vmatmul.bf16.gmra.mxu2 %v14870_v45  ;;  %6476 = vmatmul.bf16.gmra.mxu0 %v14870_v45  ;;  %v9894_v50 = vor.u32 %v10693_v37, %v9893_v13 }
 0x67d   : > { %9839 = vmatmul.msk.bf16.gmra.mxu3 %vm1587_vm15, %v14872_v36  ;;  %9846 = vmatmul.msk.bf16.gmra.mxu1 %vm1587_vm15, %v14872_v36 }
 0x67e   : > { %6742 = vmatpush.bf16.msrb.mxu2 %v9894_v50 }
 0x67f   : > { %v6104_v1 = vpop.f32.mrf.mxu2 }
 0x680   : > { %v6142_v9 = vpop.f32.mrf.mxu3  ;;  %v10692_v1 = vld [vmem:[%s16401_s9 + $0x1a4] sm:$0xf] }
 0x681   : > { %v6181_v41 = vpop.f32.mrf.mxu0  ;;  %v9895_v9 = vld [vmem:[%s16401_s9 + $0x1a8] sm:$0xf0] }
 0x682   : > { %v6219_v19 = vpop.f32.mrf.mxu1 }
 0x683   : > { %v15447_v48 = vadd.f32 %v6219_v19, %v6181_v41  ;;  %v9898_v19 = vor.u32 %v10692_v1, %v9895_v9 }
 0x685   : > { %6818 = vmatpush.bf16.msrb.mxu0 %v9898_v19  ;;  %v10690_v19 = vld [vmem:[%s16401_s9 + $0x194] sm:$0xf] }
 0x687   : > { %v6105_v53 = vpop.f32.mrf.mxu2 }
 0x688   : > { %v6143_v26 = vpop.f32.mrf.mxu3 }
 0x689   : > { %v15455_v16 = vadd.f32 %v6143_v26, %v6105_v53  ;;  %v6184_v46 = vpop.f32.mrf.mxu0  ;;  %v9885_v53 = vld [vmem:[%s16401_s9 + $0x190] sm:$0xf]  ;;  %v10691_v26 = vld [vmem:[%s16401_s9 + $0x194] sm:$0xf0] }
 0x68a   : > { %v6222_v41 = vpop.f32.mrf.mxu1  ;;  %v9941_v46 = vld [vmem:[%s16401_s9 + $0x200] sm:$0xf]  ;;  %v9886_v9 = vor.u32 %v10691_v26, %v9885_v53  ;;  %v10704_v53 = vld [vmem:[%s16401_s9 + $0x204] sm:$0xf]  ;;  %v9943_v26 = vld [vmem:[%s16401_s9 + $0x208] sm:$0xf0] }
 0x68b   : > { %v10705_v41 = vld [vmem:[%s16401_s9 + $0x204] sm:$0xf0]  ;;  %v9946_v62 = vor.u32 %v10704_v53, %v9943_v26 }
 0x68c   : > { %6404 = vmatmul.bf16.gmra.mxu2 %v14959_v52  ;;  %6480 = vmatmul.bf16.gmra.mxu0 %v14959_v52  ;;  %v9942_v24 = vor.u32 %v10705_v41, %v9941_v46  ;;  %v10688_v41 = vld [vmem:[%s16401_s9 + $0x184] sm:$0xf] }
 0x68d   : > { %9840 = vmatmul.msk.bf16.gmra.mxu3 %vm1587_vm15, %v14961_v29  ;;  %9847 = vmatmul.msk.bf16.gmra.mxu1 %vm1587_vm15, %v14961_v29 }
 0x68e   : > { %6743 = vmatpush.bf16.msrb.mxu2 %v9886_v9  ;;  %6782 = vmatpush.bf16.msrb.mxu3 %v9942_v24 }
 0x68f   : > { %v6108_v13 = vpop.f32.mrf.mxu2  ;;  %6858 = vmatpush.bf16.msrb.mxu1 %v9946_v62  ;;  %v9877_v62 = vld [vmem:[%s16401_s9 + $0x180] sm:$0xf] }
 0x690   : > { %v6146_v37 = vpop.f32.mrf.mxu3  ;;  %v9887_v13 = vld [vmem:[%s16401_s9 + $0x198] sm:$0xf0] }
 0x691   : > { %v6185_v50 = vpop.f32.mrf.mxu0  ;;  %v9890_v55 = vor.u32 %v10690_v19, %v9887_v13  ;;  %v9879_v19 = vld [vmem:[%s16401_s9 + $0x188] sm:$0xf0] }
 0x692   : > { %v6223_v1 = vpop.f32.mrf.mxu1  ;;  %v9882_v53 = vor.u32 %v10688_v41, %v9879_v19  ;;  %v10735_v41 = vld [vmem:[%s16401_s9 + $0x2f4] sm:$0xf0] }
 0x693   : > { %v15487_v37 = vadd.f32 %v6223_v1, %v6185_v50  ;;  %6819 = vmatpush.bf16.msrb.mxu0 %v9890_v55 }
 0x697   : > { %v6109_v27 = vpop.f32.mrf.mxu2  ;;  %6820 = vmatpush.bf16.msrb.mxu0 %v9882_v53 }
 0x698   : > { %v6147_v59 = vpop.f32.mrf.mxu3 }
 0x699   : > { %v15495_v14 = vadd.f32 %v6147_v59, %v6109_v27  ;;  %v6188_v50 = vpop.f32.mrf.mxu0  ;;  %v10689_v59 = vld [vmem:[%s16401_s9 + $0x184] sm:$0xf0] }
 0x69a   : > { %v6226_v46 = vpop.f32.mrf.mxu1  ;;  %v9878_v27 = vor.u32 %v10689_v59, %v9877_v62 }
 0x69c   : > { %6408 = vmatmul.bf16.gmra.mxu2 %v15052_v4  ;;  %6484 = vmatmul.bf16.gmra.mxu0 %v15052_v4 }
 0x69d   : > { %9841 = vmatmul.msk.bf16.gmra.mxu3 %vm1587_vm15, %v15054_v39  ;;  %9848 = vmatmul.msk.bf16.gmra.mxu1 %vm1587_vm15, %v15054_v39 }
 0x69e   : > { %6744 = vmatpush.bf16.msrb.mxu2 %v9878_v27 }
 0x69f   : > { %v6112_v55 = vpop.f32.mrf.mxu2 }
 0x6a0   : > { %v6150_v24 = vpop.f32.mrf.mxu3  ;;  %v10069_v55 = vld [vmem:[%s16401_s9 + $0x2b0] sm:$0xf] }
 0x6a1   : > { %v6189_v1 = vpop.f32.mrf.mxu0  ;;  %v10727_v24 = vld [vmem:[%s16401_s9 + $0x2b4] sm:$0xf0] }
 0x6a2   : > { %v6227_v9 = vpop.f32.mrf.mxu1 }
 0x6a3   : > { %v15515_v13 = vadd.f32 %v6227_v9, %v6189_v1  ;;  %v10101_v1 = vld [vmem:[%s16401_s9 + $0x2f0] sm:$0xf]  ;;  %v10070_v9 = vor.u32 %v10727_v24, %v10069_v55  ;;  %v10071_v55 = vld [vmem:[%s16401_s9 + $0x2b8] sm:$0xf0]  ;;  %v10734_v24 = vld [vmem:[%s16401_s9 + $0x2f4] sm:$0xf] }
 0x6a4   : > { %v10102_v53 = vor.u32 %v10735_v41, %v10101_v1  ;;  %v10074_v1 = vor.u32 %v10726_v11, %v10071_v55  ;;  %v10061_v11 = vld [vmem:[%s16401_s9 + $0x2a0] sm:$0xf]  ;;  %v10725_v55 = vld [vmem:[%s16401_s9 + $0x2a4] sm:$0xf0] }
 0x6a5   : > { %7137 = vmatpush.bf16.msra.mxu2 %v10070_v9  ;;  %v10103_v9 = vld [vmem:[%s16401_s9 + $0x2f8] sm:$0xf0] }
 0x6a6   : > { %7179 = vmatpush.bf16.msra.mxu3 %v10102_v53  ;;  %v10106_v41 = vor.u32 %v10734_v24, %v10103_v9  ;;  %7213 = vmatpush.bf16.msra.mxu0 %v10074_v1  ;;  %v10062_v24 = vor.u32 %v10725_v55, %v10061_v11  ;;  %v6536_v11 = vrot.slane %v14780_v60, 1 }
 0x6a7   : > { %v6113_v26 = vpop.f32.mrf.mxu2 }
 0x6a8   : > { %v6151_v50 = vpop.f32.mrf.mxu3  ;;  %7255 = vmatpush.bf16.msra.mxu1 %v10106_v41 }
 0x6a9   : > { %v15517_v46 = vadd.f32 %v6151_v50, %v6113_v26  ;;  %v6192_v62 = vpop.f32.mrf.mxu0  ;;  %7138 = vmatpush.bf16.msra.mxu2 %v10062_v24  ;;  %v6539_v24 = vrot.slane %v14782_v47, 1 }
 0x6aa   : > { %v6230_v59 = vpop.f32.mrf.mxu1 }
 0x6ab   : > { %v15519_v27 = vadd.f32 %v6230_v59, %v6192_v62 }
 0x6ac   : > { %6412 = vmatmul.bf16.gmra.mxu2 %v15177_v30  ;;  %6488 = vmatmul.bf16.gmra.mxu0 %v15177_v30 }
 0x6ad   : > { %9842 = vmatmul.msk.bf16.gmra.mxu3 %vm1587_vm15, %v15179_v10  ;;  %9849 = vmatmul.msk.bf16.gmra.mxu1 %vm1587_vm15, %v15179_v10 }
 0x6af   : > { %v6116_v19 = vpop.f32.mrf.mxu2 }
 0x6b0   : > { %v6154_v26 = vpop.f32.mrf.mxu3 }
 0x6b1   : > { %v15539_v50 = vadd.f32 %v6154_v26, %v6116_v19  ;;  %v6194_v62 = vpop.f32.mrf.mxu0 }
 0x6b2   : > { %v6232_v59 = vpop.f32.mrf.mxu1 }
 0x6b7   : > { %v6118_v19 = vpop.f32.mrf.mxu2 }
 0x6b8   : > { %v6156_v53 = vpop.f32.mrf.mxu3 }
 0x6b9   : > { %v6196_v26 = vpop.f32.mrf.mxu0 }
 0x6ba   : > { %v6234_v62 = vpop.f32.mrf.mxu1 }
 0x6bb   : > { %v15553_v59 = vadd.f32 %v6234_v62, %v6196_v26  ;;  %v10724_v26 = vld [vmem:[%s16401_s9 + $0x2a4] sm:$0xf]  ;;  %v10063_v62 = vld [vmem:[%s16401_s9 + $0x2a8] sm:$0xf0] }
 0x6bc   : > { %6416 = vmatmul.bf16.gmra.mxu2 %v15225_v61  ;;  %6492 = vmatmul.bf16.gmra.mxu0 %v15225_v61  ;;  %v10066_v2 = vor.u32 %v10724_v26, %v10063_v62 }
 0x6bd   : > { %9843 = vmatmul.msk.bf16.gmra.mxu3 %vm1587_vm15, %v15227_v15  ;;  %9850 = vmatmul.msk.bf16.gmra.mxu1 %vm1587_vm15, %v15227_v15 }
 0x6be   : > { %7214 = vmatpush.bf16.msra.mxu0 %v10066_v2  ;;  %v10723_v2 = vld [vmem:[%s16401_s9 + $0x294] sm:$0xf0] }
 0x6bf   : > { %v6120_v1 = vpop.f32.mrf.mxu2 }
 0x6c0   : > { %v6158_v9 = vpop.f32.mrf.mxu3 }
 0x6c1   : > { %v15567_v41 = vadd.f32 %v6158_v9, %v6120_v1  ;;  %v6198_v19 = vpop.f32.mrf.mxu0  ;;  %v6535_v9 = vrot.slane %v14700_v21, 1 }
 0x6c2   : > { %v6236_v53 = vpop.f32.mrf.mxu1  ;;  %v6538_v19 = vrot.slane %v14702_v31, 1  ;;  %v10733_v31 = vld [vmem:[%s16401_s9 + $0x2e4] sm:$0xf0] }
 0x6c3   : > { %v6537_v62 = vsel %vm823_vm5, %v6535_v9, %v6536_v11  ;;  %v10732_v9 = vld [vmem:[%s16401_s9 + $0x2e4] sm:$0xf] }
 0x6c4   : > { %v6540_v21 = vsel %vm823_vm5, %v6538_v19, %v6539_v24 }
 0x6c7   : > { %v6122_v28 = vpop.f32.mrf.mxu2 }
 0x6c8   : > { %v6160_v55 = vpop.f32.mrf.mxu3  ;;  %v10093_v28 = vld [vmem:[%s16401_s9 + $0x2e0] sm:$0xf] }
 0x6c9   : > { %v6200_v1 = vpop.f32.mrf.mxu0  ;;  %v10054_v55 = vor.u32 %v10723_v2, %v10053_v34  ;;  %v10094_v47 = vor.u32 %v10733_v31, %v10093_v28  ;;  %v10055_v34 = vld [vmem:[%s16401_s9 + $0x298] sm:$0xf0]  ;;  %v10095_v31 = vld [vmem:[%s16401_s9 + $0x2e8] sm:$0xf0] }
 0x6ca   : > { %v6238_v53 = vpop.f32.mrf.mxu1 }
 0x6cb   : > { %v15588_v26 = vadd.f32 %v6238_v53, %v6200_v1  ;;  %v10722_v1 = vld [vmem:[%s16401_s9 + $0x294] sm:$0xf]  ;;  %7139 = vmatpush.bf16.msra.mxu2 %v10054_v55  ;;  %7180 = vmatpush.bf16.msra.mxu3 %v10094_v47  ;;  %v10098_v53 = vor.u32 %v10732_v9, %v10095_v31  ;;  %v10721_v47 = vld [vmem:[%s16401_s9 + $0x284] sm:$0xf0] }
 0x6cc   : > { %6745 = vmatmul.bf16.vlgmr.msrb.gmra.mxu2 %v6537_v62  ;;  %6821 = vmatmul.bf16.vlgmr.msrb.gmra.mxu0 %v6537_v62  ;;  %v10058_v19 = vor.u32 %v10722_v1, %v10055_v34  ;;  %v10046_v55 = vor.u32 %v10721_v47, %v10045_v5  ;;  %v6541_v34 = vrot.slane %v14870_v45, 1  ;;  %v10720_v5 = vld [vmem:[%s16401_s9 + $0x284] sm:$0xf] }
 0x6cd   : > { %9972 = vmatmul.msk.bf16.vlgmr.msrb.gmra.mxu3 %vm1587_vm15, %v6540_v21  ;;  %9980 = vmatmul.msk.bf16.vlgmr.msrb.gmra.mxu1 %vm1587_vm15, %v6540_v21 }
 0x6ce   : > { %7215 = vmatpush.bf16.msra.mxu0 %v10058_v19  ;;  %7256 = vmatpush.bf16.msra.mxu1 %v10098_v53  ;;  %v6543_v19 = vrot.slane %v14872_v36, 1  ;;  %v6542_v53 = vsel %vm823_vm5, %v6536_v11, %v6541_v34 }
 0x6cf   : > { %v6124_v21 = vpop.f32.mrf.mxu2  ;;  %7140 = vmatpush.bf16.msra.mxu2 %v10046_v55 }
 0x6d0   : > { %v6162_v2 = vpop.f32.mrf.mxu3 }
 0x6d1   : > { %v15609_v28 = vadd.f32 %v6162_v2, %v6124_v21  ;;  %v6202_v62 = vpop.f32.mrf.mxu0 }
 0x6d2   : > { %v6240_v60 = vpop.f32.mrf.mxu1  ;;  %v6544_v62 = vsel %vm823_vm5, %v6539_v24, %v6543_v19 }
 0x6d7   : > { %v6126_v1 = vpop.f32.mrf.mxu2 }
 0x6d8   : > { %v6164_v9 = vpop.f32.mrf.mxu3 }
 0x6d9   : > { %v6468_v31 = vpop.f32.mrf.mxu0 }
 0x6da   : > { %v6469_v21 = vadd.f32 %v6468_v31, %v15397_v33  ;;  %v6506_v60 = vpop.f32.mrf.mxu1  ;;  %v10047_v33 = vld [vmem:[%s16401_s9 + $0x288] sm:$0xf0] }
 0x6db   : > { %v10050_v47 = vor.u32 %v10720_v5, %v10047_v33 }
 0x6dc   : > { %v15621_v2 = vadd.f32 %v6506_v60, %v6469_v21  ;;  %6750 = vmatmul.bf16.gmra.mxu2 %v6542_v53  ;;  %6826 = vmatmul.bf16.gmra.mxu0 %v6542_v53  ;;  %v10037_v53 = vld [vmem:[%s16401_s9 + $0x270] sm:$0xf] }
 0x6dd   : > { %9973 = vmatmul.msk.bf16.gmra.mxu3 %vm1587_vm15, %v6544_v62  ;;  %9981 = vmatmul.msk.bf16.gmra.mxu1 %vm1587_vm15, %v6544_v62  ;;  %v10719_v62 = vld [vmem:[%s16401_s9 + $0x274] sm:$0xf0] }
 0x6de   : > { %7216 = vmatpush.bf16.msra.mxu0 %v10050_v47  ;;  %v10038_v5 = vor.u32 %v10719_v62, %v10037_v53  ;;  %v10718_v53 = vld [vmem:[%s16401_s9 + $0x274] sm:$0xf]  ;;  %v10039_v62 = vld [vmem:[%s16401_s9 + $0x278] sm:$0xf0] }
 0x6df   : > { %v6392_v11 = vpop.f32.mrf.mxu2 }
 0x6e0   : > { %v6393_v55 = vadd.f32 %v6392_v11, %v15411_v8  ;;  %v6430_v1 = vpop.f32.mrf.mxu3  ;;  %v10085_v8 = vld [vmem:[%s16401_s9 + $0x2d0] sm:$0xf]  ;;  %v6545_v11 = vrot.slane %v14959_v52, 1  ;;  %7141 = vmatpush.bf16.msra.mxu2 %v10038_v5  ;;  %v10042_v5 = vor.u32 %v10718_v53, %v10039_v62  ;;  %v10717_v62 = vld [vmem:[%s16401_s9 + $0x264] sm:$0xf0] }
 0x6e1   : > { %v6470_v24 = vpop.f32.mrf.mxu0 }
 0x6e2   : > { %v15633_v9 = vadd.f32 %v6430_v1, %v6393_v55  ;;  %v6471_v31 = vadd.f32 %v6470_v24, %v15413_v35  ;;  %v6508_v21 = vpop.f32.mrf.mxu1  ;;  %v10731_v35 = vld [vmem:[%s16401_s9 + $0x2d4] sm:$0xf0]  ;;  %v6547_v24 = vrot.slane %v14961_v29, 1  ;;  %7217 = vmatpush.bf16.msra.mxu0 %v10042_v5  ;;  %v6549_v5 = vrot.slane %v15052_v4, 1 }
 0x6e3   : > { %v10086_v33 = vor.u32 %v10731_v35, %v10085_v8  ;;  %v6546_v8 = vsel %vm823_vm5, %v6541_v34, %v6545_v11  ;;  %v10087_v35 = vld [vmem:[%s16401_s9 + $0x2d8] sm:$0xf0] }
 0x6e4   : > { %v15636_v60 = vadd.f32 %v6508_v21, %v6471_v31 }
 0x6e5   : > { %7181 = vmatpush.bf16.msra.mxu3 %v10086_v33 }
 0x6e7   : > { %v6394_v47 = vpop.f32.mrf.mxu2 }
 0x6e8   : > { %v6395_v55 = vadd.f32 %v6394_v47, %v15427_v18  ;;  %v6432_v1 = vpop.f32.mrf.mxu3  ;;  %v10730_v18 = vld [vmem:[%s16401_s9 + $0x2d4] sm:$0xf] }
 0x6e9   : > { %v6473_v31 = vpop.f32.mrf.mxu0  ;;  %v10090_v33 = vor.u32 %v10730_v18, %v10087_v35 }
 0x6ea   : > { %v15653_v21 = vadd.f32 %v6432_v1, %v6395_v55  ;;  %v6511_v36 = vpop.f32.mrf.mxu1 }
 0x6eb   : > { %v6548_v36 = vsel %vm823_vm5, %v6543_v19, %v6547_v24  ;;  %7257 = vmatpush.bf16.msra.mxu1 %v10090_v33  ;;  %v10029_v19 = vld [vmem:[%s16401_s9 + $0x260] sm:$0xf] }
 0x6ec   : > { %6754 = vmatmul.bf16.gmra.mxu2 %v6546_v8  ;;  %6830 = vmatmul.bf16.gmra.mxu0 %v6546_v8  ;;  %v10030_v18 = vor.u32 %v10717_v62, %v10029_v19 }
 0x6ed   : > { %9974 = vmatmul.msk.bf16.gmra.mxu3 %vm1587_vm15, %v6548_v36  ;;  %9982 = vmatmul.msk.bf16.gmra.mxu1 %vm1587_vm15, %v6548_v36 }
 0x6ee   : > { %7142 = vmatpush.bf16.msra.mxu2 %v10030_v18 }
 0x6ef   : > { %v6397_v47 = vpop.f32.mrf.mxu2 }
 0x6f0   : > { %v6435_v55 = vpop.f32.mrf.mxu3 }
 0x6f1   : > { %v6474_v1 = vpop.f32.mrf.mxu0 }
 0x6f2   : > { %v6475_v34 = vadd.f32 %v6474_v1, %v15447_v48  ;;  %v6512_v31 = vpop.f32.mrf.mxu1  ;;  %v6551_v48 = vrot.slane %v15054_v39, 1  ;;  %v10716_v1 = vld [vmem:[%s16401_s9 + $0x264] sm:$0xf] }
 0x6f4   : > { %v15672_v53 = vadd.f32 %v6512_v31, %v6475_v34  ;;  %v10031_v34 = vld [vmem:[%s16401_s9 + $0x268] sm:$0xf0]  ;;  %v6550_v31 = vsel %vm823_vm5, %v6545_v11, %v6549_v5  ;;  %v10021_v11 = vld [vmem:[%s16401_s9 + $0x250] sm:$0xf] }
 0x6f5   : > { %v10034_v19 = vor.u32 %v10716_v1, %v10031_v34  ;;  %v10729_v1 = vld [vmem:[%s16401_s9 + $0x2c4] sm:$0xf0]  ;;  %v10023_v34 = vld [vmem:[%s16401_s9 + $0x258] sm:$0xf0] }
 0x6f7   : > { %v6398_v8 = vpop.f32.mrf.mxu2  ;;  %7218 = vmatpush.bf16.msra.mxu0 %v10034_v19 }
 0x6f8   : > { %v6399_v35 = vadd.f32 %v6398_v8, %v15455_v16  ;;  %v6436_v36 = vpop.f32.mrf.mxu3  ;;  %v6552_v16 = vsel %vm823_vm5, %v6547_v24, %v6551_v48  ;;  %v10715_v24 = vld [vmem:[%s16401_s9 + $0x254] sm:$0xf0] }
 0x6f9   : > { %v6477_v33 = vpop.f32.mrf.mxu0 }
 0x6fa   : > { %v15683_v47 = vadd.f32 %v6436_v36, %v6399_v35  ;;  %v6515_v55 = vpop.f32.mrf.mxu1  ;;  %v10077_v33 = vld [vmem:[%s16401_s9 + $0x2c0] sm:$0xf] }
 0x6fb   : > { %v10022_v55 = vor.u32 %v10715_v24, %v10021_v11  ;;  %v10078_v19 = vor.u32 %v10729_v1, %v10077_v33  ;;  %v6553_v24 = vrot.slane %v15177_v30, 1  ;;  %v6555_v33 = vrot.slane %v15179_v10, 1 }
 0x6fc   : > { %6758 = vmatmul.bf16.gmra.mxu2 %v6550_v31  ;;  %6834 = vmatmul.bf16.gmra.mxu0 %v6550_v31 }
 0x6fd   : > { %9975 = vmatmul.msk.bf16.gmra.mxu3 %vm1587_vm15, %v6552_v16  ;;  %9983 = vmatmul.msk.bf16.gmra.mxu1 %vm1587_vm15, %v6552_v16  ;;  %v6554_v39 = vsel %vm823_vm5, %v6549_v5, %v6553_v24 }
 0x6fe   : > { %7143 = vmatpush.bf16.msra.mxu2 %v10022_v55  ;;  %7182 = vmatpush.bf16.msra.mxu3 %v10078_v19  ;;  %v6556_v55 = vsel %vm823_vm5, %v6551_v48, %v6555_v33  ;;  %v10713_v19 = vld [vmem:[%s16401_s9 + $0x244] sm:$0xf0] }
 0x6ff   : > { %v6401_v62 = vpop.f32.mrf.mxu2 }
 0x700   : > { %v6439_v18 = vpop.f32.mrf.mxu3  ;;  %v10728_v62 = vld [vmem:[%s16401_s9 + $0x2c4] sm:$0xf] }
 0x701   : > { %v6478_v8 = vpop.f32.mrf.mxu0  ;;  %v10079_v18 = vld [vmem:[%s16401_s9 + $0x2c8] sm:$0xf0] }
 0x702   : > { %v6479_v35 = vadd.f32 %v6478_v8, %v15487_v37  ;;  %v6516_v36 = vpop.f32.mrf.mxu1  ;;  %v10714_v37 = vld [vmem:[%s16401_s9 + $0x254] sm:$0xf]  ;;  %v10082_v8 = vor.u32 %v10728_v62, %v10079_v18 }
 0x703   : > { %v10026_v16 = vor.u32 %v10714_v37, %v10023_v34 }
 0x704   : > { %v15714_v31 = vadd.f32 %v6516_v36, %v6479_v35  ;;  %7258 = vmatpush.bf16.msra.mxu1 %v10082_v8  ;;  %v10712_v8 = vld [vmem:[%s16401_s9 + $0x244] sm:$0xf] }
 0x705   : > { %7219 = vmatpush.bf16.msra.mxu0 %v10026_v16 }
 0x707   : > { %v6402_v11 = vpop.f32.mrf.mxu2 }
 0x708   : > { %v6403_v35 = vadd.f32 %v6402_v11, %v15495_v14  ;;  %v6440_v36 = vpop.f32.mrf.mxu3  ;;  %v10013_v14 = vld [vmem:[%s16401_s9 + $0x240] sm:$0xf]  ;;  %v10015_v11 = vld [vmem:[%s16401_s9 + $0x248] sm:$0xf0] }
 0x709   : > { %v6481_v1 = vpop.f32.mrf.mxu0  ;;  %v10014_v16 = vor.u32 %v10713_v19, %v10013_v14 }
 0x70a   : > { %v15725_v37 = vadd.f32 %v6440_v36, %v6403_v35  ;;  %v6519_v34 = vpop.f32.mrf.mxu1  ;;  %v10018_v35 = vor.u32 %v10712_v8, %v10015_v11 }
 0x70b   : > { %7144 = vmatpush.bf16.msra.mxu2 %v10014_v16  ;;  %v6557_v34 = vrot.slane %v15225_v61, 1 }
 0x70c   : > { %6762 = vmatmul.bf16.gmra.mxu2 %v6554_v39  ;;  %6838 = vmatmul.bf16.gmra.mxu0 %v6554_v39 }
 0x70d   : > { %9976 = vmatmul.msk.bf16.gmra.mxu3 %vm1587_vm15, %v6556_v55  ;;  %9984 = vmatmul.msk.bf16.gmra.mxu1 %vm1587_vm15, %v6556_v55 }
 0x70e   : > { %7220 = vmatpush.bf16.msra.mxu0 %v10018_v35 }
 0x70f   : > { %v6405_v62 = vpop.f32.mrf.mxu2 }
 0x710   : > { %v6443_v18 = vpop.f32.mrf.mxu3 }
 0x711   : > { %v6482_v5 = vpop.f32.mrf.mxu0 }
 0x712   : > { %v6483_v48 = vadd.f32 %v6482_v5, %v15515_v13  ;;  %v6520_v39 = vpop.f32.mrf.mxu1  ;;  %v6559_v13 = vrot.slane %v15227_v15, 1  ;;  %v6558_v5 = vsel %vm823_vm5, %v6553_v24, %v6557_v34  ;;  %v10235_v24 = vld [vmem:[%s16401_s9 + $0x3b0] sm:$0xf] }
 0x714   : > { %v15744_v36 = vadd.f32 %v6520_v39, %v6483_v48  ;;  %v6560_v48 = vsel %vm823_vm5, %v6555_v33, %v6559_v13  ;;  %v10759_v33 = vld [vmem:[%s16401_s9 + $0x3b4] sm:$0xf0] }
 0x715   : > { %v10236_v35 = vor.u32 %v10759_v33, %v10235_v24 }
 0x717   : > { %v6406_v1 = vpop.f32.mrf.mxu2  ;;  %7551 = vmatpush.bf16.msrb.mxu3 %v10236_v35 }
 0x718   : > { %v6407_v55 = vadd.f32 %v6406_v1, %v15517_v46  ;;  %v6444_v14 = vpop.f32.mrf.mxu3  ;;  %v10203_v46 = vld [vmem:[%s16401_s9 + $0x370] sm:$0xf] }
 0x719   : > { %v6485_v19 = vpop.f32.mrf.mxu0 }
 0x71a   : > { %v15749_v16 = vadd.f32 %v6444_v14, %v6407_v55  ;;  %v6486_v62 = vadd.f32 %v6485_v19, %v15519_v27  ;;  %v6523_v18 = vpop.f32.mrf.mxu1  ;;  %v10751_v27 = vld [vmem:[%s16401_s9 + $0x374] sm:$0xf0] }
 0x71b   : > { %v10204_v39 = vor.u32 %v10751_v27, %v10203_v46  ;;  %v10237_v46 = vld [vmem:[%s16401_s9 + $0x3b8] sm:$0xf0] }
 0x71c   : > { %v15753_v8 = vadd.f32 %v6523_v18, %v6486_v62  ;;  %6766 = vmatmul.bf16.gmra.mxu2 %v6558_v5  ;;  %6842 = vmatmul.bf16.gmra.mxu0 %v6558_v5  ;;  %v10750_v18 = vld [vmem:[%s16401_s9 + $0x374] sm:$0xf]  ;;  %v10205_v5 = vld [vmem:[%s16401_s9 + $0x378] sm:$0xf0] }
 0x71d   : > { %9977 = vmatmul.msk.bf16.gmra.mxu3 %vm1587_vm15, %v6560_v48  ;;  %9985 = vmatmul.msk.bf16.gmra.mxu1 %vm1587_vm15, %v6560_v48  ;;  %v10758_v48 = vld [vmem:[%s16401_s9 + $0x3b4] sm:$0xf] }
 0x71e   : > { %7509 = vmatpush.bf16.msrb.mxu2 %v10204_v39  ;;  %v10240_v27 = vor.u32 %v10758_v48, %v10237_v46  ;;  %v6909_v46 = vrot.slane %v14868_v63, 1 }
 0x71f   : > { %v6409_v11 = vpop.f32.mrf.mxu2 }
 0x720   : > { %v6410_v1 = vadd.f32 %v6409_v11, %v15539_v50  ;;  %v6447_v55 = vpop.f32.mrf.mxu3  ;;  %v10208_v50 = vor.u32 %v10750_v18, %v10205_v5  ;;  %7627 = vmatpush.bf16.msrb.mxu1 %v10240_v27  ;;  %v6910_v27 = vrot.slane %v14799_v25, 2 }
 0x721   : > { %v6487_v14 = vpop.f32.mrf.mxu0 }
 0x722   : > { %v15771_v19 = vadd.f32 %v6447_v55, %v6410_v1  ;;  %v6525_v62 = vpop.f32.mrf.mxu1  ;;  %7585 = vmatpush.bf16.msrb.mxu0 %v10208_v50  ;;  %v6571_v55 = vsel %vm823_vm5, %v6559_v13, 0  ;;  %v10195_v14 = vld [vmem:[%s16401_s9 + $0x360] sm:$0xf] }
 0x727   : > { %v6411_v24 = vpop.f32.mrf.mxu2 }
 0x728   : > { %v6449_v39 = vpop.f32.mrf.mxu3  ;;  %v10748_v24 = vld [vmem:[%s16401_s9 + $0x364] sm:$0xf] }
 0x729   : > { %v6489_v33 = vpop.f32.mrf.mxu0  ;;  %v10197_v39 = vld [vmem:[%s16401_s9 + $0x368] sm:$0xf0] }
 0x72a   : > { %v6490_v11 = vadd.f32 %v6489_v33, %v15553_v59  ;;  %v6527_v35 = vpop.f32.mrf.mxu1  ;;  %v10749_v59 = vld [vmem:[%s16401_s9 + $0x364] sm:$0xf0]  ;;  %v6917_v33 = vrot.slane %v14802_v32, 2 }
 0x72b   : > { %v10196_v62 = vor.u32 %v10749_v59, %v10195_v14  ;;  %v6913_v14 = vrot.slane %v14748_v3, 1  ;;  %v6914_v59 = vrot.slane %v14751_v58, 2 }
 0x72c   : > { %v15786_v1 = vadd.f32 %v6527_v35, %v6490_v11  ;;  %9971 = vmatmul.msk.bf16.gmra.mxu2 %vm823_vm5, %v6557_v34  ;;  %9979 = vmatmul.msk.bf16.gmra.mxu0 %vm823_vm5, %v6557_v34  ;;  %v10200_v11 = vor.u32 %v10748_v24, %v10197_v39  ;;  %v6906_v35 = vrot.slane %v14745_v43, 1  ;;  %v10187_v39 = vld [vmem:[%s16401_s9 + $0x350] sm:$0xf] }
 0x72d   : > { %9978 = vmatmul.msk.bf16.gmra.mxu3 %vm1587_vm15, %v6571_v55  ;;  %9986 = vmatmul.msk.bf16.gmra.mxu1 %vm1587_vm15, %v6571_v55  ;;  %v6907_v55 = vrot.slane %v14738_v17, 2  ;;  %v6915_v32 = vor.u32 %v6914_v59, %v6913_v14  ;;  %v10229_v14 = vld [vmem:[%s16401_s9 + $0x3a8] sm:$0xf0] }
 0x72e   : > { %7510 = vmatpush.bf16.msrb.mxu2 %v10196_v62  ;;  %7586 = vmatpush.bf16.msrb.mxu0 %v10200_v11  ;;  %v10747_v11 = vld [vmem:[%s16401_s9 + $0x354] sm:$0xf0] }
 0x72f   : > { %v6413_v18 = vpop.f32.mrf.mxu2 }
 0x730   : > { %v6414_v5 = vadd.f32 %v6413_v18, %v15567_v41  ;;  %v6451_v48 = vpop.f32.mrf.mxu3  ;;  %v6916_v41 = vrot.slane %v14880_v7, 1  ;;  %v6911_v18 = vor.u32 %v6910_v27, %v6909_v46  ;;  %v10227_v46 = vld [vmem:[%s16401_s9 + $0x3a0] sm:$0xf] }
 0x731   : > { %v6491_v13 = vpop.f32.mrf.mxu0 }
 0x732   : > { %v15800_v34 = vadd.f32 %v6451_v48, %v6414_v5  ;;  %v6529_v50 = vpop.f32.mrf.mxu1  ;;  %v6918_v48 = vor.u32 %v6917_v33, %v6916_v41  ;;  %v10188_v41 = vor.u32 %v10747_v11, %v10187_v39  ;;  %v10757_v33 = vld [vmem:[%s16401_s9 + $0x3a4] sm:$0xf0]  ;;  %v6920_v11 = vrot.slane %v14957_v22, 1 }
 0x733   : > { %v6908_v50 = vor.u32 %v6907_v55, %v6906_v35  ;;  %v10228_v35 = vor.u32 %v10757_v33, %v10227_v46  ;;  %v10746_v55 = vld [vmem:[%s16401_s9 + $0x354] sm:$0xf]  ;;  %v6921_v46 = vrot.slane %v14890_v20, 2  ;;  %v10179_v33 = vld [vmem:[%s16401_s9 + $0x340] sm:$0xf] }
 0x734   : > { %7511 = vmatpush.bf16.msrb.mxu2 %v10188_v41  ;;  %v6925_v41 = vrot.slane %v14893_v38, 2 }
 0x735   : > { %v6912_v24 = vsel %vm6905_vm1, %v6908_v50, %v6911_v18  ;;  %7552 = vmatpush.bf16.msrb.mxu3 %v10228_v35 }
 0x737   : > { %v6415_v62 = vpop.f32.mrf.mxu2 }
 0x738   : > { %v6453_v5 = vpop.f32.mrf.mxu3 }
 0x739   : > { %v6493_v13 = vpop.f32.mrf.mxu0 }
 0x73a   : > { %v6494_v7 = vadd.f32 %v6493_v13, %v15588_v26  ;;  %v6531_v25 = vpop.f32.mrf.mxu1  ;;  %v6919_v26 = vsel %vm6905_vm1, %v6915_v32, %v6918_v48  ;;  %v10756_v32 = vld [vmem:[%s16401_s9 + $0x3a4] sm:$0xf] }
 0x73b   : > { %v10232_v62 = vor.u32 %v10756_v32, %v10229_v14 }
 0x73c   : > { %v15827_v27 = vadd.f32 %v6531_v25, %v6494_v7  ;;  %7145 = vmatmul.bf16.vlgmr.msra.gmra.mxu2 %v6912_v24  ;;  %7221 = vmatmul.bf16.vlgmr.msra.gmra.mxu0 %v6912_v24  ;;  %v10189_v25 = vld [vmem:[%s16401_s9 + $0x358] sm:$0xf0] }
 0x73d   : > { %10107 = vmatmul.msk.bf16.vlgmr.msra.gmra.mxu3 %vm1587_vm15, %v6919_v26  ;;  %10114 = vmatmul.msk.bf16.vlgmr.msra.gmra.mxu1 %vm1587_vm15, %v6919_v26  ;;  %v10192_v7 = vor.u32 %v10746_v55, %v10189_v25  ;;  %v6924_v26 = vrot.slane %v14964_v51, 1  ;;  %v6922_v25 = vor.u32 %v6921_v46, %v6920_v11  ;;  %v10181_v11 = vld [vmem:[%s16401_s9 + $0x348] sm:$0xf0] }
 0x73e   : > { %7628 = vmatpush.bf16.msrb.mxu1 %v10232_v62 }
 0x73f   : > { %v6417_v59 = vpop.f32.mrf.mxu2  ;;  %7587 = vmatpush.bf16.msrb.mxu0 %v10192_v7  ;;  %v6926_v7 = vor.u32 %v6925_v41, %v6924_v26 }
 0x740   : > { %v6418_v5 = vadd.f32 %v6417_v59, %v15609_v28  ;;  %v6455_v13 = vpop.f32.mrf.mxu3  ;;  %v10745_v28 = vld [vmem:[%s16401_s9 + $0x344] sm:$0xf0] }
 0x741   : > { %v6495_v50 = vpop.f32.mrf.mxu0  ;;  %v10180_v35 = vor.u32 %v10745_v28, %v10179_v33 }
 0x742   : > { %v15848_v24 = vadd.f32 %v6455_v13, %v6418_v5  ;;  %v6533_v39 = vpop.f32.mrf.mxu1  ;;  %v6923_v5 = vsel %vm6905_vm1, %v6911_v18, %v6922_v25  ;;  %v6927_v13 = vsel %vm6905_vm1, %v6918_v48, %v6926_v7 }
 0x743   : > { %7512 = vmatpush.bf16.msrb.mxu2 %v10180_v35  ;;  %v10744_v39 = vld [vmem:[%s16401_s9 + $0x344] sm:$0xf] }
 0x744   : > { %v10184_v18 = vor.u32 %v10744_v39, %v10181_v11 }
 0x746   : > { %7588 = vmatpush.bf16.msrb.mxu0 %v10184_v18 }
 0x747   : > { %v6419_v55 = vpop.f32.mrf.mxu2 }
 0x748   : > { %v6457_v32 = vpop.f32.mrf.mxu3  ;;  %v10171_v55 = vld [vmem:[%s16401_s9 + $0x330] sm:$0xf] }
 0x749   : > { %v6822_v14 = vpop.f32.mrf.mxu0  ;;  %v10743_v32 = vld [vmem:[%s16401_s9 + $0x334] sm:$0xf0] }
 0x74a   : > { %v6860_v59 = vpop.f32.mrf.mxu1 }
 0x74b   : > { %v6861_v62 = vadd.f32 %v6860_v59, %v6822_v14  ;;  %v10219_v14 = vld [vmem:[%s16401_s9 + $0x390] sm:$0xf]  ;;  %v10172_v59 = vor.u32 %v10743_v32, %v10171_v55 }
 0x74c   : > { %7150 = vmatmul.bf16.gmra.mxu2 %v6923_v5  ;;  %7226 = vmatmul.bf16.gmra.mxu0 %v6923_v5 }
 0x74d   : > { %v15863_v50 = vadd.f32 %v6861_v62, %v15621_v2  ;;  %10108 = vmatmul.msk.bf16.gmra.mxu3 %vm1587_vm15, %v6927_v13  ;;  %10115 = vmatmul.msk.bf16.gmra.mxu1 %vm1587_vm15, %v6927_v13 }
 0x74e   : > { %7513 = vmatpush.bf16.msrb.mxu2 %v10172_v59 }
 0x74f   : > { %v6746_v46 = vpop.f32.mrf.mxu2 }
 0x750   : > { %v6784_v26 = vpop.f32.mrf.mxu3 }
 0x751   : > { %v6785_v48 = vadd.f32 %v6784_v26, %v6746_v46  ;;  %v6824_v41 = vpop.f32.mrf.mxu0  ;;  %v6931_v46 = vsel %vm6905_vm1, %v6922_v25, %v15281_v6  ;;  %v10742_v26 = vld [vmem:[%s16401_s9 + $0x334] sm:$0xf]  ;;  %v10221_v6 = vld [vmem:[%s16401_s9 + $0x398] sm:$0xf0] }
 0x752   : > { %v6862_v2 = vpop.f32.mrf.mxu1 }
 0x753   : > { %v15874_v33 = vadd.f32 %v6785_v48, %v15633_v9  ;;  %v6863_v28 = vadd.f32 %v6862_v2, %v6824_v41  ;;  %v10755_v9 = vld [vmem:[%s16401_s9 + $0x394] sm:$0xf0]  ;;  %v10173_v48 = vld [vmem:[%s16401_s9 + $0x338] sm:$0xf0]  ;;  %v10754_v41 = vld [vmem:[%s16401_s9 + $0x394] sm:$0xf] }
 0x754   : > { %v10176_v2 = vor.u32 %v10742_v26, %v10173_v48  ;;  %v10224_v25 = vor.u32 %v10754_v41, %v10221_v6  ;;  %v10165_v26 = vld [vmem:[%s16401_s9 + $0x328] sm:$0xf0] }
 0x755   : > { %v15877_v35 = vadd.f32 %v6863_v28, %v15636_v60  ;;  %v10220_v60 = vor.u32 %v10755_v9, %v10219_v14  ;;  %v10741_v9 = vld [vmem:[%s16401_s9 + $0x324] sm:$0xf0] }
 0x756   : > { %7589 = vmatpush.bf16.msrb.mxu0 %v10176_v2  ;;  %7629 = vmatpush.bf16.msrb.mxu1 %v10224_v25  ;;  %v10155_v25 = vld [vmem:[%s16401_s9 + $0x310] sm:$0xf] }
 0x757   : > { %v6748_v62 = vpop.f32.mrf.mxu2  ;;  %7553 = vmatpush.bf16.msrb.mxu3 %v10220_v60 }
 0x758   : > { %v6786_v5 = vpop.f32.mrf.mxu3 }
 0x759   : > { %v6787_v13 = vadd.f32 %v6786_v5, %v6748_v62  ;;  %v6827_v39 = vpop.f32.mrf.mxu0 }
 0x75a   : > { %v6865_v11 = vpop.f32.mrf.mxu1 }
 0x75b   : > { %v15892_v18 = vadd.f32 %v6787_v13, %v15653_v21  ;;  %v6935_v21 = vsel %vm6905_vm1, %v6926_v7, %v15286_v0  ;;  %v10163_v7 = vld [vmem:[%s16401_s9 + $0x320] sm:$0xf] }
 0x75c   : > { %7154 = vmatmul.bf16.gmra.mxu2 %v6931_v46  ;;  %7230 = vmatmul.bf16.gmra.mxu0 %v6931_v46  ;;  %v10164_v62 = vor.u32 %v10741_v9, %v10163_v7 }
 0x75d   : > { %10109 = vmatmul.msk.bf16.gmra.mxu3 %vm1587_vm15, %v6935_v21  ;;  %10116 = vmatmul.msk.bf16.gmra.mxu1 %vm1587_vm15, %v6935_v21 }
 0x75e   : > { %7514 = vmatpush.bf16.msrb.mxu2 %v10164_v62  ;;  %v10752_v62 = vld [vmem:[%s16401_s9 + $0x384] sm:$0xf] }
 0x75f   : > { %v6751_v28 = vpop.f32.mrf.mxu2 }
 0x760   : > { %v6789_v55 = vpop.f32.mrf.mxu3  ;;  %v10211_v28 = vld [vmem:[%s16401_s9 + $0x380] sm:$0xf] }
 0x761   : > { %v6828_v32 = vpop.f32.mrf.mxu0 }
 0x762   : > { %v6866_v14 = vpop.f32.mrf.mxu1 }
 0x763   : > { %v6867_v59 = vadd.f32 %v6866_v14, %v6828_v32  ;;  %v10738_v32 = vld [vmem:[%s16401_s9 + $0x314] sm:$0xf]  ;;  %v10157_v14 = vld [vmem:[%s16401_s9 + $0x318] sm:$0xf0] }
 0x764   : > { %v10160_v9 = vor.u32 %v10738_v32, %v10157_v14 }
 0x765   : > { %v15913_v0 = vadd.f32 %v6867_v59, %v15672_v53  ;;  %v10740_v53 = vld [vmem:[%s16401_s9 + $0x324] sm:$0xf] }
 0x766   : > { %v10168_v48 = vor.u32 %v10740_v53, %v10165_v26 }
 0x767   : > { %v6752_v60 = vpop.f32.mrf.mxu2 }
 0x768   : > { %v6790_v5 = vpop.f32.mrf.mxu3  ;;  %7590 = vmatpush.bf16.msrb.mxu0 %v10168_v48  ;;  %v10147_v48 = vld [vmem:[%s16401_s9 + $0x300] sm:$0xf] }
 0x769   : > { %v6791_v13 = vadd.f32 %v6790_v5, %v6752_v60  ;;  %v6831_v39 = vpop.f32.mrf.mxu0  ;;  %v10213_v60 = vld [vmem:[%s16401_s9 + $0x388] sm:$0xf0] }
 0x76a   : > { %v6869_v11 = vpop.f32.mrf.mxu1  ;;  %v10216_v5 = vor.u32 %v10752_v62, %v10213_v60 }
 0x76b   : > { %v15922_v46 = vadd.f32 %v6791_v13, %v15683_v47 }
 0x76c   : > { %7158 = vmatmul.bf16.gmra.mxu2 %v15294_v44  ;;  %7234 = vmatmul.bf16.gmra.mxu0 %v15294_v44  ;;  %v10739_v44 = vld [vmem:[%s16401_s9 + $0x314] sm:$0xf0] }
 0x76d   : > { %10110 = vmatmul.msk.bf16.gmra.mxu3 %vm1587_vm15, %v15298_v12  ;;  %10117 = vmatmul.msk.bf16.gmra.mxu1 %vm1587_vm15, %v15298_v12  ;;  %v10156_v55 = vor.u32 %v10739_v44, %v10155_v25  ;;  %v10753_v12 = vld [vmem:[%s16401_s9 + $0x384] sm:$0xf0]  ;;  %v6952_v25 = vrot.slane %v15284_v49, 1  ;;  %v6953_v44 = vrot.slane %v15233_v54, 2 }
 0x76e   : > { %v10212_v7 = vor.u32 %v10753_v12, %v10211_v28  ;;  %7591 = vmatpush.bf16.msrb.mxu0 %v10160_v9  ;;  %7630 = vmatpush.bf16.msrb.mxu1 %v10216_v5  ;;  %v10149_v28 = vld [vmem:[%s16401_s9 + $0x308] sm:$0xf0]  ;;  %v6957_v12 = vrot.slane %v15239_v40, 2 }
 0x76f   : > { %v6755_v47 = vpop.f32.mrf.mxu2  ;;  %7515 = vmatpush.bf16.msrb.mxu2 %v10156_v55  ;;  %v6956_v55 = vrot.slane %v15289_v23, 1  ;;  %v6954_v9 = vor.u32 %v6953_v44, %v6952_v25 }
 0x770   : > { %v6793_v41 = vpop.f32.mrf.mxu3  ;;  %7554 = vmatpush.bf16.msrb.mxu3 %v10212_v7  ;;  %v10737_v47 = vld [vmem:[%s16401_s9 + $0x304] sm:$0xf0] }
 0x771   : > { %v6832_v21 = vpop.f32.mrf.mxu0  ;;  %v6958_v60 = vor.u32 %v6957_v12, %v6956_v55  ;;  %v10341_v55 = vld [vmem:[%s16401_s9 + $0x438] sm:$0xf0]  ;;  %v10782_v12 = vld [vmem:[%s16401_s9 + $0x474] sm:$0xf] }
 0x772   : > { %v6870_v2 = vpop.f32.mrf.mxu1 }
 0x773   : > { %v6871_v6 = vadd.f32 %v6870_v2, %v6832_v21 }
 0x775   : > { %v15955_v59 = vadd.f32 %v6871_v6, %v15714_v31 }
 0x777   : > { %v6756_v13 = vpop.f32.mrf.mxu2 }
 0x778   : > { %v6794_v39 = vpop.f32.mrf.mxu3 }
 0x779   : > { %v6795_v11 = vadd.f32 %v6794_v39, %v6756_v13  ;;  %v6835_v31 = vpop.f32.mrf.mxu0 }
 0x77a   : > { %v6873_v53 = vpop.f32.mrf.mxu1 }
 0x77b   : > { %v15964_v26 = vadd.f32 %v6795_v11, %v15725_v37  ;;  %v10148_v37 = vor.u32 %v10737_v47, %v10147_v48  ;;  %v6955_v53 = vsel %vm6905_vm1, %v15323_v42, %v6954_v9  ;;  %v16490_v48 = vld [vmem:[#allocation2_spill] sm:$0xff]  ;;  %v10775_v42 = vld [vmem:[%s16401_s9 + $0x434] sm:$0xf0] }
 0x77c   : > { %7162 = vmatmul.bf16.gmra.mxu2 %v15329_v56  ;;  %7238 = vmatmul.bf16.gmra.mxu0 %v15329_v56 }
 0x77d   : > { %10111 = vmatmul.msk.bf16.gmra.mxu3 %vm1587_vm15, %v15333_v57  ;;  %10118 = vmatmul.msk.bf16.gmra.mxu1 %vm1587_vm15, %v15333_v57  ;;  %v10736_v57 = vld [vmem:[%s16401_s9 + $0x304] sm:$0xf] }
 0x77e   : > { %7516 = vmatpush.bf16.msrb.mxu2 %v10148_v37  ;;  %v10152_v32 = vor.u32 %v10736_v57, %v10149_v28  ;;  %v10371_v37 = vld [vmem:[%s16401_s9 + $0x470] sm:$0xf]  ;;  %v10774_v28 = vld [vmem:[%s16401_s9 + $0x434] sm:$0xf] }
 0x77f   : > { %v6759_v41 = vpop.f32.mrf.mxu2 }
 0x780   : > { %v6797_v21 = vpop.f32.mrf.mxu3  ;;  %7592 = vmatpush.bf16.msrb.mxu0 %v10152_v32  ;;  %v10344_v32 = vor.u32 %v10774_v28, %v10341_v55 }
 0x781   : > { %v6836_v2 = vpop.f32.mrf.mxu0 }
 0x782   : > { %v6874_v56 = vpop.f32.mrf.mxu1 }
 0x783   : > { %v6875_v6 = vadd.f32 %v6874_v56, %v6836_v2 }
 0x784   : > { %7985 = vmatpush.bf16.msra.mxu0 %v10344_v32 }
 0x785   : > { %v15989_v14 = vadd.f32 %v6875_v6, %v15744_v36  ;;  %v6959_v36 = vsel %vm6905_vm1, %v16490_v48, %v6958_v60  ;;  %v6970_v48 = vsel %vm6968_vm9, %v6958_v60, 0 }
 0x787   : > { %v6760_v7 = vpop.f32.mrf.mxu2 }
 0x788   : > { %v6798_v62 = vpop.f32.mrf.mxu3 }
 0x789   : > { %v6799_v5 = vadd.f32 %v6798_v62, %v6760_v7  ;;  %v6839_v13 = vpop.f32.mrf.mxu0  ;;  %v10373_v7 = vld [vmem:[%s16401_s9 + $0x478] sm:$0xf0] }
 0x78a   : > { %v6877_v39 = vpop.f32.mrf.mxu1  ;;  %v10376_v62 = vor.u32 %v10782_v12, %v10373_v7  ;;  %v16492_v12 = vld [vmem:[#allocation11_spill] sm:$0xff] }
 0x78b   : > { %v15992_v11 = vadd.f32 %v6799_v5, %v15749_v16  ;;  %v6878_v31 = vadd.f32 %v6877_v39, %v6839_v13  ;;  %v10339_v16 = vld [vmem:[%s16401_s9 + $0x430] sm:$0xf]  ;;  %v7310_v32 = vrot.slane %v16492_v12, 2 }
 0x78c   : > { %7166 = vmatmul.bf16.gmra.mxu2 %v6955_v53  ;;  %7242 = vmatmul.bf16.gmra.mxu0 %v6955_v53  ;;  %v10340_v41 = vor.u32 %v10775_v42, %v10339_v16  ;;  %v6969_v53 = vsel %vm6968_vm9, %v6954_v9, 0  ;;  %v10331_v16 = vld [vmem:[%s16401_s9 + $0x420] sm:$0xf]  ;;  %v10773_v42 = vld [vmem:[%s16401_s9 + $0x424] sm:$0xf0] }
 0x78d   : > { %v15999_v47 = vadd.f32 %v6878_v31, %v15753_v8  ;;  %10112 = vmatmul.msk.bf16.gmra.mxu3 %vm1587_vm15, %v6959_v36  ;;  %10119 = vmatmul.msk.bf16.gmra.mxu1 %vm1587_vm15, %v6959_v36  ;;  %v10783_v8 = vld [vmem:[%s16401_s9 + $0x474] sm:$0xf0] }
 0x78e   : > { %v10372_v2 = vor.u32 %v10783_v8, %v10371_v37  ;;  %7909 = vmatpush.bf16.msra.mxu2 %v10340_v41  ;;  %8027 = vmatpush.bf16.msra.mxu1 %v10376_v62  ;;  %v10332_v37 = vor.u32 %v10773_v42, %v10331_v16  ;;  %v10363_v16 = vld [vmem:[%s16401_s9 + $0x460] sm:$0xf] }
 0x78f   : > { %v6763_v21 = vpop.f32.mrf.mxu2 }
 0x790   : > { %v6801_v56 = vpop.f32.mrf.mxu3  ;;  %7951 = vmatpush.bf16.msra.mxu3 %v10372_v2  ;;  %v10772_v2 = vld [vmem:[%s16401_s9 + $0x424] sm:$0xf] }
 0x791   : > { %v6802_v6 = vadd.f32 %v6801_v56, %v6763_v21  ;;  %v6841_v25 = vpop.f32.mrf.mxu0  ;;  %v10333_v56 = vld [vmem:[%s16401_s9 + $0x428] sm:$0xf0] }
 0x792   : > { %v6879_v44 = vpop.f32.mrf.mxu1  ;;  %7910 = vmatpush.bf16.msra.mxu2 %v10332_v37 }
 0x793   : > { %v16016_v57 = vadd.f32 %v6802_v6, %v15771_v19  ;;  %v10336_v6 = vor.u32 %v10772_v2, %v10333_v56  ;;  %v16491_v44 = vld [vmem:[#allocation8_spill] sm:$0xff]  ;;  %v10780_v2 = vld [vmem:[%s16401_s9 + $0x464] sm:$0xf]  ;;  %v10365_v56 = vld [vmem:[%s16401_s9 + $0x468] sm:$0xf0] }
 0x794   : > { %v7307_v28 = vrot.slane %v16491_v44, 2 }
 0x795   : > { %7986 = vmatpush.bf16.msra.mxu0 %v10336_v6 }
 0x797   : > { %v6765_v19 = vpop.f32.mrf.mxu2 }
 0x798   : > { %v6803_v5 = vpop.f32.mrf.mxu3 }
 0x799   : > { %v6843_v13 = vpop.f32.mrf.mxu0  ;;  %v16494_v5 = vld [vmem:[#allocation4_spill] sm:$0xff] }
 0x79a   : > { %v6881_v39 = vpop.f32.mrf.mxu1 }
 0x79b   : > { %v6882_v31 = vadd.f32 %v6881_v39, %v6843_v13  ;;  %v7309_v13 = vrot.slane %v16494_v5, 2 }
 0x79c   : > { %7170 = vmatmul.bf16.gmra.mxu2 %v6969_v53  ;;  %7246 = vmatmul.bf16.gmra.mxu0 %v6969_v53  ;;  %v10323_v53 = vld [vmem:[%s16401_s9 + $0x410] sm:$0xf] }
 0x79d   : > { %v16033_v36 = vadd.f32 %v6882_v31, %v15786_v1  ;;  %10113 = vmatmul.msk.bf16.gmra.mxu3 %vm1587_vm15, %v6970_v48  ;;  %10120 = vmatmul.msk.bf16.gmra.mxu1 %vm1587_vm15, %v6970_v48  ;;  %v10771_v48 = vld [vmem:[%s16401_s9 + $0x414] sm:$0xf0]  ;;  %v7311_v42 = vsel %vm7305_vm10, %v7309_v13, %v7310_v32 }
 0x79e   : > { %v10324_v37 = vor.u32 %v10771_v48, %v10323_v53  ;;  %v16495_v53 = vld [vmem:[#allocation14_spill] sm:$0xff] }
 0x79f   : > { %v6767_v9 = vpop.f32.mrf.mxu2  ;;  %v7314_v48 = vrot.slane %v16495_v53, 2 }
 0x7a0   : > { %v6805_v41 = vpop.f32.mrf.mxu3  ;;  %7911 = vmatpush.bf16.msra.mxu2 %v10324_v37 }
 0x7a1   : > { %v6806_v60 = vadd.f32 %v6805_v41, %v6767_v9  ;;  %v6845_v8 = vpop.f32.mrf.mxu0  ;;  %v10781_v9 = vld [vmem:[%s16401_s9 + $0x464] sm:$0xf0] }
 0x7a2   : > { %v6883_v1 = vpop.f32.mrf.mxu1  ;;  %v10770_v8 = vld [vmem:[%s16401_s9 + $0x414] sm:$0xf] }
 0x7a3   : > { %v16044_v21 = vadd.f32 %v6806_v60, %v15800_v34  ;;  %v16493_v34 = vld [vmem:[#allocation10_spill] sm:$0xff]  ;;  %v10364_v60 = vor.u32 %v10781_v9, %v10363_v16  ;;  %v10325_v1 = vld [vmem:[%s16401_s9 + $0x418] sm:$0xf0]  ;;  %v7315_v9 = vsel %vm7305_vm10, %v7310_v32, %v7314_v48 }
 0x7a4   : > { %v7306_v62 = vrot.slane %v16493_v34, 2 }
 0x7a5   : > { %7952 = vmatpush.bf16.msra.mxu3 %v10364_v60 }
 0x7a6   : > { %v7308_v31 = vsel %vm7305_vm10, %v7306_v62, %v7307_v28  ;;  %v10315_v62 = vld [vmem:[%s16401_s9 + $0x400] sm:$0xf] }
 0x7a7   : > { %v6769_v25 = vpop.f32.mrf.mxu2 }
 0x7a8   : > { %v6807_v55 = vpop.f32.mrf.mxu3  ;;  %v10368_v25 = vor.u32 %v10780_v2, %v10365_v56 }
 0x7a9   : > { %v6847_v7 = vpop.f32.mrf.mxu0 }
 0x7aa   : > { %v6885_v19 = vpop.f32.mrf.mxu1  ;;  %8028 = vmatpush.bf16.msra.mxu1 %v10368_v25 }
 0x7ab   : > { %v6886_v39 = vadd.f32 %v6885_v19, %v6847_v7  ;;  %v10769_v19 = vld [vmem:[%s16401_s9 + $0x404] sm:$0xf0] }
 0x7ac   : > { %7517 = vmatmul.bf16.vlgmr.msrb.gmra.mxu2 %v7308_v31  ;;  %7593 = vmatmul.bf16.vlgmr.msrb.gmra.mxu0 %v7308_v31  ;;  %v10316_v5 = vor.u32 %v10769_v19, %v10315_v62 }
 0x7ad   : > { %v16071_v41 = vadd.f32 %v6886_v39, %v15827_v27  ;;  %10242 = vmatmul.msk.bf16.vlgmr.msrb.gmra.mxu3 %vm1587_vm15, %v7311_v42  ;;  %10250 = vmatmul.msk.bf16.vlgmr.msrb.gmra.mxu1 %vm1587_vm15, %v7311_v42  ;;  %v10328_v27 = vor.u32 %v10770_v8, %v10325_v1  ;;  %v7312_v39 = vrot.slane %v14870_v45, 2  ;;  %v10768_v45 = vld [vmem:[%s16401_s9 + $0x404] sm:$0xf]  ;;  %v10317_v8 = vld [vmem:[%s16401_s9 + $0x408] sm:$0xf0] }
 0x7ae   : > { %7912 = vmatpush.bf16.msra.mxu2 %v10316_v5 }
 0x7af   : > { %v6771_v6 = vpop.f32.mrf.mxu2  ;;  %7987 = vmatpush.bf16.msra.mxu0 %v10328_v27  ;;  %v7313_v37 = vsel %vm7305_vm10, %v7307_v28, %v7312_v39  ;;  %v10320_v28 = vor.u32 %v10768_v45, %v10317_v8 }
 0x7b0   : > { %v6809_v44 = vpop.f32.mrf.mxu3 }
 0x7b1   : > { %v6810_v55 = vadd.f32 %v6809_v44, %v6771_v6  ;;  %v6849_v12 = vpop.f32.mrf.mxu0  ;;  %v10307_v44 = vld [vmem:[%s16401_s9 + $0x3f0] sm:$0xf] }
 0x7b2   : > { %v6887_v7 = vpop.f32.mrf.mxu1  ;;  %v10355_v12 = vld [vmem:[%s16401_s9 + $0x450] sm:$0xf] }
 0x7b3   : > { %v16088_v34 = vadd.f32 %v6810_v55, %v15848_v24  ;;  %7988 = vmatpush.bf16.msra.mxu0 %v10320_v28  ;;  %v10767_v55 = vld [vmem:[%s16401_s9 + $0x3f4] sm:$0xf0] }
 0x7b4   : > { %v10308_v7 = vor.u32 %v10767_v55, %v10307_v44  ;;  %v7320_v55 = vrot.slane %v15052_v4, 2  ;;  %v10301_v4 = vld [vmem:[%s16401_s9 + $0x3e8] sm:$0xf0] }
 0x7b6   : > { %7913 = vmatpush.bf16.msra.mxu2 %v10308_v7  ;;  %v16496_v7 = vld [vmem:[#allocation3_spill] sm:$0xff] }
 0x7b7   : > { %v6773_v13 = vpop.f32.mrf.mxu2 }
 0x7b8   : > { %v6811_v31 = vpop.f32.mrf.mxu3  ;;  %v7318_v13 = vrot.slane %v14961_v29, 2  ;;  %v10778_v29 = vld [vmem:[%s16401_s9 + $0x454] sm:$0xf] }
 0x7b9   : > { %v7222_v16 = vpop.f32.mrf.mxu0 }
 0x7ba   : > { %v7260_v42 = vpop.f32.mrf.mxu1 }
 0x7bb   : > { %v7261_v24 = vadd.f32 %v7260_v42, %v7222_v16 }
 0x7bc   : > { %7522 = vmatmul.bf16.gmra.mxu2 %v7313_v37  ;;  %7598 = vmatmul.bf16.gmra.mxu0 %v7313_v37  ;;  %v10766_v37 = vld [vmem:[%s16401_s9 + $0x3f4] sm:$0xf] }
 0x7bd   : > { %v16101_v60 = vadd.f32 %v7261_v24, %v15863_v50  ;;  %10243 = vmatmul.msk.bf16.gmra.mxu3 %vm1587_vm15, %v7315_v9  ;;  %10251 = vmatmul.msk.bf16.gmra.mxu1 %vm1587_vm15, %v7315_v9  ;;  %v7319_v9 = vsel %vm7305_vm10, %v7314_v48, %v7318_v13 }
 0x7bf   : > { %v7146_v1 = vpop.f32.mrf.mxu2 }
 0x7c0   : > { %v7184_v2 = vpop.f32.mrf.mxu3 }
 0x7c1   : > { %v7185_v32 = vadd.f32 %v7184_v2, %v7146_v1  ;;  %v7224_v27 = vpop.f32.mrf.mxu0 }
 0x7c2   : > { %v7262_v50 = vpop.f32.mrf.mxu1 }
 0x7c3   : > { %v16112_v56 = vadd.f32 %v7185_v32, %v15874_v33  ;;  %v7263_v6 = vadd.f32 %v7262_v50, %v7224_v27  ;;  %v10779_v33 = vld [vmem:[%s16401_s9 + $0x454] sm:$0xf0]  ;;  %v10299_v27 = vld [vmem:[%s16401_s9 + $0x3e0] sm:$0xf]  ;;  %v10765_v50 = vld [vmem:[%s16401_s9 + $0x3e4] sm:$0xf0] }
 0x7c4   : > { %v10356_v19 = vor.u32 %v10779_v33, %v10355_v12  ;;  %v7322_v33 = vrot.slane %v16496_v7, 2 }
 0x7c5   : > { %v16115_v25 = vadd.f32 %v7263_v6, %v15877_v35  ;;  %v7316_v35 = vrot.slane %v14959_v52, 2  ;;  %v10309_v52 = vld [vmem:[%s16401_s9 + $0x3f8] sm:$0xf0]  ;;  %v10300_v6 = vor.u32 %v10765_v50, %v10299_v27  ;;  %v10776_v27 = vld [vmem:[%s16401_s9 + $0x444] sm:$0xf] }
 0x7c6   : > { %7953 = vmatpush.bf16.msra.mxu3 %v10356_v19  ;;  %v10349_v50 = vld [vmem:[%s16401_s9 + $0x448] sm:$0xf0] }
 0x7c7   : > { %v7148_v62 = vpop.f32.mrf.mxu2  ;;  %v7317_v24 = vsel %vm7305_vm10, %v7312_v39, %v7316_v35  ;;  %v10357_v39 = vld [vmem:[%s16401_s9 + $0x458] sm:$0xf0]  ;;  %7914 = vmatpush.bf16.msra.mxu2 %v10300_v6  ;;  %v10352_v6 = vor.u32 %v10776_v27, %v10349_v50 }
 0x7c8   : > { %v7186_v5 = vpop.f32.mrf.mxu3  ;;  %v10360_v45 = vor.u32 %v10778_v29, %v10357_v39 }
 0x7c9   : > { %v7187_v31 = vadd.f32 %v7186_v5, %v7148_v62  ;;  %v7227_v53 = vpop.f32.mrf.mxu0 }
 0x7ca   : > { %v7265_v16 = vpop.f32.mrf.mxu1  ;;  %8029 = vmatpush.bf16.msra.mxu1 %v10360_v45  ;;  %v10764_v53 = vld [vmem:[%s16401_s9 + $0x3e4] sm:$0xf]  ;;  %v10777_v45 = vld [vmem:[%s16401_s9 + $0x444] sm:$0xf0] }
 0x7cb   : > { %v16132_v42 = vadd.f32 %v7187_v31, %v15892_v18  ;;  %v10312_v18 = vor.u32 %v10766_v37, %v10309_v52  ;;  %v7321_v31 = vsel %vm7305_vm10, %v7316_v35, %v7320_v55  ;;  %v7323_v16 = vsel %vm7305_vm10, %v7318_v13, %v7322_v33  ;;  %v10763_v13 = vld [vmem:[%s16401_s9 + $0x3d4] sm:$0xf0] }
 0x7cc   : > { %7526 = vmatmul.bf16.gmra.mxu2 %v7317_v24  ;;  %7602 = vmatmul.bf16.gmra.mxu0 %v7317_v24  ;;  %v10304_v24 = vor.u32 %v10764_v53, %v10301_v4 }
 0x7cd   : > { %10244 = vmatmul.msk.bf16.gmra.mxu3 %vm1587_vm15, %v7319_v9  ;;  %10252 = vmatmul.msk.bf16.gmra.mxu1 %vm1587_vm15, %v7319_v9  ;;  %v10291_v9 = vld [vmem:[%s16401_s9 + $0x3d0] sm:$0xf] }
 0x7ce   : > { %7989 = vmatpush.bf16.msra.mxu0 %v10312_v18  ;;  %v10347_v18 = vld [vmem:[%s16401_s9 + $0x440] sm:$0xf]  ;;  %v10292_v39 = vor.u32 %v10763_v13, %v10291_v9  ;;  %8030 = vmatpush.bf16.msra.mxu1 %v10352_v6  ;;  %v7328_v13 = vrot.slane %v15225_v61, 2 }
 0x7cf   : > { %v7151_v8 = vpop.f32.mrf.mxu2 }
 0x7d0   : > { %v7189_v28 = vpop.f32.mrf.mxu3  ;;  %v10762_v8 = vld [vmem:[%s16401_s9 + $0x3d4] sm:$0xf]  ;;  %7915 = vmatpush.bf16.msra.mxu2 %v10292_v39  ;;  %v7330_v39 = vrot.slane %v15227_v15, 2 }
 0x7d1   : > { %v7228_v1 = vpop.f32.mrf.mxu0  ;;  %v10293_v28 = vld [vmem:[%s16401_s9 + $0x3d8] sm:$0xf0] }
 0x7d2   : > { %v7266_v2 = vpop.f32.mrf.mxu1  ;;  %7990 = vmatpush.bf16.msra.mxu0 %v10304_v24 }
 0x7d3   : > { %v7267_v32 = vadd.f32 %v7266_v2, %v7228_v1  ;;  %v10348_v2 = vor.u32 %v10777_v45, %v10347_v18 }
 0x7d5   : > { %v16151_v48 = vadd.f32 %v7267_v32, %v15913_v0  ;;  %v10296_v32 = vor.u32 %v10762_v8, %v10293_v28  ;;  %7954 = vmatpush.bf16.msra.mxu3 %v10348_v2 }
 0x7d7   : > { %v7152_v44 = vpop.f32.mrf.mxu2  ;;  %7991 = vmatpush.bf16.msra.mxu0 %v10296_v32 }
 0x7d8   : > { %v7190_v12 = vpop.f32.mrf.mxu3 }
 0x7d9   : > { %v7191_v62 = vadd.f32 %v7190_v12, %v7152_v44  ;;  %v7231_v19 = vpop.f32.mrf.mxu0  ;;  %v7324_v12 = vrot.slane %v15177_v30, 2  ;;  %v10283_v30 = vld [vmem:[%s16401_s9 + $0x3c0] sm:$0xf] }
 0x7da   : > { %v7269_v0 = vpop.f32.mrf.mxu1 }
 0x7db   : > { %v16162_v5 = vadd.f32 %v7191_v62, %v15922_v46  ;;  %v7325_v53 = vsel %vm7305_vm10, %v7320_v55, %v7324_v12  ;;  %v7329_v27 = vsel %vm7305_vm10, %v7324_v12, %v7328_v13 }
 0x7dc   : > { %7530 = vmatmul.bf16.gmra.mxu2 %v7321_v31  ;;  %7606 = vmatmul.bf16.gmra.mxu0 %v7321_v31 }
 0x7dd   : > { %10245 = vmatmul.msk.bf16.gmra.mxu3 %vm1587_vm15, %v7323_v16  ;;  %10253 = vmatmul.msk.bf16.gmra.mxu1 %vm1587_vm15, %v7323_v16 }
 0x7df   : > { %v7155_v46 = vpop.f32.mrf.mxu2 }
 0x7e0   : > { %v7193_v35 = vpop.f32.mrf.mxu3 }
 0x7e1   : > { %v7232_v37 = vpop.f32.mrf.mxu0  ;;  %v10760_v35 = vld [vmem:[%s16401_s9 + $0x3c4] sm:$0xf] }
 0x7e2   : > { %v7270_v52 = vpop.f32.mrf.mxu1 }
 0x7e3   : > { %v7271_v29 = vadd.f32 %v7270_v52, %v7232_v37  ;;  %v10285_v37 = vld [vmem:[%s16401_s9 + $0x3c8] sm:$0xf0] }
 0x7e4   : > { %v10288_v52 = vor.u32 %v10760_v35, %v10285_v37 }
 0x7e5   : > { %v16193_v1 = vadd.f32 %v7271_v29, %v15955_v59  ;;  %v7326_v59 = vrot.slane %v15179_v10, 2  ;;  %v10761_v10 = vld [vmem:[%s16401_s9 + $0x3c4] sm:$0xf0] }
 0x7e6   : > { %7992 = vmatpush.bf16.msra.mxu0 %v10288_v52  ;;  %v7678_v52 = vrot.slane %v14745_v43, 2 }
 0x7e7   : > { %v7156_v44 = vpop.f32.mrf.mxu2  ;;  %v7327_v4 = vsel %vm7305_vm10, %v7322_v33, %v7326_v59 }
 0x7e8   : > { %v7194_v7 = vpop.f32.mrf.mxu3 }
 0x7e9   : > { %v7195_v62 = vadd.f32 %v7194_v7, %v7156_v44  ;;  %v7235_v19 = vpop.f32.mrf.mxu0 }
 0x7ea   : > { %v7273_v0 = vpop.f32.mrf.mxu1 }
 0x7eb   : > { %v16204_v31 = vadd.f32 %v7195_v62, %v15964_v26  ;;  %v10284_v26 = vor.u32 %v10761_v10, %v10283_v30 }
 0x7ec   : > { %7534 = vmatmul.bf16.gmra.mxu2 %v7325_v53  ;;  %7610 = vmatmul.bf16.gmra.mxu0 %v7325_v53 }
 0x7ed   : > { %10246 = vmatmul.msk.bf16.gmra.mxu3 %vm1587_vm15, %v7327_v4  ;;  %10254 = vmatmul.msk.bf16.gmra.mxu1 %vm1587_vm15, %v7327_v4 }
 0x7ee   : > { %7916 = vmatpush.bf16.msra.mxu2 %v10284_v26 }
 0x7ef   : > { %v7159_v16 = vpop.f32.mrf.mxu2 }
 0x7f0   : > { %v7197_v24 = vpop.f32.mrf.mxu3 }
 0x7f1   : > { %v7236_v55 = vpop.f32.mrf.mxu0  ;;  %v7681_v24 = vrot.slane %v14868_v63, 2 }
 0x7f2   : > { %v7274_v46 = vpop.f32.mrf.mxu1 }
 0x7f3   : > { %v7275_v33 = vadd.f32 %v7274_v46, %v7236_v55  ;;  %v16497_v55 = vld [vmem:[#allocation12_spill] sm:$0xff] }
 0x7f4   : > { %v7682_v46 = vrot.slane %v16497_v55, 3 }
 0x7f5   : > { %v16223_v29 = vadd.f32 %v7275_v33, %v15989_v14  ;;  %v7331_v14 = vsel %vm7305_vm10, %v7326_v59, %v7330_v39  ;;  %v16498_v33 = vld [vmem:[#allocation15_spill] sm:$0xff] }
 0x7f6   : > { %v7688_v35 = vrot.slane %v16498_v33, 2 }
 0x7f7   : > { %v7160_v9 = vpop.f32.mrf.mxu2 }
 0x7f8   : > { %v7198_v18 = vpop.f32.mrf.mxu3 }
 0x7f9   : > { %v7199_v45 = vadd.f32 %v7198_v18, %v7160_v9  ;;  %v7239_v8 = vpop.f32.mrf.mxu0  ;;  %v7679_v9 = vrot.slane %v14738_v17, 3  ;;  %v7686_v18 = vrot.slane %v14751_v58, 3 }
 0x7fa   : > { %v7277_v28 = vpop.f32.mrf.mxu1 }
 0x7fb   : > { %v16228_v2 = vadd.f32 %v7199_v45, %v15992_v11  ;;  %v7278_v32 = vadd.f32 %v7277_v28, %v7239_v8  ;;  %v7683_v45 = vor.u32 %v7682_v46, %v7681_v24  ;;  %v7680_v63 = vor.u32 %v7679_v9, %v7678_v52 }
 0x7fc   : > { %7538 = vmatmul.bf16.gmra.mxu2 %v7329_v27  ;;  %7614 = vmatmul.bf16.gmra.mxu0 %v7329_v27 }
 0x7fd   : > { %v16233_v50 = vadd.f32 %v7278_v32, %v15999_v47  ;;  %10247 = vmatmul.msk.bf16.gmra.mxu3 %vm1587_vm15, %v7331_v14  ;;  %10255 = vmatmul.msk.bf16.gmra.mxu1 %vm1587_vm15, %v7331_v14  ;;  %v7343_v47 = vsel %vm7305_vm10, %v7330_v39, 0 }
 0x7ff   : > { %v7163_v61 = vpop.f32.mrf.mxu2 }
 0x800   : > { %v7201_v15 = vpop.f32.mrf.mxu3 }
 0x801   : > { %v7202_v6 = vadd.f32 %v7201_v15, %v7163_v61  ;;  %v7241_v44 = vpop.f32.mrf.mxu0  ;;  %v7684_v61 = vsel %vm7677_vm4, %v7680_v63, %v7683_v45 }
 0x802   : > { %v7279_v11 = vpop.f32.mrf.mxu1 }
 0x803   : > { %v16238_v7 = vadd.f32 %v7202_v6, %v16016_v57 }
 0x807   : > { %v7165_v12 = vpop.f32.mrf.mxu2 }
 0x808   : > { %v7203_v62 = vpop.f32.mrf.mxu3  ;;  %v7692_v12 = vrot.slane %v14957_v22, 2 }
 0x809   : > { %v7243_v19 = vpop.f32.mrf.mxu0  ;;  %v7693_v62 = vrot.slane %v14890_v20, 3 }
 0x80a   : > { %v7281_v59 = vpop.f32.mrf.mxu1 }
 0x80b   : > { %v7282_v0 = vadd.f32 %v7281_v59, %v7243_v19  ;;  %v7696_v19 = vrot.slane %v14964_v51, 2 }
 0x80c   : > { %10241 = vmatmul.msk.bf16.gmra.mxu2 %vm7305_vm10, %v7328_v13  ;;  %10249 = vmatmul.msk.bf16.gmra.mxu0 %vm7305_vm10, %v7328_v13  ;;  %v7685_v13 = vrot.slane %v14748_v3, 2 }
 0x80d   : > { %v16244_v53 = vadd.f32 %v7282_v0, %v16033_v36  ;;  %10248 = vmatmul.msk.bf16.gmra.mxu3 %vm1587_vm15, %v7343_v47  ;;  %10256 = vmatmul.msk.bf16.gmra.mxu1 %vm1587_vm15, %v7343_v47  ;;  %v16499_v36 = vld [vmem:[#allocation13_spill] sm:$0xff]  ;;  %v7694_v0 = vor.u32 %v7693_v62, %v7692_v12 }
 0x80e   : > { %v7689_v37 = vrot.slane %v16499_v36, 3  ;;  %v7687_v27 = vor.u32 %v7686_v18, %v7685_v13  ;;  %v16500_v18 = vld [vmem:[#allocation16_spill] sm:$0xff] }
 0x80f   : > { %v7167_v57 = vpop.f32.mrf.mxu2 }
 0x810   : > { %v7205_v4 = vpop.f32.mrf.mxu3  ;;  %v7690_v8 = vor.u32 %v7689_v37, %v7688_v35 }
 0x811   : > { %v7206_v30 = vadd.f32 %v7205_v4, %v7167_v57  ;;  %v7245_v10 = vpop.f32.mrf.mxu0 }
 0x812   : > { %v7283_v26 = vpop.f32.mrf.mxu1  ;;  %v7691_v43 = vsel %vm7677_vm4, %v7687_v27, %v7690_v8 }
 0x813   : > { %v16249_v16 = vadd.f32 %v7206_v30, %v16044_v21  ;;  %v7695_v26 = vsel %vm7677_vm4, %v7683_v45, %v7694_v0  ;;  %v16501_v45 = vld [vmem:[#allocation17_spill] sm:$0xff] }
 0x817   : > { %v7169_v39 = vpop.f32.mrf.mxu2 }
 0x818   : > { %v7207_v21 = vpop.f32.mrf.mxu3  ;;  %v7703_v39 = vsel %vm7677_vm4, %v7694_v0, %v16500_v18  ;;  %v16506_v0 = vld [vmem:[#allocation6_spill] sm:$0xff] }
 0x819   : > { %v7247_v28 = vpop.f32.mrf.mxu0 }
 0x81a   : > { %v7285_v32 = vpop.f32.mrf.mxu1 }
 0x81b   : > { %v7286_v14 = vadd.f32 %v7285_v32, %v7247_v28 }
 0x81c   : > { %7917 = vmatmul.bf16.vlgmr.msra.gmra.mxu2 %v7684_v61  ;;  %7993 = vmatmul.bf16.vlgmr.msra.gmra.mxu0 %v7684_v61 }
 0x81d   : > { %v16262_v17 = vadd.f32 %v7286_v14, %v16071_v41  ;;  %10377 = vmatmul.msk.bf16.vlgmr.msra.gmra.mxu3 %vm1587_vm15, %v7691_v43  ;;  %10384 = vmatmul.msk.bf16.vlgmr.msra.gmra.mxu1 %vm1587_vm15, %v7691_v43  ;;  %v7697_v41 = vrot.slane %v14893_v38, 3 }
 0x81f   : > { %v7171_v3 = vpop.f32.mrf.mxu2  ;;  %v7698_v57 = vor.u32 %v7697_v41, %v7696_v19  ;;  %v16504_v19 = vld [vmem:[#allocation7_spill] sm:$0xff] }
 0x820   : > { %v7209_v58 = vpop.f32.mrf.mxu3  ;;  %v7716_v41 = vrot.slane %v16504_v19, 2 }
 0x821   : > { %v7210_v15 = vadd.f32 %v7209_v58, %v7171_v3  ;;  %v7249_v6 = vpop.f32.mrf.mxu0  ;;  %v16502_v58 = vld [vmem:[#allocation20_spill] sm:$0xff] }
 0x822   : > { %v7287_v44 = vpop.f32.mrf.mxu1 }
 0x823   : > { %v16267_v11 = vadd.f32 %v7210_v15, %v16088_v34  ;;  %v7699_v34 = vsel %vm7677_vm4, %v7690_v8, %v7698_v57  ;;  %v16503_v15 = vld [vmem:[#allocation21_spill] sm:$0xff] }
 0x827   : > { %v7173_v59 = vpop.f32.mrf.mxu2 }
 0x828   : > { %v7211_v47 = vpop.f32.mrf.mxu3  ;;  %v16505_v59 = vld [vmem:[#allocation9_spill] sm:$0xff] }
 0x829   : > { %v7594_v4 = vpop.f32.mrf.mxu0  ;;  %v7720_v47 = vrot.slane %v16506_v0, 2 }
 0x82a   : > { %v7632_v30 = vpop.f32.mrf.mxu1 }
 0x82b   : > { %v7633_v10 = vadd.f32 %v7632_v30, %v7594_v4 }
 0x82c   : > { %7922 = vmatmul.bf16.gmra.mxu2 %v7695_v26  ;;  %7998 = vmatmul.bf16.gmra.mxu0 %v7695_v26 }
 0x82d   : > { %v16276_v22 = vadd.f32 %v7633_v10, %v16101_v60  ;;  %10378 = vmatmul.msk.bf16.gmra.mxu3 %vm1587_vm15, %v7699_v34  ;;  %10385 = vmatmul.msk.bf16.gmra.mxu1 %vm1587_vm15, %v7699_v34 }
 0x82f   : > { %v7518_v20 = vpop.f32.mrf.mxu2 }
 0x830   : > { %v7556_v38 = vpop.f32.mrf.mxu3 }
 0x831   : > { %v7557_v51 = vadd.f32 %v7556_v38, %v7518_v20  ;;  %v7596_v24 = vpop.f32.mrf.mxu0 }
 0x832   : > { %v7634_v55 = vpop.f32.mrf.mxu1 }
 0x833   : > { %v16281_v46 = vadd.f32 %v7557_v51, %v16112_v56  ;;  %v7635_v33 = vadd.f32 %v7634_v55, %v7596_v24  ;;  %v7707_v56 = vsel %vm7677_vm4, %v7698_v57, %v16501_v45  ;;  %v16507_v57 = vld [vmem:[#allocation5_spill] sm:$0xff]  ;;  %v7725_v45 = vrot.slane %v15233_v54, 3 }
 0x834   : > { %v7721_v4 = vrot.slane %v16507_v57, 3 }
 0x835   : > { %v16284_v35 = vadd.f32 %v7635_v33, %v16115_v25  ;;  %v16508_v33 = vld [vmem:[#allocation18_spill] sm:$0xff] }
 0x836   : > { %v7722_v20 = vor.u32 %v7721_v4, %v7720_v47 }
 0x837   : > { %v7520_v36 = vpop.f32.mrf.mxu2 }
 0x838   : > { %v7558_v37 = vpop.f32.mrf.mxu3 }
 0x839   : > { %v7559_v60 = vadd.f32 %v7558_v37, %v7520_v36  ;;  %v7599_v52 = vpop.f32.mrf.mxu0  ;;  %v16509_v37 = vld [vmem:[#allocation19_spill] sm:$0xff] }
 0x83a   : > { %v7637_v9 = vpop.f32.mrf.mxu1 }
 0x83b   : > { %v16287_v13 = vadd.f32 %v7559_v60, %v16132_v42  ;;  %v7723_v60 = vsel %vm7677_vm4, %v16509_v37, %v7722_v20 }
 0x83c   : > { %7926 = vmatmul.bf16.gmra.mxu2 %v7703_v39  ;;  %8002 = vmatmul.bf16.gmra.mxu0 %v7703_v39 }
 0x83d   : > { %10379 = vmatmul.msk.bf16.gmra.mxu3 %vm1587_vm15, %v7707_v56  ;;  %10386 = vmatmul.msk.bf16.gmra.mxu1 %vm1587_vm15, %v7707_v56  ;;  %v7728_v56 = vrot.slane %v15289_v23, 2 }
 0x83f   : > { %v7523_v25 = vpop.f32.mrf.mxu2 }
 0x840   : > { %v7561_v21 = vpop.f32.mrf.mxu3  ;;  %v7729_v25 = vrot.slane %v15239_v40, 3 }
 0x841   : > { %v7600_v8 = vpop.f32.mrf.mxu0 }
 0x842   : > { %v7638_v28 = vpop.f32.mrf.mxu1 }
 0x843   : > { %v7639_v63 = vadd.f32 %v7638_v28, %v7600_v8 }
 0x845   : > { %v16296_v42 = vadd.f32 %v7639_v63, %v16151_v48 }
 0x847   : > { %v7524_v32 = vpop.f32.mrf.mxu2 }
 0x848   : > { %v7562_v27 = vpop.f32.mrf.mxu3 }
 0x849   : > { %v7563_v14 = vadd.f32 %v7562_v27, %v7524_v32  ;;  %v7603_v61 = vpop.f32.mrf.mxu0  ;;  %v7730_v32 = vor.u32 %v7729_v25, %v7728_v56 }
 0x84a   : > { %v7641_v43 = vpop.f32.mrf.mxu1 }
 0x84b   : > { %v16299_v3 = vadd.f32 %v7563_v14, %v16162_v5  ;;  %v7717_v5 = vrot.slane %v16505_v59, 3  ;;  %v7731_v23 = vsel %vm7677_vm4, %v7722_v20, %v7730_v32  ;;  %v7742_v59 = vsel %vm7740_vm12, %v7730_v32, 0 }
 0x84c   : > { %7930 = vmatmul.bf16.gmra.mxu2 %v16502_v58  ;;  %8006 = vmatmul.bf16.gmra.mxu0 %v16502_v58 }
 0x84d   : > { %10380 = vmatmul.msk.bf16.gmra.mxu3 %vm1587_vm15, %v16503_v15  ;;  %10387 = vmatmul.msk.bf16.gmra.mxu1 %vm1587_vm15, %v16503_v15  ;;  %v7718_v26 = vor.u32 %v7717_v5, %v7716_v41 }
 0x84f   : > { %v7527_v48 = vpop.f32.mrf.mxu2  ;;  %v7719_v36 = vsel %vm7677_vm4, %v16508_v33, %v7718_v26 }
 0x850   : > { %v7565_v6 = vpop.f32.mrf.mxu3 }
 0x851   : > { %v7604_v44 = vpop.f32.mrf.mxu0 }
 0x852   : > { %v7642_v12 = vpop.f32.mrf.mxu1 }
 0x853   : > { %v7643_v62 = vadd.f32 %v7642_v12, %v7604_v44 }
 0x855   : > { %v16312_v30 = vadd.f32 %v7643_v62, %v16193_v1 }
 0x857   : > { %v7528_v10 = vpop.f32.mrf.mxu2 }
 0x858   : > { %v7566_v34 = vpop.f32.mrf.mxu3 }
 0x859   : > { %v7567_v38 = vadd.f32 %v7566_v34, %v7528_v10  ;;  %v7607_v51 = vpop.f32.mrf.mxu0 }
 0x85a   : > { %v7645_v24 = vpop.f32.mrf.mxu1 }
 0x85b   : > { %v16315_v55 = vadd.f32 %v7567_v38, %v16204_v31  ;;  %v7724_v31 = vrot.slane %v15284_v49, 2 }
 0x85c   : > { %7934 = vmatmul.bf16.gmra.mxu2 %v7719_v36  ;;  %8010 = vmatmul.bf16.gmra.mxu0 %v7719_v36 }
 0x85d   : > { %10381 = vmatmul.msk.bf16.gmra.mxu3 %vm1587_vm15, %v7723_v60  ;;  %10388 = vmatmul.msk.bf16.gmra.mxu1 %vm1587_vm15, %v7723_v60  ;;  %v7726_v28 = vor.u32 %v7725_v45, %v7724_v31 }
 0x85f   : > { %v7531_v1 = vpop.f32.mrf.mxu2  ;;  %v7727_v54 = vsel %vm7677_vm4, %v7718_v26, %v7726_v28  ;;  %v7741_v41 = vsel %vm7740_vm12, %v7726_v28, 0 }
 0x860   : > { %v7569_v52 = vpop.f32.mrf.mxu3 }
 0x861   : > { %v7608_v9 = vpop.f32.mrf.mxu0 }
 0x862   : > { %v7646_v18 = vpop.f32.mrf.mxu1 }
 0x863   : > { %v7647_v39 = vadd.f32 %v7646_v18, %v7608_v9 }
 0x865   : > { %v16328_v21 = vadd.f32 %v7647_v39, %v16223_v29 }
 0x867   : > { %v7532_v8 = vpop.f32.mrf.mxu2 }
 0x868   : > { %v7570_v63 = vpop.f32.mrf.mxu3 }
 0x869   : > { %v7571_v27 = vadd.f32 %v7570_v63, %v7532_v8  ;;  %v7611_v14 = vpop.f32.mrf.mxu0 }
 0x86a   : > { %v7649_v61 = vpop.f32.mrf.mxu1 }
 0x86b   : > { %v16331_v43 = vadd.f32 %v7571_v27, %v16228_v2  ;;  %v7650_v49 = vadd.f32 %v7649_v61, %v7611_v14 }
 0x86c   : > { %7938 = vmatmul.bf16.gmra.mxu2 %v7727_v54  ;;  %8014 = vmatmul.bf16.gmra.mxu0 %v7727_v54 }
 0x86d   : > { %v16336_v40 = vadd.f32 %v7650_v49, %v16233_v50  ;;  %10382 = vmatmul.msk.bf16.gmra.mxu3 %vm1587_vm15, %v7731_v23  ;;  %10389 = vmatmul.msk.bf16.gmra.mxu1 %vm1587_vm15, %v7731_v23 }
 0x86f   : > { %v7535_v29 = vpop.f32.mrf.mxu2 }
 0x870   : > { %v7573_v58 = vpop.f32.mrf.mxu3 }
 0x871   : > { %v7574_v15 = vadd.f32 %v7573_v58, %v7535_v29  ;;  %v7613_v48 = vpop.f32.mrf.mxu0 }
 0x872   : > { %v7651_v2 = vpop.f32.mrf.mxu1 }
 0x873   : > { %v16341_v6 = vadd.f32 %v7574_v15, %v16238_v7 }
 0x877   : > { %v7537_v44 = vpop.f32.mrf.mxu2 }
 0x878   : > { %v7575_v12 = vpop.f32.mrf.mxu3 }
 0x879   : > { %v7615_v62 = vpop.f32.mrf.mxu0 }
 0x87a   : > { %v7653_v50 = vpop.f32.mrf.mxu1 }
 0x87b   : > { %v7654_v19 = vadd.f32 %v7653_v50, %v7615_v62 }
 0x87c   : > { %7942 = vmatmul.bf16.gmra.mxu2 %v7741_v41  ;;  %8018 = vmatmul.bf16.gmra.mxu0 %v7741_v41 }
 0x87d   : > { %v16346_v5 = vadd.f32 %v7654_v19, %v16244_v53  ;;  %10383 = vmatmul.msk.bf16.gmra.mxu3 %vm1587_vm15, %v7742_v59  ;;  %10390 = vmatmul.msk.bf16.gmra.mxu1 %vm1587_vm15, %v7742_v59  ;;  %vm8119_vm15 = vcmask 1040384  }
 0x87f   : > { %v7539_v7 = vpop.f32.mrf.mxu2 }
 0x880   : > { %v7577_v0 = vpop.f32.mrf.mxu3 }
 0x881   : > { %v7578_v47 = vadd.f32 %v7577_v0, %v7539_v7  ;;  %v7617_v57 = vpop.f32.mrf.mxu0 }
 0x882   : > { %v7655_v4 = vpop.f32.mrf.mxu1 }
 0x883   : > { %v16351_v10 = vadd.f32 %v7578_v47, %v16249_v16 }
 0x887   : > { %v7541_v26 = vpop.f32.mrf.mxu2 }
 0x888   : > { %v7579_v34 = vpop.f32.mrf.mxu3 }
 0x889   : > { %v7619_v20 = vpop.f32.mrf.mxu0 }
 0x88a   : > { %v7657_v38 = vpop.f32.mrf.mxu1 }
 0x88b   : > { %v7658_v51 = vadd.f32 %v7657_v38, %v7619_v20 }
 0x88d   : > { %v16354_v53 = vadd.f32 %v7658_v51, %v16262_v17 }
 0x88f   : > { %v7543_v24 = vpop.f32.mrf.mxu2 }
 0x890   : > { %v7581_v33 = vpop.f32.mrf.mxu3 }
 0x891   : > { %v7582_v36 = vadd.f32 %v7581_v33, %v7543_v24  ;;  %v7621_v37 = vpop.f32.mrf.mxu0 }
 0x892   : > { %v7659_v60 = vpop.f32.mrf.mxu1 }
 0x893   : > { %v16357_v1 = vadd.f32 %v7582_v36, %v16267_v11 }
 0x897   : > { %v7545_v52 = vpop.f32.mrf.mxu2 }
 0x898   : > { %v7583_v9 = vpop.f32.mrf.mxu3 }
 0x899   : > { %v7994_v16 = vpop.f32.mrf.mxu0 }
 0x89a   : > { %v8032_v18 = vpop.f32.mrf.mxu1 }
 0x89b   : > { %v8033_v39 = vadd.f32 %v8032_v18, %v7994_v16 }
 0x89d   : > { %v8062_v31 = vadd.f32 %v8033_v39, %v16276_v22 }
 0x89f   : > { %v7918_v45 = vpop.f32.mrf.mxu2 }
 0x8a0   : > { %v7956_v56 = vpop.f32.mrf.mxu3 }
 0x8a1   : > { %v7957_v25 = vadd.f32 %v7956_v56, %v7918_v45  ;;  %v7996_v17 = vpop.f32.mrf.mxu0 }
 0x8a2   : > { %v8034_v8 = vpop.f32.mrf.mxu1 }
 0x8a3   : > { %v8061_v28 = vadd.f32 %v7957_v25, %v16281_v46  ;;  %v8035_v63 = vadd.f32 %v8034_v8, %v7996_v17 }
 0x8a5   : > { %v8064_v32 = vadd.f32 %v8035_v63, %v16284_v35 }
 0x8a7   : > { %v8080_v11 = vrot.slane %v8064_v32, 5  ;;  %v7920_v27 = vpop.f32.mrf.mxu2 }
 0x8a8   : > { %v7958_v14 = vpop.f32.mrf.mxu3 }
 0x8a9   : > { %v8121_v61 = vsel %vm8119_vm15, %v8062_v31, %v8080_v11  ;;  %v7959_v49 = vadd.f32 %v7958_v14, %v7920_v27  ;;  %v7999_v54 = vpop.f32.mrf.mxu0 }
 0x8aa   : > { %v8037_v23 = vpop.f32.mrf.mxu1 }
 0x8ab   : > { %v8063_v22 = vadd.f32 %v7959_v49, %v16287_v13 }
 0x8ad   : > { %v8079_v29 = vrot.slane %v8063_v22, 5 }
 0x8af   : > { %v8120_v58 = vsel %vm8119_vm15, %v8061_v28, %v8079_v29  ;;  %v7923_v15 = vpop.f32.mrf.mxu2 }
 0x8b0   : > { %v7961_v48 = vpop.f32.mrf.mxu3 }
 0x8b1   : > { %v8000_v2 = vpop.f32.mrf.mxu0 }
 0x8b2   : > { %v8038_v44 = vpop.f32.mrf.mxu1 }
 0x8b3   : > { %v8039_v46 = vadd.f32 %v8038_v44, %v8000_v2 }
 0x8b5   : > { %v8066_v12 = vadd.f32 %v8039_v46, %v16296_v42 }
 0x8b7   : > { %v8086_v35 = vrot.slane %v8066_v12, 2  ;;  %v7924_v62 = vpop.f32.mrf.mxu2 }
 0x8b8   : > { %v7962_v50 = vpop.f32.mrf.mxu3 }
 0x8b9   : > { %v8124_v19 = vsel %vm8122_vm13, %v8121_v61, %v8086_v35  ;;  %v7963_v41 = vadd.f32 %v7962_v50, %v7924_v62  ;;  %v8003_v59 = vpop.f32.mrf.mxu0 }
 0x8ba   : > { %v8041_v7 = vpop.f32.mrf.mxu1 }
 0x8bb   : > { %v8065_v0 = vadd.f32 %v7963_v41, %v16299_v3 }
 0x8bd   : > { %v8085_v13 = vrot.slane %v8065_v0, 2 }
 0x8bf   : > { %v8123_v47 = vsel %vm8122_vm13, %v8120_v58, %v8085_v13  ;;  %v7927_v57 = vpop.f32.mrf.mxu2 }
 0x8c0   : > { %v7965_v4 = vpop.f32.mrf.mxu3 }
 0x8c1   : > { %v8004_v26 = vpop.f32.mrf.mxu0 }
 0x8c2   : > { %v8042_v34 = vpop.f32.mrf.mxu1 }
 0x8c3   : > { %v8043_v20 = vadd.f32 %v8042_v34, %v8004_v26 }
 0x8c5   : > { %v8068_v38 = vadd.f32 %v8043_v20, %v16312_v30  ;;  %v8137_v20 = vld [vmem:[%s16402_s10] sm:$0x3] }
 0x8c7   : > { %v8092_v42 = vrot.slane %v8068_v38, 7  ;;  %v7928_v51 = vpop.f32.mrf.mxu2 }
 0x8c8   : > { %v7966_v24 = vpop.f32.mrf.mxu3 }
 0x8c9   : > { %v8127_v33 = vsel %vm8125_vm14, %v8124_v19, %v8092_v42  ;;  %v7967_v36 = vadd.f32 %v7966_v24, %v7928_v51  ;;  %v8007_v37 = vpop.f32.mrf.mxu0  ;;  %v8140_v42 = vperm.slane %v8137_v20, 1 }
 0x8ca   : > { %v8045_v60 = vpop.f32.mrf.mxu1 }
 0x8cb   : > { %v8067_v52 = vadd.f32 %v7967_v36, %v16315_v55 }
 0x8cd   : > { %v8091_v3 = vrot.slane %v8067_v52, 7 }
 0x8cf   : > { %v8126_v9 = vsel %vm8125_vm14, %v8123_v47, %v8091_v3  ;;  %v7931_v16 = vpop.f32.mrf.mxu2 }
 0x8d0   : > { %v7969_v18 = vpop.f32.mrf.mxu3 }
 0x8d1   : > { %v8008_v39 = vpop.f32.mrf.mxu0 }
 0x8d2   : > { %v8046_v31 = vpop.f32.mrf.mxu1 }
 0x8d3   : > { %v8047_v45 = vadd.f32 %v8046_v31, %v8008_v39 }
 0x8d5   : > { %v8070_v56 = vadd.f32 %v8047_v45, %v16328_v21 }
 0x8d7   : > { %v8098_v30 = vrot.slane %v8070_v56, 4  ;;  %v7932_v25 = vpop.f32.mrf.mxu2 }
 0x8d8   : > { %v7970_v17 = vpop.f32.mrf.mxu3 }
 0x8d9   : > { %v8129_v8 = vsel %vm585_vm0, %v8127_v33, %v8098_v30  ;;  %v7971_v28 = vadd.f32 %v7970_v17, %v7932_v25  ;;  %v8011_v63 = vpop.f32.mrf.mxu0 }
 0x8da   : > { %v8049_v32 = vpop.f32.mrf.mxu1 }
 0x8db   : > { %v8069_v11 = vadd.f32 %v7971_v28, %v16331_v43  ;;  %v8050_v55 = vadd.f32 %v8049_v32, %v8011_v63 }
 0x8dd   : > { %v8097_v27 = vrot.slane %v8069_v11, 4  ;;  %v8072_v14 = vadd.f32 %v8050_v55, %v16336_v40 }
 0x8df   : > { %v8128_v61 = vsel %vm585_vm0, %v8126_v9, %v8097_v27  ;;  %v8104_v49 = vrot.slane %v8072_v14, 1  ;;  %v7935_v54 = vpop.f32.mrf.mxu2  ;;  %vm8146_vm0 = vcmask 130048   ;;  %v8139_v9 = vperm.slane %v8137_v20, 0 }
 0x8e0   : > { %v7973_v21 = vpop.f32.mrf.mxu3 }
 0x8e1   : > { %v8132_v23 = vsel %vm8130_vm2, %v8129_v8, %v8104_v49  ;;  %v7974_v22 = vadd.f32 %v7973_v21, %v7935_v54  ;;  %v8013_v29 = vpop.f32.mrf.mxu0 }
 0x8e2   : > { %v8051_v58 = vpop.f32.mrf.mxu1 }
 0x8e3   : > { %v8071_v15 = vadd.f32 %v7974_v22, %v16341_v6 }
 0x8e5   : > { %v8103_v48 = vrot.slane %v8071_v15, 1 }
 0x8e7   : > { %v8131_v2 = vsel %vm8130_vm2, %v8128_v61, %v8103_v48  ;;  %v7937_v43 = vpop.f32.mrf.mxu2 }
 0x8e8   : > { %v7975_v44 = vpop.f32.mrf.mxu3 }
 0x8e9   : > { %v8015_v46 = vpop.f32.mrf.mxu0 }
 0x8ea   : > { %v8053_v12 = vpop.f32.mrf.mxu1 }
 0x8eb   : > { %v8054_v40 = vadd.f32 %v8053_v12, %v8015_v46 }
 0x8ed   : > { %v8074_v35 = vadd.f32 %v8054_v40, %v16346_v5 }
 0x8ef   : > { %v8110_v62 = vrot.slane %v8074_v35, 6  ;;  %v7939_v50 = vpop.f32.mrf.mxu2 }
 0x8f0   : > { %v7977_v19 = vpop.f32.mrf.mxu3 }
 0x8f1   : > { %v8134_v41 = vsel %vm7305_vm10, %v8132_v23, %v8110_v62  ;;  %v7978_v59 = vadd.f32 %v7977_v19, %v7939_v50  ;;  %v8017_v7 = vpop.f32.mrf.mxu0 }
 0x8f2   : > { %v8055_v0 = vpop.f32.mrf.mxu1 }
 0x8f3   : > { %v8073_v6 = vadd.f32 %v7978_v59, %v16351_v10 }
 0x8f5   : > { %v8109_v13 = vrot.slane %v8073_v6, 6 }
 0x8f7   : > { %v8133_v47 = vsel %vm7305_vm10, %v8131_v2, %v8109_v13  ;;  %v7941_v57 = vpop.f32.mrf.mxu2 }
 0x8f8   : > { %v7979_v4 = vpop.f32.mrf.mxu3 }
 0x8f9   : > { %v8019_v26 = vpop.f32.mrf.mxu0 }
 0x8fa   : > { %v8057_v34 = vpop.f32.mrf.mxu1 }
 0x8fb   : > { %v8058_v5 = vadd.f32 %v8057_v34, %v8019_v26 }
 0x8fd   : > { %v8076_v38 = vadd.f32 %v8058_v5, %v16354_v53 }
 0x8ff   : > { %v8116_v51 = vrot.slane %v8076_v38, 3  ;;  %v7943_v10 = vpop.f32.mrf.mxu2 }
 0x900   : > { %v7981_v24 = vpop.f32.mrf.mxu3 }
 0x901   : > { %v8136_v33 = vsel %vm823_vm5, %v8134_v41, %v8116_v51  ;;  %v7982_v36 = vadd.f32 %v7981_v24, %v7943_v10  ;;  %v8021_v37 = vpop.f32.mrf.mxu0 }
 0x902   : > { %v8144_v60 = vadd.f32 %v8140_v42, %v8136_v33  ;;  %v8059_v52 = vpop.f32.mrf.mxu1 }
 0x903   : > { %v8075_v3 = vadd.f32 %v7982_v36, %v16357_v1 }
 0x904   : > { %8147 = vst.msk [vmem:[%s388_s24 + $0x8] sm:$0xff] %vm8146_vm0, %v8144_v60 }
 0x905   : > { %v8115_v53 = vrot.slane %v8075_v3, 3 }
 0x907   : > { %v8135_v16 = vsel %vm823_vm5, %v8133_v47, %v8115_v53  ;;  %v7945_v18 = vpop.f32.mrf.mxu2 }
 0x908   : > { %v8143_v39 = vadd.f32 %v8139_v9, %v8135_v16  ;;  %v7983_v31 = vpop.f32.mrf.mxu3 }
 0x90a   : > { %8145 = vst [vmem:[%s388_s24] sm:$0xff] %v8143_v39 }
 0x90b PF: > { %s21_s17 = sadd.s32 1, %s11030_s17  }
 0x90c   : > { %p18_p5 = scmp.ge.s32.totalorder %s21_s17, 4  }
 0x90e   :  { %20 = sbr.rel (!%p18_p5) target bundleno = 1 (0x1), region = 107 }

</bundles_post_ra>
